<compile_context>
chip_gen: v6e
topology: v6e:2x2x1
jax: 0.10.0
libtpu: 0.0.40
codegen_flags: <defaults>
</compile_context>

<pallas_src>
import functools

import jax
import jax.numpy as jnp
from jax.experimental import pallas as pl
from jax.experimental.pallas import tpu as pltpu


# ------------------------------ Pallas kernel -------------------------------

def _cnn_kernel(x_ref, w1_ref, b1_ref, w2_ref, b2_ref, fw_ref, fcb_ref,
                out_ref, p1_ref):
    f32 = jnp.float32
    tb = out_ref.shape[0]

    # ---- conv1 (1->32, k5) + bias + 2x2 maxpool + ReLU: one matmul ---------
    # x_ref rows = (b, pool-row-parity q, pooled-row-group s); K = 6 rows * 28
    # cols = 168.  Output lanes = (pool-offset beta 0..3) * 384 + pooled_col*32
    # + ch, so the full 2x2 pool is a 4-way lane-block max.
    c1 = jnp.dot(x_ref[...], w1_ref[...], preferred_element_type=f32)   # (tb*12, 1536)
    p1 = jnp.maximum(jnp.maximum(c1[:, 0:384], c1[:, 384:768]),
                     jnp.maximum(c1[:, 768:1152], c1[:, 1152:1536]))
    p1 = jnp.maximum(p1 + b1_ref[...], 0.0)
    p1_ref[...] = p1.astype(jnp.bfloat16).reshape(tb, 2, 6, 384)

    # ---- conv2 LHS: im2col over 6 pooled-1 rows.  p1 is parity-split, so each
    # of the 6 pieces is a contiguous, 128-lane-aligned slice. -----------------
    pieces = [p1_ref[:, dh % 2, dh // 2: dh // 2 + 4, :] for dh in range(6)]
    lhs2 = jnp.concatenate(pieces, axis=-1).reshape(tb * 4, 2304)       # bf16

    # ---- conv2 (32->64, k5) + bias + 2x2 maxpool + ReLU: one matmul --------
    c2 = jnp.dot(lhs2, w2_ref[...], preferred_element_type=f32)         # (tb*4, 1024)
    p2 = jnp.maximum(jnp.maximum(c2[:, 0:256], c2[:, 256:512]),
                     jnp.maximum(c2[:, 512:768], c2[:, 768:1024]))
    p2 = jnp.maximum(p2 + b2_ref[...], 0.0)                             # (tb*4, 256)

    # ---- Linear(1024, 10) (padded to 128 out lanes) + log-softmax ----------
    z = jnp.dot(p2.reshape(tb, 1024), fw_ref[...],
                preferred_element_type=f32) + fcb_ref[...]              # (tb, 128)
    m = jnp.max(z, axis=-1, keepdims=True)
    lse = m + jnp.log(jnp.sum(jnp.exp(z - m), axis=-1, keepdims=True))
    out_ref[...] = z - lse


# -------------------- weight preprocessing (pure JAX, tiny) ------------------

def _build_conv1_weight(w1, b1):
    # w1: (32, 1, 5, 5) torch (cout, cin=1, kh, kw) -> fused (168, 1536) bf16.
    # Row = dh*28 + in_col; col = (rq*2+cp)*384 + pooled_col*32 + cout, where
    # (rq, cp) is the 2x2 pool offset and dh = rq + kh, in_col = 2*pc + cp + kw.
    w = jnp.transpose(w1[:, 0].astype(jnp.float32), (1, 2, 0))          # (kh, kw, co)
    dh = jnp.arange(6)
    rq = jnp.arange(2)
    ic = jnp.arange(28)
    cp = jnp.arange(2)
    pc = jnp.arange(12)
    kh_i = dh[:, None] - rq[None, :]                                    # (6, 2)
    kw_i = ic[:, None, None] - cp[None, :, None] - 2 * pc[None, None, :]  # (28, 2, 12)
    vh = (kh_i >= 0) & (kh_i <= 4)
    vw = (kw_i >= 0) & (kw_i <= 4)
    g = w[jnp.clip(kh_i, 0, 4)[:, :, None, None, None],
          jnp.clip(kw_i, 0, 4)[None, None, :, :, :]]                    # (6,2,28,2,12,32)
    mask = vh[:, :, None, None, None] & vw[None, None, :, :, :]
    g = g * mask[..., None].astype(jnp.float32)
    g = jnp.transpose(g, (0, 2, 1, 3, 4, 5))                            # (dh, ic, rq, cp, pc, co)
    w1f = g.reshape(168, 1536).astype(jnp.bfloat16)
    b1w = jnp.tile(b1.astype(jnp.float32), 12).reshape(1, 384)
    return w1f, b1w


def _build_conv2_weight(w2, b2):
    # w2: (64, 32, 5, 5) torch (cout, cin, kh, kw) -> fused (2304, 1024) bf16.
    # Row = dh*384 + pooled1_col*32 + cin; col = (rq*2+cp)*256 + pooled2_col*64
    # + cout, with dh = rq + kh, pooled1_col = 2*pc2 + cp + kw.
    w = jnp.transpose(w2.astype(jnp.float32), (2, 3, 1, 0))             # (kh, kw, ci, o)
    dh = jnp.arange(6)
    rq = jnp.arange(2)
    pc = jnp.arange(12)
    cp = jnp.arange(2)
    pc2 = jnp.arange(4)
    kh_i = dh[:, None] - rq[None, :]                                    # (6, 2)
    kw_i = pc[:, None, None] - cp[None, :, None] - 2 * pc2[None, None, :]  # (12, 2, 4)
    vh = (kh_i >= 0) & (kh_i <= 4)
    vw = (kw_i >= 0) & (kw_i <= 4)
    g = w[jnp.clip(kh_i, 0, 4)[:, :, None, None, None],
          jnp.clip(kw_i, 0, 4)[None, None, :, :, :]]                    # (6,2,12,2,4,32,64)
    mask = vh[:, :, None, None, None] & vw[None, None, :, :, :]
    g = g * mask[..., None, None].astype(jnp.float32)
    g = jnp.transpose(g, (0, 2, 5, 1, 3, 4, 6))                         # (dh, pc, ci, rq, cp, pc2, o)
    w2f = g.reshape(2304, 1024).astype(jnp.bfloat16)
    b2w = jnp.tile(b2.astype(jnp.float32), 4).reshape(1, 256)
    return w2f, b2w


def _build_fc_weight(fcw, fcb):
    # fcw: (10, 1024); torch flattens NCHW -> feature = ch*16 + h*4 + w.
    # Kernel feature order is h*256 + w*64 + ch; pad outputs 10 -> 128 lanes
    # (padded lanes get a -1e30 bias so log-softmax ignores them).
    f = fcw.astype(jnp.float32).reshape(10, 64, 4, 4)                   # (j, o, hr, wc)
    f = jnp.transpose(f, (2, 3, 1, 0)).reshape(1024, 10)                # row = hr*256+wc*64+o
    fwp = jnp.pad(f, ((0, 0), (0, 118)))
    fcbp = jnp.concatenate([fcb.astype(jnp.float32),
                            jnp.full((118,), -1e30, jnp.float32)]).reshape(1, 128)
    return fwp, fcbp


# --------------------------------- forward ----------------------------------

def _pick_tb(B):
    # Tunable batch tile: multiple of 8, default up to 32; >=2 grid steps for
    # realistic batches so v7x's two TensorCores both get work.
    return min(32, max(8, ((B // 2) + 7) // 8 * 8))


@functools.partial(jax.jit, static_argnames=("tb",))
def cnn_forward(x_nchw, params, tb=None):
    w1, b1, w2, b2, fcw, fcb = params
    B = x_nchw.shape[0]
    if tb is None:
        tb = _pick_tb(B)
    tb = max(8, (int(tb) + 7) // 8 * 8)                    # keep a multiple of 8
    b_pad = ((B + tb - 1) // tb) * tb

    x = x_nchw[:, 0].astype(jnp.bfloat16)                  # (B, 28, 28), Cin=1
    if b_pad != B:
        x = jnp.pad(x, ((0, b_pad - B), (0, 0), (0, 0)))

    # Pool-parity-split im2col over H: X[b, q, s, dh*28+ic] = x[b, 4s+2q+dh, ic]
    q = jnp.arange(2)
    s = jnp.arange(6)
    dh = jnp.arange(6)
    rows = 4 * s[None, :, None] + 2 * q[:, None, None] + dh[None, None, :]   # (2,6,6)
    xi = x[:, rows, :].reshape(b_pad * 12, 168)            # rows = b*12 + q*6 + s

    w1f, b1w = _build_conv1_weight(w1, b1)
    w2f, b2w = _build_conv2_weight(w2, b2)
    fwp, fcbp = _build_fc_weight(fcw, fcb)

    out = pl.pallas_call(
        _cnn_kernel,
        out_shape=jax.ShapeDtypeStruct((b_pad, 128), jnp.float32),
        grid=(b_pad // tb,),
        in_specs=[
            pl.BlockSpec((tb * 12, 168), lambda i: (i, 0)),   # im2col'd x (bf16)
            pl.BlockSpec((168, 1536), lambda i: (0, 0)),      # fused conv1 weight
            pl.BlockSpec((1, 384), lambda i: (0, 0)),         # conv1 bias (tiled)
            pl.BlockSpec((2304, 1024), lambda i: (0, 0)),     # fused conv2 weight
            pl.BlockSpec((1, 256), lambda i: (0, 0)),         # conv2 bias (tiled)
            pl.BlockSpec((1024, 128), lambda i: (0, 0)),      # FC weight (padded)
            pl.BlockSpec((1, 128), lambda i: (0, 0)),         # FC bias (padded)
        ],
        out_specs=pl.BlockSpec((tb, 128), lambda i: (i, 0)),
        scratch_shapes=[
            pltpu.VMEM((tb, 2, 6, 384), jnp.bfloat16),        # pooled-1 activations
        ],
        compiler_params=pltpu.CompilerParams(
            dimension_semantics=("parallel",),
            vmem_limit_bytes=32 * 1024 * 1024,
        ),
    )(xi, w1f, b1w, w2f, b2w, fwp, fcbp)
    return out[:B, :10]


# ---------------------------- pure-JAX reference ----------------------------

def reference_forward(x_nchw, params):
    w1, b1, w2, b2, fcw, fcb = params
    B = x_nchw.shape[0]
    x = jnp.transpose(x_nchw, (0, 2, 3, 1)).astype(jnp.float32)

    def conv(x, w, b):
        w_hwio = jnp.transpose(w, (2, 3, 1, 0))
        y = jax.lax.conv_general_dilated(
            x, w_hwio, (1, 1), 'VALID',
            dimension_numbers=('NHWC', 'HWIO', 'NHWC'),
            precision=jax.lax.Precision.HIGHEST)
        return y + b

    def pool(x):
        return jax.lax.reduce_window(x, -jnp.inf, jax.lax.max,
                                     (1, 2, 2, 1), (1, 2, 2, 1), 'VALID')

    y = jax.nn.relu(pool(conv(x, w1, b1)))
    y = jax.nn.relu(pool(conv(y, w2, b2)))
    flat = jnp.transpose(y, (0, 3, 1, 2)).reshape(B, -1)
    z = jnp.dot(flat, fcw.T, precision=jax.lax.Precision.HIGHEST) + fcb
    return jax.nn.log_softmax(z, axis=1)


# ---------------------------------- main -------------------------------------

if __name__ == "__main__":
    key = jax.random.PRNGKey(0)
    ks = jax.random.split(key, 8)

    # Deterministic synthetic parameters (PyTorch param shapes).
    w1 = (jax.random.normal(ks[0], (32, 1, 5, 5)) * 0.10).astype(jnp.float32)
    b1 = (jax.random.normal(ks[1], (32,)) * 0.10).astype(jnp.float32)
    w2 = (jax.random.normal(ks[2], (64, 32, 5, 5)) * 0.05).astype(jnp.float32)
    b2 = (jax.random.normal(ks[3], (64,)) * 0.05).astype(jnp.float32)
    fcw = (jax.random.normal(ks[4], (10, 4 * 4 * 64)) * 0.05).astype(jnp.float32)
    fcb = (jax.random.normal(ks[5], (10,)) * 0.05).astype(jnp.float32)
    params = (w1, b1, w2, b2, fcw, fcb)

    # Input spatial size 28x28 is forced by the Linear(4*4*64, 10) layer.
    x_small = jax.random.normal(ks[6], (2, 1, 28, 28), dtype=jnp.float32)
    out = jax.block_until_ready(cnn_forward(x_small, params))
    ref = reference_forward(x_small, params)
    assert out.shape == (2, 10) and out.dtype == jnp.float32
    if not jnp.allclose(out, ref, atol=8e-2, rtol=8e-2):
        raise AssertionError("Pallas CNN output mismatch vs reference (B=2)")

    # Also exercise the padded, multi-step ("parallel") grid path.
    x_big = jax.random.normal(ks[7], (40, 1, 28, 28), dtype=jnp.float32)
    out_b = jax.block_until_ready(cnn_forward(x_big, params))
    ref_b = reference_forward(x_big, params)
    assert out_b.shape == (40, 10)
    if not jnp.allclose(out_b, ref_b, atol=8e-2, rtol=8e-2):
        raise AssertionError("Pallas CNN output mismatch vs reference (B=40)")

    print("KERNEL_OK")
</pallas_src>

<mosaic_0001>
module attributes {stable_mosaic.version = 11 : i64} {
  func.func @_cnn_kernel(%arg0: i32, %arg1: memref<96x168xbf16, #tpu.memory_space<vmem>>, %arg2: memref<168x1536xbf16, #tpu.memory_space<vmem>>, %arg3: memref<1x384xf32, #tpu.memory_space<vmem>>, %arg4: memref<2304x1024xbf16, #tpu.memory_space<vmem>>, %arg5: memref<1x256xf32, #tpu.memory_space<vmem>>, %arg6: memref<1024x128xf32, #tpu.memory_space<vmem>>, %arg7: memref<1x128xf32, #tpu.memory_space<vmem>>, %arg8: memref<8x128xf32, #tpu.memory_space<vmem>>, %arg9: memref<8x2x6x384xbf16, #tpu.memory_space<vmem>>) attributes {dimension_semantics = [#tpu.dimension_semantics<parallel>], iteration_bounds = array<i64: 1>, scalar_prefetch = 0 : i64, scratch_operands = 1 : i64, tpu.core_type = #tpu.core_type<tc>, window_params = [{transform_indices = @transform_0, window_bounds = array<i64: 96, 168>}, {pipeline_mode = #tpu.pipeline_mode<synchronous>, transform_indices = @transform_1, window_bounds = array<i64: 168, 1536>}, {pipeline_mode = #tpu.pipeline_mode<synchronous>, transform_indices = @transform_2, window_bounds = array<i64: 1, 384>}, {pipeline_mode = #tpu.pipeline_mode<synchronous>, transform_indices = @transform_3, window_bounds = array<i64: 2304, 1024>}, {pipeline_mode = #tpu.pipeline_mode<synchronous>, transform_indices = @transform_4, window_bounds = array<i64: 1, 256>}, {pipeline_mode = #tpu.pipeline_mode<synchronous>, transform_indices = @transform_5, window_bounds = array<i64: 1024, 128>}, {pipeline_mode = #tpu.pipeline_mode<synchronous>, transform_indices = @transform_6, window_bounds = array<i64: 1, 128>}, {transform_indices = @transform_7, window_bounds = array<i64: 8, 128>}]} {
    %c0 = arith.constant 0 : index
    %c0_0 = arith.constant 0 : index
    %0 = vector.load %arg1[%c0, %c0_0] : memref<96x168xbf16, #tpu.memory_space<vmem>>, vector<96x168xbf16>
    %c0_1 = arith.constant 0 : index
    %c0_2 = arith.constant 0 : index
    %1 = vector.load %arg2[%c0_1, %c0_2] : memref<168x1536xbf16, #tpu.memory_space<vmem>>, vector<168x1536xbf16>
    %cst = arith.constant dense<0.000000e+00> : vector<96x1536xf32>
    %2 = tpu.matmul %0, %1, %cst {dimension_numbers = #tpu.dot_dimension_numbers<[1], [0], [0], [1], [0, 0, 1, 1], [], []>} : vector<96x168xbf16>, vector<168x1536xbf16>, vector<96x1536xf32> -> vector<96x1536xf32>
    %3 = vector.extract_strided_slice %2 {offsets = [0, 0], sizes = [96, 384], strides = [1, 1]} : vector<96x1536xf32> to vector<96x384xf32>
    %4 = vector.extract_strided_slice %2 {offsets = [0, 384], sizes = [96, 384], strides = [1, 1]} : vector<96x1536xf32> to vector<96x384xf32>
    %5 = arith.maximumf %3, %4 : vector<96x384xf32>
    %6 = vector.extract_strided_slice %2 {offsets = [0, 768], sizes = [96, 384], strides = [1, 1]} : vector<96x1536xf32> to vector<96x384xf32>
    %7 = vector.extract_strided_slice %2 {offsets = [0, 1152], sizes = [96, 384], strides = [1, 1]} : vector<96x1536xf32> to vector<96x384xf32>
    %8 = arith.maximumf %6, %7 : vector<96x384xf32>
    %9 = arith.maximumf %5, %8 : vector<96x384xf32>
    %c0_3 = arith.constant 0 : index
    %c0_4 = arith.constant 0 : index
    %10 = vector.load %arg3[%c0_3, %c0_4] : memref<1x384xf32, #tpu.memory_space<vmem>>, vector<1x384xf32>
    %11 = vector.broadcast %10 : vector<1x384xf32> to vector<96x384xf32>
    %12 = arith.addf %9, %11 : vector<96x384xf32>
    %cst_5 = arith.constant 0.000000e+00 : f32
    %13 = vector.broadcast %cst_5 : f32 to vector<96x384xf32>
    %14 = arith.maximumf %12, %13 : vector<96x384xf32>
    %15 = arith.truncf %14 : vector<96x384xf32> to vector<96x384xbf16>
    %16 = vector.shape_cast %15 : vector<96x384xbf16> to vector<8x2x6x384xbf16>
    %c0_6 = arith.constant 0 : index
    %c0_7 = arith.constant 0 : index
    %c0_8 = arith.constant 0 : index
    %c0_9 = arith.constant 0 : index
    %17 = vector.load %arg9[%c0_6, %c0_7, %c0_8, %c0_9] : memref<8x2x6x384xbf16, #tpu.memory_space<vmem>>, vector<8x2x6x384xbf16>
    tpu.vector_store %arg9[%c0_6, %c0_7, %c0_8, %c0_9], %16 {strides = array<i32>} : memref<8x2x6x384xbf16, #tpu.memory_space<vmem>>, vector<8x2x6x384xbf16>,
    %c0_10 = arith.constant 0 : index
    %c0_11 = arith.constant 0 : index
    %c0_12 = arith.constant 0 : index
    %c0_13 = arith.constant 0 : index
    %18 = vector.load %arg9[%c0_10, %c0_11, %c0_12, %c0_13] : memref<8x2x6x384xbf16, #tpu.memory_space<vmem>>, vector<8x1x4x384xbf16>
    %19 = vector.shape_cast %18 : vector<8x1x4x384xbf16> to vector<8x4x384xbf16>
    %c0_14 = arith.constant 0 : index
    %c1 = arith.constant 1 : index
    %c0_15 = arith.constant 0 : index
    %c0_16 = arith.constant 0 : index
    %20 = vector.load %arg9[%c0_14, %c1, %c0_15, %c0_16] : memref<8x2x6x384xbf16, #tpu.memory_space<vmem>>, vector<8x1x4x384xbf16>
    %21 = vector.shape_cast %20 : vector<8x1x4x384xbf16> to vector<8x4x384xbf16>
    %c0_17 = arith.constant 0 : index
    %c0_18 = arith.constant 0 : index
    %c1_19 = arith.constant 1 : index
    %c0_20 = arith.constant 0 : index
    %22 = vector.load %arg9[%c0_17, %c0_18, %c1_19, %c0_20] : memref<8x2x6x384xbf16, #tpu.memory_space<vmem>>, vector<8x1x4x384xbf16>
    %23 = vector.shape_cast %22 : vector<8x1x4x384xbf16> to vector<8x4x384xbf16>
    %c0_21 = arith.constant 0 : index
    %c1_22 = arith.constant 1 : index
    %c1_23 = arith.constant 1 : index
    %c0_24 = arith.constant 0 : index
    %24 = vector.load %arg9[%c0_21, %c1_22, %c1_23, %c0_24] : memref<8x2x6x384xbf16, #tpu.memory_space<vmem>>, vector<8x1x4x384xbf16>
    %25 = vector.shape_cast %24 : vector<8x1x4x384xbf16> to vector<8x4x384xbf16>
    %c0_25 = arith.constant 0 : index
    %c0_26 = arith.constant 0 : index
    %c2 = arith.constant 2 : index
    %c0_27 = arith.constant 0 : index
    %26 = vector.load %arg9[%c0_25, %c0_26, %c2, %c0_27] : memref<8x2x6x384xbf16, #tpu.memory_space<vmem>>, vector<8x1x4x384xbf16>
    %27 = vector.shape_cast %26 : vector<8x1x4x384xbf16> to vector<8x4x384xbf16>
    %c0_28 = arith.constant 0 : index
    %c1_29 = arith.constant 1 : index
    %c2_30 = arith.constant 2 : index
    %c0_31 = arith.constant 0 : index
    %28 = vector.load %arg9[%c0_28, %c1_29, %c2_30, %c0_31] : memref<8x2x6x384xbf16, #tpu.memory_space<vmem>>, vector<8x1x4x384xbf16>
    %29 = vector.shape_cast %28 : vector<8x1x4x384xbf16> to vector<8x4x384xbf16>
    %30 = tpu.concatenate %19, %21, %23, %25, %27, %29 in 2 : vector<8x4x384xbf16>, vector<8x4x384xbf16>, vector<8x4x384xbf16>, vector<8x4x384xbf16>, vector<8x4x384xbf16>, vector<8x4x384xbf16> -> vector<8x4x2304xbf16>
    %31 = vector.shape_cast %30 : vector<8x4x2304xbf16> to vector<32x2304xbf16>
    %c0_32 = arith.constant 0 : index
    %c0_33 = arith.constant 0 : index
    %32 = vector.load %arg4[%c0_32, %c0_33] : memref<2304x1024xbf16, #tpu.memory_space<vmem>>, vector<2304x1024xbf16>
    %cst_34 = arith.constant dense<0.000000e+00> : vector<32x1024xf32>
    %33 = tpu.matmul %31, %32, %cst_34 {dimension_numbers = #tpu.dot_dimension_numbers<[1], [0], [0], [1], [0, 0, 1, 1], [], []>} : vector<32x2304xbf16>, vector<2304x1024xbf16>, vector<32x1024xf32> -> vector<32x1024xf32>
    %34 = vector.extract_strided_slice %33 {offsets = [0, 0], sizes = [32, 256], strides = [1, 1]} : vector<32x1024xf32> to vector<32x256xf32>
    %35 = vector.extract_strided_slice %33 {offsets = [0, 256], sizes = [32, 256], strides = [1, 1]} : vector<32x1024xf32> to vector<32x256xf32>
    %36 = arith.maximumf %34, %35 : vector<32x256xf32>
    %37 = vector.extract_strided_slice %33 {offsets = [0, 512], sizes = [32, 256], strides = [1, 1]} : vector<32x1024xf32> to vector<32x256xf32>
    %38 = vector.extract_strided_slice %33 {offsets = [0, 768], sizes = [32, 256], strides = [1, 1]} : vector<32x1024xf32> to vector<32x256xf32>
    %39 = arith.maximumf %37, %38 : vector<32x256xf32>
    %40 = arith.maximumf %36, %39 : vector<32x256xf32>
    %c0_35 = arith.constant 0 : index
    %c0_36 = arith.constant 0 : index
    %41 = vector.load %arg5[%c0_35, %c0_36] : memref<1x256xf32, #tpu.memory_space<vmem>>, vector<1x256xf32>
    %42 = vector.broadcast %41 : vector<1x256xf32> to vector<32x256xf32>
    %43 = arith.addf %40, %42 : vector<32x256xf32>
    %cst_37 = arith.constant 0.000000e+00 : f32
    %44 = vector.broadcast %cst_37 : f32 to vector<32x256xf32>
    %45 = arith.maximumf %43, %44 : vector<32x256xf32>
    %46 = vector.shape_cast %45 : vector<32x256xf32> to vector<8x1024xf32>
    %c0_38 = arith.constant 0 : index
    %c0_39 = arith.constant 0 : index
    %47 = vector.load %arg6[%c0_38, %c0_39] : memref<1024x128xf32, #tpu.memory_space<vmem>>, vector<1024x128xf32>
    %cst_40 = arith.constant dense<0.000000e+00> : vector<8x128xf32>
    %48 = tpu.matmul %46, %47, %cst_40 {dimension_numbers = #tpu.dot_dimension_numbers<[1], [0], [0], [1], [0, 0, 1, 1], [], []>} : vector<8x1024xf32>, vector<1024x128xf32>, vector<8x128xf32> -> vector<8x128xf32>
    %c0_41 = arith.constant 0 : index
    %c0_42 = arith.constant 0 : index
    %49 = vector.load %arg7[%c0_41, %c0_42] : memref<1x128xf32, #tpu.memory_space<vmem>>, vector<1x128xf32>
    %50 = vector.broadcast %49 : vector<1x128xf32> to vector<8x128xf32>
    %51 = arith.addf %48, %50 : vector<8x128xf32>
    %cst_43 = arith.constant dense<0xFF800000> : vector<8xf32>
    %52 = vector.multi_reduction <maximumf>, %51, %cst_43 [1] : vector<8x128xf32> to vector<8xf32>
    %53 = vector.shape_cast %52 : vector<8xf32> to vector<8x1xf32>
    %54 = vector.broadcast %53 : vector<8x1xf32> to vector<8x128xf32>
    %55 = arith.subf %51, %54 : vector<8x128xf32>
    %56 = math.exp %55 : vector<8x128xf32>
    %cst_44 = arith.constant dense<0.000000e+00> : vector<8xf32>
    %57 = vector.multi_reduction <add>, %56, %cst_44 [1] : vector<8x128xf32> to vector<8xf32>
    %58 = vector.shape_cast %57 : vector<8xf32> to vector<8x1xf32>
    %59 = math.log %58 : vector<8x1xf32>
    %60 = arith.addf %53, %59 : vector<8x1xf32>
    %61 = vector.broadcast %60 : vector<8x1xf32> to vector<8x128xf32>
    %62 = arith.subf %51, %61 : vector<8x128xf32>
    %c0_45 = arith.constant 0 : index
    %c0_46 = arith.constant 0 : index
    %63 = vector.load %arg8[%c0_45, %c0_46] : memref<8x128xf32, #tpu.memory_space<vmem>>, vector<8x128xf32>
    tpu.vector_store %arg8[%c0_45, %c0_46], %62 {strides = array<i32>} : memref<8x128xf32, #tpu.memory_space<vmem>>, vector<8x128xf32>,
    return
  }
  func.func @transform_0(%arg0: i32) -> (i32, i32) {
    %c0_i32 = arith.constant 0 : i32
    %c0_i32_0 = arith.constant 0 : i32
    return %arg0, %c0_i32 : i32, i32
  }
  func.func @transform_1(%arg0: i32) -> (i32, i32) {
    %c0_i32 = arith.constant 0 : i32
    %c0_i32_0 = arith.constant 0 : i32
    %c0_i32_1 = arith.constant 0 : i32
    return %c0_i32, %c0_i32_0 : i32, i32
  }
  func.func @transform_2(%arg0: i32) -> (i32, i32) {
    %c0_i32 = arith.constant 0 : i32
    %c0_i32_0 = arith.constant 0 : i32
    %c0_i32_1 = arith.constant 0 : i32
    return %c0_i32, %c0_i32_0 : i32, i32
  }
  func.func @transform_3(%arg0: i32) -> (i32, i32) {
    %c0_i32 = arith.constant 0 : i32
    %c0_i32_0 = arith.constant 0 : i32
    %c0_i32_1 = arith.constant 0 : i32
    return %c0_i32, %c0_i32_0 : i32, i32
  }
  func.func @transform_4(%arg0: i32) -> (i32, i32) {
    %c0_i32 = arith.constant 0 : i32
    %c0_i32_0 = arith.constant 0 : i32
    %c0_i32_1 = arith.constant 0 : i32
    return %c0_i32, %c0_i32_0 : i32, i32
  }
  func.func @transform_5(%arg0: i32) -> (i32, i32) {
    %c0_i32 = arith.constant 0 : i32
    %c0_i32_0 = arith.constant 0 : i32
    %c0_i32_1 = arith.constant 0 : i32
    return %c0_i32, %c0_i32_0 : i32, i32
  }
  func.func @transform_6(%arg0: i32) -> (i32, i32) {
    %c0_i32 = arith.constant 0 : i32
    %c0_i32_0 = arith.constant 0 : i32
    %c0_i32_1 = arith.constant 0 : i32
    return %c0_i32, %c0_i32_0 : i32, i32
  }
  func.func @transform_7(%arg0: i32) -> (i32, i32) {
    %c0_i32 = arith.constant 0 : i32
    %c0_i32_0 = arith.constant 0 : i32
    return %arg0, %c0_i32 : i32, i32
  }
}

</mosaic_0001>

<bundles_post_ra>
// kernel: tile.13
= control target key start
LH: loop header
LB: loop body
LE: loop exit
PB: predicated region body
PF: predicated region fallthrough
CT: control target
= control target key end

     0   :  { %s28_s0 = inlined_call_operand.vmem [shape: f32[32], index: 0, kind: input, shape index: {}]   ;;  %s29_s1 = inlined_call_operand.vmem [shape: f32[12,32], index: 1, kind: output, shape index: {}]  }
   0x1   :  { %v4_v0 = vld [vmem:[%s28_s0] ss:$0 sm:$0xff] }
   0x2   :  { %5 = vst [vmem:[%s29_s1] sm:$0xff] %v4_v0  ;;  %8 = vst [vmem:[%s29_s1 + $0x8] sm:$0xff] %v4_v0 }

// kernel: tile.14
= control target key start
LH: loop header
LB: loop body
LE: loop exit
PB: predicated region body
PF: predicated region fallthrough
CT: control target
= control target key end

     0   :  { %s53_s8 = smov 96   ;;  %vm3_vm0 = vcmask 261120   ;;  %s55_s15 = smov 64   ;;  %vm9_vm1 = vcmask 1048320   ;;  %vm15_vm2 = vcmask 785920   ;;  %vm21_vm3 = vcmask 523520   ;;  %s87_s0 = inlined_call_operand.vmem [shape: f32[12,32], index: 0, kind: input, shape index: {}]   ;;  %s88_s1 = inlined_call_operand.vmem [shape: f32[1,384], index: 1, kind: output, shape index: {}]  }
   0x1   :  { %v45_v0 = vld [vmem:[%s87_s0 + $0x3] ss:$4 sm:$0x7]   ;;  %v46_v1 = vld [vmem:[%s87_s0 + $0x2] ss:$4 sm:$0x7]  }
   0x2   :  { %7 = vrot.lane.b32.xlu0 %v45_v0, %s53_s8  ;;  %v47_v2 = vld [vmem:[%s87_s0 + $0x1] ss:$4 sm:$0x7]   ;;  %v2_v3 = vld [vmem:[%s87_s0] ss:$4 sm:$0x7]  }
   0x3   :  { %s54_s0 = smov 32   ;;  %4 = vst.msk [vmem:[#allocation0] ss:$8 sm:$0x7] %vm3_vm0, %v2_v3  }
   0x4   :  { %19 = vrot.lane.b32.xlu1 %v47_v2, %s54_s0 }
   0x6   :  { %13 = vrot.lane.b32.xlu0 %v46_v1, %s55_s15 }
  0x74   :  { %v8_v4 = vpop.permute.xlu0 %7  }
  0x75   :  { %10 = vst.msk [vmem:[#allocation0] ss:$8 sm:$0x7] %vm9_vm1, %v8_v4  }
  0x76   :  { %v20_v5 = vpop.permute.xlu1 %19  }
  0x78   :  { %v14_v6 = vpop.permute.xlu0 %13  }
  0x79   :  { %16 = vst.msk [vmem:[#allocation0] ss:$8 sm:$0x7] %vm15_vm2, %v14_v6  }
  0x7a   :  { %22 = vst.msk [vmem:[#allocation0] ss:$8 sm:$0x7] %vm21_vm3, %v20_v5  }
  0x81   :  { %v27_v7 = vld [vmem:[#allocation0] sm:$0x1]  ;;  %v32_v8 = vld [vmem:[#allocation0 + $0x8] sm:$0x1]  ;;  %v38_v9 = vld [vmem:[#allocation0 + $0x10] sm:$0x1] }
  0x82   :  { %30 = vst [vmem:[%s88_s1] sm:$0x1] %v27_v7  ;;  %48 = vst [vmem:[%s88_s1 + $0x1] sm:$0x1] %v32_v8 }
  0x83   :  { %49 = vst [vmem:[%s88_s1 + $0x2] sm:$0x1] %v38_v9 }

// kernel: tile.18
= control target key start
LH: loop header
LB: loop body
LE: loop exit
PB: predicated region body
PF: predicated region fallthrough
CT: control target
= control target key end

     0   :  { %s22_s0 = inlined_call_operand.vmem [shape: f32[64], index: 0, kind: input, shape index: {}]   ;;  %s23_s1 = inlined_call_operand.vmem [shape: f32[4,64], index: 1, kind: output, shape index: {}]  }
   0x1   :  { %v4_v0 = vld [vmem:[%s22_s0] ss:$0 sm:$0xff] }
   0x2   :  { %5 = vst [vmem:[%s23_s1] sm:$0xf] %v4_v0 }

// kernel: tile.19
= control target key start
LH: loop header
LB: loop body
LE: loop exit
PB: predicated region body
PF: predicated region fallthrough
CT: control target
= control target key end

     0   :  { %s7_s8 = smov 3  ;;  %vm9_vm0 = vcmask 523264   ;;  %s34_s9 = smov 64   ;;  %vm16_vm1 = vcmask 1048064   ;;  %s54_s0 = inlined_call_operand.vmem [shape: f32[4,64], index: 0, kind: input, shape index: {}]   ;;  %s55_s1 = inlined_call_operand.vmem [shape: f32[1,256], index: 1, kind: output, shape index: {}]  }
   0x1   :  { %v5_v0 = vld [vmem:[%s54_s0] sm:$0xf]  ;;  %s12_s0 = smov 3 }
   0x2   :  { %6 = vst [vmem:[#allocation1] sm:$0xf] %v5_v0 }
   0x9   :  { %v13_v1 = vld [vmem:[#allocation1 + $0x1] ss:$2 sm:%s12_s0]   ;;  %v8_v2 = vld [vmem:[#allocation1] ss:$2 sm:%s7_s8]  }
   0xa   :  { %14 = vrot.lane.b32.xlu0 %v13_v1, %s34_s9  ;;  %10 = vst.msk [vmem:[#allocation0] ss:$8 sm:$0x3] %vm9_vm0, %v8_v2  }
  0x7c   :  { %v15_v3 = vpop.permute.xlu0 %14  }
  0x7d   :  { %17 = vst.msk [vmem:[#allocation0] ss:$8 sm:$0x3] %vm16_vm1, %v15_v3  }
  0x84   :  { %v22_v4 = vld [vmem:[#allocation0] sm:$0x1]  ;;  %v27_v5 = vld [vmem:[#allocation0 + $0x8] sm:$0x1] }
  0x85   :  { %25 = vst [vmem:[%s55_s1] sm:$0x1] %v22_v4  ;;  %32 = vst [vmem:[%s55_s1 + $0x1] sm:$0x1] %v27_v5 }

// kernel: cnn_forward.1
= control target key start
LH: loop header
LB: loop body
LE: loop exit
PB: predicated region body
PF: predicated region fallthrough
CT: control target
= control target key end

     0   :  { %vm849_vm0 = vcmask 326656   ;;  %vm868_vm1 = vcmask 1043456   ;;  %s23237_s1 = inlined_call_operand.vmem [shape: bf16[168,1536], index: 1, kind: input, shape index: {}]   ;;  %s23238_s0 = inlined_call_operand.vmem [shape: bf16[96,168], index: 0, kind: input, shape index: {}]   ;;  %s23239_s3 = inlined_call_operand.vmem [shape: bf16[2304,1024], index: 3, kind: input, shape index: {}]   ;;  %s23240_s2 = inlined_call_operand.vmem [shape: f32[1,384], index: 2, kind: input, shape index: {}]   ;;  %s23241_s5 = inlined_call_operand.vmem [shape: f32[1024,128], index: 5, kind: input, shape index: {}]   ;;  %s23242_s4 = inlined_call_operand.vmem [shape: f32[1,256], index: 4, kind: input, shape index: {}]   ;;  %s23243_s6 = inlined_call_operand.vmem [shape: f32[1,128], index: 6, kind: input, shape index: {}]   ;;  %s23244_s7 = inlined_call_operand.vmem [shape: f32[8,128], index: 7, kind: output, shape index: {}]  }
   0x1   :  { %v15758_v0 = vld [vmem:[%s23237_s1 + $0x2a4] ss:$48 sps:$4 sm:$0xff]   ;;  %v15760_v1 = vld [vmem:[%s23237_s1 + $0x2ac] ss:$48 sps:$4 sm:$0xff]   ;;  %v15762_v2 = vld [vmem:[%s23237_s1 + $0x2a0] ss:$48 sps:$4 sm:$0xff]  }
   0x2   :  { %905 = vmatprep.subr.bf16.mxu0 %v15758_v0  ;;  %v15763_v3 = vld [vmem:[%s23237_s1 + $0x2a8] ss:$48 sps:$4 sm:$0xff]   ;;  %998 = vmatprep.subr.bf16.mxu1 %v15760_v1  ;;  %v15764_v4 = vld [vmem:[%s23237_s1 + $0x244] ss:$48 sps:$4 sm:$0xff]   ;;  %v15766_v5 = vld [vmem:[%s23237_s1 + $0x24c] ss:$48 sps:$4 sm:$0xff]  }
   0x3   :  { %906 = vmatpush1.bf16.msra.mxu0 %v15762_v2  ;;  %999 = vmatpush1.bf16.msra.mxu1 %v15763_v3  ;;  %v15768_v6 = vld [vmem:[%s23237_s1 + $0x240] ss:$48 sps:$4 sm:$0xff]   ;;  %v15769_v7 = vld [vmem:[%s23237_s1 + $0x248] ss:$48 sps:$4 sm:$0xff]   ;;  %v15770_v8 = vld [vmem:[%s23237_s1 + $0x1e4] ss:$48 sps:$4 sm:$0xff]  }
   0x4   :  { %907 = vmatprep.subr.bf16.mxu0 %v15764_v4  ;;  %1000 = vmatprep.subr.bf16.mxu1 %v15766_v5  ;;  %v15772_v9 = vld [vmem:[%s23237_s1 + $0x1ec] ss:$48 sps:$4 sm:$0xff]   ;;  %v15774_v10 = vld [vmem:[%s23237_s1 + $0x1e0] ss:$48 sps:$4 sm:$0xff]   ;;  %v15775_v11 = vld [vmem:[%s23237_s1 + $0x1e8] ss:$48 sps:$4 sm:$0xff]  }
   0x5   :  { %v15776_v12 = vld [vmem:[%s23237_s1 + $0x184] ss:$48 sps:$4 sm:$0xff]   ;;  %v15778_v13 = vld [vmem:[%s23237_s1 + $0x18c] ss:$48 sps:$4 sm:$0xff]   ;;  %v15780_v14 = vld [vmem:[%s23237_s1 + $0x180] ss:$48 sps:$4 sm:$0xff]  }
   0x6   :  { %v15781_v15 = vld [vmem:[%s23237_s1 + $0x188] ss:$48 sps:$4 sm:$0xff]   ;;  %v15782_v16 = vld [vmem:[%s23237_s1 + $0x124] ss:$48 sps:$4 sm:$0xff]   ;;  %v15784_v17 = vld [vmem:[%s23237_s1 + $0x12c] ss:$48 sps:$4 sm:$0xff]  }
   0x7   :  { %908 = vmatpush1.bf16.msra.mxu0 %v15768_v6  ;;  %1001 = vmatpush1.bf16.msra.mxu1 %v15769_v7  ;;  %v15786_v18 = vld [vmem:[%s23237_s1 + $0x120] ss:$48 sps:$4 sm:$0xff]   ;;  %v15787_v19 = vld [vmem:[%s23237_s1 + $0x128] ss:$48 sps:$4 sm:$0xff]   ;;  %v15788_v20 = vld [vmem:[%s23237_s1 + $0xc4] ss:$48 sps:$4 sm:$0xff]  }
   0x8   :  { %909 = vmatprep.subr.bf16.mxu0 %v15770_v8  ;;  %1002 = vmatprep.subr.bf16.mxu1 %v15772_v9  ;;  %v15790_v21 = vld [vmem:[%s23237_s1 + $0xcc] ss:$48 sps:$4 sm:$0xff]   ;;  %v15792_v22 = vld [vmem:[%s23237_s1 + $0xc0] ss:$48 sps:$4 sm:$0xff]   ;;  %v15793_v23 = vld [vmem:[%s23237_s1 + $0xc8] ss:$48 sps:$4 sm:$0xff]  }
   0x9   :  { %v15794_v24 = vld [vmem:[%s23237_s1 + $0x64] ss:$48 sps:$4 sm:$0xff]   ;;  %v15796_v25 = vld [vmem:[%s23237_s1 + $0x6c] ss:$48 sps:$4 sm:$0xff]   ;;  %v15798_v26 = vld [vmem:[%s23237_s1 + $0x60] ss:$48 sps:$4 sm:$0xff]  }
   0xa   :  { %v15799_v27 = vld [vmem:[%s23237_s1 + $0x68] ss:$48 sps:$4 sm:$0xff]   ;;  %v15800_v28 = vld [vmem:[%s23237_s1 + $0x4] ss:$48 sps:$4 sm:$0xff]   ;;  %v15802_v29 = vld [vmem:[%s23237_s1 + $0xc] ss:$48 sps:$4 sm:$0xff]  }
   0xb   :  { %910 = vmatpush1.bf16.msra.mxu0 %v15774_v10  ;;  %1003 = vmatpush1.bf16.msra.mxu1 %v15775_v11  ;;  %v159_v30 = vld [vmem:[%s23237_s1 + $0x3c0] sm:$0xff]  ;;  %v160_v31 = vld [vmem:[%s23237_s1 + $0x3c8] sm:$0xff]  ;;  %v16292_v56 = vld [vmem:[%s23238_s0 + $0x14] ss:$8 sps:$4 sm:$0xff]  }
   0xc   :  { %911 = vmatprep.subr.bf16.mxu0 %v15776_v12  ;;  %1004 = vmatprep.subr.bf16.mxu1 %v15778_v13  ;;  %v15804_v32 = vld [vmem:[%s23237_s1] ss:$48 sps:$4 sm:$0xff]   ;;  %v15805_v33 = vld [vmem:[%s23237_s1 + $0x8] ss:$48 sps:$4 sm:$0xff]   ;;  %v14159_v34 = vcombine.high %v159_v30, %v159_v30  ;;  %v16232_v35 = vld [vmem:[%s23238_s0 + $0x4] ss:$8 sps:$4 sm:$0xff]   ;;  %v14161_v36 = vcombine.high %v160_v31, %v160_v31  ;;  %v14158_v37 = vcombine.low %v159_v30, %v159_v30 }
   0xd   :  { %v14160_v38 = vcombine.low %v160_v31, %v160_v31  ;;  %14171 = vmatprep.mubr.msk.bf16.mxu0 %vm849_vm0, %v16232_v35  ;;  %14178 = vmatprep.mubr.msk.bf16.mxu1 %vm849_vm0, %v16232_v35  ;;  %v15810_v39 = vld [vmem:[%s23237_s1 + $0x364] ss:$48 sps:$4 sm:$0xff]   ;;  %v15812_v42 = vld [vmem:[%s23237_s1 + $0x36c] ss:$48 sps:$4 sm:$0xff]   ;;  %v15814_v43 = vld [vmem:[%s23237_s1 + $0x360] ss:$48 sps:$4 sm:$0xff]  }
   0xe   :  { %v870_v40 = vsel %vm868_vm1, %v14158_v37, 0  ;;  %v15815_v44 = vld [vmem:[%s23237_s1 + $0x368] ss:$48 sps:$4 sm:$0xff]   ;;  %v15816_v45 = vld [vmem:[%s23237_s1 + $0x304] ss:$48 sps:$4 sm:$0xff]  }
   0xf   :  { %912 = vmatpush1.bf16.msra.mxu0 %v15780_v14  ;;  %1005 = vmatpush1.bf16.msra.mxu1 %v15781_v15  ;;  %v876_v41 = vsel %vm868_vm1, %v14160_v38, 0  ;;  %v15818_v46 = vld [vmem:[%s23237_s1 + $0x30c] ss:$48 sps:$4 sm:$0xff]   ;;  %v15820_v47 = vld [vmem:[%s23237_s1 + $0x300] ss:$48 sps:$4 sm:$0xff]  }
  0x10   :  { %913 = vmatprep.subr.bf16.mxu0 %v15782_v16  ;;  %1006 = vmatprep.subr.bf16.mxu1 %v15784_v17  ;;  %v15821_v48 = vld [vmem:[%s23237_s1 + $0x308] ss:$48 sps:$4 sm:$0xff]   ;;  %v15827_v49 = vld [vmem:[%s23237_s1 + $0x2b4] ss:$48 sps:$4 sm:$0xff]   ;;  %v15830_v50 = vld [vmem:[%s23237_s1 + $0x2bc] ss:$48 sps:$4 sm:$0xff]  }
  0x11   :  { %v16275_v51 = vld [vmem:[%s23238_s0] ss:$8 sps:$4 sm:$0xff]   ;;  %v15833_v54 = vld [vmem:[%s23237_s1 + $0x254] ss:$48 sps:$4 sm:$0xff]   ;;  %v15836_v55 = vld [vmem:[%s23237_s1 + $0x25c] ss:$48 sps:$4 sm:$0xff]  }
  0x12   :  { %v15825_v52 = vld [vmem:[%s23237_s1 + $0x2b0] ss:$48 sps:$4 sm:$0xff]   ;;  %v15828_v53 = vld [vmem:[%s23237_s1 + $0x2b8] ss:$48 sps:$4 sm:$0xff]   ;;  %v15842_v59 = vld [vmem:[%s23237_s1 + $0x1f4] ss:$48 sps:$4 sm:$0xff]  }
  0x13   :  { %914 = vmatpush1.bf16.msra.mxu0 %v15786_v18  ;;  %1007 = vmatpush1.bf16.msra.mxu1 %v15787_v19  ;;  %v15831_v57 = vld [vmem:[%s23237_s1 + $0x250] ss:$48 sps:$4 sm:$0xff]   ;;  %v15834_v58 = vld [vmem:[%s23237_s1 + $0x258] ss:$48 sps:$4 sm:$0xff]   ;;  %v15845_v60 = vld [vmem:[%s23237_s1 + $0x1fc] ss:$48 sps:$4 sm:$0xff]  }
  0x14   :  { %915 = vmatprep.subr.bf16.mxu0 %v15788_v20  ;;  %1008 = vmatprep.subr.bf16.mxu1 %v15790_v21  ;;  %v16315_v61 = vld [vmem:[%s23238_s0 + $0x10] ss:$8 sps:$4 sm:$0xff]   ;;  %v15848_v0 = vld [vmem:[%s23237_s1 + $0x194] ss:$48 sps:$4 sm:$0xff]   ;;  %v15851_v1 = vld [vmem:[%s23237_s1 + $0x19c] ss:$48 sps:$4 sm:$0xff]  }
  0x15   :  { %v15840_v62 = vld [vmem:[%s23237_s1 + $0x1f0] ss:$48 sps:$4 sm:$0xff]   ;;  %v15843_v63 = vld [vmem:[%s23237_s1 + $0x1f8] ss:$48 sps:$4 sm:$0xff]   ;;  %v16332_v2 = vld [vmem:[%s23238_s0 + $0x24] ss:$8 sps:$4 sm:$0xff]  }
  0x16   :  { %v15846_v3 = vld [vmem:[%s23237_s1 + $0x190] ss:$48 sps:$4 sm:$0xff]   ;;  %v15849_v4 = vld [vmem:[%s23237_s1 + $0x198] ss:$48 sps:$4 sm:$0xff]   ;;  %v15857_v5 = vld [vmem:[%s23237_s1 + $0x134] ss:$48 sps:$4 sm:$0xff]  }
  0x17   :  { %916 = vmatpush1.bf16.msra.mxu0 %v15792_v22  ;;  %1009 = vmatpush1.bf16.msra.mxu1 %v15793_v23  ;;  %v15860_v6 = vld [vmem:[%s23237_s1 + $0x13c] ss:$48 sps:$4 sm:$0xff]   ;;  %v16355_v7 = vld [vmem:[%s23238_s0 + $0x20] ss:$8 sps:$4 sm:$0xff]   ;;  %v15863_v10 = vld [vmem:[%s23237_s1 + $0xd4] ss:$48 sps:$4 sm:$0xff]  }
  0x18   :  { %917 = vmatprep.subr.bf16.mxu0 %v15794_v24  ;;  %1010 = vmatprep.subr.bf16.mxu1 %v15796_v25  ;;  %v15855_v8 = vld [vmem:[%s23237_s1 + $0x130] ss:$48 sps:$4 sm:$0xff]   ;;  %v15858_v9 = vld [vmem:[%s23237_s1 + $0x138] ss:$48 sps:$4 sm:$0xff]   ;;  %v15866_v11 = vld [vmem:[%s23237_s1 + $0xdc] ss:$48 sps:$4 sm:$0xff]  }
  0x19   :  { %v16372_v12 = vld [vmem:[%s23238_s0 + $0x34] ss:$8 sps:$4 sm:$0xff]   ;;  %v15861_v13 = vld [vmem:[%s23237_s1 + $0xd0] ss:$48 sps:$4 sm:$0xff]   ;;  %v15864_v14 = vld [vmem:[%s23237_s1 + $0xd8] ss:$48 sps:$4 sm:$0xff]  }
  0x1a   :  { %v15872_v15 = vld [vmem:[%s23237_s1 + $0x74] ss:$48 sps:$4 sm:$0xff]   ;;  %v15875_v16 = vld [vmem:[%s23237_s1 + $0x7c] ss:$48 sps:$4 sm:$0xff]   ;;  %v16395_v17 = vld [vmem:[%s23238_s0 + $0x30] ss:$8 sps:$4 sm:$0xff]  }
  0x1b   :  { %918 = vmatpush1.bf16.msra.mxu0 %v15798_v26  ;;  %1011 = vmatpush1.bf16.msra.mxu1 %v15799_v27  ;;  %v15870_v18 = vld [vmem:[%s23237_s1 + $0x70] ss:$48 sps:$4 sm:$0xff]   ;;  %v15873_v19 = vld [vmem:[%s23237_s1 + $0x78] ss:$48 sps:$4 sm:$0xff]   ;;  %v16406_v20 = vld [vmem:[%s23238_s0 + $0x44] ss:$8 sps:$4 sm:$0xff]  }
  0x1c   :  { %919 = vmatprep.subr.bf16.mxu0 %v15800_v28  ;;  %1012 = vmatprep.subr.bf16.mxu1 %v15802_v29  ;;  %v15880_v21 = vld [vmem:[%s23237_s1 + $0x14] ss:$48 sps:$4 sm:$0xff]   ;;  %v15883_v23 = vld [vmem:[%s23237_s1 + $0x1c] ss:$48 sps:$4 sm:$0xff]   ;;  %v15878_v25 = vld [vmem:[%s23237_s1 + $0x10] ss:$48 sps:$4 sm:$0xff]  }
  0x1d   :  { %v161_v22 = vld [vmem:[%s23237_s1 + $0x3d0] sm:$0xff]  ;;  %v162_v24 = vld [vmem:[%s23237_s1 + $0x3d8] sm:$0xff]  ;;  %v16435_v31 = vld [vmem:[%s23238_s0 + $0x40] ss:$8 sps:$4 sm:$0xff]  }
  0x1e   :  { %v15881_v26 = vld [vmem:[%s23237_s1 + $0x18] ss:$48 sps:$4 sm:$0xff]   ;;  %v14163_v27 = vcombine.high %v161_v22, %v161_v22  ;;  %v14165_v28 = vcombine.high %v162_v24, %v162_v24  ;;  %v14162_v29 = vcombine.low %v161_v22, %v161_v22  ;;  %v14164_v30 = vcombine.low %v162_v24, %v162_v24  ;;  %v15897_v37 = vld [vmem:[%s23237_s1 + $0x37c] ss:$48 sps:$4 sm:$0xff]   ;;  %v15892_v38 = vld [vmem:[%s23237_s1 + $0x370] ss:$48 sps:$4 sm:$0xff]  }
  0x1f   :  { %920 = vmatpush1.bf16.msra.mxu0 %v15804_v32  ;;  %1013 = vmatpush1.bf16.msra.mxu1 %v15805_v33  ;;  %v15949_v22 = vld [vmem:[%s23237_s1 + $0x28] ss:$48 sps:$4 sm:$0xff]  }
  0x20   :  { %14170 = vmatprep.subr.msk.bf16.mxu0 %vm868_vm1, %v14159_v34  ;;  %14177 = vmatprep.subr.msk.bf16.mxu1 %vm868_vm1, %v14161_v36  ;;  %v882_v32 = vsel %vm868_vm1, %v14162_v29, 0  ;;  %v888_v33 = vsel %vm868_vm1, %v14164_v30, 0  ;;  %v16444_v34 = vld [vmem:[%s23238_s0 + $0x54] ss:$8 sps:$4 sm:$0xff]  }
  0x21   :  { %v15894_v36 = vld [vmem:[%s23237_s1 + $0x374] ss:$48 sps:$4 sm:$0xff]   ;;  %v15961_v30 = vld [vmem:[%s23237_s1 + $0x38c] ss:$48 sps:$4 sm:$0xff]  }
  0x22   :  { %v15958_v29 = vld [vmem:[%s23237_s1 + $0x384] ss:$48 sps:$4 sm:$0xff]  }
  0x23   :  { %932 = vmatpush2.bf16.msra.mxu0 %v870_v40  ;;  %1025 = vmatpush2.bf16.msra.mxu1 %v876_v41  ;;  %v15900_v40 = vld [vmem:[%s23237_s1 + $0x314] ss:$48 sps:$4 sm:$0xff]   ;;  %v15903_v41 = vld [vmem:[%s23237_s1 + $0x31c] ss:$48 sps:$4 sm:$0xff]  }
  0x24   :  { %933 = vmatprep.subr.bf16.mxu0 %v15810_v39  ;;  %1026 = vmatprep.subr.bf16.mxu1 %v15812_v42  ;;  %v15895_v39 = vld [vmem:[%s23237_s1 + $0x378] ss:$48 sps:$4 sm:$0xff]  }
  0x25   :  { %v16473_v42 = vld [vmem:[%s23238_s0 + $0x50] ss:$8 sps:$4 sm:$0xff]  }
  0x27   :  { %934 = vmatpush2.bf16.msra.mxu0 %v15814_v43  ;;  %1027 = vmatpush2.bf16.msra.mxu1 %v15815_v44  ;;  %v15898_v43 = vld [vmem:[%s23237_s1 + $0x310] ss:$48 sps:$4 sm:$0xff]   ;;  %v15901_v44 = vld [vmem:[%s23237_s1 + $0x318] ss:$48 sps:$4 sm:$0xff]  }
  0x28   :  { %935 = vmatprep.subr.bf16.mxu0 %v15816_v45  ;;  %1028 = vmatprep.subr.bf16.mxu1 %v15818_v46  ;;  %v15906_v45 = vld [vmem:[%s23237_s1 + $0x2c4] ss:$48 sps:$4 sm:$0xff]   ;;  %v15909_v46 = vld [vmem:[%s23237_s1 + $0x2cc] ss:$48 sps:$4 sm:$0xff]  }
  0x2b   :  { %936 = vmatpush2.bf16.msra.mxu0 %v15820_v47  ;;  %1029 = vmatpush2.bf16.msra.mxu1 %v15821_v48  ;;  %v15904_v47 = vld [vmem:[%s23237_s1 + $0x2c0] ss:$48 sps:$4 sm:$0xff]   ;;  %v15907_v48 = vld [vmem:[%s23237_s1 + $0x2c8] ss:$48 sps:$4 sm:$0xff]  }
  0x2c   :  { %1091 = vmatprep.subr.bf16.mxu0 %v15827_v49  ;;  %1184 = vmatprep.subr.bf16.mxu1 %v15830_v50  ;;  %v15912_v49 = vld [vmem:[%s23237_s1 + $0x264] ss:$48 sps:$4 sm:$0xff]   ;;  %v15915_v50 = vld [vmem:[%s23237_s1 + $0x26c] ss:$48 sps:$4 sm:$0xff]  }
  0x2e   :  { %938 = vmatmul.mubr.bf16.vlgmr.msra.gmra.mxu0 %v16275_v51  ;;  %1031 = vmatmul.mubr.bf16.vlgmr.msra.gmra.mxu1 %v16275_v51 }
  0x2f   :  { %1092 = vmatpush1.bf16.msra.mxu0 %v15825_v52  ;;  %1185 = vmatpush1.bf16.msra.mxu1 %v15828_v53  ;;  %v15910_v52 = vld [vmem:[%s23237_s1 + $0x260] ss:$48 sps:$4 sm:$0xff]   ;;  %v15913_v53 = vld [vmem:[%s23237_s1 + $0x268] ss:$48 sps:$4 sm:$0xff]  }
  0x30   :  { %1093 = vmatprep.subr.bf16.mxu0 %v15833_v54  ;;  %1186 = vmatprep.subr.bf16.mxu1 %v15836_v55  ;;  %v15918_v54 = vld [vmem:[%s23237_s1 + $0x204] ss:$48 sps:$4 sm:$0xff]   ;;  %v15921_v55 = vld [vmem:[%s23237_s1 + $0x20c] ss:$48 sps:$4 sm:$0xff]  }
  0x31   :  { %14172 = vmatprep.mubr.msk.bf16.mxu0 %vm849_vm0, %v16292_v56  ;;  %14179 = vmatprep.mubr.msk.bf16.mxu1 %vm849_vm0, %v16292_v56 }
  0x33   :  { %1094 = vmatpush1.bf16.msra.mxu0 %v15831_v57  ;;  %1187 = vmatpush1.bf16.msra.mxu1 %v15834_v58  ;;  %v15916_v57 = vld [vmem:[%s23237_s1 + $0x200] ss:$48 sps:$4 sm:$0xff]   ;;  %v15919_v58 = vld [vmem:[%s23237_s1 + $0x208] ss:$48 sps:$4 sm:$0xff]  }
  0x34   :  { %1095 = vmatprep.subr.bf16.mxu0 %v15842_v59  ;;  %1188 = vmatprep.subr.bf16.mxu1 %v15845_v60  ;;  %v15924_v59 = vld [vmem:[%s23237_s1 + $0x1a4] ss:$48 sps:$4 sm:$0xff]   ;;  %v15927_v60 = vld [vmem:[%s23237_s1 + $0x1ac] ss:$48 sps:$4 sm:$0xff]  }
  0x36   :  { %948 = vmatmul.mubr.bf16.gmra.mxu0 %v16315_v61  ;;  %1041 = vmatmul.mubr.bf16.gmra.mxu1 %v16315_v61 }
  0x37   :  { %1096 = vmatpush1.bf16.msra.mxu0 %v15840_v62  ;;  %1189 = vmatpush1.bf16.msra.mxu1 %v15843_v63  ;;  %v15922_v62 = vld [vmem:[%s23237_s1 + $0x1a0] ss:$48 sps:$4 sm:$0xff]   ;;  %v15925_v63 = vld [vmem:[%s23237_s1 + $0x1a8] ss:$48 sps:$4 sm:$0xff]  }
  0x38   :  { %1097 = vmatprep.subr.bf16.mxu0 %v15848_v0  ;;  %1190 = vmatprep.subr.bf16.mxu1 %v15851_v1  ;;  %v15930_v0 = vld [vmem:[%s23237_s1 + $0x144] ss:$48 sps:$4 sm:$0xff]   ;;  %v15933_v1 = vld [vmem:[%s23237_s1 + $0x14c] ss:$48 sps:$4 sm:$0xff]  }
  0x39   :  { %14173 = vmatprep.mubr.msk.bf16.mxu0 %vm849_vm0, %v16332_v2  ;;  %14180 = vmatprep.mubr.msk.bf16.mxu1 %vm849_vm0, %v16332_v2 }
  0x3b   :  { %1098 = vmatpush1.bf16.msra.mxu0 %v15846_v3  ;;  %1191 = vmatpush1.bf16.msra.mxu1 %v15849_v4  ;;  %v15928_v3 = vld [vmem:[%s23237_s1 + $0x140] ss:$48 sps:$4 sm:$0xff]   ;;  %v15931_v4 = vld [vmem:[%s23237_s1 + $0x148] ss:$48 sps:$4 sm:$0xff]  }
  0x3c   :  { %1099 = vmatprep.subr.bf16.mxu0 %v15857_v5  ;;  %1192 = vmatprep.subr.bf16.mxu1 %v15860_v6  ;;  %v15936_v5 = vld [vmem:[%s23237_s1 + $0xe4] ss:$48 sps:$4 sm:$0xff]   ;;  %v15939_v6 = vld [vmem:[%s23237_s1 + $0xec] ss:$48 sps:$4 sm:$0xff]  }
  0x3e   :  { %958 = vmatmul.mubr.bf16.gmra.mxu0 %v16355_v7  ;;  %1051 = vmatmul.mubr.bf16.gmra.mxu1 %v16355_v7 }
  0x3f   :  { %1100 = vmatpush1.bf16.msra.mxu0 %v15855_v8  ;;  %1193 = vmatpush1.bf16.msra.mxu1 %v15858_v9  ;;  %v15934_v8 = vld [vmem:[%s23237_s1 + $0xe0] ss:$48 sps:$4 sm:$0xff]   ;;  %v15937_v9 = vld [vmem:[%s23237_s1 + $0xe8] ss:$48 sps:$4 sm:$0xff]  }
  0x40   :  { %1101 = vmatprep.subr.bf16.mxu0 %v15863_v10  ;;  %1194 = vmatprep.subr.bf16.mxu1 %v15866_v11  ;;  %v15942_v10 = vld [vmem:[%s23237_s1 + $0x84] ss:$48 sps:$4 sm:$0xff]   ;;  %v15945_v11 = vld [vmem:[%s23237_s1 + $0x8c] ss:$48 sps:$4 sm:$0xff]  }
  0x41   :  { %14174 = vmatprep.mubr.msk.bf16.mxu0 %vm849_vm0, %v16372_v12  ;;  %14181 = vmatprep.mubr.msk.bf16.mxu1 %vm849_vm0, %v16372_v12 }
  0x43   :  { %1102 = vmatpush1.bf16.msra.mxu0 %v15861_v13  ;;  %1195 = vmatpush1.bf16.msra.mxu1 %v15864_v14  ;;  %v15940_v13 = vld [vmem:[%s23237_s1 + $0x80] ss:$48 sps:$4 sm:$0xff]   ;;  %v15943_v14 = vld [vmem:[%s23237_s1 + $0x88] ss:$48 sps:$4 sm:$0xff]  }
  0x44   :  { %1103 = vmatprep.subr.bf16.mxu0 %v15872_v15  ;;  %1196 = vmatprep.subr.bf16.mxu1 %v15875_v16  ;;  %v163_v15 = vld [vmem:[%s23237_s1 + $0x3e0] sm:$0xff] }
  0x45   :  { %v15948_v16 = vld [vmem:[%s23237_s1 + $0x24] ss:$48 sps:$4 sm:$0xff]  }
  0x46   :  { %968 = vmatmul.mubr.bf16.gmra.mxu0 %v16395_v17  ;;  %1061 = vmatmul.mubr.bf16.gmra.mxu1 %v16395_v17 }
  0x47   :  { %1104 = vmatpush1.bf16.msra.mxu0 %v15870_v18  ;;  %1197 = vmatpush1.bf16.msra.mxu1 %v15873_v19  ;;  %v15951_v18 = vld [vmem:[%s23237_s1 + $0x2c] ss:$48 sps:$4 sm:$0xff]  }
  0x48   :  { %14175 = vmatprep.mubr.msk.bf16.mxu0 %vm849_vm0, %v16406_v20  ;;  %14182 = vmatprep.mubr.msk.bf16.mxu1 %vm849_vm0, %v16406_v20  ;;  %v164_v19 = vld [vmem:[%s23237_s1 + $0x3e8] sm:$0xff] }
  0x49   :  { %1105 = vmatprep.subr.bf16.mxu0 %v15880_v21  ;;  %1198 = vmatprep.subr.bf16.mxu1 %v15883_v23  ;;  %v15946_v21 = vld [vmem:[%s23237_s1 + $0x20] ss:$48 sps:$4 sm:$0xff]   ;;  %v14167_v23 = vcombine.high %v163_v15, %v163_v15  ;;  %v14169_v24 = vcombine.high %v164_v19, %v164_v19 }
  0x4b   :  { %1106 = vmatpush1.bf16.msra.mxu0 %v15878_v25  ;;  %1199 = vmatpush1.bf16.msra.mxu1 %v15881_v26  ;;  %v14166_v25 = vcombine.low %v163_v15, %v163_v15  ;;  %v14168_v26 = vcombine.low %v164_v19, %v164_v19  ;;  %v4139_v15 = vld [vmem:[%s23239_s3 + $0x40] sm:$0xff] }
  0x4c   :  { %14184 = vmatprep.subr.msk.bf16.mxu0 %vm868_vm1, %v14163_v27  ;;  %14191 = vmatprep.subr.msk.bf16.mxu1 %vm868_vm1, %v14165_v28 }
  0x4d   :  { %v894_v27 = vsel %vm868_vm1, %v14166_v25, 0  ;;  %v900_v28 = vsel %vm868_vm1, %v14168_v26, 0 }
  0x4e   :  { %978 = vmatmul.mubr.bf16.gmra.mxu0 %v16435_v31  ;;  %1071 = vmatmul.mubr.bf16.gmra.mxu1 %v16435_v31 }
  0x4f   :  { %1118 = vmatpush2.bf16.msra.mxu0 %v882_v32  ;;  %1211 = vmatpush2.bf16.msra.mxu1 %v888_v33  ;;  %v15956_v32 = vld [vmem:[%s23237_s1 + $0x380] ss:$48 sps:$4 sm:$0xff]   ;;  %v15959_v33 = vld [vmem:[%s23237_s1 + $0x388] ss:$48 sps:$4 sm:$0xff]  }
  0x50   :  { %14176 = vmatprep.mubr.msk.bf16.mxu0 %vm849_vm0, %v16444_v34  ;;  %14183 = vmatprep.mubr.msk.bf16.mxu1 %vm849_vm0, %v16444_v34 }
  0x51   :  { %1119 = vmatprep.subr.bf16.mxu0 %v15894_v36  ;;  %1212 = vmatprep.subr.bf16.mxu1 %v15897_v37  ;;  %v15964_v36 = vld [vmem:[%s23237_s1 + $0x324] ss:$48 sps:$4 sm:$0xff]   ;;  %v15967_v37 = vld [vmem:[%s23237_s1 + $0x32c] ss:$48 sps:$4 sm:$0xff]  }
  0x53   :  { %1120 = vmatpush2.bf16.msra.mxu0 %v15892_v38  ;;  %1213 = vmatpush2.bf16.msra.mxu1 %v15895_v39  ;;  %v15962_v38 = vld [vmem:[%s23237_s1 + $0x320] ss:$48 sps:$4 sm:$0xff]   ;;  %v15965_v39 = vld [vmem:[%s23237_s1 + $0x328] ss:$48 sps:$4 sm:$0xff]  }
  0x54   :  { %1121 = vmatprep.subr.bf16.mxu0 %v15900_v40  ;;  %1214 = vmatprep.subr.bf16.mxu1 %v15903_v41  ;;  %v4171_v41 = vld [vmem:[%s23239_s3 + $0x140] sm:$0xff] }
  0x56   :  { %988 = vmatmul.mubr.bf16.gmra.mxu0 %v16473_v42  ;;  %1081 = vmatmul.mubr.bf16.gmra.mxu1 %v16473_v42 }
  0x57   :  { %1122 = vmatpush2.bf16.msra.mxu0 %v15898_v43  ;;  %1215 = vmatpush2.bf16.msra.mxu1 %v15901_v44  ;;  %v4307_v44 = vld [vmem:[%s23239_s3 + $0x580] sm:$0xff] }
  0x58   :  { %14185 = vmatprep.mubr.msk.bf16.mxu0 %vm849_vm0, %v16232_v35  ;;  %14192 = vmatprep.mubr.msk.bf16.mxu1 %vm849_vm0, %v16232_v35 }
  0x59   :  { %1277 = vmatprep.subr.bf16.mxu0 %v15906_v45  ;;  %1370 = vmatprep.subr.bf16.mxu1 %v15909_v46  ;;  %v4311_v45 = vld [vmem:[%s23239_s3 + $0x5a0] sm:$0xff] }
  0x5e   :  { %1124 = vmatmul.mubr.bf16.vlgmr.msra.gmra.mxu0 %v16275_v51  ;;  %1217 = vmatmul.mubr.bf16.vlgmr.msra.gmra.mxu1 %v16275_v51 }
  0x5f   :  { %1278 = vmatpush1.bf16.msra.mxu0 %v15904_v47  ;;  %1371 = vmatpush1.bf16.msra.mxu1 %v15907_v48  ;;  %v14630_v47 = vcombine.low %v4307_v44, %v4311_v45  ;;  %v14631_v48 = vcombine.high %v4307_v44, %v4311_v45 }
  0x60   :  { %1279 = vmatprep.subr.bf16.mxu0 %v15912_v49  ;;  %1372 = vmatprep.subr.bf16.mxu1 %v15915_v50  ;;  %v4163_v49 = vld [vmem:[%s23239_s3 + $0x100] sm:$0xff] }
  0x61   :  { %14186 = vmatprep.mubr.msk.bf16.mxu0 %vm849_vm0, %v16292_v56  ;;  %14193 = vmatprep.mubr.msk.bf16.mxu1 %vm849_vm0, %v16292_v56  ;;  %v4167_v50 = vld [vmem:[%s23239_s3 + $0x120] sm:$0xff] }
  0x63   :  { %1280 = vmatpush1.bf16.msra.mxu0 %v15910_v52  ;;  %1373 = vmatpush1.bf16.msra.mxu1 %v15913_v53  ;;  %v4299_v52 = vld [vmem:[%s23239_s3 + $0x540] sm:$0xff]  ;;  %v14487_v53 = vcombine.high %v4163_v49, %v4167_v50 }
  0x64   :  { %1281 = vmatprep.subr.bf16.mxu0 %v15918_v54  ;;  %1374 = vmatprep.subr.bf16.mxu1 %v15921_v55  ;;  %v4303_v54 = vld [vmem:[%s23239_s3 + $0x560] sm:$0xff]  ;;  %v14486_v55 = vcombine.low %v4163_v49, %v4167_v50 }
  0x66   :  { %1134 = vmatmul.mubr.bf16.gmra.mxu0 %v16315_v61  ;;  %1227 = vmatmul.mubr.bf16.gmra.mxu1 %v16315_v61 }
  0x67   :  { %1282 = vmatpush1.bf16.msra.mxu0 %v15916_v57  ;;  %1375 = vmatpush1.bf16.msra.mxu1 %v15919_v58  ;;  %v14622_v57 = vcombine.low %v4299_v52, %v4303_v54  ;;  %v14623_v58 = vcombine.high %v4299_v52, %v4303_v54  ;;  %v4243_v54 = vld [vmem:[%s23239_s3 + $0x380] sm:$0xff] }
  0x68   :  { %1283 = vmatprep.subr.bf16.mxu0 %v15924_v59  ;;  %1376 = vmatprep.subr.bf16.mxu1 %v15927_v60  ;;  %v4155_v59 = vld [vmem:[%s23239_s3 + $0xc0] sm:$0xff] }
  0x69   :  { %14187 = vmatprep.mubr.msk.bf16.mxu0 %vm849_vm0, %v16332_v2  ;;  %14194 = vmatprep.mubr.msk.bf16.mxu1 %vm849_vm0, %v16332_v2  ;;  %v4159_v60 = vld [vmem:[%s23239_s3 + $0xe0] sm:$0xff] }
  0x6b   :  { %1284 = vmatpush1.bf16.msra.mxu0 %v15922_v62  ;;  %1377 = vmatpush1.bf16.msra.mxu1 %v15925_v63  ;;  %v4291_v62 = vld [vmem:[%s23239_s3 + $0x500] sm:$0xff]  ;;  %v14479_v63 = vcombine.high %v4155_v59, %v4159_v60 }
  0x6c   :  { %1285 = vmatprep.subr.bf16.mxu0 %v15930_v0  ;;  %1378 = vmatprep.subr.bf16.mxu1 %v15933_v1  ;;  %v4295_v0 = vld [vmem:[%s23239_s3 + $0x520] sm:$0xff]  ;;  %v14478_v1 = vcombine.low %v4155_v59, %v4159_v60 }
  0x6e   :  { %1144 = vmatmul.mubr.bf16.gmra.mxu0 %v16355_v7  ;;  %1237 = vmatmul.mubr.bf16.gmra.mxu1 %v16355_v7 }
  0x6f   :  { %1286 = vmatpush1.bf16.msra.mxu0 %v15928_v3  ;;  %1379 = vmatpush1.bf16.msra.mxu1 %v15931_v4  ;;  %v14614_v3 = vcombine.low %v4291_v62, %v4295_v0  ;;  %v14615_v4 = vcombine.high %v4291_v62, %v4295_v0  ;;  %v4383_v62 = vld [vmem:[%s23239_s3 + $0x7e0] sm:$0xff] }
  0x70   :  { %1287 = vmatprep.subr.bf16.mxu0 %v15936_v5  ;;  %1380 = vmatprep.subr.bf16.mxu1 %v15939_v6  ;;  %v4147_v5 = vld [vmem:[%s23239_s3 + $0x80] sm:$0xff] }
  0x71   :  { %14188 = vmatprep.mubr.msk.bf16.mxu0 %vm849_vm0, %v16372_v12  ;;  %14195 = vmatprep.mubr.msk.bf16.mxu1 %vm849_vm0, %v16372_v12  ;;  %v4151_v6 = vld [vmem:[%s23239_s3 + $0xa0] sm:$0xff] }
  0x73   :  { %1288 = vmatpush1.bf16.msra.mxu0 %v15934_v8  ;;  %1381 = vmatpush1.bf16.msra.mxu1 %v15937_v9  ;;  %v4283_v8 = vld [vmem:[%s23239_s3 + $0x4c0] sm:$0xff]  ;;  %v14471_v9 = vcombine.high %v4147_v5, %v4151_v6 }
  0x74   :  { %1289 = vmatprep.subr.bf16.mxu0 %v15942_v10  ;;  %1382 = vmatprep.subr.bf16.mxu1 %v15945_v11  ;;  %v4287_v10 = vld [vmem:[%s23239_s3 + $0x4e0] sm:$0xff]  ;;  %v14470_v11 = vcombine.low %v4147_v5, %v4151_v6 }
  0x76   :  { %1154 = vmatmul.mubr.bf16.gmra.mxu0 %v16395_v17  ;;  %1247 = vmatmul.mubr.bf16.gmra.mxu1 %v16395_v17 }
  0x77   :  { %1290 = vmatpush1.bf16.msra.mxu0 %v15940_v13  ;;  %1383 = vmatpush1.bf16.msra.mxu1 %v15943_v14  ;;  %v14606_v13 = vcombine.low %v4283_v8, %v4287_v10  ;;  %v14607_v14 = vcombine.high %v4283_v8, %v4287_v10 }
  0x78   :  { %14189 = vmatprep.mubr.msk.bf16.mxu0 %vm849_vm0, %v16406_v20  ;;  %14196 = vmatprep.mubr.msk.bf16.mxu1 %vm849_vm0, %v16406_v20 }
  0x79   :  { %1291 = vmatprep.subr.bf16.mxu0 %v15948_v16  ;;  %1384 = vmatprep.subr.bf16.mxu1 %v15951_v18  ;;  %v4143_v16 = vld [vmem:[%s23239_s3 + $0x60] sm:$0xff] }
  0x7a   :  { %v4275_v18 = vld [vmem:[%s23239_s3 + $0x480] sm:$0xff]  ;;  %v14463_v19 = vcombine.high %v4139_v15, %v4143_v16 }
  0x7b   :  { %1292 = vmatpush1.bf16.msra.mxu0 %v15946_v21  ;;  %1385 = vmatpush1.bf16.msra.mxu1 %v15949_v22  ;;  %v4279_v21 = vld [vmem:[%s23239_s3 + $0x4a0] sm:$0xff]  ;;  %v14462_v22 = vcombine.low %v4139_v15, %v4143_v16 }
  0x7c   :  { %14198 = vmatprep.subr.msk.bf16.mxu0 %vm868_vm1, %v14167_v23  ;;  %14205 = vmatprep.subr.msk.bf16.mxu1 %vm868_vm1, %v14169_v24  ;;  %v14598_v23 = vcombine.low %v4275_v18, %v4279_v21  ;;  %v14599_v24 = vcombine.high %v4275_v18, %v4279_v21  ;;  %v4235_v18 = vld [vmem:[%s23239_s3 + $0x340] sm:$0xff] }
  0x7d   :  { %v4371_v21 = vld [vmem:[%s23239_s3 + $0x780] sm:$0xff] }
  0x7e   :  { %1164 = vmatmul.mubr.bf16.gmra.mxu0 %v16435_v31  ;;  %1257 = vmatmul.mubr.bf16.gmra.mxu1 %v16435_v31 }
  0x7f   :  { %1304 = vmatpush2.bf16.msra.mxu0 %v894_v27  ;;  %1397 = vmatpush2.bf16.msra.mxu1 %v900_v28 }
  0x80   :  { %14190 = vmatprep.mubr.msk.bf16.mxu0 %vm849_vm0, %v16444_v34  ;;  %14197 = vmatprep.mubr.msk.bf16.mxu1 %vm849_vm0, %v16444_v34 }
  0x81   :  { %1305 = vmatprep.subr.bf16.mxu0 %v15958_v29  ;;  %1398 = vmatprep.subr.bf16.mxu1 %v15961_v30 }
  0x83   :  { %1306 = vmatpush2.bf16.msra.mxu0 %v15956_v32  ;;  %1399 = vmatpush2.bf16.msra.mxu1 %v15959_v33 }
  0x84   :  { %1307 = vmatprep.subr.bf16.mxu0 %v15964_v36  ;;  %1400 = vmatprep.subr.bf16.mxu1 %v15967_v37  ;;  %v4131_v37 = vld [vmem:[%s23239_s3] sm:$0xff] }
  0x86   :  { %1174 = vmatmul.mubr.bf16.gmra.mxu0 %v16473_v42  ;;  %1267 = vmatmul.mubr.bf16.gmra.mxu1 %v16473_v42 }
  0x87   :  { %1308 = vmatpush2.bf16.msra.mxu0 %v15962_v38  ;;  %1401 = vmatpush2.bf16.msra.mxu1 %v15965_v39  ;;  %v4135_v38 = vld [vmem:[%s23239_s3 + $0x20] sm:$0xff] }
  0x88   :  { %14199 = vmatprep.mubr.msk.bf16.mxu0 %vm849_vm0, %v16232_v35  ;;  %14206 = vmatprep.mubr.msk.bf16.mxu1 %vm849_vm0, %v16232_v35  ;;  %v4187_v35 = vld [vmem:[%s23239_s3 + $0x1c0] sm:$0xff] }
  0x89   :  { %v4267_v39 = vld [vmem:[%s23239_s3 + $0x440] sm:$0xff] }
  0x8e   :  { %1310 = vmatmul.mubr.bf16.vlgmr.msra.gmra.mxu0 %v16275_v51  ;;  %1403 = vmatmul.mubr.bf16.vlgmr.msra.gmra.mxu1 %v16275_v51  ;;  %v4191_v51 = vld [vmem:[%s23239_s3 + $0x1e0] sm:$0xff] }
  0x8f   :  { %14200 = vmatprep.mubr.msk.bf16.mxu0 %vm849_vm0, %v16292_v56  ;;  %14207 = vmatprep.mubr.msk.bf16.mxu1 %vm849_vm0, %v16292_v56  ;;  %v14511_v56 = vcombine.high %v4187_v35, %v4191_v51 }
  0x91   :  { %11403 = vmatprep.subr.bf16.mxu0 %v14511_v56 }
  0x96   :  { %1320 = vmatmul.mubr.bf16.gmra.mxu0 %v16315_v61  ;;  %1413 = vmatmul.mubr.bf16.gmra.mxu1 %v16315_v61  ;;  %v14510_v61 = vcombine.low %v4187_v35, %v4191_v51  ;;  %v14455_v35 = vcombine.high %v4131_v37, %v4135_v38  ;;  %v4271_v51 = vld [vmem:[%s23239_s3 + $0x460] sm:$0xff] }
  0x97   :  { %14201 = vmatprep.mubr.msk.bf16.mxu0 %vm849_vm0, %v16332_v2  ;;  %14208 = vmatprep.mubr.msk.bf16.mxu1 %vm849_vm0, %v16332_v2  ;;  %v4179_v2 = vld [vmem:[%s23239_s3 + $0x180] sm:$0xff] }
  0x98   :  { %11404 = vmatpush1.bf16.msra.mxu0 %v14510_v61 }
  0x9e   :  { %1330 = vmatmul.mubr.bf16.gmra.mxu0 %v16355_v7  ;;  %1423 = vmatmul.mubr.bf16.gmra.mxu1 %v16355_v7  ;;  %v4183_v7 = vld [vmem:[%s23239_s3 + $0x1a0] sm:$0xff] }
  0x9f   :  { %14202 = vmatprep.mubr.msk.bf16.mxu0 %vm849_vm0, %v16372_v12  ;;  %14209 = vmatprep.mubr.msk.bf16.mxu1 %vm849_vm0, %v16372_v12  ;;  %v4315_v12 = vld [vmem:[%s23239_s3 + $0x5c0] sm:$0xff] }
  0xa6   :  { %1340 = vmatmul.mubr.bf16.gmra.mxu0 %v16395_v17  ;;  %1433 = vmatmul.mubr.bf16.gmra.mxu1 %v16395_v17  ;;  %v14503_v17 = vcombine.high %v4179_v2, %v4183_v7 }
  0xa7   :  { %14203 = vmatprep.mubr.msk.bf16.mxu0 %vm849_vm0, %v16406_v20  ;;  %14210 = vmatprep.mubr.msk.bf16.mxu1 %vm849_vm0, %v16406_v20  ;;  %v4319_v20 = vld [vmem:[%s23239_s3 + $0x5e0] sm:$0xff] }
  0xa8   :  { %v14639_v40 = vcombine.high %v4315_v12, %v4319_v20  ;;  %11405 = vmatprep.subr.bf16.mxu0 %v14503_v17 }
  0xaa   :  { %11456 = vmatprep.subr.bf16.mxu1 %v14639_v40  ;;  %v4259_v40 = vld [vmem:[%s23239_s3 + $0x400] sm:$0xff] }
  0xae   :  { %1350 = vmatmul.mubr.bf16.gmra.mxu0 %v16435_v31  ;;  %1443 = vmatmul.mubr.bf16.gmra.mxu1 %v16435_v31  ;;  %v14502_v31 = vcombine.low %v4179_v2, %v4183_v7  ;;  %v14454_v2 = vcombine.low %v4131_v37, %v4135_v38  ;;  %v14590_v7 = vcombine.low %v4267_v39, %v4271_v51  ;;  %v4375_v37 = vld [vmem:[%s23239_s3 + $0x7a0] sm:$0xff] }
  0xaf   :  { %14204 = vmatprep.mubr.msk.bf16.mxu0 %vm849_vm0, %v16444_v34  ;;  %14211 = vmatprep.mubr.msk.bf16.mxu1 %vm849_vm0, %v16444_v34  ;;  %v14638_v34 = vcombine.low %v4315_v12, %v4319_v20  ;;  %v14591_v12 = vcombine.high %v4267_v39, %v4271_v51  ;;  %v14694_v39 = vcombine.low %v4371_v21, %v4375_v37 }
  0xb0   :  { %11406 = vmatpush1.bf16.msra.mxu0 %v14502_v31  ;;  %v4251_v31 = vld [vmem:[%s23239_s3 + $0x3c0] sm:$0xff] }
  0xb1   :  { %11457 = vmatpush1.bf16.msra.mxu1 %v14638_v34  ;;  %v4255_v34 = vld [vmem:[%s23239_s3 + $0x3e0] sm:$0xff] }
  0xb2   :  { %11458 = vmatprep.subr.bf16.mxu1 %v14631_v48 }
  0xb5   :  { %11459 = vmatpush1.bf16.msra.mxu1 %v14630_v47 }
  0xb6   :  { %1360 = vmatmul.mubr.bf16.gmra.mxu0 %v16473_v42  ;;  %1453 = vmatmul.mubr.bf16.gmra.mxu1 %v16473_v42  ;;  %v4175_v42 = vld [vmem:[%s23239_s3 + $0x160] sm:$0xff] }
  0xb7   :  { %v14495_v43 = vcombine.high %v4171_v41, %v4175_v42  ;;  %v14494_v46 = vcombine.low %v4171_v41, %v4175_v42  ;;  %11460 = vmatprep.subr.bf16.mxu1 %v14623_v58  ;;  %v14575_v42 = vcombine.high %v4251_v31, %v4255_v34 }
  0xb9   :  { %11407 = vmatprep.subr.bf16.mxu0 %v14495_v43  ;;  %11461 = vmatpush1.bf16.msra.mxu1 %v14622_v57  ;;  %v4263_v43 = vld [vmem:[%s23239_s3 + $0x420] sm:$0xff] }
  0xba   :  { %11408 = vmatpush1.bf16.msra.mxu0 %v14494_v46  ;;  %11462 = vmatprep.subr.bf16.mxu1 %v14615_v4  ;;  %v14574_v46 = vcombine.low %v4251_v31, %v4255_v34  ;;  %v14582_v47 = vcombine.low %v4259_v40, %v4263_v43  ;;  %v14583_v48 = vcombine.high %v4259_v40, %v4263_v43  ;;  %v4379_v57 = vld [vmem:[%s23239_s3 + $0x7c0] sm:$0xff] }
  0xbb   :  { %11409 = vmatprep.subr.bf16.mxu0 %v14487_v53  ;;  %v4363_v31 = vld [vmem:[%s23239_s3 + $0x740] sm:$0xff] }
  0xbc   :  { %v4367_v43 = vld [vmem:[%s23239_s3 + $0x760] sm:$0xff] }
  0xbd   :  { %11463 = vmatpush1.bf16.msra.mxu1 %v14614_v3  ;;  %v14703_v3 = vcombine.high %v4379_v57, %v4383_v62 }
  0xbe   :  { %11410 = vmatpush1.bf16.msra.mxu0 %v14486_v55  ;;  %11464 = vmatprep.subr.bf16.mxu1 %v14607_v14  ;;  %v4247_v55 = vld [vmem:[%s23239_s3 + $0x3a0] sm:$0xff] }
  0xbf   :  { %11411 = vmatprep.subr.bf16.mxu0 %v14479_v63  ;;  %v14567_v60 = vcombine.high %v4243_v54, %v4247_v55  ;;  %v14566_v0 = vcombine.low %v4243_v54, %v4247_v55  ;;  %v14687_v54 = vcombine.high %v4363_v31, %v4367_v43  ;;  %v4195_v63 = vld [vmem:[%s23239_s3 + $0x200] sm:$0xff] }
  0xc1   :  { %11465 = vmatpush1.bf16.msra.mxu1 %v14606_v13 }
  0xc2   :  { %11412 = vmatpush1.bf16.msra.mxu0 %v14478_v1  ;;  %11466 = vmatprep.subr.bf16.mxu1 %v14599_v24  ;;  %v14702_v1 = vcombine.low %v4379_v57, %v4383_v62  ;;  %v4223_v62 = vld [vmem:[%s23239_s3 + $0x2e0] sm:$0xff] }
  0xc3   :  { %11413 = vmatprep.subr.bf16.mxu0 %v14471_v9 }
  0xc5   :  { %11467 = vmatpush1.bf16.msra.mxu1 %v14598_v23 }
  0xc6   :  { %11414 = vmatpush1.bf16.msra.mxu0 %v14470_v11  ;;  %11468 = vmatprep.subr.bf16.mxu1 %v14591_v12  ;;  %v4231_v12 = vld [vmem:[%s23239_s3 + $0x320] sm:$0xff] }
  0xc7   :  { %11415 = vmatprep.subr.bf16.mxu0 %v14463_v19  ;;  %v4239_v19 = vld [vmem:[%s23239_s3 + $0x360] sm:$0xff] }
  0xc8   :  { %v14559_v24 = vcombine.high %v4235_v18, %v4239_v19  ;;  %v14558_v38 = vcombine.low %v4235_v18, %v4239_v19  ;;  %v4359_v19 = vld [vmem:[%s23239_s3 + $0x720] sm:$0xff] }
  0xc9   :  { %11469 = vmatpush1.bf16.msra.mxu1 %v14590_v7  ;;  %v4227_v7 = vld [vmem:[%s23239_s3 + $0x300] sm:$0xff] }
  0xca   :  { %11416 = vmatpush1.bf16.msra.mxu0 %v14462_v22  ;;  %11470 = vmatprep.subr.bf16.mxu1 %v14583_v48  ;;  %v14686_v48 = vcombine.low %v4363_v31, %v4367_v43  ;;  %v4211_v31 = vld [vmem:[%s23239_s3 + $0x280] sm:$0xff] }
  0xcb   :  { %11417 = vmatprep.subr.bf16.mxu0 %v14455_v35  ;;  %v14695_v35 = vcombine.high %v4371_v21, %v4375_v37  ;;  %v4347_v43 = vld [vmem:[%s23239_s3 + $0x6c0] sm:$0xff] }
  0xcd   :  { %11471 = vmatpush1.bf16.msra.mxu1 %v14582_v47  ;;  %v14550_v47 = vcombine.low %v4227_v7, %v4231_v12 }
  0xce   :  { %11418 = vmatpush1.bf16.msra.mxu0 %v14454_v2  ;;  %11472 = vmatprep.subr.bf16.mxu1 %v14703_v3 }
  0xcf   :  { %11419 = vmatprep.subr.bf16.mxu0 %v14575_v42  ;;  %v14551_v42 = vcombine.high %v4227_v7, %v4231_v12 }
  0xd1   :  { %11473 = vmatpush2.bf16.msra.mxu1 %v14702_v1 }
  0xd2   :  { %11420 = vmatpush2.bf16.msra.mxu0 %v14574_v46  ;;  %11474 = vmatprep.subr.bf16.mxu1 %v14695_v35 }
  0xd3   :  { %11421 = vmatprep.subr.bf16.mxu0 %v14567_v60  ;;  %v4219_v60 = vld [vmem:[%s23239_s3 + $0x2c0] sm:$0xff] }
  0xd4   :  { %v14543_v18 = vcombine.high %v4219_v60, %v4223_v62  ;;  %v14542_v21 = vcombine.low %v4219_v60, %v4223_v62  ;;  %v4351_v60 = vld [vmem:[%s23239_s3 + $0x6e0] sm:$0xff] }
  0xd5   :  { %11475 = vmatpush2.bf16.msra.mxu1 %v14694_v39 }
  0xd6   :  { %11422 = vmatpush2.bf16.msra.mxu0 %v14566_v0  ;;  %11476 = vmatprep.subr.bf16.mxu1 %v14687_v54  ;;  %v4355_v0 = vld [vmem:[%s23239_s3 + $0x700] sm:$0xff] }
  0xd7   :  { %11423 = vmatprep.subr.bf16.mxu0 %v14559_v24  ;;  %v14678_v24 = vcombine.low %v4355_v0, %v4359_v19  ;;  %v14679_v37 = vcombine.high %v4355_v0, %v4359_v19  ;;  %v14670_v0 = vcombine.low %v4347_v43, %v4351_v60 }
  0xd9   :  { %11477 = vmatpush2.bf16.msra.mxu1 %v14686_v48 }
  0xda   :  { %11424 = vmatpush2.bf16.msra.mxu0 %v14558_v38  ;;  %11478 = vmatprep.subr.bf16.mxu1 %v14679_v37  ;;  %v4207_v37 = vld [vmem:[%s23239_s3 + $0x260] sm:$0xff] }
  0xdb   :  { %11425 = vmatprep.subr.bf16.mxu0 %v14551_v42  ;;  %v4215_v42 = vld [vmem:[%s23239_s3 + $0x2a0] sm:$0xff] }
  0xdc   :  { %v14535_v54 = vcombine.high %v4211_v31, %v4215_v42  ;;  %v14534_v62 = vcombine.low %v4211_v31, %v4215_v42  ;;  %v4339_v31 = vld [vmem:[%s23239_s3 + $0x680] sm:$0xff] }
  0xdd   :  { %11479 = vmatpush2.bf16.msra.mxu1 %v14678_v24  ;;  %v4203_v24 = vld [vmem:[%s23239_s3 + $0x240] sm:$0xff] }
  0xde   :  { %11426 = vmatpush2.bf16.msra.mxu0 %v14550_v47 }
  0xdf   :  { %11427 = vmatprep.subr.bf16.mxu0 %v14543_v18  ;;  %v14671_v18 = vcombine.high %v4347_v43, %v4351_v60  ;;  %v4343_v60 = vld [vmem:[%s23239_s3 + $0x6a0] sm:$0xff] }
  0xe0   :  { %v14663_v12 = vcombine.high %v4339_v31, %v4343_v60 }
  0xe1   :  { %11480 = vmatprep.subr.bf16.mxu1 %v14671_v18  ;;  %v14662_v18 = vcombine.low %v4339_v31, %v4343_v60 }
  0xe2   :  { %11428 = vmatpush2.bf16.msra.mxu0 %v14542_v21  ;;  %11481 = vmatpush2.bf16.msra.mxu1 %v14670_v0  ;;  %v4199_v0 = vld [vmem:[%s23239_s3 + $0x220] sm:$0xff] }
  0xe3   :  { %11429 = vmatprep.subr.bf16.mxu0 %v14535_v54  ;;  %v14527_v54 = vcombine.high %v4203_v24, %v4207_v37  ;;  %11482 = vmatprep.subr.bf16.mxu1 %v14663_v12  ;;  %v4335_v12 = vld [vmem:[%s23239_s3 + $0x660] sm:$0xff]  ;;  %v14518_v60 = vcombine.low %v4195_v63, %v4199_v0 }
  0xe6   :  { %11430 = vmatpush2.bf16.msra.mxu0 %v14534_v62  ;;  %v14526_v62 = vcombine.low %v4203_v24, %v4207_v37  ;;  %v4331_v24 = vld [vmem:[%s23239_s3 + $0x640] sm:$0xff]  ;;  %11483 = vmatpush2.bf16.msra.mxu1 %v14662_v18 }
  0xe7   :  { %11431 = vmatprep.subr.bf16.mxu0 %v14527_v54  ;;  %v14519_v54 = vcombine.high %v4195_v63, %v4199_v0  ;;  %v14655_v41 = vcombine.high %v4331_v24, %v4335_v12  ;;  %v4323_v0 = vld [vmem:[%s23239_s3 + $0x600] sm:$0xff] }
  0xe9   :  { %11484 = vmatprep.subr.bf16.mxu1 %v14655_v41  ;;  %v4327_v41 = vld [vmem:[%s23239_s3 + $0x620] sm:$0xff] }
  0xea   :  { %11432 = vmatpush2.bf16.msra.mxu0 %v14526_v62  ;;  %v14654_v62 = vcombine.low %v4331_v24, %v4335_v12  ;;  %v17016_v24 = vld [vmem:[%s23239_s3 + $0x9c0] sm:$0xff] }
  0xeb   :  { %11433 = vmatprep.subr.bf16.mxu0 %v14519_v54  ;;  %23450 = vst [vmem:[#allocation35_spill] sm:$0xff] %v17016_v24 }
  0xec   :  { %11485 = vmatpush2.bf16.msra.mxu1 %v14654_v62  ;;  %v17025_v62 = vld [vmem:[%s23239_s3 + $0x9e0] sm:$0xff] }
  0xed   :  { %23452 = vst [vmem:[#allocation37_spill] sm:$0xff] %v17025_v62 }
  0xee   :  { %v16763_v25 = vpop.f32.mrf.mxu0  ;;  %v16765_v26 = vpop.f32.mrf.mxu1  ;;  %11434 = vmatpush2.bf16.msra.mxu0 %v14518_v60  ;;  %v14647_v60 = vcombine.high %v4323_v0, %v4327_v41 }
  0xef   :  { %23418 = vst [vmem:[#allocation3_spill] sm:$0xff] %v16763_v25 }
  0xf0   :  { %v16767_v27 = vpop.f32.mrf.mxu0  ;;  %v16769_v28 = vpop.f32.mrf.mxu1  ;;  %11486 = vmatprep.subr.bf16.mxu1 %v14647_v60  ;;  %v17050_v60 = vld [vmem:[%s23239_s3 + $0xdc0] sm:$0xff] }
  0xf1   :  { %23419 = vst [vmem:[#allocation4_spill] sm:$0xff] %v16769_v28  ;;  %23458 = vst [vmem:[#allocation43_spill] sm:$0xff] %v17050_v60 }
  0xf2   :  { %v16773_v30 = vpop.f32.mrf.mxu0  ;;  %v16775_v32 = vpop.f32.mrf.mxu1 }
  0xf4   :  { %v16777_v33 = vpop.f32.mrf.mxu0  ;;  %v16779_v36 = vpop.f32.mrf.mxu1 }
  0xf6   :  { %v16793_v56 = vpop.f32.mrf.mxu0  ;;  %v16795_v61 = vpop.f32.mrf.mxu1 }
  0xf7   :  { %23420 = vst [vmem:[#allocation5_spill] sm:$0xff] %v16793_v56 }
  0xf8   :  { %v16797_v17 = vpop.f32.mrf.mxu0  ;;  %v16799_v20 = vpop.f32.mrf.mxu1 }
  0xf9   :  { %23421 = vst [vmem:[#allocation6_spill] sm:$0xff] %v16799_v20 }
  0xfa   :  { %v16815_v44 = vpop.f32.mrf.mxu0  ;;  %v16817_v45 = vpop.f32.mrf.mxu1 }
  0xfc   :  { %v16819_v49 = vpop.f32.mrf.mxu0  ;;  %v16821_v50 = vpop.f32.mrf.mxu1 }
  0xfe   :  { %v16823_v52 = vpop.f32.mrf.mxu0  ;;  %v16825_v53 = vpop.f32.mrf.mxu1 }
  0xff   :  { %23422 = vst [vmem:[#allocation7_spill] sm:$0xff] %v16823_v52  ;;  %23423 = vst [vmem:[#allocation8_spill] sm:$0xff] %v16825_v53  ;;  %v14767_v52 = vcombine.high %v17016_v24, %v17025_v62  ;;  %v1573_v53 = vlaneseq }
 0x100   :  { %v16836_v58 = vpop.f32.mrf.mxu0  ;;  %v16838_v59 = vpop.f32.mrf.mxu1 }
 0x101   :  { %23424 = vst [vmem:[#allocation9_spill] sm:$0xff] %v16836_v58  ;;  %23425 = vst [vmem:[#allocation10_spill] sm:$0xff] %v16838_v59  ;;  %11509 = vmatprep.subr.bf16.mxu0 %v14767_v52  ;;  %v17055_v52 = vld [vmem:[%s23239_s3 + $0xde0] sm:$0xff] }
 0x102   :  { %v16845_v4 = vpop.f32.mrf.mxu0  ;;  %v16847_v5 = vpop.f32.mrf.mxu1  ;;  %23459 = vst [vmem:[#allocation44_spill] sm:$0xff] %v17055_v52  ;;  %v14895_v62 = vcombine.high %v17050_v60, %v17055_v52 }
 0x104   :  { %v16849_v6 = vpop.f32.mrf.mxu0  ;;  %v16851_v8 = vpop.f32.mrf.mxu1 }
 0x106   :  { %v16853_v9 = vpop.f32.mrf.mxu0  ;;  %v16855_v10 = vpop.f32.mrf.mxu1 }
 0x107   :  { %23426 = vst [vmem:[#allocation11_spill] sm:$0xff] %v16853_v9  ;;  %v14646_v9 = vcombine.low %v4323_v0, %v4327_v41  ;;  %v17079_v0 = vshrl.u32 %v1573_v53, 7 }
 0x108   :  { %v16857_v11 = vpop.f32.mrf.mxu0  ;;  %v16859_v13 = vpop.f32.mrf.mxu1 }
 0x109   :  { %23427 = vst [vmem:[#allocation12_spill] sm:$0xff] %v16857_v11  ;;  %23428 = vst [vmem:[#allocation13_spill] sm:$0xff] %v16859_v13  ;;  %11487 = vmatpush2.bf16.msra.mxu1 %v14646_v9 }
 0x10a   :  { %v16863_v15 = vpop.f32.mrf.mxu0  ;;  %v16865_v16 = vpop.f32.mrf.mxu1  ;;  %11562 = vmatprep.subr.bf16.mxu1 %v14895_v62  ;;  %23465 = vst [vmem:[#allocation50_spill] sm:$0xff] %v17079_v0 }
 0x10b   :  { %23429 = vst [vmem:[#allocation14_spill] sm:$0xff] %v16865_v16 }
 0x10c   :  { %v16876_v22 = vpop.f32.mrf.mxu0  ;;  %v16878_v23 = vpop.f32.mrf.mxu1 }
 0x10d   :  { %23430 = vst [vmem:[#allocation15_spill] sm:$0xff] %v16878_v23  ;;  %v17243_v23 = vld [vmem:[%s23239_s3 + $0xd00] sm:$0xff] }
 0x10e   :  { %v16883_v51 = vpop.f32.mrf.mxu0  ;;  %v16885_v2 = vpop.f32.mrf.mxu1  ;;  %23496 = vst [vmem:[#allocation79_spill] sm:$0xff] %v17243_v23  ;;  %v17382_v23 = vld [vmem:[%s23239_s3 + $0xbc0] sm:$0xff] }
 0x10f   :  { %23431 = vst [vmem:[#allocation16_spill] sm:$0xff] %v16883_v51  ;;  %23432 = vst [vmem:[#allocation17_spill] sm:$0xff] %v16885_v2  ;;  %v17238_v2 = vld [vmem:[%s23239_s3 + $0x8e0] sm:$0xff] }
 0x110   :  { %v16896_v34 = vpop.f32.mrf.mxu0  ;;  %v16898_v40 = vpop.f32.mrf.mxu1  ;;  %23495 = vst [vmem:[#allocation78_spill] sm:$0xff] %v17238_v2  ;;  %23510 = vst [vmem:[#allocation92_spill] sm:$0xff] %v17382_v23 }
 0x111   :  { %23433 = vst [vmem:[#allocation18_spill] sm:$0xff] %v16896_v34  ;;  %23434 = vst [vmem:[#allocation19_spill] sm:$0xff] %v16898_v40 }
 0x112   :  { %v16905_v55 = vpop.f32.mrf.mxu0  ;;  %v16907_v57 = vpop.f32.mrf.mxu1 }
 0x113   :  { %23435 = vst [vmem:[#allocation20_spill] sm:$0xff] %v16905_v55  ;;  %23436 = vst [vmem:[#allocation21_spill] sm:$0xff] %v16907_v57  ;;  %v17248_v55 = vld [vmem:[%s23239_s3 + $0xd20] sm:$0xff] }
 0x114   :  { %v16918_v1 = vpop.f32.mrf.mxu0  ;;  %v16920_v3 = vpop.f32.mrf.mxu1  ;;  %23497 = vst [vmem:[#allocation80_spill] sm:$0xff] %v17248_v55  ;;  %v17387_v57 = vld [vmem:[%s23239_s3 + $0xbe0] sm:$0xff] }
 0x115   :  { %23437 = vst [vmem:[#allocation22_spill] sm:$0xff] %v16920_v3  ;;  %v17193_v3 = vld [vmem:[%s23239_s3 + $0x900] sm:$0xff]  ;;  %23511 = vst [vmem:[#allocation93_spill] sm:$0xff] %v17387_v57 }
 0x116   :  { %v16925_v38 = vpop.f32.mrf.mxu0  ;;  %v16927_v39 = vpop.f32.mrf.mxu1  ;;  %23488 = vst [vmem:[#allocation71_spill] sm:$0xff] %v17193_v3  ;;  %v17315_v3 = vld [vmem:[%s23239_s3 + $0xc80] sm:$0xff] }
 0x117   :  { %23438 = vst [vmem:[#allocation23_spill] sm:$0xff] %v16925_v38  ;;  %23439 = vst [vmem:[#allocation24_spill] sm:$0xff] %v16927_v39  ;;  %v17265_v39 = vld [vmem:[%s23239_s3 + $0x880] sm:$0xff] }
 0x118   :  { %v16929_v35 = vpop.f32.mrf.mxu0  ;;  %v16931_v7 = vpop.f32.mrf.mxu1  ;;  %23499 = vst [vmem:[#allocation82_spill] sm:$0xff] %v17265_v39  ;;  %23503 = vst [vmem:[#allocation86_spill] sm:$0xff] %v17315_v3  ;;  %v17428_v3 = vld [vmem:[%s23239_s3 + $0xfc0] sm:$0xff] }
 0x119   :  { %23440 = vst [vmem:[#allocation25_spill] sm:$0xff] %v16929_v35  ;;  %23441 = vst [vmem:[#allocation26_spill] sm:$0xff] %v16931_v7 }
 0x11a   :  { %v16944_v47 = vpop.f32.mrf.mxu0  ;;  %v16946_v48 = vpop.f32.mrf.mxu1 }
 0x11b   :  { %23442 = vst [vmem:[#allocation27_spill] sm:$0xff] %v16944_v47  ;;  %23443 = vst [vmem:[#allocation28_spill] sm:$0xff] %v16946_v48 }
 0x11c   :  { %v16951_v19 = vpop.f32.mrf.mxu0  ;;  %v16953_v21 = vpop.f32.mrf.mxu1 }
 0x11d   :  { %23444 = vst [vmem:[#allocation29_spill] sm:$0xff] %v16953_v21  ;;  %v17220_v21 = vld [vmem:[%s23239_s3 + $0xd60] sm:$0xff] }
 0x11e   :  { %v16964_v42 = vpop.f32.mrf.mxu0  ;;  %v16966_v43 = vpop.f32.mrf.mxu1  ;;  %23493 = vst [vmem:[#allocation76_spill] sm:$0xff] %v17220_v21 }
 0x120   :  { %v16971_v46 = vpop.f32.mrf.mxu0  ;;  %v16973_v14 = vpop.f32.mrf.mxu1 }
 0x122   :  { %v16984_v37 = vpop.f32.mrf.mxu0  ;;  %v16986_v31 = vpop.f32.mrf.mxu1 }
 0x123   :  { %23445 = vst [vmem:[#allocation30_spill] sm:$0xff] %v16986_v31 }
 0x124   :  { %v16991_v29 = vpop.f32.mrf.mxu0  ;;  %v16993_v7 = vpop.f32.mrf.mxu1 }
 0x125   :  { %23446 = vst [vmem:[#allocation31_spill] sm:$0xff] %v16993_v7  ;;  %v1583_v7 = vsub.s32 2, %v17079_v0 }
 0x126   :  { %v16995_v38 = vpop.f32.mrf.mxu0  ;;  %v16997_v40 = vpop.f32.mrf.mxu1 }
 0x127   :  { %23447 = vst [vmem:[#allocation32_spill] sm:$0xff] %v16997_v40 }
 0x128   :  { %v16999_v18 = vpop.f32.mrf.mxu0  ;;  %v17001_v51 = vpop.f32.mrf.mxu1 }
 0x129   :  { %23448 = vst [vmem:[#allocation33_spill] sm:$0xff] %v17001_v51 }
 0x12a   :  { %v17003_v13 = vpop.f32.mrf.mxu0  ;;  %v17005_v63 = vpop.f32.mrf.mxu1 }
 0x12b   :  { %23449 = vst [vmem:[#allocation34_spill] sm:$0xff] %v17005_v63 }
 0x12c   :  { %v17018_v54 = vpop.f32.mrf.mxu0  ;;  %v17020_v12 = vpop.f32.mrf.mxu1  ;;  %v23520_v23 = vld [vmem:[#allocation31_spill] sm:$0xff] }
 0x12d   :  { %23451 = vst [vmem:[#allocation36_spill] sm:$0xff] %v17020_v12 }
 0x12e   :  { %v17031_v63 = vpop.f32.mrf.mxu0  ;;  %v17033_v20 = vpop.f32.mrf.mxu1 }
 0x12f   :  { %23453 = vst [vmem:[#allocation38_spill] sm:$0xff] %v17031_v63  ;;  %23454 = vst [vmem:[#allocation39_spill] sm:$0xff] %v17033_v20 }
 0x130   :  { %v17037_v56 = vpop.f32.mrf.mxu0  ;;  %v17039_v40 = vpop.f32.mrf.mxu1 }
 0x131   :  { %23455 = vst [vmem:[#allocation40_spill] sm:$0xff] %v17037_v56  ;;  %23456 = vst [vmem:[#allocation41_spill] sm:$0xff] %v17039_v40  ;;  %v16085_v40 = vmov 1935823168   ;;  %v16086_v56 = vmov 1983009808  }
 0x132   :  { %v17043_v41 = vpop.f32.mrf.mxu0  ;;  %v17045_v59 = vpop.f32.mrf.mxu1  ;;  %v2100_v51 = vunpack.c.l.s4 %v16085_v40 }
 0x133   :  { %23457 = vst [vmem:[#allocation42_spill] sm:$0xff] %v17045_v59 }
 0x134   :  { %v17057_v9 = vpop.f32.mrf.mxu0  ;;  %v17059_v12 = vpop.f32.mrf.mxu1  ;;  %v2101_v28 = vunpack.c.0.s8 %v2100_v51  ;;  %v17225_v51 = vld [vmem:[%s23239_s3 + $0x8c0] sm:$0xff] }
 0x135   :  { %23460 = vst [vmem:[#allocation45_spill] sm:$0xff] %v17059_v12  ;;  %23494 = vst [vmem:[#allocation77_spill] sm:$0xff] %v17225_v51 }
 0x136   :  { %v17065_v24 = vpop.f32.mrf.mxu0  ;;  %v17067_v59 = vpop.f32.mrf.mxu1 }
 0x137   :  { %23461 = vst [vmem:[#allocation46_spill] sm:$0xff] %v17065_v24  ;;  %23462 = vst [vmem:[#allocation47_spill] sm:$0xff] %v17067_v59  ;;  %v16084_v59 = vmov 1966171168   ;;  %v3533_v24 = vunpack.c.l.s4 %v16086_v56  ;;  %v1571_v56 = vld [vmem:[%s23240_s2] sm:$0x7] }
 0x138   :  { %v17071_v20 = vpop.f32.mrf.mxu0  ;;  %v17073_v63 = vpop.f32.mrf.mxu1  ;;  %v1700_v62 = vunpack.c.l.s4 %v16084_v59  ;;  %v17115_v48 = vrot.slane %v1571_v56, %v1583_v7 }
 0x139   :  { %23463 = vst [vmem:[#allocation48_spill] sm:$0xff] %v17073_v63 }
 0x13a   :  { %v17075_v12 = vpop.f32.mrf.mxu0  ;;  %v17077_v58 = vpop.f32.mrf.mxu1  ;;  %v1701_v40 = vunpack.c.0.s8 %v1700_v62 }
 0x13b   :  { %23464 = vst [vmem:[#allocation49_spill] sm:$0xff] %v17077_v58  ;;  %v23473_v58 = vsub.s32 1, %v17079_v0 }
 0x13c   :  { %v17081_v52 = vpop.f32.mrf.mxu0  ;;  %v17083_v60 = vpop.f32.mrf.mxu1  ;;  %v17124_v63 = vsub.s32 %v1701_v40, %v17079_v0  ;;  %v17170_v40 = vld [vmem:[%s23239_s3 + $0x960] sm:$0xff] }
 0x13d   :  { %23466 = vst [vmem:[#allocation51_spill] sm:$0xff] %v17081_v52  ;;  %23467 = vst [vmem:[#allocation52_spill] sm:$0xff] %v17083_v60  ;;  %v17109_v34 = vrot.slane %v1571_v56, %v23473_v58  ;;  %v23509_v52 = vmax.f32 %v16767_v27, %v16964_v42  ;;  %v17392_v27 = vld [vmem:[%s23239_s3 + $0xc00] sm:$0xff]  ;;  %v23513_v42 = vld [vmem:[#allocation28_spill] sm:$0xff] }
 0x13e   :  { %v17085_v11 = vpop.f32.mrf.mxu0  ;;  %v17087_v31 = vpop.f32.mrf.mxu1  ;;  %23477 = vst [vmem:[#allocation60_spill] sm:$0xff] %v17124_v63  ;;  %23485 = vst [vmem:[#allocation68_spill] sm:$0xff] %v17170_v40  ;;  %v17288_v40 = vld [vmem:[%s23239_s3 + $0xce0] sm:$0xff] }
 0x13f   :  { %23468 = vst [vmem:[#allocation53_spill] sm:$0xff] %v17085_v11  ;;  %23469 = vst [vmem:[#allocation54_spill] sm:$0xff] %v17087_v31  ;;  %v3534_v31 = vunpack.c.0.s8 %v3533_v24 }
 0x140   :  { %v17094_v60 = vpop.f32.mrf.mxu0  ;;  %v17096_v59 = vpop.f32.mrf.mxu1  ;;  %23501 = vst [vmem:[#allocation84_spill] sm:$0xff] %v17288_v40  ;;  %23512 = vst [vmem:[#allocation94_spill] sm:$0xff] %v17392_v27  ;;  %v17410_v40 = vld [vmem:[%s23239_s3 + $0xb80] sm:$0xff] }
 0x141   :  { %23470 = vst [vmem:[#allocation55_spill] sm:$0xff] %v17094_v60  ;;  %23471 = vst [vmem:[#allocation56_spill] sm:$0xff] %v17096_v59  ;;  %v23474_v59 = vsub.s32 0, %v17079_v0  ;;  %v17130_v58 = vsub.s32 %v3534_v31, %v17079_v0  ;;  %v17148_v31 = vld [vmem:[%s23239_s3 + $0x9a0] sm:$0xff] }
 0x142   :  { %v17103_v11 = vpop.f32.mrf.mxu0  ;;  %v17105_v53 = vpop.f32.mrf.mxu1  ;;  %23481 = vst [vmem:[#allocation64_spill] sm:$0xff] %v17148_v31  ;;  %v17275_v31 = vld [vmem:[%s23239_s3 + $0xcc0] sm:$0xff] }
 0x143   :  { %23472 = vst [vmem:[#allocation57_spill] sm:$0xff] %v17105_v53  ;;  %v17113_v25 = vrot.slane %v1571_v56, %v23474_v59  ;;  %v17127_v53 = vsub.s32 %v2101_v28, %v17079_v0  ;;  %23479 = vst [vmem:[#allocation62_spill] sm:$0xff] %v17130_v58  ;;  %v17143_v28 = vld [vmem:[%s23239_s3 + $0x980] sm:$0xff] }
 0x144   :  { %v17119_v24 = vpop.f32.mrf.mxu0  ;;  %v17121_v62 = vpop.f32.mrf.mxu1  ;;  %23480 = vst [vmem:[#allocation63_spill] sm:$0xff] %v17143_v28  ;;  %v17165_v58 = vld [vmem:[%s23239_s3 + $0x940] sm:$0xff] }
 0x145   :  { %23475 = vst [vmem:[#allocation58_spill] sm:$0xff] %v17119_v24  ;;  %23476 = vst [vmem:[#allocation59_spill] sm:$0xff] %v17121_v62  ;;  %v17175_v56 = vld [vmem:[%s23239_s3 + $0xd80] sm:$0xff] }
 0x146   :  { %23478 = vst [vmem:[#allocation61_spill] sm:$0xff] %v17127_v53  ;;  %v17158_v7 = vpop.f32.mrf.mxu0  ;;  %v17160_v0 = vpop.f32.mrf.mxu1  ;;  %23484 = vst [vmem:[#allocation67_spill] sm:$0xff] %v17165_v58  ;;  %v17198_v59 = vld [vmem:[%s23239_s3 + $0x920] sm:$0xff] }
 0x147   :  { %23482 = vst [vmem:[#allocation65_spill] sm:$0xff] %v17158_v7  ;;  %23483 = vst [vmem:[#allocation66_spill] sm:$0xff] %v17160_v0  ;;  %v17188_v0 = vld [vmem:[%s23239_s3 + $0xda0] sm:$0xff] }
 0x148   :  { %23486 = vst [vmem:[#allocation69_spill] sm:$0xff] %v17175_v56  ;;  %23487 = vst [vmem:[#allocation70_spill] sm:$0xff] %v17188_v0  ;;  %v17206_v7 = vpop.f32.mrf.mxu0  ;;  %v17208_v35 = vpop.f32.mrf.mxu1  ;;  %v17215_v62 = vld [vmem:[%s23239_s3 + $0xd40] sm:$0xff] }
 0x149   :  { %23489 = vst [vmem:[#allocation72_spill] sm:$0xff] %v17198_v59  ;;  %23490 = vst [vmem:[#allocation73_spill] sm:$0xff] %v17206_v7  ;;  %v17293_v58 = vld [vmem:[%s23239_s3 + $0x840] sm:$0xff] }
 0x14a   :  { %23491 = vst [vmem:[#allocation74_spill] sm:$0xff] %v17208_v35  ;;  %23492 = vst [vmem:[#allocation75_spill] sm:$0xff] %v17215_v62  ;;  %v17252_v47 = vpop.f32.mrf.mxu0  ;;  %v17254_v60 = vpop.f32.mrf.mxu1  ;;  %v17270_v35 = vld [vmem:[%s23239_s3 + $0x8a0] sm:$0xff] }
 0x14b   :  { %23498 = vst [vmem:[#allocation81_spill] sm:$0xff] %v17254_v60  ;;  %23500 = vst [vmem:[#allocation83_spill] sm:$0xff] %v17270_v35  ;;  %v17298_v28 = vld [vmem:[%s23239_s3 + $0x860] sm:$0xff] }
 0x14c   :  { %v17304_v7 = vpop.f32.mrf.mxu0  ;;  %v17306_v21 = vpop.f32.mrf.mxu1  ;;  %v17320_v0 = vld [vmem:[%s23239_s3 + $0xca0] sm:$0xff] }
 0x14d   :  { %23502 = vst [vmem:[#allocation85_spill] sm:$0xff] %v17306_v21  ;;  %23504 = vst [vmem:[#allocation87_spill] sm:$0xff] %v17320_v0  ;;  %v17325_v56 = vld [vmem:[%s23239_s3 + $0x800] sm:$0xff] }
 0x14e   :  { %23505 = vst [vmem:[#allocation88_spill] sm:$0xff] %v17325_v56  ;;  %v17338_v60 = vld [vmem:[%s23239_s3 + $0x820] sm:$0xff]  ;;  %v1311_v51 = vpop.f32.mrf.mxu0  ;;  %v1404_v55 = vpop.f32.mrf.mxu1 }
 0x14f   :  { %23506 = vst [vmem:[#allocation89_spill] sm:$0xff] %v17338_v60  ;;  %v17343_v21 = vld [vmem:[%s23239_s3 + $0xc40] sm:$0xff]  ;;  %v1500_v39 = vmax.f32 %v16973_v14, %v1404_v55 }
 0x150   :  { %23507 = vst [vmem:[#allocation90_spill] sm:$0xff] %v17343_v21  ;;  %v17348_v62 = vld [vmem:[%s23239_s3 + $0xc60] sm:$0xff]  ;;  %v1313_v59 = vpop.f32.mrf.mxu0  ;;  %v1406_v24 = vpop.f32.mrf.mxu1  ;;  %v23519_v21 = vmax.f32 %v16765_v26, %v16971_v46 }
 0x151   :  { %23508 = vst [vmem:[#allocation91_spill] sm:$0xff] %v17348_v62  ;;  %v1536_v35 = vmax.f32 %v23509_v52, %v1500_v39  ;;  %v1499_v2 = vmax.f32 %v16966_v43, %v1313_v59  ;;  %v1501_v16 = vmax.f32 %v1311_v51, %v1406_v24  ;;  %v17405_v55 = vld [vmem:[%s23239_s3 + $0xc20] sm:$0xff]  ;;  %v23517_v39 = vld [vmem:[#allocation4_spill] sm:$0xff] }
 0x152   :  { %v1315_v52 = vpop.f32.mrf.mxu0  ;;  %v1408_v51 = vpop.f32.mrf.mxu1  ;;  %23514 = vst [vmem:[#allocation28_spill] sm:$0xff] %v17405_v55  ;;  %v17415_v14 = vld [vmem:[%s23239_s3 + $0xba0] sm:$0xff]  ;;  %v23525_v55 = vld [vmem:[#allocation33_spill] sm:$0xff] }
 0x153   :  { %23515 = vst [vmem:[#allocation95_spill] sm:$0xff] %v17415_v14  ;;  %v1589_v24 = vadd.f32 %v17109_v34, %v1536_v35  ;;  %v23516_v43 = vld [vmem:[#allocation3_spill] sm:$0xff]  ;;  %v1537_v57 = vmax.f32 %v23519_v21, %v1501_v16  ;;  %v1503_v0 = vmax.f32 %v23520_v23, %v1408_v51  ;;  %v23524_v16 = vld [vmem:[#allocation30_spill] sm:$0xff] }
 0x154   :  { %v23518_v59 = vmax.f32 %v23516_v43, %v23517_v39  ;;  %23521 = vst [vmem:[#allocation3_spill] sm:$0xff] %v17428_v3  ;;  %v17433_v60 = vld [vmem:[%s23239_s3 + $0xfe0] sm:$0xff]  ;;  %v1317_v35 = vpop.f32.mrf.mxu0  ;;  %v1410_v56 = vpop.f32.mrf.mxu1  ;;  %v23523_v43 = vmax.f32 %v16777_v33, %v16984_v37 }
 0x155   :  { %23522 = vst [vmem:[#allocation4_spill] sm:$0xff] %v17433_v60  ;;  %v1625_v46 = vmax.f32 %v1589_v24, 0.0  ;;  %v1590_v39 = vadd.f32 %v17115_v48, %v1537_v57  ;;  %v1502_v24 = vmax.f32 %v23524_v16, %v1317_v35  ;;  %v1504_v26 = vmax.f32 %v1315_v52, %v1410_v56  ;;  %v17468_v14 = vld [vmem:[%s23239_s3 + $0xf80] sm:$0xff] }
 0x156   :  { %v1535_v62 = vmax.f32 %v23518_v59, %v1499_v2  ;;  %v1539_v51 = vmax.f32 %v23523_v43, %v1503_v0  ;;  %v17451_v59 = vld [vmem:[%s23239_s3 + $0xb40] sm:$0xff]  ;;  %v1414_v23 = vpop.f32.mrf.mxu1  ;;  %v23527_v52 = vmax.f32 %v16773_v30, %v16779_v36  ;;  %v23528_v16 = vmax.f32 %v16775_v32, %v16991_v29  ;;  %v23530_v30 = vld [vmem:[#allocation32_spill] sm:$0xff] }
 0x157   :  { %v17456_v2 = vld [vmem:[%s23239_s3 + $0xb60] sm:$0xff]  ;;  %v1626_v0 = vmax.f32 %v1590_v39, 0.0  ;;  %v1506_v27 = vmax.f32 %v23525_v55, %v1414_v23  ;;  %v23529_v60 = vmax.f32 %v16797_v17, %v16995_v38 }
 0x158   :  { %v1588_v21 = vadd.f32 %v17113_v25, %v1535_v62  ;;  %v1321_v62 = vpop.f32.mrf.mxu0  ;;  %v1592_v43 = vadd.f32 %v17109_v34, %v1539_v51  ;;  %v17473_v56 = vld [vmem:[%s23239_s3 + $0xfa0] sm:$0xff]  ;;  %v1538_v35 = vmax.f32 %v23527_v52, %v1502_v24  ;;  %v1416_v55 = vpop.f32.mrf.mxu1 }
 0x159   :  { %23526 = vst [vmem:[#allocation31_spill] sm:$0xff] %v17473_v56  ;;  %v1542_v3 = vmax.f32 %v23529_v60, %v1506_v27  ;;  %v1507_v32 = vmax.f32 %v1321_v62, %v1416_v55  ;;  %v23534_v60 = vld [vmem:[#allocation36_spill] sm:$0xff]  ;;  %v23535_v62 = vmax.f32 %v16795_v61, %v16999_v18 }
 0x15a   :  { %v1624_v37 = vmax.f32 %v1588_v21, 0.0  ;;  %v1540_v21 = vmax.f32 %v23528_v16, %v1504_v26  ;;  %v1323_v39 = vpop.f32.mrf.mxu0  ;;  %v1628_v33 = vmax.f32 %v1592_v43, 0.0  ;;  %v1591_v24 = vadd.f32 %v17113_v25, %v1538_v35  ;;  %v1418_v52 = vpop.f32.mrf.mxu1  ;;  %v23532_v43 = vld [vmem:[#allocation6_spill] sm:$0xff] }
 0x15b   :  { %v1505_v36 = vmax.f32 %v23530_v30, %v1323_v39  ;;  %v1509_v27 = vmax.f32 %v23534_v60, %v1418_v52 }
 0x15c   :  { %v14212_v57 = vpack.c.bf16 %v1625_v46, %v1624_v37  ;;  %v1593_v29 = vadd.f32 %v17115_v48, %v1540_v21  ;;  %v1325_v26 = vpop.f32.mrf.mxu0  ;;  %v1595_v46 = vadd.f32 %v17109_v34, %v1542_v3  ;;  %v23531_v37 = vld [vmem:[#allocation5_spill] sm:$0xff]  ;;  %v1627_v39 = vmax.f32 %v1591_v24, 0.0  ;;  %v1420_v30 = vpop.f32.mrf.mxu1 }
 0x15d   :  { %v23533_v17 = vmax.f32 %v23531_v37, %v23532_v43  ;;  %v1543_v21 = vmax.f32 %v23535_v62, %v1507_v32  ;;  %v23536_v37 = vmax.f32 %v16819_v49, %v17003_v13  ;;  %v23537_v43 = vld [vmem:[#allocation34_spill] sm:$0xff]  ;;  %v1510_v16 = vmax.f32 %v1325_v26, %v1420_v30 }
 0x15e   :  { %v1705_v23 = vrot.slane %v14212_v57, %v17124_v63  ;;  %v1629_v35 = vmax.f32 %v1593_v29, 0.0  ;;  %v1327_v55 = vpop.f32.mrf.mxu0  ;;  %v1631_v57 = vmax.f32 %v1595_v46, 0.0  ;;  %v14213_v24 = vpack.c.bf16 %v1628_v33, %v1627_v39  ;;  %v1424_v32 = vpop.f32.mrf.mxu1 }
 0x15f   :  { %v1541_v38 = vmax.f32 %v23533_v17, %v1505_v36  ;;  %v1545_v36 = vmax.f32 %v23536_v37, %v1509_v27  ;;  %v1508_v52 = vmax.f32 %v23537_v43, %v1327_v55  ;;  %v1596_v61 = vadd.f32 %v17115_v48, %v1543_v21 }
 0x160   :  { %v1662_v29 = vpack.c.bf16 %v1629_v35, %v1626_v0  ;;  %v14214_v17 = vpack.c.bf16 %v1629_v35, %v1629_v35  ;;  %v17510_v18 = vpop.f32.mrf.mxu0  ;;  %v23538_v46 = vmax.f32 %v16815_v44, %v16821_v50  ;;  %v1712_v49 = vrot.slane %v14213_v24, %v17124_v63  ;;  %v17519_v39 = vpop.f32.mrf.mxu1 }
 0x161   :  { %v1594_v3 = vadd.f32 %v17113_v25, %v1541_v38  ;;  %v1598_v62 = vadd.f32 %v17109_v34, %v1545_v36  ;;  %v1632_v0 = vmax.f32 %v1596_v61, 0.0 }
 0x162   :  { %v1544_v38 = vmax.f32 %v23538_v46, %v1508_v52  ;;  %v1719_v13 = vrot.slane %v1662_v29, %v17124_v63  ;;  %v1726_v33 = vrot.slane %v14214_v17, %v17124_v63  ;;  %v1333_v27 = vpop.f32.mrf.mxu0  ;;  %v1428_v43 = vpop.f32.mrf.mxu1 }
 0x163   :  { %v1630_v60 = vmax.f32 %v1594_v3, 0.0  ;;  %v1634_v21 = vmax.f32 %v1598_v62, 0.0  ;;  %v23539_v3 = vmax.f32 %v16817_v45, %v17018_v54 }
 0x164   :  { %v1597_v55 = vadd.f32 %v17113_v25, %v1544_v38  ;;  %v1727_v50 = vcombine.low %v1705_v23, %v1719_v13  ;;  %v1728_v26 = vcombine.high %v1705_v23, %v1719_v13  ;;  %v1729_v30 = vcombine.low %v1712_v49, %v1726_v33  ;;  %v17525_v36 = vpop.f32.mrf.mxu0  ;;  %v23541_v38 = vld [vmem:[#allocation9_spill] sm:$0xff] }
 0x165   :  { %v14215_v35 = vpack.c.bf16 %v1631_v57, %v1630_v60  ;;  %v1546_v44 = vmax.f32 %v23539_v3, %v1510_v16  ;;  %v1730_v37 = vcombine.high %v1712_v49, %v1726_v33  ;;  %v23540_v57 = vld [vmem:[#allocation41_spill] sm:$0xff]  ;;  %v17536_v16 = vpop.f32.mrf.mxu1  ;;  %v23542_v49 = vld [vmem:[#allocation38_spill] sm:$0xff] }
 0x166   :  { %v1633_v24 = vmax.f32 %v1597_v55, 0.0  ;;  %v1512_v17 = vmax.f32 %v23540_v57, %v1424_v32  ;;  %v1737_v61 = vrot.slane %v1727_v50, %v17124_v63  ;;  %v1744_v60 = vrot.slane %v1729_v30, %v17124_v63  ;;  %v17534_v23 = vpop.f32.mrf.mxu0 }
 0x167   :  { %v1772_v52 = vrot.slane %v14215_v35, %v17124_v63  ;;  %v1599_v29 = vadd.f32 %v17115_v48, %v1546_v44  ;;  %v1751_v45 = vrot.slane %v1728_v26, %v17124_v63  ;;  %v1758_v54 = vrot.slane %v1730_v37, %v17124_v63  ;;  %v23544_v35 = vld [vmem:[#allocation39_spill] sm:$0xff] }
 0x168   :  { %v14216_v62 = vpack.c.bf16 %v1634_v21, %v1633_v24  ;;  %v23543_v13 = vmax.f32 %v23541_v38, %v23542_v49  ;;  %v1511_v32 = vmax.f32 %v23544_v35, %v1333_v27  ;;  %v1759_v55 = vcombine.high %v1737_v61, %v1737_v61  ;;  %v17545_v51 = vpop.f32.mrf.mxu0  ;;  %v17550_v27 = vpop.f32.mrf.mxu1 }
 0x169   :  { %v1635_v46 = vmax.f32 %v1599_v29, 0.0  ;;  %v1760_v3 = vcombine.high %v1744_v60, %v1744_v60  ;;  %v1761_v44 = vcombine.high %v1751_v45, %v1751_v45  ;;  %v1762_v50 = vcombine.high %v1758_v54, %v1758_v54 }
 0x16a   :  { %v1548_v33 = vmax.f32 %v23543_v13, %v1512_v17  ;;  %v2112_v26 = vrot.slane %v1751_v45, %v17127_v53  ;;  %v2143_v30 = vrot.slane %v1744_v60, %v17127_v53  ;;  %v1779_v37 = vrot.slane %v14216_v62, %v17124_v63  ;;  %v23545_v45 = vld [vmem:[#allocation7_spill] sm:$0xff]  ;;  %v23546_v13 = vld [vmem:[#allocation10_spill] sm:$0xff]  ;;  %v17564_v56 = vpop.f32.mrf.mxu0 }
 0x16b   :  { %v1665_v57 = vpack.c.bf16 %v1635_v46, %v1632_v0  ;;  %v2098_v21 = vcombine.low %v1737_v61, %v1759_v55  ;;  %v2129_v24 = vcombine.low %v1761_v44, %v1758_v54  ;;  %v17548_v29 = vrot.slane %v1762_v50, %v17127_v53 }
 0x16c   :  { %v14217_v17 = vpack.c.bf16 %v1635_v46, %v1635_v46  ;;  %v1601_v49 = vadd.f32 %v17109_v34, %v1548_v33  ;;  %v23547_v60 = vmax.f32 %v23545_v45, %v23546_v13  ;;  %v1513_v0 = vmax.f32 %v17510_v18, %v17519_v39  ;;  %v23548_v46 = vld [vmem:[#allocation45_spill] sm:$0xff]  ;;  %v1436_v18 = vpop.f32.mrf.mxu1 }
 0x16d   :  { %v1786_v38 = vrot.slane %v1665_v57, %v17124_v63  ;;  %v2105_v61 = vrot.slane %v2098_v21, %v17127_v53  ;;  %v2136_v54 = vrot.slane %v2129_v24, %v17127_v53  ;;  %v1515_v55 = vmax.f32 %v23548_v46, %v1428_v43 }
 0x16e   :  { %v1547_v35 = vmax.f32 %v23547_v60, %v1511_v32  ;;  %v1793_v62 = vrot.slane %v14217_v17, %v17124_v63  ;;  %v1637_v57 = vmax.f32 %v1601_v49, 0.0 }
 0x16f   :  { %v1794_v44 = vcombine.low %v1772_v52, %v1786_v38  ;;  %v1795_v50 = vcombine.high %v1772_v52, %v1786_v38  ;;  %v2113_v45 = vcombine.low %v2105_v61, %v2112_v26  ;;  %v2114_v32 = vcombine.high %v2105_v61, %v2112_v26  ;;  %v23549_v52 = vld [vmem:[#allocation8_spill] sm:$0xff]  ;;  %v23553_v61 = vld [vmem:[#allocation42_spill] sm:$0xff] }
 0x170   :  { %v1600_v33 = vadd.f32 %v17113_v25, %v1547_v35  ;;  %v2144_v13 = vcombine.low %v2136_v54, %v2143_v30  ;;  %v2145_v60 = vcombine.high %v2136_v54, %v2143_v30  ;;  %v1796_v39 = vcombine.low %v1779_v37, %v1793_v62  ;;  %v23550_v38 = vld [vmem:[#allocation40_spill] sm:$0xff] }
 0x171   :  { %v1797_v21 = vcombine.high %v1779_v37, %v1793_v62  ;;  %v1804_v24 = vrot.slane %v1794_v44, %v17124_v63  ;;  %v1818_v17 = vrot.slane %v1795_v50, %v17124_v63  ;;  %14230 = vst.sshfl [vmem:[#allocation2] sm:$0x5f pattern:$0x75316420] %v2113_v45  ;;  %v23551_v49 = vmax.f32 %v23549_v52, %v23550_v38  ;;  %v1345_v50 = vpop.f32.mrf.mxu0 }
 0x172   :  { %14231 = vst.sshfl [vmem:[#allocation2 + $0x8] sm:$0x13 pattern:$0x75316420] %v2114_v32  ;;  %v1636_v43 = vmax.f32 %v1600_v33, 0.0  ;;  %v23552_v26 = vmax.f32 %v16849_v6, %v17043_v41  ;;  %v1514_v37 = vmax.f32 %v23553_v61, %v17534_v23  ;;  %v1811_v54 = vrot.slane %v1796_v39, %v17124_v63 }
 0x173   :  { %14232 = vst.sshfl [vmem:[#allocation2 + $0xc] sm:$0x5f pattern:$0x75316420] %v2144_v13  ;;  %v1549_v35 = vmax.f32 %v23551_v49, %v1513_v0  ;;  %v17578_v62 = vrot.slane %v1797_v21, %v17124_v63  ;;  %v1826_v46 = vcombine.high %v1804_v24, %v1804_v24  ;;  %v1828_v44 = vcombine.high %v1818_v17, %v1818_v17  ;;  %v1438_v13 = vpop.f32.mrf.mxu1 }
 0x174   :  { %14233 = vst.sshfl [vmem:[#allocation2 + $0x14] sm:$0x13 pattern:$0x75316420] %v2145_v60  ;;  %v1551_v30 = vmax.f32 %v23552_v26, %v1515_v55  ;;  %v2160_v33 = vcombine.low %v1760_v3, %v1804_v24  ;;  %v14218_v45 = vpack.c.bf16 %v1637_v57, %v1636_v43  ;;  %v1827_v6 = vcombine.high %v1811_v54, %v1811_v54 }
 0x175   :  { %v1602_v32 = vadd.f32 %v17115_v48, %v1549_v35  ;;  %v1829_v41 = vcombine.high %v17578_v62, %v17578_v62  ;;  %v2191_v23 = vcombine.low %v1818_v17, %v1828_v44  ;;  %v2205_v55 = vrot.slane %v1826_v46, %v17127_v53  ;;  %v1347_v17 = vpop.f32.mrf.mxu0  ;;  %v1440_v46 = vpop.f32.mrf.mxu1 }
 0x176   :  { %v1604_v0 = vadd.f32 %v17109_v34, %v1551_v30  ;;  %v2167_v60 = vrot.slane %v2160_v33, %v17127_v53  ;;  %v2236_v39 = vrot.slane %v17578_v62, %v17127_v53  ;;  %v17589_v3 = vrot.slane %v14218_v45, %v17124_v63  ;;  %v23555_v30 = vld [vmem:[#allocation48_spill] sm:$0xff] }
 0x177   :  { %v1638_v57 = vmax.f32 %v1602_v32, 0.0  ;;  %v2198_v21 = vrot.slane %v2191_v23, %v17127_v53  ;;  %v2222_v24 = vcombine.low %v1811_v54, %v1827_v6  ;;  %v23554_v52 = vmax.f32 %v16845_v4, %v16851_v8 }
 0x178   :  { %v1640_v43 = vmax.f32 %v1604_v0, 0.0  ;;  %v2175_v49 = vcombine.low %v2167_v60, %v17548_v29  ;;  %v2176_v35 = vcombine.high %v2167_v60, %v17548_v29  ;;  %v1516_v26 = vmax.f32 %v17525_v36, %v17536_v16  ;;  %v23557_v29 = vld [vmem:[#allocation12_spill] sm:$0xff]  ;;  %v23560_v16 = vld [vmem:[#allocation47_spill] sm:$0xff] }
 0x179   :  { %v1550_v38 = vmax.f32 %v23554_v52, %v1514_v37  ;;  %v1518_v61 = vmax.f32 %v23555_v30, %v17550_v27  ;;  %v2206_v44 = vcombine.low %v2198_v21, %v2205_v55  ;;  %v2207_v33 = vcombine.high %v2198_v21, %v2205_v55  ;;  %v23558_v37 = vld [vmem:[#allocation46_spill] sm:$0xff]  ;;  %v23561_v60 = vld [vmem:[#allocation52_spill] sm:$0xff]  ;;  %v23562_v52 = vld [vmem:[#allocation11_spill] sm:$0xff] }
 0x17a   :  { %v2229_v54 = vrot.slane %v2222_v24, %v17127_v53  ;;  %14234 = vst.sshfl [vmem:[#allocation2 + $0x18] sm:$0x5f pattern:$0x75316420] %v2175_v49  ;;  %v23556_v4 = vmax.f32 %v16847_v5, %v17057_v9  ;;  %v23559_v32 = vmax.f32 %v23557_v29, %v23558_v37  ;;  %v1517_v27 = vmax.f32 %v23560_v16, %v17564_v56  ;;  %v17613_v24 = vpop.f32.mrf.mxu0  ;;  %v23567_v30 = vld [vmem:[#allocation49_spill] sm:$0xff]  ;;  %v23570_v37 = vld [vmem:[#allocation14_spill] sm:$0xff] }
 0x17b   :  { %v1603_v45 = vadd.f32 %v17113_v25, %v1550_v38  ;;  %14235 = vst.sshfl [vmem:[#allocation2 + $0x20] sm:$0x13 pattern:$0x75316420] %v2176_v35  ;;  %v1519_v0 = vmax.f32 %v17545_v51, %v1436_v18  ;;  %v1521_v21 = vmax.f32 %v23561_v60, %v1438_v13  ;;  %v23563_v38 = vld [vmem:[#allocation13_spill] sm:$0xff]  ;;  %v23565_v56 = vmax.f32 %v16855_v10, %v17071_v20  ;;  %v1444_v18 = vpop.f32.mrf.mxu1 }
 0x17c   :  { %v1552_v8 = vmax.f32 %v23556_v4, %v1516_v26  ;;  %v1554_v36 = vmax.f32 %v23559_v32, %v1518_v61  ;;  %v2237_v6 = vcombine.low %v2229_v54, %v2236_v39  ;;  %v2238_v23 = vcombine.high %v2229_v54, %v2236_v39  ;;  %14236 = vst.sshfl [vmem:[#allocation2 + $0x24] sm:$0x5f pattern:$0x75316420] %v2206_v44 }
 0x17d   :  { %14237 = vst.sshfl [vmem:[#allocation2 + $0x2c] sm:$0x13 pattern:$0x75316420] %v2207_v33  ;;  %v1639_v55 = vmax.f32 %v1603_v45, 0.0  ;;  %v23564_v49 = vmax.f32 %v23562_v52, %v23563_v38  ;;  %v1555_v51 = vmax.f32 %v23565_v56, %v1519_v0  ;;  %v23566_v13 = vmax.f32 %v16876_v22, %v17075_v12  ;;  %v23571_v22 = vld [vmem:[#allocation51_spill] sm:$0xff] }
 0x17e   :  { %v1605_v5 = vadd.f32 %v17115_v48, %v1552_v8  ;;  %v1607_v9 = vadd.f32 %v17109_v34, %v1554_v36  ;;  %14238 = vst.sshfl [vmem:[#allocation2 + $0x30] sm:$0x5f pattern:$0x75316420] %v2237_v6  ;;  %v1520_v61 = vmax.f32 %v23567_v30, %v1347_v17  ;;  %v1522_v44 = vmax.f32 %v1345_v50, %v1440_v46  ;;  %v23568_v8 = vld [vmem:[#allocation15_spill] sm:$0xff]  ;;  %v17637_v17 = vpop.f32.mrf.mxu0 }
 0x17f   :  { %v1553_v35 = vmax.f32 %v23564_v49, %v1517_v27  ;;  %14239 = vst.sshfl [vmem:[#allocation2 + $0x38] sm:$0x13 pattern:$0x75316420] %v2238_v23  ;;  %v14219_v39 = vpack.c.bf16 %v1640_v43, %v1639_v55  ;;  %v1557_v26 = vmax.f32 %v23566_v13, %v1521_v21  ;;  %v1608_v4 = vadd.f32 %v17115_v48, %v1555_v51  ;;  %v17639_v27 = vpop.f32.mrf.mxu1  ;;  %v23573_v55 = vld [vmem:[#allocation56_spill] sm:$0xff]  ;;  %v23575_v49 = vld [vmem:[#allocation18_spill] sm:$0xff] }
 0x180   :  { %v1641_v33 = vmax.f32 %v1605_v5, 0.0  ;;  %v1643_v54 = vmax.f32 %v1607_v9, 0.0  ;;  %v23569_v43 = vmax.f32 %v16863_v15, %v23568_v8  ;;  %v23572_v12 = vmax.f32 %v23570_v37, %v23571_v22  ;;  %v23574_v9 = vld [vmem:[#allocation54_spill] sm:$0xff]  ;;  %v17653_v13 = vpop.f32.mrf.mxu0 }
 0x181   :  { %v1606_v45 = vadd.f32 %v17113_v25, %v1553_v35  ;;  %v1846_v20 = vrot.slane %v14219_v39, %v17124_v63  ;;  %v1610_v10 = vadd.f32 %v17109_v34, %v1557_v26  ;;  %v1644_v16 = vmax.f32 %v1608_v4, 0.0  ;;  %v23576_v35 = vld [vmem:[#allocation53_spill] sm:$0xff] }
 0x182   :  { %v1556_v29 = vmax.f32 %v23569_v43, %v1520_v61  ;;  %v1558_v32 = vmax.f32 %v23572_v12, %v1522_v44  ;;  %v1668_v50 = vpack.c.bf16 %v1641_v33, %v1638_v57  ;;  %v14220_v46 = vpack.c.bf16 %v1641_v33, %v1641_v33  ;;  %v17657_v44 = vpop.f32.mrf.mxu1  ;;  %v17670_v12 = vpop.f32.mrf.mxu0 }
 0x183   :  { %v1642_v36 = vmax.f32 %v1606_v45, 0.0  ;;  %v1646_v0 = vmax.f32 %v1610_v10, 0.0  ;;  %v1524_v15 = vmax.f32 %v23573_v55, %v1444_v18  ;;  %v1523_v57 = vmax.f32 %v23574_v9, %v17637_v17 }
 0x184   :  { %v1609_v6 = vadd.f32 %v17113_v25, %v1556_v29  ;;  %v1611_v23 = vadd.f32 %v17115_v48, %v1558_v32  ;;  %v1853_v60 = vrot.slane %v1668_v50, %v17124_v63  ;;  %v1860_v21 = vrot.slane %v14220_v46, %v17124_v63 }
 0x185   :  { %v14221_v5 = vpack.c.bf16 %v1643_v54, %v1642_v36  ;;  %v23577_v56 = vmax.f32 %v23575_v49, %v23576_v35  ;;  %v1525_v39 = vmax.f32 %v17613_v24, %v17639_v27 }
 0x186   :  { %v1645_v52 = vmax.f32 %v1609_v6, 0.0  ;;  %v1647_v38 = vmax.f32 %v1611_v23, 0.0  ;;  %v1861_v18 = vcombine.low %v17589_v3, %v1853_v60  ;;  %v1862_v26 = vcombine.high %v17589_v3, %v1853_v60 }
 0x187   :  { %v1560_v51 = vmax.f32 %v23577_v56, %v1524_v15  ;;  %v1863_v30 = vcombine.low %v1846_v20, %v1860_v21  ;;  %v1864_v61 = vcombine.high %v1846_v20, %v1860_v21  ;;  %v1906_v33 = vrot.slane %v14221_v5, %v17124_v63  ;;  %v17680_v56 = vpop.f32.mrf.mxu0 }
 0x188   :  { %v14222_v54 = vpack.c.bf16 %v1646_v0, %v1645_v52  ;;  %v1671_v45 = vpack.c.bf16 %v1647_v38, %v1644_v16  ;;  %v14223_v4 = vpack.c.bf16 %v1647_v38, %v1647_v38  ;;  %v1871_v10 = vrot.slane %v1861_v18, %v17124_v63  ;;  %v1450_v16 = vpop.f32.mrf.mxu1 }
 0x189   :  { %v1878_v8 = vrot.slane %v1863_v30, %v17124_v63  ;;  %v1885_v43 = vrot.slane %v1862_v26, %v17124_v63  ;;  %v1892_v29 = vrot.slane %v1864_v61, %v17124_v63  ;;  %v17668_v22 = vadd.f32 %v17109_v34, %v1560_v51 }
 0x18a   :  { %v1913_v37 = vrot.slane %v14222_v54, %v17124_v63  ;;  %v1920_v3 = vrot.slane %v1671_v45, %v17124_v63  ;;  %v1927_v20 = vrot.slane %v14223_v4, %v17124_v63  ;;  %v1893_v32 = vcombine.high %v1871_v10, %v1871_v10  ;;  %v1454_v26 = vpop.f32.mrf.mxu1 }
 0x18b   :  { %v1894_v50 = vcombine.high %v1878_v8, %v1878_v8  ;;  %v1895_v46 = vcombine.high %v1885_v43, %v1885_v43  ;;  %v1896_v36 = vcombine.high %v1892_v29, %v1892_v29  ;;  %v2253_v0 = vcombine.low %v1829_v41, %v1885_v43 }
 0x18c   :  { %v2267_v6 = vrot.slane %v1871_v10, %v17127_v53  ;;  %v1928_v23 = vcombine.low %v1906_v33, %v1920_v3  ;;  %v1929_v55 = vcombine.high %v1906_v33, %v1920_v3  ;;  %v2284_v15 = vcombine.low %v1893_v32, %v1878_v8 }
 0x18d   :  { %v2298_v60 = vrot.slane %v1895_v46, %v17127_v53  ;;  %v2315_v21 = vcombine.low %v1892_v29, %v1896_v36  ;;  %v2329_v5 = vrot.slane %v1894_v50, %v17127_v53  ;;  %v2260_v52 = vrot.slane %v2253_v0, %v17127_v53  ;;  %v23578_v50 = vld [vmem:[#allocation16_spill] sm:$0xff]  ;;  %v23579_v46 = vld [vmem:[#allocation19_spill] sm:$0xff] }
 0x18e   :  { %v1930_v38 = vcombine.low %v1913_v37, %v1927_v20  ;;  %v1931_v49 = vcombine.high %v1913_v37, %v1927_v20  ;;  %v1938_v35 = vrot.slane %v1928_v23, %v17124_v63  ;;  %v2291_v62 = vrot.slane %v2284_v15, %v17127_v53  ;;  %v1363_v20 = vpop.f32.mrf.mxu0  ;;  %v23582_v23 = vld [vmem:[#allocation55_spill] sm:$0xff] }
 0x18f   :  { %v2322_v41 = vrot.slane %v2315_v21, %v17127_v53  ;;  %v1952_v51 = vrot.slane %v1929_v55, %v17124_v63  ;;  %v1649_v18 = vmax.f32 %v17668_v22, 0.0  ;;  %v2268_v30 = vcombine.low %v2260_v52, %v2267_v6 }
 0x190   :  { %v2269_v61 = vcombine.high %v2260_v52, %v2267_v6  ;;  %v17687_v33 = vrot.slane %v1930_v38, %v17124_v63  ;;  %v1959_v54 = vrot.slane %v1931_v49, %v17124_v63  ;;  %v2299_v45 = vcombine.low %v2291_v62, %v2298_v60  ;;  %v23581_v6 = vld [vmem:[#allocation17_spill] sm:$0xff]  ;;  %v23584_v38 = vld [vmem:[#allocation59_spill] sm:$0xff] }
 0x191   :  { %v2300_v4 = vcombine.high %v2291_v62, %v2298_v60  ;;  %v2330_v10 = vcombine.low %v2322_v41, %v2329_v5  ;;  %v2331_v8 = vcombine.high %v2322_v41, %v2329_v5  ;;  %14240 = vst.sshfl [vmem:[#allocation2 + $0x3c] sm:$0x5f pattern:$0x75316420] %v2268_v30  ;;  %v1960_v43 = vcombine.high %v1938_v35, %v1938_v35  ;;  %v1456_v60 = vpop.f32.mrf.mxu1  ;;  %v23585_v49 = vld [vmem:[#allocation57_spill] sm:$0xff] }
 0x192   :  { %14241 = vst.sshfl [vmem:[#allocation2 + $0x44] sm:$0x13 pattern:$0x75316420] %v2269_v61  ;;  %v1961_v29 = vcombine.high %v17687_v33, %v17687_v33  ;;  %v1962_v37 = vcombine.high %v1952_v51, %v1952_v51  ;;  %v1963_v3 = vcombine.high %v1959_v54, %v1959_v54  ;;  %v2360_v22 = vrot.slane %v1952_v51, %v17127_v53  ;;  %v23587_v51 = vld [vmem:[#allocation74_spill] sm:$0xff] }
 0x193   :  { %14242 = vst.sshfl [vmem:[#allocation2 + $0x48] sm:$0x5f pattern:$0x75316420] %v2299_v45  ;;  %v2391_v32 = vrot.slane %v17687_v33, %v17127_v53  ;;  %v23580_v36 = vmax.f32 %v23578_v50, %v23579_v46  ;;  %v23583_v55 = vmax.f32 %v23581_v6, %v23582_v23  ;;  %v2346_v21 = vcombine.low %v1938_v35, %v1960_v43  ;;  %v23588_v45 = vld [vmem:[#allocation20_spill] sm:$0xff]  ;;  %v23592_v43 = vld [vmem:[#allocation58_spill] sm:$0xff] }
 0x194   :  { %14243 = vst.sshfl [vmem:[#allocation2 + $0x50] sm:$0x13 pattern:$0x75316420] %v2300_v4  ;;  %v2377_v5 = vcombine.low %v1962_v37, %v1959_v54  ;;  %v17708_v52 = vrot.slane %v1963_v3, %v17127_v53  ;;  %v1527_v17 = vmax.f32 %v23584_v38, %v17657_v44  ;;  %v1526_v24 = vmax.f32 %v23585_v49, %v17670_v12  ;;  %v1365_v44 = vpop.f32.mrf.mxu0  ;;  %v23589_v4 = vld [vmem:[#allocation22_spill] sm:$0xff]  ;;  %v23591_v12 = vld [vmem:[#allocation21_spill] sm:$0xff]  ;;  %v1458_v37 = vpop.f32.mrf.mxu1 }
 0x195   :  { %14244 = vst.sshfl [vmem:[#allocation2 + $0x54] sm:$0x5f pattern:$0x75316420] %v2330_v10  ;;  %v1559_v0 = vmax.f32 %v23580_v36, %v1523_v57  ;;  %v1561_v15 = vmax.f32 %v23583_v55, %v1525_v39  ;;  %v1528_v27 = vmax.f32 %v17653_v13, %v1450_v16  ;;  %v2353_v39 = vrot.slane %v2346_v21, %v17127_v53  ;;  %v23594_v6 = vld [vmem:[#allocation25_spill] sm:$0xff]  ;;  %v23597_v21 = vld [vmem:[#allocation66_spill] sm:$0xff] }
 0x196   :  { %14245 = vst.sshfl [vmem:[#allocation2 + $0x5c] sm:$0x13 pattern:$0x75316420] %v2331_v8  ;;  %v2384_v35 = vrot.slane %v2377_v5, %v17127_v53  ;;  %v23586_v62 = vmax.f32 %v16918_v1, %v17103_v11  ;;  %v1530_v30 = vmax.f32 %v23587_v51, %v1454_v26  ;;  %v23590_v10 = vmax.f32 %v23588_v45, %v23589_v4  ;;  %v23595_v23 = vld [vmem:[#allocation65_spill] sm:$0xff]  ;;  %v1367_v38 = vpop.f32.mrf.mxu0 }
 0x197   :  { %v1612_v9 = vadd.f32 %v17113_v25, %v1559_v0  ;;  %v1614_v57 = vadd.f32 %v17115_v48, %v1561_v15  ;;  %v23593_v13 = vmax.f32 %v23591_v12, %v23592_v43  ;;  %v2361_v3 = vcombine.low %v2353_v39, %v2360_v22  ;;  %v23603_v51 = vld [vmem:[#allocation73_spill] sm:$0xff]  ;;  %v1460_v12 = vpop.f32.mrf.mxu1 }
 0x198   :  { %v1563_v41 = vmax.f32 %v23586_v62, %v1527_v17  ;;  %v1562_v8 = vmax.f32 %v23590_v10, %v1526_v24  ;;  %v2362_v50 = vcombine.high %v2353_v39, %v2360_v22  ;;  %v2392_v46 = vcombine.low %v2384_v35, %v2391_v32  ;;  %v23600_v39 = vld [vmem:[#allocation26_spill] sm:$0xff]  ;;  %v23606_v10 = vld [vmem:[#allocation81_spill] sm:$0xff] }
 0x199   :  { %v1648_v61 = vmax.f32 %v1612_v9, 0.0  ;;  %v1650_v54 = vmax.f32 %v1614_v57, 0.0  ;;  %v1564_v16 = vmax.f32 %v23593_v13, %v1528_v27  ;;  %v2393_v36 = vcombine.high %v2384_v35, %v2391_v32  ;;  %14246 = vst.sshfl [vmem:[#allocation2 + $0x60] sm:$0x5f pattern:$0x75316420] %v2361_v3 }
 0x19a   :  { %v1616_v1 = vadd.f32 %v17109_v34, %v1563_v41  ;;  %v1615_v26 = vadd.f32 %v17113_v25, %v1562_v8  ;;  %14247 = vst.sshfl [vmem:[#allocation2 + $0x68] sm:$0x13 pattern:$0x75316420] %v2362_v50  ;;  %v23596_v55 = vmax.f32 %v23594_v6, %v23595_v23  ;;  %v1529_v5 = vmax.f32 %v23597_v21, %v1363_v20  ;;  %v23598_v32 = vld [vmem:[#allocation85_spill] sm:$0xff]  ;;  %v23599_v27 = vld [vmem:[#allocation23_spill] sm:$0xff] }
 0x19b   :  { %v14224_v11 = vpack.c.bf16 %v1649_v18, %v1648_v61  ;;  %v1617_v0 = vadd.f32 %v17115_v48, %v1564_v16  ;;  %14248 = vst.sshfl [vmem:[#allocation2 + $0x6c] sm:$0x5f pattern:$0x75316420] %v2392_v46  ;;  %v1531_v22 = vmax.f32 %v17680_v56, %v1456_v60  ;;  %v1533_v18 = vmax.f32 %v23598_v32, %v1458_v37  ;;  %v23602_v41 = vld [vmem:[#allocation24_spill] sm:$0xff]  ;;  %v23608_v46 = vld [vmem:[#allocation29_spill] sm:$0xff] }
 0x19c   :  { %14249 = vst.sshfl [vmem:[#allocation2 + $0x74] sm:$0x13 pattern:$0x75316420] %v2393_v36  ;;  %v1566_v15 = vmax.f32 %v23596_v55, %v1530_v30  ;;  %v1652_v9 = vmax.f32 %v1616_v1, 0.0  ;;  %v1651_v57 = vmax.f32 %v1615_v26, 0.0  ;;  %v23601_v35 = vmax.f32 %v23599_v27, %v23600_v39 }
 0x19d   :  { %v1973_v17 = vrot.slane %v14224_v11, %v17124_v63  ;;  %v1653_v49 = vmax.f32 %v1617_v0, 0.0  ;;  %v23604_v30 = vmax.f32 %v23602_v41, %v23603_v51  ;;  %v23605_v56 = vmax.f32 %v16951_v19, %v17252_v47  ;;  %v23607_v19 = vld [vmem:[#allocation27_spill] sm:$0xff]  ;;  %v15608_v1 = vld.sshfl [vmem:[#allocation2 + $0x18] sm:$0xf pattern:$0x76325410] }
 0x19e   :  { %v1619_v24 = vadd.f32 %v17109_v34, %v1566_v15  ;;  %v1565_v62 = vmax.f32 %v23601_v35, %v1529_v5  ;;  %v14225_v61 = vpack.c.bf16 %v1652_v9, %v1651_v57  ;;  %v1532_v8 = vmax.f32 %v23606_v10, %v1367_v38  ;;  %v15607_v11 = vld.sshfl [vmem:[#allocation2] sm:$0xf pattern:$0x76325410]  ;;  %v23611_v10 = vld [vmem:[#allocation62_spill] sm:$0xff] }
 0x19f   :  { %v1567_v20 = vmax.f32 %v23604_v30, %v1531_v22  ;;  %v1569_v60 = vmax.f32 %v23605_v56, %v1533_v18  ;;  %v1674_v45 = vpack.c.bf16 %v1653_v49, %v1650_v54  ;;  %v14226_v4 = vpack.c.bf16 %v1653_v49, %v1653_v49  ;;  %v15610_v5 = vld.sshfl [vmem:[#allocation2 + $0x48] sm:$0xf pattern:$0x76325410] }
 0x1a0   :  { %v1655_v43 = vmax.f32 %v1619_v24, 0.0  ;;  %v1618_v13 = vadd.f32 %v17113_v25, %v1565_v62  ;;  %v1980_v3 = vrot.slane %v14225_v61, %v17124_v63  ;;  %v23609_v54 = vmax.f32 %v23607_v19, %v23608_v46  ;;  %v17778_v61 = vld [vmem:[#allocation2 + $0xc] sm:$0x33] }
 0x1a1   :  { %v1620_v16 = vadd.f32 %v17115_v48, %v1567_v20  ;;  %v1622_v37 = vadd.f32 %v17109_v34, %v1569_v60  ;;  %v1987_v50 = vrot.slane %v1674_v45, %v17124_v63  ;;  %v1994_v47 = vrot.slane %v14226_v4, %v17124_v63  ;;  %v2659_v60 = vld [vmem:[#allocation2 + $0x8] sm:$0x3] }
 0x1a2   :  { %v1568_v36 = vmax.f32 %v23609_v54, %v1532_v8  ;;  %v1654_v26 = vmax.f32 %v1618_v13, 0.0  ;;  %v1534_v23 = vmax.f32 %v1365_v44, %v1460_v12  ;;  %v23610_v18 = vmax.f32 %v23513_v42, %v17304_v7 }
 0x1a3   :  { %v1656_v0 = vmax.f32 %v1620_v16, 0.0  ;;  %v1658_v6 = vmax.f32 %v1622_v37, 0.0  ;;  %v1995_v55 = vcombine.low %v1973_v17, %v1987_v50  ;;  %v1996_v15 = vcombine.high %v1973_v17, %v1987_v50  ;;  %v15609_v17 = vld.sshfl [vmem:[#allocation2 + $0x30] sm:$0xf pattern:$0x76325410] }
 0x1a4   :  { %v1997_v21 = vcombine.low %v1980_v3, %v1994_v47  ;;  %v1998_v34 = vcombine.high %v1980_v3, %v1994_v47  ;;  %v14227_v22 = vpack.c.bf16 %v1655_v43, %v1654_v26  ;;  %v1621_v32 = vadd.f32 %v17113_v25, %v1568_v36  ;;  %v17787_v3 = vld [vmem:[#allocation2 + $0x24] sm:$0x33] }
 0x1a5   :  { %v1570_v38 = vmax.f32 %v23610_v18, %v1534_v23  ;;  %v14422_v9 = vcombine.low %v15607_v11, %v15608_v1  ;;  %v2005_v57 = vrot.slane %v1995_v55, %v17124_v63  ;;  %v2019_v24 = vrot.slane %v1996_v15, %v17124_v63 }
 0x1a6   :  { %v2012_v49 = vrot.slane %v1997_v21, %v17124_v63  ;;  %v17767_v44 = vrot.slane %v1998_v34, %v17124_v63  ;;  %v2040_v27 = vrot.slane %v14227_v22, %v17124_v63  ;;  %v1657_v39 = vmax.f32 %v1621_v32, 0.0  ;;  %v2665_v34 = vld [vmem:[#allocation2 + $0x50] sm:$0x3] }
 0x1a7   :  { %v1623_v25 = vadd.f32 %v17115_v48, %v1570_v38  ;;  %v14424_v35 = vcombine.low %v15609_v17, %v15610_v5  ;;  %v2027_v62 = vcombine.high %v2005_v57, %v2005_v57  ;;  %v2029_v42 = vcombine.high %v2019_v24, %v2019_v24  ;;  %v17796_v5 = vld [vmem:[#allocation2 + $0x54] sm:$0x33] }
 0x1a8   :  { %v2028_v7 = vcombine.high %v2012_v49, %v2012_v49  ;;  %v2030_v41 = vcombine.high %v17767_v44, %v17767_v44  ;;  %v2408_v51 = vcombine.low %v1961_v29, %v2005_v57  ;;  %v2484_v30 = vrot.slane %v17767_v44, %v17127_v53 }
 0x1a9   :  { %v14228_v20 = vpack.c.bf16 %v1658_v6, %v1657_v39  ;;  %v1659_v56 = vmax.f32 %v1623_v25, 0.0  ;;  %v2439_v48 = vcombine.low %v2019_v24, %v2029_v42  ;;  %v2453_v45 = vrot.slane %v2027_v62, %v17127_v53  ;;  %v17794_v6 = vld [vmem:[#allocation2 + $0x3c] sm:$0x33]  ;;  %v2663_v24 = vld [vmem:[#allocation2 + $0x38] sm:$0x3] }
 0x1aa   :  { %v2470_v4 = vcombine.low %v2012_v49, %v2028_v7  ;;  %v5293_v8 = vrot.slane %v14422_v9, %v23611_v10  ;;  %v2415_v12 = vrot.slane %v2408_v51, %v17127_v53  ;;  %v5307_v37 = vrot.slane %v14424_v35, %v23611_v10 }
 0x1ab   :  { %v2047_v43 = vrot.slane %v14228_v20, %v17124_v63  ;;  %v1677_v33 = vpack.c.bf16 %v1659_v56, %v1656_v0  ;;  %v14229_v29 = vpack.c.bf16 %v1659_v56, %v1659_v56  ;;  %v2446_v13 = vrot.slane %v2439_v48, %v17127_v53  ;;  %v2661_v0 = vld [vmem:[#allocation2 + $0x20] sm:$0x3]  ;;  %v23614_v20 = vld [vmem:[#allocation37_spill] sm:$0xff] }
 0x1ac   :  { %v2477_v16 = vrot.slane %v2470_v4, %v17127_v53  ;;  %v14406_v50 = vcombine.low %v2659_v60, %v17778_v61  ;;  %v2423_v47 = vcombine.low %v2415_v12, %v17708_v52  ;;  %v2424_v19 = vcombine.high %v2415_v12, %v17708_v52  ;;  %v23616_v12 = vld [vmem:[#allocation63_spill] sm:$0xff] }
 0x1ad   :  { %v2054_v46 = vrot.slane %v1677_v33, %v17124_v63  ;;  %v2061_v54 = vrot.slane %v14229_v29, %v17124_v63  ;;  %v2454_v36 = vcombine.low %v2446_v13, %v2453_v45  ;;  %v2455_v11 = vcombine.high %v2446_v13, %v2453_v45 }
 0x1ae   :  { %v2485_v1 = vcombine.low %v2477_v16, %v2484_v30  ;;  %v2486_v26 = vcombine.high %v2477_v16, %v2484_v30  ;;  %14250 = vst.sshfl [vmem:[#allocation2 + $0x78] sm:$0x5f pattern:$0x75316420] %v2423_v47  ;;  %v17798_v52 = vcombine.low %v5293_v8, %v5307_v37  ;;  %v17800_v22 = vcombine.high %v5293_v8, %v5307_v37  ;;  %v23613_v30 = vld [vmem:[#allocation35_spill] sm:$0xff] }
 0x1af   :  { %14251 = vst.sshfl [vmem:[#allocation2 + $0x80] sm:$0x13 pattern:$0x75316420] %v2424_v19  ;;  %v2062_v23 = vcombine.low %v2040_v27, %v2054_v46  ;;  %v2063_v55 = vcombine.high %v2040_v27, %v2054_v46  ;;  %v2064_v15 = vcombine.low %v2047_v43, %v2061_v54  ;;  %v2065_v21 = vcombine.high %v2047_v43, %v2061_v54  ;;  %v23617_v43 = vld [vmem:[#allocation64_spill] sm:$0xff] }
 0x1b0   :  { %14252 = vst.sshfl [vmem:[#allocation2 + $0x84] sm:$0x5f pattern:$0x75316420] %v2454_v36  ;;  %23612 = vst [vmem:[#allocation30_spill] sm:$0xff] %v17798_v52  ;;  %v3538_v32 = vrot.slane %v14406_v50, %v23611_v10  ;;  %v14408_v18 = vcombine.low %v2661_v0, %v17787_v3  ;;  %11435 = vmatprep.mubr.bf16.mxu0 %v17800_v22  ;;  %v14410_v17 = vcombine.low %v2663_v24, %v17794_v6 }
 0x1b1   :  { %14253 = vst.sshfl [vmem:[#allocation2 + $0x8c] sm:$0x13 pattern:$0x75316420] %v2455_v11  ;;  %v2072_v38 = vrot.slane %v2062_v23, %v17124_v63  ;;  %v2079_v9 = vrot.slane %v2064_v15, %v17124_v63  ;;  %v2086_v57 = vrot.slane %v2063_v55, %v17124_v63  ;;  %v2093_v49 = vrot.slane %v2065_v21, %v17124_v63  ;;  %v2676_v23 = vld [vmem:[#allocation2 + $0x14] sm:$0x3] }
 0x1b2   :  { %14254 = vst.sshfl [vmem:[#allocation2 + $0x90] sm:$0x5f pattern:$0x75316420] %v2485_v1  ;;  %v3614_v44 = vrot.slane %v14408_v18, %v23611_v10  ;;  %v14412_v27 = vcombine.low %v2665_v34, %v17796_v5  ;;  %v14287_v39 = vcombine.high %v17778_v61, %v17778_v61  ;;  %11436 = vmatmul.mubr.bf16.vlgmr.msra.gmra.mxu0 %v17798_v52  ;;  %v17838_v55 = vld [vmem:[#allocation2 + $0x6c] sm:$0x33] }
 0x1b3   :  { %14255 = vst.sshfl [vmem:[#allocation2 + $0x98] sm:$0x13 pattern:$0x75316420] %v2486_v26  ;;  %v2094_v25 = vcombine.high %v2072_v38, %v2072_v38  ;;  %v2095_v35 = vcombine.high %v2079_v9, %v2079_v9  ;;  %v2096_v62 = vcombine.high %v2086_v57, %v2086_v57  ;;  %v2097_v7 = vcombine.high %v2093_v49, %v2093_v49  ;;  %v23620_v18 = vld [vmem:[#allocation67_spill] sm:$0xff] }
 0x1b4   :  { %v2501_v42 = vcombine.low %v2030_v41, %v2086_v57  ;;  %v2515_v51 = vrot.slane %v2072_v38, %v17127_v53  ;;  %v23615_v56 = vcombine.low %v23613_v30, %v23614_v20  ;;  %v3690_v60 = vrot.slane %v14410_v17, %v23611_v10  ;;  %v15611_v41 = vld.sshfl [vmem:[#allocation2 + $0x60] sm:$0xf pattern:$0x76325410]  ;;  %v23621_v38 = vld [vmem:[#allocation68_spill] sm:$0xff] }
 0x1b5   :  { %v3766_v48 = vrot.slane %v14412_v27, %v23611_v10  ;;  %v2532_v45 = vcombine.low %v2094_v25, %v2079_v9  ;;  %v2546_v61 = vrot.slane %v2096_v62, %v17127_v53  ;;  %v2563_v4 = vcombine.low %v2093_v49, %v2097_v7  ;;  %v15612_v37 = vld.sshfl [vmem:[#allocation2 + $0x78] sm:$0xf pattern:$0x76325410]  ;;  %v2678_v57 = vld [vmem:[#allocation2 + $0x2c] sm:$0x3] }
 0x1b6   :  { %11510 = vmatpush1.bf16.msra.mxu0 %v23615_v56  ;;  %v2577_v8 = vrot.slane %v2095_v35, %v17127_v53  ;;  %v23618_v33 = vcombine.high %v23616_v12, %v23617_v43  ;;  %v2508_v29 = vrot.slane %v2501_v42, %v17127_v53  ;;  %v14423_v13 = vcombine.low %v3538_v32, %v3614_v44  ;;  %v17840_v15 = vld [vmem:[#allocation2 + $0x8] ss:$0 sps:$4 sm:$0x77]   ;;  %v2691_v24 = vld [vmem:[#allocation2] sm:$0x77] }
 0x1b7   :  { %v14425_v16 = vcombine.low %v3690_v60, %v3766_v48  ;;  %v14290_v50 = vcombine.high %v17787_v3, %v17787_v3  ;;  %v2539_v47 = vrot.slane %v2532_v45, %v17127_v53  ;;  %v2570_v19 = vrot.slane %v2563_v4, %v17127_v53  ;;  %v2667_v3 = vld [vmem:[#allocation2 + $0x68] sm:$0x3]  ;;  %v2680_v25 = vld [vmem:[#allocation2 + $0x44] sm:$0x3]  ;;  %v2682_v35 = vld [vmem:[#allocation2 + $0x5c] sm:$0x3] }
 0x1b8   :  { %11511 = vmatprep.subr.bf16.mxu0 %v23618_v33  ;;  %v14438_v46 = vcombine.low %v15611_v41, %v15612_v37  ;;  %v14293_v54 = vcombine.high %v17794_v6, %v17794_v6  ;;  %v2516_v36 = vcombine.low %v2508_v29, %v2515_v51  ;;  %v2517_v11 = vcombine.high %v2508_v29, %v2515_v51  ;;  %v17845_v49 = vld [vmem:[#allocation2 + $0x84] sm:$0x33]  ;;  %v2669_v30 = vld [vmem:[#allocation2 + $0x80] sm:$0x3]  ;;  %v2695_v33 = vld [vmem:[#allocation2 + $0x30] sm:$0x77] }
 0x1b9   :  { %v5300_v1 = vrot.slane %v14423_v13, %v23611_v10  ;;  %v5314_v26 = vrot.slane %v14425_v16, %v23611_v10  ;;  %v23619_v0 = vcombine.low %v23616_v12, %v23617_v43  ;;  %v2547_v21 = vcombine.low %v2539_v47, %v2546_v61  ;;  %v23628_v41 = vld [vmem:[#allocation43_spill] sm:$0xff]  ;;  %v23629_v29 = vld [vmem:[#allocation44_spill] sm:$0xff] }
 0x1ba   :  { %v2548_v34 = vcombine.high %v2539_v47, %v2546_v61  ;;  %v2578_v32 = vcombine.low %v2570_v19, %v2577_v8  ;;  %v2579_v6 = vcombine.high %v2570_v19, %v2577_v8  ;;  %v23622_v9 = vcombine.high %v23620_v18, %v23621_v38  ;;  %14256 = vst.sshfl [vmem:[#allocation2 + $0x9c] sm:$0x5f pattern:$0x75316420] %v2516_v36  ;;  %v23625_v61 = vld [vmem:[#allocation71_spill] sm:$0xff] }
 0x1bb   :  { %11512 = vmatpush1.bf16.msra.mxu0 %v23619_v0  ;;  %14257 = vst.sshfl [vmem:[#allocation2 + $0xa4] sm:$0x13 pattern:$0x75316420] %v2517_v11  ;;  %v17847_v44 = vcombine.low %v5300_v1, %v5314_v26  ;;  %v17849_v17 = vcombine.high %v5300_v1, %v5314_v26  ;;  %v17852_v27 = vrot.slane %v14438_v46, %v23611_v10  ;;  %v2697_v47 = vld [vmem:[#allocation2 + $0x48] sm:$0x77] }
 0x1bc   :  { %11513 = vmatprep.subr.bf16.mxu0 %v23622_v9  ;;  %v14296_v62 = vcombine.high %v17796_v5, %v17796_v5  ;;  %14258 = vst.sshfl [vmem:[#allocation2 + $0xa8] sm:$0x5f pattern:$0x75316420] %v2547_v21  ;;  %v14407_v7 = vcombine.low %v14287_v39, %v2676_v23  ;;  %v14409_v42 = vcombine.low %v14290_v50, %v2678_v57  ;;  %v2693_v5 = vld [vmem:[#allocation2 + $0x18] sm:$0x77] }
 0x1bd   :  { %23623 = vst [vmem:[#allocation33_spill] sm:$0xff] %v17847_v44  ;;  %14259 = vst.sshfl [vmem:[#allocation2 + $0xb0] sm:$0x13 pattern:$0x75316420] %v2548_v34  ;;  %v14411_v51 = vcombine.low %v14293_v54, %v2680_v25  ;;  %v14414_v20 = vcombine.low %v2667_v3, %v17838_v55  ;;  %11488 = vmatprep.mubr.bf16.mxu1 %v17849_v17  ;;  %v23624_v56 = vcombine.low %v23620_v18, %v23621_v38  ;;  %v23626_v39 = vld [vmem:[#allocation72_spill] sm:$0xff] }
 0x1be   :  { %14260 = vst.sshfl [vmem:[#allocation2 + $0xb4] sm:$0x5f pattern:$0x75316420] %v2578_v32  ;;  %v14413_v60 = vcombine.low %v14296_v62, %v2682_v35  ;;  %v14416_v48 = vcombine.low %v2669_v30, %v17845_v49  ;;  %v14310_v45 = vcombine.low %v2691_v24, %v2691_v24  ;;  %11489 = vmatmul.mubr.bf16.vlgmr.msra.gmra.mxu1 %v17847_v44  ;;  %v2964_v19 = vshll.u32 %v17840_v15, 16  ;;  %v23631_v46 = vld [vmem:[#allocation69_spill] sm:$0xff] }
 0x1bf   :  { %14261 = vst.sshfl [vmem:[#allocation2 + $0xbc] sm:$0x13 pattern:$0x75316420] %v2579_v6  ;;  %11514 = vmatpush1.bf16.msra.mxu0 %v23624_v56  ;;  %v23627_v4 = vcombine.high %v23625_v61, %v23626_v39  ;;  %v3548_v8 = vrot.slane %v14407_v7, %v23611_v10  ;;  %v3624_v12 = vrot.slane %v14409_v42, %v23611_v10  ;;  %v23632_v54 = vld [vmem:[#allocation70_spill] sm:$0xff]  ;;  %v17893_v18 = vld [vmem:[%s23239_s3 + $0xb00] sm:$0xff] }
 0x1c0   :  { %v3700_v43 = vrot.slane %v14411_v51, %v23611_v10  ;;  %v23630_v13 = vcombine.low %v23628_v41, %v23629_v29  ;;  %v3776_v16 = vrot.slane %v14413_v60, %v23611_v10  ;;  %v3842_v37 = vrot.slane %v14414_v20, %v23611_v10  ;;  %v15613_v3 = vld.sshfl [vmem:[#allocation2 + $0x90] sm:$0xf pattern:$0x76325410]  ;;  %v17898_v38 = vld [vmem:[%s23239_s3 + $0xb20] sm:$0xff]  ;;  %v23636_v57 = vld [vmem:[#allocation78_spill] sm:$0xff] }
 0x1c1   :  { %11515 = vmatprep.subr.bf16.mxu0 %v23627_v4  ;;  %v3918_v50 = vrot.slane %v14416_v48, %v23611_v10  ;;  %v23633_v36 = vcombine.high %v23631_v46, %v23632_v54  ;;  %v14426_v11 = vcombine.low %v3548_v8, %v3624_v12  ;;  %v14311_v1 = vcombine.high %v2691_v24, %v2691_v24  ;;  %v23635_v9 = vld [vmem:[#allocation77_spill] sm:$0xff]  ;;  %v2671_v35 = vld [vmem:[#allocation2 + $0x98] sm:$0x3]  ;;  %v17906_v62 = vld [vmem:[#allocation2 + $0x9c] sm:$0x33] }
 0x1c2   :  { %11563 = vmatpush1.bf16.msra.mxu1 %v23630_v13  ;;  %v17879_v26 = vcombine.low %v2693_v5, %v2693_v5  ;;  %v17881_v0 = vcombine.high %v2693_v5, %v2693_v5  ;;  %v23634_v23 = vcombine.low %v23625_v61, %v23626_v39  ;;  %v14428_v21 = vcombine.low %v3700_v43, %v3776_v16  ;;  %v23639_v39 = vld [vmem:[#allocation75_spill] sm:$0xff]  ;;  %v23640_v4 = vld [vmem:[#allocation76_spill] sm:$0xff]  ;;  %v2701_v44 = vld [vmem:[#allocation2 + $0x78] sm:$0x77] }
 0x1c3   :  { %11564 = vmatprep.subr.bf16.mxu1 %v23633_v36  ;;  %v14439_v34 = vcombine.low %v3842_v37, %v3918_v50  ;;  %v17886_v32 = vcombine.low %v2695_v33, %v2695_v33  ;;  %v17888_v6 = vcombine.high %v2695_v33, %v2695_v33  ;;  %v23637_v24 = vcombine.high %v23635_v9, %v23636_v57  ;;  %v15614_v20 = vld.sshfl [vmem:[#allocation2 + $0xa8] sm:$0xf pattern:$0x76325410] }
 0x1c4   :  { %11516 = vmatpush1.bf16.msra.mxu0 %v23634_v23  ;;  %v17904_v25 = vrot.slane %v14426_v11, %v23611_v10  ;;  %v17908_v7 = vcombine.low %v2697_v47, %v2697_v47  ;;  %v2948_v42 = vshrl.u32 %v14310_v45, 16  ;;  %v2950_v51 = vshll.u32 %v14310_v45, 16  ;;  %v2673_v60 = vld [vmem:[#allocation2 + $0xb0] sm:$0x3]  ;;  %v2686_v53 = vld [vmem:[#allocation2 + $0x8c] sm:$0x3] }
 0x1c5   :  { %11517 = vmatprep.subr.bf16.mxu0 %v23637_v24  ;;  %v23638_v30 = vcombine.low %v23631_v46, %v23632_v54  ;;  %v17914_v56 = vrot.slane %v14428_v21, %v23611_v10  ;;  %v14418_v48 = vcombine.low %v2671_v35, %v17906_v62  ;;  %v5462_v5 = vrot.slane %v14439_v34, %v23611_v10  ;;  %v17923_v12 = vld [vmem:[#allocation2 + $0xb4] sm:$0x33]  ;;  %v23645_v46 = vld [vmem:[#allocation83_spill] sm:$0xff]  ;;  %v23649_v35 = vld [vmem:[#allocation80_spill] sm:$0xff] }
 0x1c6   :  { %v17918_v61 = vcombine.high %v2697_v47, %v2697_v47  ;;  %v23641_v8 = vcombine.high %v23639_v39, %v23640_v4  ;;  %v14440_v45 = vcombine.low %v15613_v3, %v15614_v20  ;;  %v2952_v43 = vrot.slane %v2950_v51, 1  ;;  %v23644_v47 = vld [vmem:[#allocation82_spill] sm:$0xff]  ;;  %v23648_v24 = vld [vmem:[#allocation79_spill] sm:$0xff] }
 0x1c7   :  { %11565 = vmatpush1.bf16.msra.mxu1 %v23638_v30  ;;  %v2957_v33 = vshll.u32 %v14311_v1, 16  ;;  %v23642_v29 = vcombine.low %v23635_v9, %v23636_v57  ;;  %v17932_v13 = vcombine.high %v17904_v25, %v17914_v56  ;;  %v3994_v16 = vrot.slane %v14418_v48, %v23611_v10 }
 0x1c8   :  { %11566 = vmatprep.subr.bf16.mxu1 %v23641_v8  ;;  %v14420_v37 = vcombine.low %v2673_v60, %v17923_v12  ;;  %v2955_v50 = vshrl.u32 %v14311_v1, 16  ;;  %v23646_v54 = vcombine.high %v23644_v47, %v23645_v46  ;;  %v5469_v36 = vrot.slane %v14440_v45, %v23611_v10 }
 0x1c9   :  { %11518 = vmatpush1.bf16.msra.mxu0 %v23642_v29  ;;  %23643 = vst [vmem:[#allocation32_spill] sm:$0xff] %v17932_v13  ;;  %v2953_v11 = vor.u32 %v2952_v43, %v2948_v42  ;;  %v2959_v23 = vrot.slane %v2957_v33, 1  ;;  %v2969_v3 = vshrl.u32 %v17879_v26, 16  ;;  %v23647_v21 = vcombine.low %v23639_v39, %v23640_v4 }
 0x1ca   :  { %11519 = vmatprep.subr.bf16.mxu0 %v23646_v54  ;;  %v4070_v34 = vrot.slane %v14420_v37, %v23611_v10  ;;  %v2971_v9 = vshll.u32 %v17879_v26, 16  ;;  %v2976_v1 = vshrl.u32 %v17881_v0, 16  ;;  %v2978_v57 = vshll.u32 %v17881_v0, 16 }
 0x1cb   :  { %11567 = vmatpush1.bf16.msra.mxu1 %v23647_v21  ;;  %v23650_v51 = vcombine.high %v23648_v24, %v23649_v35  ;;  %v17952_v42 = vcombine.high %v17852_v27, %v5469_v36  ;;  %v17955_v30 = vcombine.low %v17852_v27, %v5469_v36  ;;  %v2960_v20 = vor.u32 %v2959_v23, %v2955_v50  ;;  %v17984_v23 = vld [vmem:[%s23239_s3 + $0xf40] sm:$0xff] }
 0x1cc   :  { %v2990_v60 = vshrl.u32 %v17886_v32, 16  ;;  %v23653_v26 = vcombine.low %v23644_v47, %v23645_v46  ;;  %v14441_v48 = vcombine.low %v3994_v16, %v4070_v34  ;;  %v2973_v39 = vrot.slane %v2971_v9, 1  ;;  %v23656_v47 = vld [vmem:[#allocation84_spill] sm:$0xff] }
 0x1cd   :  { %11568 = vmatprep.subr.bf16.mxu1 %v23650_v51  ;;  %23651 = vst [vmem:[#allocation5_spill] sm:$0xff] %v17952_v42  ;;  %23652 = vst [vmem:[#allocation6_spill] sm:$0xff] %v17955_v30  ;;  %v2980_v0 = vrot.slane %v2978_v57, 1  ;;  %v2992_v4 = vshll.u32 %v17886_v32, 16  ;;  %11445 = vmatprep.mubr.bf16.mxu0 %v17952_v42  ;;  %v23654_v8 = vcombine.high %v17293_v58, %v17298_v28  ;;  %v2997_v27 = vshrl.u32 %v17888_v6, 16  ;;  %v17996_v57 = vld [vmem:[%s23239_s3 + $0xf60] sm:$0xff] }
 0x1ce   :  { %11520 = vmatpush1.bf16.msra.mxu0 %v23653_v26  ;;  %v2999_v45 = vshll.u32 %v17888_v6, 16  ;;  %v3011_v43 = vshrl.u32 %v17908_v7, 16  ;;  %v3013_v33 = vshll.u32 %v17908_v7, 16  ;;  %v23655_v29 = vcombine.low %v23648_v24, %v23649_v35  ;;  %v18019_v26 = vld [vmem:[%s23239_s3 + $0xf20] sm:$0xff] }
 0x1cf   :  { %11521 = vmatprep.subr.bf16.mxu0 %v23654_v8  ;;  %11446 = vmatmul.mubr.bf16.gmra.mxu0 %v17955_v30  ;;  %v5476_v32 = vrot.slane %v14441_v48, %v23611_v10  ;;  %v2974_v16 = vor.u32 %v2973_v39, %v2969_v3  ;;  %v2981_v37 = vor.u32 %v2980_v0, %v2976_v1  ;;  %v2994_v50 = vrot.slane %v2992_v4, 1  ;;  %v18024_v48 = vld [vmem:[%s23239_s3 + $0xa80] sm:$0xff] }
 0x1d0   :  { %11569 = vmatpush1.bf16.msra.mxu1 %v23655_v29  ;;  %v23657_v46 = vcombine.high %v17275_v31, %v23656_v47  ;;  %11541 = vmatprep.mubr.bf16.mxu0 %v17932_v13  ;;  %v3001_v6 = vrot.slane %v2999_v45, 1  ;;  %v3015_v54 = vrot.slane %v3013_v33, 1  ;;  %v3018_v7 = vshrl.u32 %v17918_v61, 16  ;;  %v23667_v45 = vld [vmem:[#allocation87_spill] sm:$0xff]  ;;  %v2703_v13 = vld [vmem:[#allocation2 + $0x90] sm:$0x77] }
 0x1d1   :  { %v3020_v36 = vshll.u32 %v17918_v61, 16  ;;  %v23658_v3 = vcombine.low %v17293_v58, %v17298_v28  ;;  %v17989_v21 = vcombine.high %v5462_v5, %v5476_v32  ;;  %v17991_v34 = vcombine.low %v5462_v5, %v5476_v32  ;;  %v18001_v61 = vld [vmem:[%s23239_s3 + $0xac0] sm:$0xff]  ;;  %v23661_v28 = vld [vmem:[#allocation88_spill] sm:$0xff]  ;;  %v23662_v5 = vld [vmem:[#allocation89_spill] sm:$0xff] }
 0x1d2   :  { %11570 = vmatprep.subr.bf16.mxu1 %v23657_v46  ;;  %v2995_v9 = vor.u32 %v2994_v50, %v2990_v60  ;;  %v3541_v1 = vcombine.low %v2953_v11, %v2960_v20  ;;  %v18006_v58 = vld [vmem:[%s23239_s3 + $0xae0] sm:$0xff]  ;;  %v23663_v24 = vcombine.high %v23661_v28, %v23662_v5  ;;  %v3002_v11 = vor.u32 %v3001_v6, %v2997_v27  ;;  %v2684_v46 = vld [vmem:[#allocation2 + $0x74] sm:$0x3] }
 0x1d3   :  { %11522 = vmatpush1.bf16.msra.mxu0 %v23658_v3  ;;  %23659 = vst [vmem:[#allocation36_spill] sm:$0xff] %v17989_v21  ;;  %23660 = vst [vmem:[#allocation34_spill] sm:$0xff] %v17991_v34  ;;  %v3016_v35 = vor.u32 %v3015_v54, %v3011_v43  ;;  %v3022_v51 = vrot.slane %v3020_v36, 1  ;;  %v3617_v20 = vcombine.low %v2974_v16, %v2981_v37  ;;  %v18014_v60 = vld [vmem:[%s23239_s3 + $0xf00] sm:$0xff]  ;;  %11498 = vmatprep.mubr.bf16.mxu1 %v17989_v21 }
 0x1d4   :  { %11523 = vmatprep.subr.bf16.mxu0 %v23663_v24  ;;  %v23664_v39 = vcombine.low %v17275_v31, %v23656_v47  ;;  %v18031_v0 = vcombine.low %v17904_v25, %v17914_v56  ;;  %v3555_v4 = vrot.slane %v3541_v1, %v23611_v10  ;;  %v18040_v27 = vld [vmem:[%s23239_s3 + $0xaa0] sm:$0xff]  ;;  %v23666_v56 = vld [vmem:[#allocation86_spill] sm:$0xff]  ;;  %11499 = vmatmul.mubr.bf16.gmra.mxu1 %v17991_v34  ;;  %v23671_v1 = vld [vmem:[#allocation93_spill] sm:$0xff] }
 0x1d5   :  { %v18045_v31 = vld [vmem:[%s23239_s3 + $0xec0] sm:$0xff]  ;;  %v23668_v43 = vcombine.high %v23666_v56, %v23667_v45  ;;  %v3023_v33 = vor.u32 %v3022_v51, %v3018_v7  ;;  %v3631_v29 = vrot.slane %v3617_v20, %v23611_v10  ;;  %v3693_v32 = vcombine.low %v2995_v9, %v3002_v11  ;;  %v23670_v9 = vld [vmem:[#allocation92_spill] sm:$0xff] }
 0x1d6   :  { %11571 = vmatpush1.bf16.msra.mxu1 %v23664_v39  ;;  %23665 = vst [vmem:[#allocation41_spill] sm:$0xff] %v18031_v0  ;;  %v18050_v25 = vld [vmem:[%s23239_s3 + $0xee0] sm:$0xff]  ;;  %v23669_v50 = vcombine.low %v23661_v28, %v23662_v5  ;;  %v18079_v7 = vrot.slane %v2964_v19, 1  ;;  %v23672_v28 = vcombine.high %v23670_v9, %v23671_v1  ;;  %v23673_v51 = vcombine.low %v23666_v56, %v23667_v45 }
 0x1d7   :  { %11572 = vmatprep.subr.bf16.mxu1 %v23668_v43  ;;  %v18060_v16 = vld [vmem:[%s23239_s3 + $0xa40] sm:$0xff]  ;;  %v3769_v36 = vcombine.low %v3016_v35, %v3023_v33  ;;  %v14427_v3 = vcombine.low %v3555_v4, %v3631_v29  ;;  %v3707_v20 = vrot.slane %v3693_v32, %v23611_v10  ;;  %v23674_v29 = vld [vmem:[#allocation90_spill] sm:$0xff]  ;;  %v14299_v24 = vcombine.high %v17838_v55, %v17838_v55 }
 0x1d8   :  { %11524 = vmatpush1.bf16.msra.mxu0 %v23669_v50  ;;  %v18075_v54 = vld [vmem:[%s23239_s3 + $0xa60] sm:$0xff]  ;;  %v14302_v55 = vcombine.high %v17845_v49, %v17845_v49  ;;  %v14305_v5 = vcombine.high %v17906_v62, %v17906_v62  ;;  %v14308_v41 = vcombine.high %v17923_v12, %v17923_v12  ;;  %v23686_v12 = vcombine.high %v17451_v59, %v17456_v2 }
 0x1d9   :  { %11525 = vmatprep.subr.bf16.mxu0 %v23672_v28  ;;  %v18091_v11 = vld [vmem:[%s23239_s3 + $0xe80] sm:$0xff]  ;;  %v3783_v28 = vrot.slane %v3769_v36, %v23611_v10  ;;  %v23677_v36 = vcombine.low %v23670_v9, %v23671_v1  ;;  %v14415_v49 = vcombine.low %v14299_v24, %v2684_v46  ;;  %v14326_v62 = vcombine.high %v2701_v44, %v2701_v44 }
 0x1da   :  { %v18096_v19 = vld [vmem:[%s23239_s3 + $0xea0] sm:$0xff]  ;;  %11573 = vmatpush1.bf16.msra.mxu1 %v23673_v51  ;;  %v5336_v51 = vrot.slane %v14427_v3, %v23611_v10 }
 0x1db   :  { %v18101_v35 = vld [vmem:[%s23239_s3 + $0xa00] sm:$0xff]  ;;  %v14429_v1 = vcombine.low %v3707_v20, %v3783_v28 }
 0x1dc   :  { %v18116_v33 = vld [vmem:[%s23239_s3 + $0xa20] sm:$0xff]  ;;  %11526 = vmatpush2.bf16.msra.mxu0 %v23677_v36 }
 0x1dd   :  { %v18121_v56 = vld [vmem:[%s23239_s3 + $0xe40] sm:$0xff] }
 0x1de   :  { %v18126_v45 = vld [vmem:[%s23239_s3 + $0xe60] sm:$0xff] }
 0x1df   :  { %v23675_v32 = vld [vmem:[#allocation91_spill] sm:$0xff] }
 0x1e0   :  { %v23676_v50 = vcombine.high %v23674_v29, %v23675_v32  ;;  %v18140_v4 = vld [vmem:[%s23239_s3 + $0xe00] sm:$0xff]  ;;  %v23680_v28 = vcombine.low %v23674_v29, %v23675_v32 }
 0x1e1   :  { %v18145_v39 = vld [vmem:[%s23239_s3 + $0xe20] sm:$0xff] }
 0x1e2   :  { %11574 = vmatprep.subr.bf16.mxu1 %v23676_v50  ;;  %v18161_v47 = vld [vmem:[%s23239_s3 + $0x11c0] sm:$0xff]  ;;  %v23681_v50 = vld [vmem:[#allocation94_spill] sm:$0xff] }
 0x1e3   :  { %v18166_v9 = vld [vmem:[%s23239_s3 + $0x11e0] sm:$0xff]  ;;  %11575 = vmatpush1.bf16.msra.mxu1 %v23680_v28  ;;  %v5350_v28 = vrot.slane %v14429_v1, %v23611_v10 }
 0x1e4   :  { %v23678_v36 = vld [vmem:[#allocation95_spill] sm:$0xff] }
 0x1e5   :  { %v23679_v3 = vcombine.high %v17410_v40, %v23678_v36  ;;  %v18180_v43 = vld [vmem:[%s23239_s3 + $0x1180] sm:$0xff]  ;;  %v23684_v63 = vcombine.low %v17410_v40, %v23678_v36  ;;  %v18229_v21 = vcombine.high %v5336_v51, %v5350_v28  ;;  %v2690_v40 = vld [vmem:[#allocation2 + $0xbc] sm:$0x3] }
 0x1e6   :  { %v18185_v20 = vld [vmem:[%s23239_s3 + $0x11a0] sm:$0xff]  ;;  %v14421_v24 = vcombine.low %v14308_v41, %v2690_v40  ;;  %v23692_v41 = vcombine.low %v17451_v59, %v17456_v2 }
 0x1e7   :  { %11527 = vmatprep.subr.bf16.mxu0 %v23679_v3  ;;  %v18201_v6 = vld [vmem:[%s23239_s3 + $0x15c0] sm:$0xff]  ;;  %v23682_v3 = vld [vmem:[#allocation28_spill] sm:$0xff]  ;;  %23685 = vst [vmem:[#allocation9_spill] sm:$0xff] %v18229_v21  ;;  %11594 = vmatprep.mubr.bf16.mxu1 %v18229_v21 }
 0x1e8   :  { %v18206_v29 = vld [vmem:[%s23239_s3 + $0x15e0] sm:$0xff]  ;;  %v23683_v37 = vcombine.high %v23681_v50, %v23682_v3  ;;  %11528 = vmatpush2.bf16.msra.mxu0 %v23684_v63  ;;  %v14417_v63 = vcombine.low %v14302_v55, %v2686_v53  ;;  %v23688_v46 = vcombine.low %v23681_v50, %v23682_v3  ;;  %v3852_v55 = vrot.slane %v14415_v49, %v23611_v10 }
 0x1e9   :  { %v18208_v32 = vld [vmem:[#allocation2 + $0x20] ss:$0 sps:$4 sm:$0x77]   ;;  %v2688_v34 = vld [vmem:[#allocation2 + $0xa4] sm:$0x3]  ;;  %11529 = vmatprep.subr.bf16.mxu0 %v23686_v12  ;;  %v4080_v40 = vrot.slane %v14421_v24, %v23611_v10 }
 0x1ea   :  { %11576 = vmatprep.subr.bf16.mxu1 %v23683_v37  ;;  %v2699_v8 = vld [vmem:[#allocation2 + $0x60] sm:$0x77]  ;;  %v14419_v36 = vcombine.low %v14305_v5, %v2688_v34  ;;  %v18236_v37 = vcombine.low %v5336_v51, %v5350_v28  ;;  %v23690_v34 = vld [vmem:[#allocation4_spill] sm:$0xff]  ;;  %v3928_v51 = vrot.slane %v14417_v63, %v23611_v10  ;;  %v14328_v63 = vcombine.low %v2703_v13, %v2703_v13 }
 0x1eb   :  { %11577 = vmatpush1.bf16.msra.mxu1 %v23688_v46  ;;  %v14322_v30 = vcombine.low %v2699_v8, %v2699_v8  ;;  %v23689_v53 = vld [vmem:[#allocation3_spill] sm:$0xff]  ;;  %v2705_v28 = vld [vmem:[#allocation2 + $0xa8] sm:$0x77]  ;;  %v14323_v12 = vcombine.high %v2699_v8, %v2699_v8  ;;  %v14325_v46 = vcombine.low %v2701_v44, %v2701_v44  ;;  %v23697_v8 = vcombine.low %v17893_v18, %v17898_v38 }
 0x1ec   :  { %23687 = vst [vmem:[#allocation38_spill] sm:$0xff] %v18236_v37  ;;  %v23691_v5 = vcombine.high %v23689_v53, %v23690_v34  ;;  %11530 = vmatpush2.bf16.msra.mxu0 %v23692_v41  ;;  %v4004_v3 = vrot.slane %v14419_v36, %v23611_v10  ;;  %v14442_v49 = vcombine.low %v3852_v55, %v3928_v51  ;;  %v23695_v44 = vld [vmem:[#allocation31_spill] sm:$0xff] }
 0x1ed   :  { %v23694_v2 = vcombine.low %v23689_v53, %v23690_v34  ;;  %v14329_v36 = vcombine.high %v2703_v13, %v2703_v13  ;;  %v14331_v24 = vcombine.low %v2705_v28, %v2705_v28  ;;  %v3034_v41 = vshll.u32 %v14322_v30, 16 }
 0x1ee   :  { %11578 = vmatprep.subr.bf16.mxu1 %v23691_v5  ;;  %v23693_v5 = vcombine.high %v17893_v18, %v17898_v38  ;;  %v14444_v59 = vcombine.low %v4004_v3, %v4080_v40  ;;  %v23696_v50 = vcombine.high %v17468_v14, %v23695_v44  ;;  %v3032_v55 = vshrl.u32 %v14322_v30, 16 }
 0x1ef   :  { %11579 = vmatpush2.bf16.msra.mxu1 %v23694_v2  ;;  %v3041_v51 = vshll.u32 %v14323_v12, 16  ;;  %v3055_v21 = vshll.u32 %v14325_v46, 16  ;;  %v3036_v1 = vrot.slane %v3034_v41, 1  ;;  %v3039_v42 = vshrl.u32 %v14323_v12, 16 }
 0x1f0   :  { %11531 = vmatprep.subr.bf16.mxu0 %v23693_v5  ;;  %11580 = vmatprep.subr.bf16.mxu1 %v23696_v50  ;;  %v14332_v5 = vcombine.high %v2705_v28, %v2705_v28  ;;  %v3053_v53 = vshrl.u32 %v14325_v46, 16  ;;  %v3062_v34 = vshll.u32 %v14326_v62, 16  ;;  %v23698_v13 = vcombine.high %v18001_v61, %v18006_v58 }
 0x1f1   :  { %11532 = vmatpush2.bf16.msra.mxu0 %v23697_v8  ;;  %v5505_v3 = vrot.slane %v14444_v59, %v23611_v10  ;;  %v3043_v40 = vrot.slane %v3041_v51, 1  ;;  %v3057_v50 = vrot.slane %v3055_v21, 1  ;;  %v3076_v28 = vshll.u32 %v14328_v63, 16 }
 0x1f2   :  { %11533 = vmatprep.subr.bf16.mxu0 %v23698_v13  ;;  %v23699_v30 = vcombine.low %v17468_v14, %v23695_v44  ;;  %v3037_v2 = vor.u32 %v3036_v1, %v3032_v55  ;;  %v3060_v18 = vshrl.u32 %v14326_v62, 16  ;;  %v3064_v38 = vrot.slane %v3062_v34, 1 }
 0x1f3   :  { %v3074_v8 = vshrl.u32 %v14328_v63, 16  ;;  %v23700_v12 = vcombine.high %v17984_v23, %v17996_v57  ;;  %v3044_v46 = vor.u32 %v3043_v40, %v3039_v42  ;;  %v3058_v41 = vor.u32 %v3057_v50, %v3053_v53  ;;  %v18290_v53 = vld [vmem:[%s23239_s3 + $0x1140] sm:$0xff] }
 0x1f4   :  { %11581 = vmatpush2.bf16.msra.mxu1 %v23699_v30  ;;  %v3078_v13 = vrot.slane %v3076_v28, 1  ;;  %v3083_v52 = vshll.u32 %v14329_v36, 16  ;;  %v23701_v21 = vcombine.low %v18001_v61, %v18006_v58  ;;  %v5491_v59 = vrot.slane %v14442_v49, %v23611_v10  ;;  %v18295_v61 = vld [vmem:[%s23239_s3 + $0x1160] sm:$0xff]  ;;  %v16002_v28 = vld [vmem:[#allocation2 + $0x38] ss:$0 sps:$4 sm:$0x77]  }
 0x1f5   :  { %11582 = vmatprep.subr.bf16.mxu1 %v23700_v12  ;;  %v3065_v14 = vor.u32 %v3064_v38, %v3060_v18  ;;  %v3081_v44 = vshrl.u32 %v14329_v36, 16  ;;  %v3097_v1 = vshll.u32 %v14331_v24, 16  ;;  %v23702_v62 = vcombine.high %v18024_v48, %v18040_v27  ;;  %v18300_v58 = vld [vmem:[%s23239_s3 + $0x1580] sm:$0xff] }
 0x1f6   :  { %11534 = vmatpush2.bf16.msra.mxu0 %v23701_v21  ;;  %v3079_v63 = vor.u32 %v3078_v13, %v3074_v8  ;;  %v3085_v55 = vrot.slane %v3083_v52, 1  ;;  %v3104_v51 = vshll.u32 %v14332_v5, 16  ;;  %v3845_v42 = vcombine.low %v3037_v2, %v3044_v46  ;;  %v18310_v50 = vld [vmem:[%s23239_s3 + $0x15a0] sm:$0xff] }
 0x1f7   :  { %11535 = vmatprep.subr.bf16.mxu0 %v23702_v62  ;;  %v23703_v52 = vcombine.low %v17984_v23, %v17996_v57  ;;  %v18305_v49 = vcombine.high %v5491_v59, %v5505_v3  ;;  %v3095_v36 = vshrl.u32 %v14331_v24, 16  ;;  %v3099_v34 = vrot.slane %v3097_v1, 1  ;;  %v16003_v57 = vld [vmem:[#allocation2 + $0x50] ss:$0 sps:$4 sm:$0x77]  }
 0x1f8   :  { %v3921_v40 = vcombine.low %v3058_v41, %v3065_v14  ;;  %v23705_v30 = vcombine.high %v18014_v60, %v18019_v26  ;;  %v3086_v2 = vor.u32 %v3085_v55, %v3081_v44  ;;  %v3102_v18 = vshrl.u32 %v14332_v5, 16  ;;  %v18340_v62 = vld [vmem:[#allocation2 + $0x3c] sm:$0x77] }
 0x1f9   :  { %11583 = vmatpush2.bf16.msra.mxu1 %v23703_v52  ;;  %23704 = vst [vmem:[#allocation39_spill] sm:$0xff] %v18305_v49  ;;  %v3106_v38 = vrot.slane %v3104_v51, 1  ;;  %v18315_v23 = vcombine.low %v5491_v59, %v5505_v3  ;;  %v23707_v24 = vcombine.low %v18024_v48, %v18040_v27  ;;  %v3100_v8 = vor.u32 %v3099_v34, %v3095_v36  ;;  %v18331_v27 = vld [vmem:[#allocation2 + $0xc] sm:$0x77]  ;;  %v18333_v59 = vld [vmem:[#allocation2 + $0x24] sm:$0x77] }
 0x1fa   :  { %11584 = vmatprep.subr.bf16.mxu1 %v23705_v30  ;;  %v3859_v12 = vrot.slane %v3845_v42, %v23611_v10  ;;  %v3935_v46 = vrot.slane %v3921_v40, %v23611_v10  ;;  %v15006_v41 = vcombine.low %v18290_v53, %v18295_v61  ;;  %v23708_v13 = vcombine.high %v18060_v16, %v18075_v54 }
 0x1fb   :  { %23706 = vst [vmem:[#allocation7_spill] sm:$0xff] %v18315_v23  ;;  %11536 = vmatpush2.bf16.msra.mxu0 %v23707_v24  ;;  %v3107_v5 = vor.u32 %v3106_v38, %v3102_v18  ;;  %v3997_v3 = vcombine.low %v3079_v63, %v3086_v2  ;;  %v15007_v21 = vcombine.high %v18290_v53, %v18295_v61  ;;  %v18342_v63 = vld [vmem:[#allocation2 + $0x54] sm:$0x77]  ;;  %v23710_v55 = vshll.u32 %v18208_v32, 16 }
 0x1fc   :  { %11537 = vmatprep.subr.bf16.mxu0 %v23708_v13  ;;  %v15142_v48 = vcombine.low %v18300_v58, %v18310_v50  ;;  %v23709_v14 = vcombine.low %v18014_v60, %v18019_v26  ;;  %v14443_v44 = vcombine.low %v3859_v12, %v3935_v46  ;;  %v15143_v1 = vcombine.high %v18300_v58, %v18310_v50 }
 0x1fd   :  { %v2987_v51 = vrot.slane %v23710_v55, 1  ;;  %v3006_v42 = vshll.u32 %v16002_v28, 16  ;;  %v23711_v52 = vcombine.high %v18045_v31, %v18050_v25  ;;  %v4073_v36 = vcombine.low %v3100_v8, %v3107_v5 }
 0x1fe   :  { %11585 = vmatpush2.bf16.msra.mxu1 %v23709_v14  ;;  %v23712_v60 = vshrl.u32 %v17840_v15, 16  ;;  %v3004_v34 = vshrl.u32 %v16002_v28, 16  ;;  %v3027_v40 = vshll.u32 %v16003_v57, 16  ;;  %v23713_v30 = vcombine.low %v18060_v16, %v18075_v54 }
 0x1ff   :  { %11586 = vmatprep.subr.bf16.mxu1 %v23711_v52  ;;  %v4011_v2 = vrot.slane %v3997_v3, %v23611_v10  ;;  %v3008_v18 = vrot.slane %v3006_v42, 1  ;;  %v14334_v38 = vcombine.low %v18331_v27, %v18331_v27  ;;  %v14337_v24 = vcombine.low %v18333_v59, %v18333_v59 }
 0x200   :  { %v18352_v26 = vor.u32 %v18079_v7, %v23712_v60  ;;  %11538 = vmatpush2.bf16.msra.mxu0 %v23713_v30  ;;  %v23714_v15 = vcombine.high %v18101_v35, %v18116_v33  ;;  %v4087_v7 = vrot.slane %v4073_v36, %v23611_v10  ;;  %v3029_v28 = vrot.slane %v3027_v40, 1  ;;  %v18381_v60 = vld [vmem:[#allocation2 + $0x14] ss:$0 sps:$4 sm:$0x77]  }
 0x201   :  { %v14340_v16 = vcombine.low %v18340_v62, %v18340_v62  ;;  %v14343_v54 = vcombine.low %v18342_v63, %v18342_v63  ;;  %v23715_v8 = vcombine.low %v18045_v31, %v18050_v25  ;;  %v18374_v12 = vrot.slane %v14443_v44, %v23611_v10 }
 0x202   :  { %11539 = vmatprep.subr.bf16.mxu0 %v23714_v15  ;;  %v23716_v46 = vshrl.u32 %v18208_v32, 16  ;;  %v3025_v5 = vshrl.u32 %v16003_v57, 16  ;;  %v3182_v3 = vshll.u32 %v14334_v38, 16  ;;  %v23717_v14 = vcombine.high %v18091_v11, %v18096_v19  ;;  %v18389_v57 = vld [vmem:[%s23239_s3 + $0x1100] sm:$0xff] }
 0x203   :  { %11587 = vmatpush2.bf16.msra.mxu1 %v23715_v8  ;;  %v14445_v55 = vcombine.low %v4011_v2, %v4087_v7  ;;  %v3009_v42 = vor.u32 %v3008_v18, %v3004_v34  ;;  %v3180_v52 = vshrl.u32 %v14334_v38, 16  ;;  %v3203_v36 = vshll.u32 %v14337_v24, 16  ;;  %v18394_v34 = vld [vmem:[%s23239_s3 + $0x1120] sm:$0xff] }
 0x204   :  { %v2988_v13 = vor.u32 %v2987_v51, %v23716_v46  ;;  %11588 = vmatprep.subr.bf16.mxu1 %v23717_v14  ;;  %v23718_v31 = vcombine.low %v18101_v35, %v18116_v33  ;;  %v3184_v25 = vrot.slane %v3182_v3, 1  ;;  %v3201_v44 = vshrl.u32 %v14337_v24, 16 }
 0x205   :  { %v3224_v32 = vshll.u32 %v14340_v16, 16  ;;  %v3245_v51 = vshll.u32 %v14343_v54, 16  ;;  %v23719_v40 = vcombine.high %v18161_v47, %v18166_v9  ;;  %v18400_v35 = vrot.slane %v14445_v55, %v23611_v10 }
 0x206   :  { %11540 = vmatpush2.bf16.msra.mxu0 %v23718_v31  ;;  %v3030_v33 = vor.u32 %v3029_v28, %v3025_v5  ;;  %v3205_v30 = vrot.slane %v3203_v36, 1  ;;  %v3222_v2 = vshrl.u32 %v14340_v16, 16  ;;  %v23720_v18 = vcombine.low %v18091_v11, %v18096_v19  ;;  %v18416_v11 = vld [vmem:[%s23239_s3 + $0x1540] sm:$0xff] }
 0x207   :  { %11615 = vmatprep.subr.bf16.mxu0 %v23719_v40  ;;  %v3185_v38 = vor.u32 %v3184_v25, %v3180_v52  ;;  %v3226_v24 = vrot.slane %v3224_v32, 1  ;;  %v3243_v15 = vshrl.u32 %v14343_v54, 16  ;;  %v3247_v7 = vrot.slane %v3245_v51, 1  ;;  %v18421_v19 = vld [vmem:[%s23239_s3 + $0x1560] sm:$0xff] }
 0x208   :  { %11589 = vmatpush2.bf16.msra.mxu1 %v23720_v18  ;;  %v23721_v8 = vcombine.high %v18121_v56, %v18126_v45  ;;  %v3206_v46 = vor.u32 %v3205_v30, %v3201_v44  ;;  %v14998_v28 = vcombine.low %v18389_v57, %v18394_v34  ;;  %v14999_v16 = vcombine.high %v18389_v57, %v18394_v34  ;;  %v16011_v51 = vld [vmem:[#allocation2 + $0x2c] ss:$0 sps:$4 sm:$0x77]   ;;  %v16013_v30 = vld [vmem:[#allocation2 + $0x44] ss:$0 sps:$4 sm:$0x77]  }
 0x209   :  { %11542 = vmatmul.mubr.bf16.vlgmr.msra.gmra.mxu0 %v18031_v0  ;;  %v23722_v54 = vcombine.low %v18161_v47, %v18166_v9  ;;  %v3227_v5 = vor.u32 %v3226_v24, %v3222_v2  ;;  %v3248_v3 = vor.u32 %v3247_v7, %v3243_v15  ;;  %v3557_v14 = vcombine.low %v18352_v26, %v3185_v38  ;;  %v4659_v57 = vld [vmem:[%s23239_s3 + $0x1080] sm:$0xff] }
 0x20a   :  { %11590 = vmatprep.subr.bf16.mxu1 %v23721_v8  ;;  %11551 = vmatprep.mubr.bf16.mxu0 %v18305_v49  ;;  %v3196_v55 = vshll.u32 %v18381_v60, 16  ;;  %v23723_v52 = vcombine.high %v18180_v43, %v18185_v20  ;;  %v18434_v36 = vcombine.high %v18374_v12, %v18400_v35  ;;  %v3633_v31 = vcombine.low %v2988_v13, %v3206_v46  ;;  %v4663_v34 = vld [vmem:[%s23239_s3 + $0x10a0] sm:$0xff] }
 0x20b   :  { %11616 = vmatpush1.bf16.msra.mxu0 %v23722_v54  ;;  %v14335_v25 = vcombine.high %v18331_v27, %v18331_v27  ;;  %v14338_v47 = vcombine.high %v18333_v59, %v18333_v59  ;;  %v23725_v9 = vcombine.low %v18121_v56, %v18126_v45  ;;  %v3709_v26 = vcombine.low %v3009_v42, %v3227_v5  ;;  %v16015_v54 = vld [vmem:[#allocation2 + $0x5c] ss:$0 sps:$4 sm:$0x77]  }
 0x20c   :  { %11617 = vmatprep.subr.bf16.mxu0 %v23723_v52  ;;  %23724 = vst [vmem:[#allocation10_spill] sm:$0xff] %v18434_v36  ;;  %v3785_v44 = vcombine.low %v3030_v33, %v3248_v3  ;;  %v15135_v32 = vcombine.high %v18416_v11, %v18421_v19  ;;  %v3194_v40 = vshrl.u32 %v18381_v60, 16  ;;  %v23726_v13 = vcombine.high %v18140_v4, %v18145_v39 }
 0x20d   :  { %11591 = vmatpush2.bf16.msra.mxu1 %v23725_v9  ;;  %v3565_v27 = vrot.slane %v3557_v14, %v23611_v10  ;;  %v3641_v59 = vrot.slane %v3633_v31, %v23611_v10  ;;  %v14341_v56 = vcombine.high %v18340_v62, %v18340_v62  ;;  %v3189_v45 = vshll.u32 %v14335_v25, 16 }
 0x20e   :  { %11592 = vmatprep.subr.bf16.mxu1 %v23726_v13  ;;  %v23727_v42 = vcombine.low %v18180_v43, %v18185_v20  ;;  %v3717_v33 = vrot.slane %v3709_v26, %v23611_v10  ;;  %v3793_v60 = vrot.slane %v3785_v44, %v23611_v10  ;;  %v14344_v2 = vcombine.high %v18342_v63, %v18342_v63 }
 0x20f   :  { %v3198_v18 = vrot.slane %v3196_v55, 1  ;;  %v14430_v38 = vcombine.low %v3565_v27, %v3641_v59  ;;  %v3187_v62 = vshrl.u32 %v14335_v25, 16  ;;  %v3191_v24 = vrot.slane %v3189_v45, 1 }
 0x210   :  { %11618 = vmatpush1.bf16.msra.mxu0 %v23727_v42  ;;  %v3210_v15 = vshll.u32 %v14338_v47, 16  ;;  %v23728_v43 = vcombine.low %v18140_v4, %v18145_v39  ;;  %v14432_v20 = vcombine.low %v3717_v33, %v3793_v60  ;;  %v3208_v7 = vshrl.u32 %v14338_v47, 16  ;;  %v18504_v42 = vld [vmem:[%s23239_s3 + $0x1500] sm:$0xff] }
 0x211   :  { %11619 = vmatprep.subr.bf16.mxu0 %v15007_v21  ;;  %v3215_v8 = vshrl.u32 %v16011_v51, 16  ;;  %v3217_v46 = vshll.u32 %v16011_v51, 16  ;;  %v23729_v63 = vcombine.high %v18201_v6, %v18206_v29  ;;  %11552 = vmatmul.mubr.bf16.gmra.mxu0 %v18315_v23  ;;  %v18471_v21 = vrot.slane %v14430_v38, %v23611_v10  ;;  %v4671_v51 = vld [vmem:[%s23239_s3 + $0x10e0] sm:$0xff] }
 0x212   :  { %11593 = vmatpush2.bf16.msra.mxu1 %v23728_v43  ;;  %v3199_v5 = vor.u32 %v3198_v18, %v3194_v40  ;;  %v3212_v3 = vrot.slane %v3210_v15, 1  ;;  %v3231_v14 = vshll.u32 %v14341_v56, 16  ;;  %v18477_v39 = vrot.slane %v14432_v20, %v23611_v10  ;;  %v18543_v43 = vld [vmem:[%s23239_s3 + $0x14c0] sm:$0xff] }
 0x213   :  { %11668 = vmatprep.subr.bf16.mxu1 %v23729_v63  ;;  %v3192_v4 = vor.u32 %v3191_v24, %v3187_v62  ;;  %v3219_v55 = vrot.slane %v3217_v46, 1  ;;  %v3238_v52 = vshll.u32 %v16013_v30, 16  ;;  %v3229_v25 = vshrl.u32 %v14341_v56, 16  ;;  %v18528_v62 = vld [vmem:[%s23239_s3 + $0x1040] sm:$0xff] }
 0x214   :  { %11620 = vmatpush1.bf16.msra.mxu0 %v15006_v41  ;;  %v3213_v31 = vor.u32 %v3212_v3, %v3208_v7  ;;  %v3233_v47 = vrot.slane %v3231_v14, 1  ;;  %v3252_v9 = vshll.u32 %v14344_v2, 16  ;;  %v23730_v26 = vcombine.low %v18201_v6, %v18206_v29  ;;  %v18533_v24 = vld [vmem:[%s23239_s3 + $0x1060] sm:$0xff]  ;;  %v18568_v46 = vld [vmem:[#allocation2 + $0x68] ss:$0 sps:$4 sm:$0x77]  }
 0x215   :  { %11595 = vmatmul.mubr.bf16.vlgmr.msra.gmra.mxu1 %v18236_v37  ;;  %11621 = vmatprep.subr.bf16.mxu0 %v14999_v16  ;;  %v18486_v53 = vcombine.high %v18471_v21, %v18477_v39  ;;  %v3220_v61 = vor.u32 %v3219_v55, %v3215_v8  ;;  %v3236_v41 = vshrl.u32 %v16013_v30, 16  ;;  %v3240_v44 = vrot.slane %v3238_v52, 1  ;;  %v4667_v16 = vld [vmem:[%s23239_s3 + $0x10c0] sm:$0xff] }
 0x216   :  { %11604 = vmatprep.mubr.bf16.mxu1 %v18434_v36  ;;  %11669 = vmatpush1.bf16.msra.mxu1 %v23730_v26  ;;  %v3234_v6 = vor.u32 %v3233_v47, %v3229_v25  ;;  %v3250_v29 = vshrl.u32 %v14344_v2, 16  ;;  %v3254_v40 = vrot.slane %v3252_v9, 1  ;;  %v3259_v13 = vshll.u32 %v16015_v54, 16  ;;  %v18556_v20 = vld [vmem:[%s23239_s3 + $0x1480] sm:$0xff] }
 0x217   :  { %23731 = vst [vmem:[#allocation45_spill] sm:$0xff] %v18486_v53  ;;  %11670 = vmatprep.subr.bf16.mxu1 %v15143_v1  ;;  %11647 = vmatprep.mubr.bf16.mxu0 %v18486_v53  ;;  %v3241_v27 = vor.u32 %v3240_v44, %v3236_v41  ;;  %v3257_v59 = vshrl.u32 %v16015_v54, 16  ;;  %v3558_v56 = vcombine.low %v3192_v4, %v3199_v5  ;;  %v4807_v1 = vld [vmem:[%s23239_s3 + $0x1520] sm:$0xff]  ;;  %v18841_v53 = vld [vmem:[#allocation2 + $0x74] ss:$0 sps:$4 sm:$0x77]  }
 0x218   :  { %11622 = vmatpush1.bf16.msra.mxu0 %v14998_v28  ;;  %v3634_v45 = vcombine.low %v3213_v31, %v3220_v61  ;;  %v3255_v33 = vor.u32 %v3254_v40, %v3250_v29  ;;  %v3261_v60 = vrot.slane %v3259_v13, 1  ;;  %v14990_v30 = vcombine.low %v4667_v16, %v4671_v51  ;;  %v18561_v7 = vld [vmem:[%s23239_s3 + $0x14a0] sm:$0xff] }
 0x219   :  { %v14991_v2 = vcombine.high %v4667_v16, %v4671_v51  ;;  %v18520_v28 = vcombine.low %v18374_v12, %v18400_v35  ;;  %v15134_v18 = vcombine.low %v18416_v11, %v18421_v19  ;;  %v3710_v50 = vcombine.low %v3234_v6, %v3241_v27  ;;  %v18548_v11 = vld [vmem:[%s23239_s3 + $0x14e0] sm:$0xff] }
 0x21a   :  { %11671 = vmatpush1.bf16.msra.mxu1 %v15142_v48  ;;  %v3648_v38 = vrot.slane %v3634_v45, %v23611_v10  ;;  %v3262_v58 = vor.u32 %v3261_v60, %v3257_v59  ;;  %v15127_v48 = vcombine.high %v18504_v42, %v4807_v1  ;;  %v3572_v12 = vrot.slane %v3558_v56, %v23611_v10  ;;  %v18566_v8 = vld [vmem:[%s23239_s3 + $0x1000] sm:$0xff] }
 0x21b   :  { %23732 = vst [vmem:[#allocation8_spill] sm:$0xff] %v18520_v28  ;;  %11672 = vmatprep.subr.bf16.mxu1 %v15135_v32  ;;  %11623 = vmatprep.subr.bf16.mxu0 %v14991_v2  ;;  %v14982_v35 = vcombine.low %v4659_v57, %v4663_v34  ;;  %v14983_v15 = vcombine.high %v4659_v57, %v4663_v34  ;;  %v18574_v5 = vld [vmem:[%s23239_s3 + $0x1020] sm:$0xff]  ;;  %v3048_v27 = vshll.u32 %v18568_v46, 16 }
 0x21c   :  { %11624 = vmatpush1.bf16.msra.mxu0 %v14990_v30  ;;  %v3786_v19 = vcombine.low %v3255_v33, %v3262_v58  ;;  %v14975_v32 = vcombine.high %v18528_v62, %v18533_v24  ;;  %v14431_v63 = vcombine.low %v3572_v12, %v3648_v38  ;;  %v15126_v54 = vcombine.low %v18504_v42, %v4807_v1  ;;  %v18579_v3 = vld [vmem:[%s23239_s3 + $0x1440] sm:$0xff] }
 0x21d   :  { %11605 = vmatmul.mubr.bf16.gmra.mxu1 %v18520_v28  ;;  %11625 = vmatprep.subr.bf16.mxu0 %v14983_v15  ;;  %v18584_v14 = vld [vmem:[%s23239_s3 + $0x1460] sm:$0xff]  ;;  %v3724_v4 = vrot.slane %v3710_v50, %v23611_v10  ;;  %v15119_v52 = vcombine.high %v18543_v43, %v18548_v11  ;;  %v18612_v26 = vcombine.low %v18471_v21, %v18477_v39 }
 0x21e   :  { %11673 = vmatpush1.bf16.msra.mxu1 %v15134_v18  ;;  %v3800_v55 = vrot.slane %v3786_v19, %v23611_v10  ;;  %v18593_v31 = vld [vmem:[%s23239_s3 + $0x13c0] sm:$0xff]  ;;  %v14974_v61 = vcombine.low %v18528_v62, %v18533_v24  ;;  %v14967_v51 = vcombine.high %v18566_v8, %v18574_v5  ;;  %v5372_v59 = vrot.slane %v14431_v63, %v23611_v10 }
 0x21f   :  { %11674 = vmatprep.subr.bf16.mxu1 %v15127_v48  ;;  %v18598_v25 = vld [vmem:[%s23239_s3 + $0x13e0] sm:$0xff]  ;;  %v15118_v56 = vcombine.low %v18543_v43, %v18548_v11  ;;  %v15110_v45 = vcombine.low %v18556_v20, %v18561_v7  ;;  %v15111_v42 = vcombine.high %v18556_v20, %v18561_v7  ;;  %v14966_v2 = vcombine.low %v18566_v8, %v18574_v5 }
 0x220   :  { %v18603_v47 = vld [vmem:[%s23239_s3 + $0x1400] sm:$0xff]  ;;  %11626 = vmatpush1.bf16.msra.mxu0 %v14982_v35  ;;  %v14433_v39 = vcombine.low %v3724_v4, %v3800_v55  ;;  %v15102_v57 = vcombine.low %v18579_v3, %v18584_v14  ;;  %v15103_v34 = vcombine.high %v18579_v3, %v18584_v14  ;;  %v15086_v58 = vcombine.low %v18593_v31, %v18598_v25 }
 0x221   :  { %v18608_v9 = vld [vmem:[%s23239_s3 + $0x1420] sm:$0xff]  ;;  %11627 = vmatprep.subr.bf16.mxu0 %v14975_v32  ;;  %v15087_v50 = vcombine.high %v18593_v31, %v18598_v25  ;;  %v18760_v31 = vld [vmem:[#allocation2 + $0x98] ss:$0 sps:$4 sm:$0x77]   ;;  %v3050_v55 = vrot.slane %v3048_v27, 1 }
 0x222   :  { %v18619_v41 = vld [vmem:[%s23239_s3 + $0x1380] sm:$0xff]  ;;  %11675 = vmatpush1.bf16.msra.mxu1 %v15126_v54  ;;  %v5386_v30 = vrot.slane %v14433_v39, %v23611_v10  ;;  %v3090_v27 = vshll.u32 %v18760_v31, 16 }
 0x223   :  { %v18624_v44 = vld [vmem:[%s23239_s3 + $0x13a0] sm:$0xff]  ;;  %11676 = vmatprep.subr.bf16.mxu1 %v15119_v52 }
 0x224   :  { %v18629_v16 = vld [vmem:[%s23239_s3 + $0x17c0] sm:$0xff]  ;;  %11628 = vmatpush1.bf16.msra.mxu0 %v14974_v61  ;;  %v18727_v11 = vcombine.high %v5372_v59, %v5386_v30  ;;  %v15079_v32 = vcombine.high %v18619_v41, %v18624_v44  ;;  %v18779_v20 = vcombine.low %v5372_v59, %v5386_v30  ;;  %v2715_v30 = vld [vmem:[#allocation2 + $0x6c] sm:$0x77]  ;;  %v3092_v39 = vrot.slane %v3090_v27, 1 }
 0x225   :  { %v18634_v21 = vld [vmem:[%s23239_s3 + $0x17e0] sm:$0xff]  ;;  %11629 = vmatprep.subr.bf16.mxu0 %v14967_v51  ;;  %v14346_v48 = vcombine.low %v2715_v30, %v2715_v30  ;;  %v23736_v3 = vcombine.low %v18619_v41, %v18624_v44  ;;  %v14347_v23 = vcombine.high %v2715_v30, %v2715_v30 }
 0x226   :  { %v18641_v6 = vld [vmem:[%s23239_s3 + $0x1340] sm:$0xff]  ;;  %23733 = vst [vmem:[#allocation40_spill] sm:$0xff] %v18727_v11  ;;  %11677 = vmatpush1.bf16.msra.mxu1 %v15118_v56  ;;  %11700 = vmatprep.mubr.bf16.mxu1 %v18727_v11  ;;  %v23739_v49 = vcombine.high %v18629_v16, %v18634_v21 }
 0x227   :  { %v18646_v29 = vld [vmem:[%s23239_s3 + $0x1360] sm:$0xff]  ;;  %11678 = vmatprep.subr.bf16.mxu1 %v15111_v42  ;;  %v16019_v42 = vld [vmem:[#allocation2 + $0xb0] ss:$0 sps:$4 sm:$0x77]   ;;  %v3266_v28 = vshll.u32 %v14346_v48, 16  ;;  %v3264_v36 = vshrl.u32 %v14346_v48, 16 }
 0x228   :  { %v18651_v40 = vld [vmem:[%s23239_s3 + $0x1780] sm:$0xff]  ;;  %11630 = vmatpush1.bf16.msra.mxu0 %v14966_v2  ;;  %v3111_v25 = vshll.u32 %v16019_v42, 16  ;;  %v3109_v11 = vshrl.u32 %v16019_v42, 16 }
 0x229   :  { %v18665_v1 = vld [vmem:[%s23239_s3 + $0x17a0] sm:$0xff]  ;;  %11631 = vmatprep.subr.bf16.mxu0 %v15087_v50  ;;  %v18815_v50 = vld [vmem:[#allocation2 + $0xb4] sm:$0x77] }
 0x22a   :  { %v18670_v33 = vld [vmem:[%s23239_s3 + $0x1300] sm:$0xff]  ;;  %11679 = vmatpush1.bf16.msra.mxu1 %v15110_v45  ;;  %v3113_v12 = vrot.slane %v3111_v25, 1  ;;  %v14355_v13 = vcombine.low %v18815_v50, %v18815_v50 }
 0x22b   :  { %v18675_v60 = vld [vmem:[%s23239_s3 + $0x1320] sm:$0xff]  ;;  %11680 = vmatprep.subr.bf16.mxu1 %v15103_v34  ;;  %v23735_v34 = vcombine.high %v18603_v47, %v18608_v9 }
 0x22c   :  { %v18687_v18 = vld [vmem:[%s23239_s3 + $0x1740] sm:$0xff]  ;;  %11632 = vmatpush2.bf16.msra.mxu0 %v15086_v58  ;;  %v23734_v58 = vshrl.u32 %v18568_v46, 16  ;;  %v3114_v42 = vor.u32 %v3113_v12, %v3109_v11 }
 0x22d   :  { %v18692_v38 = vld [vmem:[%s23239_s3 + $0x1760] sm:$0xff]  ;;  %11633 = vmatprep.subr.bf16.mxu0 %v15079_v32  ;;  %v3088_v32 = vshrl.u32 %v18760_v31, 16  ;;  %v23737_v31 = vcombine.high %v18641_v6, %v18646_v29 }
 0x22e   :  { %v18697_v62 = vld [vmem:[%s23239_s3 + $0x12c0] sm:$0xff]  ;;  %11681 = vmatpush1.bf16.msra.mxu1 %v15102_v57  ;;  %v3268_v57 = vrot.slane %v3266_v28, 1 }
 0x22f   :  { %v18702_v24 = vld [vmem:[%s23239_s3 + $0x12e0] sm:$0xff]  ;;  %11682 = vmatprep.subr.bf16.mxu1 %v23735_v34  ;;  %v23738_v34 = vcombine.low %v18603_v47, %v18608_v9  ;;  %v23740_v47 = vcombine.low %v18641_v6, %v18646_v29  ;;  %v3093_v11 = vor.u32 %v3092_v39, %v3088_v32  ;;  %v23741_v6 = vcombine.high %v18670_v33, %v18675_v60 }
 0x230   :  { %v18715_v35 = vld [vmem:[%s23239_s3 + $0x1700] sm:$0xff]  ;;  %11634 = vmatpush2.bf16.msra.mxu0 %v23736_v3 }
 0x231   :  { %v18720_v15 = vld [vmem:[%s23239_s3 + $0x1720] sm:$0xff]  ;;  %11635 = vmatprep.subr.bf16.mxu0 %v23737_v31 }
 0x232   :  { %v18725_v43 = vld [vmem:[%s23239_s3 + $0x1280] sm:$0xff]  ;;  %11683 = vmatpush1.bf16.msra.mxu1 %v23738_v34 }
 0x233   :  { %v18738_v7 = vld [vmem:[%s23239_s3 + $0x12a0] sm:$0xff]  ;;  %11684 = vmatprep.subr.bf16.mxu1 %v23739_v49 }
 0x234   :  { %v18743_v8 = vld [vmem:[%s23239_s3 + $0x16c0] sm:$0xff]  ;;  %11636 = vmatpush2.bf16.msra.mxu0 %v23740_v47  ;;  %v16031_v47 = vld [vmem:[#allocation2 + $0xbc] ss:$0 sps:$4 sm:$0x77]  }
 0x235   :  { %v18748_v63 = vld [vmem:[%s23239_s3 + $0x16e0] sm:$0xff]  ;;  %11637 = vmatprep.subr.bf16.mxu0 %v23741_v6 }
 0x236   :  { %v18758_v52 = vld [vmem:[#allocation2 + $0x80] ss:$0 sps:$4 sm:$0x77]   ;;  %v2717_v2 = vld [vmem:[#allocation2 + $0x84] sm:$0x77] }
 0x237   :  { %v18772_v51 = vld [vmem:[%s23239_s3 + $0x1240] sm:$0xff]  ;;  %v3069_v54 = vshll.u32 %v18758_v52, 16  ;;  %v3067_v5 = vshrl.u32 %v18758_v52, 16  ;;  %v14349_v4 = vcombine.low %v2717_v2, %v2717_v2  ;;  %v18835_v52 = vor.u32 %v3050_v55, %v23734_v58 }
 0x238   :  { %v18777_v56 = vld [vmem:[%s23239_s3 + $0x1260] sm:$0xff]  ;;  %v3329_v55 = vshll.u32 %v14355_v13, 16  ;;  %v3269_v58 = vor.u32 %v3268_v57, %v3264_v36 }
 0x239   :  { %v18795_v61 = vld [vmem:[#allocation2 + $0x9c] sm:$0x77]  ;;  %v3071_v25 = vrot.slane %v3069_v54, 1  ;;  %v3287_v37 = vshll.u32 %v14349_v4, 16  ;;  %v3285_v54 = vshrl.u32 %v14349_v4, 16  ;;  %v3327_v4 = vshrl.u32 %v14355_v13, 16 }
 0x23a   :  { %v18808_v59 = vld [vmem:[%s23239_s3 + $0x1680] sm:$0xff]  ;;  %v14352_v19 = vcombine.low %v18795_v61, %v18795_v61  ;;  %v3331_v31 = vrot.slane %v3329_v55, 1  ;;  %v14350_v13 = vcombine.high %v2717_v2, %v2717_v2  ;;  %v16027_v2 = vld [vmem:[#allocation2 + $0x8c] ss:$0 sps:$4 sm:$0x77]   ;;  %v3861_v57 = vcombine.low %v18835_v52, %v3269_v58 }
 0x23b   :  { %v18813_v45 = vld [vmem:[%s23239_s3 + $0x16a0] sm:$0xff]  ;;  %v3289_v27 = vrot.slane %v3287_v37, 1  ;;  %v3072_v29 = vor.u32 %v3071_v25, %v3067_v5  ;;  %v23742_v55 = vcombine.low %v18629_v16, %v18634_v21  ;;  %v23743_v5 = vcombine.high %v18651_v40, %v18665_v1 }
 0x23c   :  { %v18849_v46 = vld [vmem:[%s23239_s3 + $0x1200] sm:$0xff]  ;;  %v3308_v48 = vshll.u32 %v14352_v19, 16  ;;  %v3306_v28 = vshrl.u32 %v14352_v19, 16  ;;  %v3332_v30 = vor.u32 %v3331_v31, %v3327_v4  ;;  %v3294_v16 = vshll.u32 %v14350_v13, 16 }
 0x23d   :  { %v18854_v14 = vld [vmem:[%s23239_s3 + $0x1220] sm:$0xff]  ;;  %v3290_v12 = vor.u32 %v3289_v27, %v3285_v54  ;;  %v3273_v54 = vshll.u32 %v14347_v23, 16  ;;  %11685 = vmatpush2.bf16.msra.mxu1 %v23742_v55  ;;  %v23744_v21 = vcombine.low %v18670_v33, %v18675_v60  ;;  %v23745_v31 = vcombine.high %v18697_v62, %v18702_v24 }
 0x23e   :  { %v18862_v41 = vld [vmem:[%s23239_s3 + $0x1640] sm:$0xff]  ;;  %v3310_v3 = vrot.slane %v3308_v48, 1  ;;  %v15030_v0 = vcombine.low %v18849_v46, %v18854_v14  ;;  %v15031_v37 = vcombine.high %v18849_v46, %v18854_v14  ;;  %v3280_v48 = vshll.u32 %v18841_v53, 16  ;;  %11686 = vmatprep.subr.bf16.mxu1 %v23743_v5 }
 0x23f   :  { %v18867_v44 = vld [vmem:[%s23239_s3 + $0x1660] sm:$0xff]  ;;  %v4089_v27 = vcombine.low %v3114_v42, %v3332_v30  ;;  %v3937_v25 = vcombine.low %v3072_v29, %v3290_v12  ;;  %v3275_v34 = vrot.slane %v3273_v54, 1  ;;  %11638 = vmatpush2.bf16.msra.mxu0 %v23744_v21  ;;  %v18921_v12 = vrot.slane %v3861_v57, %v23611_v10 }
 0x240   :  { %v15166_v36 = vcombine.low %v18862_v41, %v18867_v44  ;;  %v18887_v9 = vld [vmem:[%s23239_s3 + $0x1600] sm:$0xff]  ;;  %v3311_v19 = vor.u32 %v3310_v3, %v3306_v28  ;;  %v15167_v39 = vcombine.high %v18862_v41, %v18867_v44  ;;  %v14353_v28 = vcombine.high %v18795_v61, %v18795_v61  ;;  %11639 = vmatprep.subr.bf16.mxu0 %v23745_v31 }
 0x241   :  { %v18892_v49 = vld [vmem:[%s23239_s3 + $0x1620] sm:$0xff]  ;;  %v4097_v42 = vrot.slane %v4089_v27, %v23611_v10  ;;  %v14356_v61 = vcombine.high %v18815_v50, %v18815_v50  ;;  %v3282_v58 = vrot.slane %v3280_v48, 1  ;;  %v3301_v3 = vshll.u32 %v16027_v2, 16 }
 0x242   :  { %v4013_v32 = vcombine.low %v3093_v11, %v3311_v19  ;;  %v15158_v52 = vcombine.low %v18887_v9, %v18892_v49  ;;  %v16029_v4 = vld [vmem:[#allocation2 + $0xa4] ss:$0 sps:$4 sm:$0x77]   ;;  %v3271_v11 = vshrl.u32 %v14347_v23, 16  ;;  %v3278_v19 = vshrl.u32 %v18841_v53, 16 }
 0x243   :  { %v3292_v33 = vshrl.u32 %v14350_v13, 16  ;;  %v23746_v60 = vcombine.low %v18651_v40, %v18665_v1  ;;  %v3296_v30 = vrot.slane %v3294_v16, 1  ;;  %v3303_v6 = vrot.slane %v3301_v3, 1  ;;  %v18942_v1 = vld [vmem:[%s23239_s3 + $0x19c0] sm:$0xff] }
 0x244   :  { %v4021_v50 = vrot.slane %v4013_v32, %v23611_v10  ;;  %v3315_v29 = vshll.u32 %v14353_v28, 16  ;;  %v23747_v54 = vcombine.high %v18687_v18, %v18692_v38  ;;  %v18932_v57 = vrot.slane %v3937_v25, %v23611_v10  ;;  %v18947_v48 = vld [vmem:[%s23239_s3 + $0x19e0] sm:$0xff] }
 0x245   :  { %11687 = vmatpush2.bf16.msra.mxu1 %v23746_v60  ;;  %v18934_v23 = vor.u32 %v3275_v34, %v3271_v11  ;;  %v3299_v53 = vshrl.u32 %v16027_v2, 16  ;;  %v3322_v13 = vshll.u32 %v16029_v4, 16  ;;  %v23748_v40 = vcombine.low %v18697_v62, %v18702_v24  ;;  %v18957_v62 = vld [vmem:[%s23239_s3 + $0x1980] sm:$0xff] }
 0x246   :  { %11688 = vmatprep.subr.bf16.mxu1 %v23747_v54  ;;  %v14448_v55 = vcombine.low %v4021_v50, %v4097_v42  ;;  %v18949_v32 = vor.u32 %v3282_v58, %v3278_v19  ;;  %v3313_v27 = vshrl.u32 %v14353_v28, 16  ;;  %v3317_v2 = vrot.slane %v3315_v29, 1  ;;  %v18962_v24 = vld [vmem:[%s23239_s3 + $0x19a0] sm:$0xff] }
 0x247   :  { %11640 = vmatpush2.bf16.msra.mxu0 %v23748_v40  ;;  %v23749_v5 = vcombine.high %v18725_v43, %v18738_v7  ;;  %v3320_v25 = vshrl.u32 %v16029_v4, 16  ;;  %v3324_v34 = vrot.slane %v3322_v13, 1  ;;  %v3336_v16 = vshll.u32 %v14356_v61, 16  ;;  %v2723_v4 = vld [vmem:[#allocation2] sm:$0x66] }
 0x248   :  { %v3343_v21 = vshll.u32 %v16031_v47, 16  ;;  %v23750_v28 = vcombine.low %v18687_v18, %v18692_v38  ;;  %v3297_v42 = vor.u32 %v3296_v30, %v3292_v33  ;;  %v3304_v58 = vor.u32 %v3303_v6, %v3299_v53  ;;  %v2725_v30 = vld [vmem:[#allocation2 + $0x18] sm:$0x66]  ;;  %v2727_v13 = vld [vmem:[#allocation2 + $0x30] sm:$0x66]  ;;  %v5075_v41 = vld [vmem:[%s23239_s3 + $0x1d80] sm:$0xff] }
 0x249   :  { %11641 = vmatprep.subr.bf16.mxu0 %v23749_v5  ;;  %v3318_v3 = vor.u32 %v3317_v2, %v3313_v27  ;;  %v3334_v31 = vshrl.u32 %v14356_v61, 16  ;;  %v23751_v11 = vcombine.high %v18715_v35, %v18720_v15  ;;  %v3325_v19 = vor.u32 %v3324_v34, %v3320_v25  ;;  %v2729_v40 = vld [vmem:[#allocation2 + $0x48] sm:$0x66]  ;;  %v19049_v46 = vld [vmem:[#allocation2 + $0x3c] sm:$0x66] }
 0x24a   :  { %11689 = vmatpush2.bf16.msra.mxu1 %v23750_v28  ;;  %v3338_v60 = vrot.slane %v3336_v16, 1  ;;  %v3341_v50 = vshrl.u32 %v16031_v47, 16  ;;  %v3345_v29 = vrot.slane %v3343_v21, 1  ;;  %v23752_v54 = vcombine.low %v18725_v43, %v18738_v7  ;;  %v5079_v44 = vld [vmem:[%s23239_s3 + $0x1da0] sm:$0xff] }
 0x24b   :  { %11690 = vmatprep.subr.bf16.mxu1 %v23751_v11  ;;  %v15159_v18 = vcombine.high %v18887_v9, %v18892_v49  ;;  %v15278_v38 = vcombine.low %v18942_v1, %v18947_v48  ;;  %v15279_v61 = vcombine.high %v18942_v1, %v18947_v48  ;;  %v15270_v33 = vcombine.low %v18957_v62, %v18962_v24  ;;  %v4931_v48 = vld [vmem:[%s23239_s3 + $0x1900] sm:$0xff] }
 0x24c   :  { %11642 = vmatpush2.bf16.msra.mxu0 %v23752_v54  ;;  %v23753_v47 = vcombine.high %v18772_v51, %v18777_v56  ;;  %v14446_v43 = vcombine.low %v18921_v12, %v18932_v57  ;;  %v3339_v7 = vor.u32 %v3338_v60, %v3334_v31  ;;  %v3346_v6 = vor.u32 %v3345_v29, %v3341_v50  ;;  %v19018_v29 = vld [vmem:[#allocation2 + $0x8] ss:$0 sps:$4 sm:$0x66]   ;;  %v19034_v54 = vld [vmem:[%s23239_s3 + $0x1960] sm:$0xff] }
 0x24d   :  { %v4014_v53 = vcombine.low %v3318_v3, %v3325_v19  ;;  %v23754_v27 = vcombine.low %v18715_v35, %v18720_v15  ;;  %v18990_v2 = vrot.slane %v14448_v55, %v23611_v10  ;;  %v3862_v5 = vcombine.low %v18934_v23, %v18949_v32 }
 0x24e   :  { %11643 = vmatprep.subr.bf16.mxu0 %v23753_v47  ;;  %v14358_v25 = vcombine.low %v2723_v4, %v2723_v4  ;;  %v14359_v34 = vcombine.high %v2723_v4, %v2723_v4  ;;  %v23755_v12 = vcombine.high %v18743_v8, %v18748_v63  ;;  %v3938_v57 = vcombine.low %v3297_v42, %v3304_v58  ;;  %v19029_v4 = vld [vmem:[%s23239_s3 + $0x1940] sm:$0xff] }
 0x24f   :  { %11691 = vmatpush2.bf16.msra.mxu1 %v23754_v27  ;;  %v4090_v16 = vcombine.low %v3339_v7, %v3346_v6  ;;  %v14361_v21 = vcombine.low %v2725_v30, %v2725_v30  ;;  %v14362_v28 = vcombine.high %v2725_v30, %v2725_v30  ;;  %v23756_v35 = vcombine.low %v18772_v51, %v18777_v56  ;;  %v19011_v51 = vld [vmem:[%s23239_s3 + $0x1dc0] sm:$0xff]  ;;  %v19036_v6 = vld [vmem:[#allocation2 + $0xc] sm:$0x66] }
 0x250   :  { %11692 = vmatprep.subr.bf16.mxu1 %v23755_v12  ;;  %v4028_v15 = vrot.slane %v4014_v53, %v23611_v10  ;;  %v14364_v55 = vcombine.low %v2727_v13, %v2727_v13  ;;  %v14365_v3 = vcombine.high %v2727_v13, %v2727_v13  ;;  %v14367_v31 = vcombine.low %v2729_v40, %v2729_v40  ;;  %v19016_v56 = vld [vmem:[%s23239_s3 + $0x1de0] sm:$0xff] }
 0x251   :  { %11644 = vmatpush2.bf16.msra.mxu0 %v23756_v35  ;;  %v4104_v23 = vrot.slane %v4090_v16, %v23611_v10  ;;  %v14368_v32 = vcombine.high %v2729_v40, %v2729_v40  ;;  %v3411_v42 = vrot.slane %v14358_v25, 1  ;;  %v3412_v58 = vrot.slane %v14359_v34, 1  ;;  %v19042_v25 = vld [vmem:[#allocation2 + $0x24] sm:$0x66] }
 0x252   :  { %11645 = vmatprep.subr.bf16.mxu0 %v15031_v37  ;;  %v23757_v11 = vcombine.low %v18743_v8, %v18748_v63  ;;  %v3414_v37 = vrot.slane %v14361_v21, 1  ;;  %v3415_v19 = vrot.slane %v14362_v28, 1  ;;  %v3417_v60 = vrot.slane %v14364_v55, 1  ;;  %v16041_v34 = vld [vmem:[#allocation2 + $0x20] ss:$0 sps:$4 sm:$0x66]  }
 0x253   :  { %v3418_v50 = vrot.slane %v14365_v3, 1  ;;  %v23758_v8 = vcombine.high %v18808_v59, %v18813_v45  ;;  %v19024_v63 = vrot.slane %v3938_v57, %v23611_v10  ;;  %v3420_v30 = vrot.slane %v14367_v31, 1 }
 0x254   :  { %11693 = vmatpush2.bf16.msra.mxu1 %v23757_v11  ;;  %v3421_v47 = vrot.slane %v14368_v32, 1  ;;  %v3574_v7 = vcombine.low %v3411_v42, %v3412_v58  ;;  %v5527_v53 = vrot.slane %v14446_v43, %v23611_v10  ;;  %v14449_v13 = vcombine.low %v4028_v15, %v4104_v23  ;;  %v19061_v15 = vld [vmem:[#allocation2 + $0x54] sm:$0x66] }
 0x255   :  { %11694 = vmatprep.subr.bf16.mxu1 %v23758_v8  ;;  %11646 = vmatpush2.bf16.msra.mxu0 %v15030_v0  ;;  %v3650_v40 = vcombine.low %v3414_v37, %v3415_v19  ;;  %v3726_v27 = vcombine.low %v3417_v60, %v3418_v50  ;;  %v15271_v12 = vcombine.high %v18957_v62, %v18962_v24  ;;  %v16042_v0 = vld [vmem:[#allocation2 + $0x38] ss:$0 sps:$4 sm:$0x66]   ;;  %v3416_v11 = vrot.slane %v16041_v34, 1 }
 0x256   :  { %11721 = vmatprep.subr.bf16.mxu0 %v15279_v61  ;;  %v15407_v57 = vcombine.high %v19011_v51, %v19016_v56  ;;  %v3876_v16 = vrot.slane %v3862_v5, %v23611_v10  ;;  %v3802_v21 = vcombine.low %v3420_v30, %v3421_v47  ;;  %v23759_v14 = vcombine.low %v18808_v59, %v18813_v45  ;;  %v16043_v5 = vld [vmem:[#allocation2 + $0x50] ss:$0 sps:$4 sm:$0x66]  }
 0x257   :  { %v19055_v43 = vcombine.high %v5527_v53, %v18990_v2  ;;  %v15263_v61 = vcombine.high %v19029_v4, %v19034_v54  ;;  %v3582_v28 = vrot.slane %v3574_v7, %v23611_v10  ;;  %v3658_v35 = vrot.slane %v3650_v40, %v23611_v10 }
 0x258   :  { %11695 = vmatpush2.bf16.msra.mxu1 %v23759_v14  ;;  %11648 = vmatmul.mubr.bf16.vlgmr.msra.gmra.mxu0 %v18612_v26  ;;  %v14447_v59 = vcombine.low %v3876_v16, %v19024_v63  ;;  %v3734_v45 = vrot.slane %v3726_v27, %v23611_v10  ;;  %v3810_v55 = vrot.slane %v3802_v21, %v23611_v10  ;;  %v3419_v37 = vrot.slane %v16042_v0, 1  ;;  %v4915_v14 = vld [vmem:[%s23239_s3 + $0x1880] sm:$0xff] }
 0x259   :  { %11696 = vmatprep.subr.bf16.mxu1 %v15167_v39  ;;  %11657 = vmatprep.mubr.bf16.mxu0 %v19055_v43  ;;  %v19075_v3 = vrot.slane %v14449_v13, %v23611_v10  ;;  %v14434_v31 = vcombine.low %v3582_v28, %v3658_v35  ;;  %v3413_v39 = vrot.slane %v19018_v29, 1  ;;  %v14382_v23 = vcombine.low %v19036_v6, %v19036_v6 }
 0x25a   :  { %11722 = vmatpush1.bf16.msra.mxu0 %v15278_v38  ;;  %v14436_v32 = vcombine.low %v3734_v45, %v3810_v55  ;;  %v14385_v42 = vcombine.low %v19042_v25, %v19042_v25  ;;  %v14388_v58 = vcombine.low %v19049_v46, %v19049_v46  ;;  %v14391_v1 = vcombine.low %v19061_v15, %v19061_v15  ;;  %v4935_v38 = vld [vmem:[%s23239_s3 + $0x1920] sm:$0xff] }
 0x25b   :  { %11723 = vmatprep.subr.bf16.mxu0 %v15271_v12  ;;  %v3422_v19 = vrot.slane %v16043_v5, 1  ;;  %v3499_v60 = vrot.slane %v14382_v23, 1  ;;  %v15262_v63 = vcombine.low %v19029_v4, %v19034_v54  ;;  %v19116_v30 = vrot.slane %v14434_v31, %v23611_v10  ;;  %v4923_v4 = vld [vmem:[%s23239_s3 + $0x18c0] sm:$0xff] }
 0x25c   :  { %11697 = vmatpush2.bf16.msra.mxu1 %v15166_v36  ;;  %v19105_v36 = vrot.slane %v14436_v32, %v23611_v10  ;;  %v3502_v50 = vrot.slane %v14385_v42, 1  ;;  %v3505_v29 = vrot.slane %v14388_v58, 1  ;;  %v3508_v8 = vrot.slane %v14391_v1, 1  ;;  %v4927_v54 = vld [vmem:[%s23239_s3 + $0x18e0] sm:$0xff] }
 0x25d   :  { %11698 = vmatprep.subr.bf16.mxu1 %v15159_v18  ;;  %v19111_v18 = vcombine.low %v5527_v53, %v18990_v2  ;;  %v3575_v47 = vcombine.low %v3413_v39, %v3499_v60  ;;  %v5534_v7 = vrot.slane %v14447_v59, %v23611_v10  ;;  %v15255_v13 = vcombine.high %v4931_v48, %v4935_v38  ;;  %v5059_v59 = vld [vmem:[%s23239_s3 + $0x1d00] sm:$0xff] }
 0x25e   :  { %11724 = vmatpush1.bf16.msra.mxu0 %v15270_v33  ;;  %v3651_v40 = vcombine.low %v3416_v11, %v3502_v50  ;;  %v3727_v27 = vcombine.low %v3419_v37, %v3505_v29  ;;  %v15406_v62 = vcombine.low %v19011_v51, %v19016_v56  ;;  %v15399_v24 = vcombine.high %v5075_v41, %v5079_v44  ;;  %v5067_v51 = vld [vmem:[%s23239_s3 + $0x1d40] sm:$0xff] }
 0x25f   :  { %11725 = vmatprep.subr.bf16.mxu0 %v15263_v61  ;;  %v19126_v33 = vcombine.high %v19116_v30, %v19105_v36  ;;  %v3803_v2 = vcombine.low %v3422_v19, %v3508_v8  ;;  %v19135_v9 = vcombine.high %v5534_v7, %v19075_v3  ;;  %v15254_v49 = vcombine.low %v4931_v48, %v4935_v38  ;;  %v5071_v56 = vld [vmem:[%s23239_s3 + $0x1d60] sm:$0xff] }
 0x260   :  { %11699 = vmatpush2.bf16.msra.mxu1 %v15158_v52  ;;  %11658 = vmatmul.mubr.bf16.gmra.mxu0 %v19111_v18  ;;  %v3665_v52 = vrot.slane %v3651_v40, %v23611_v10  ;;  %v3589_v53 = vrot.slane %v3575_v47, %v23611_v10  ;;  %v3741_v34 = vrot.slane %v3727_v27, %v23611_v10  ;;  %v4919_v61 = vld [vmem:[%s23239_s3 + $0x18a0] sm:$0xff] }
 0x261   :  { %11774 = vmatprep.subr.bf16.mxu1 %v15407_v57  ;;  %11753 = vmatprep.mubr.bf16.mxu0 %v19126_v33  ;;  %v3817_v12 = vrot.slane %v3803_v2, %v23611_v10  ;;  %v15247_v57 = vcombine.high %v4923_v4, %v4927_v54  ;;  %v15398_v16 = vcombine.low %v5075_v41, %v5079_v44  ;;  %v5063_v45 = vld [vmem:[%s23239_s3 + $0x1d20] sm:$0xff] }
 0x262   :  { %11726 = vmatpush1.bf16.msra.mxu0 %v15262_v63  ;;  %v14435_v21 = vcombine.low %v3589_v53, %v3665_v52  ;;  %v15391_v28 = vcombine.high %v5067_v51, %v5071_v56  ;;  %v15246_v5 = vcombine.low %v4923_v4, %v4927_v54  ;;  %v15239_v55 = vcombine.high %v4915_v14, %v4919_v61  ;;  %v4907_v23 = vld [vmem:[%s23239_s3 + $0x1840] sm:$0xff] }
 0x263   :  { %11701 = vmatmul.mubr.bf16.vlgmr.msra.gmra.mxu1 %v18779_v20  ;;  %11727 = vmatprep.subr.bf16.mxu0 %v15255_v13  ;;  %v14437_v0 = vcombine.low %v3741_v34, %v3817_v12  ;;  %v15390_v31 = vcombine.low %v5067_v51, %v5071_v56  ;;  %v4911_v32 = vld [vmem:[%s23239_s3 + $0x1860] sm:$0xff]  ;;  %v19176_v42 = vcombine.low %v5534_v7, %v19075_v3 }
 0x264   :  { %11710 = vmatprep.mubr.bf16.mxu1 %v19135_v9  ;;  %11775 = vmatpush1.bf16.msra.mxu1 %v15406_v62  ;;  %v19167_v39 = vrot.slane %v14435_v21, %v23611_v10  ;;  %v15383_v58 = vcombine.high %v5059_v59, %v5063_v45  ;;  %v15238_v48 = vcombine.low %v4915_v14, %v4919_v61  ;;  %v5051_v38 = vld [vmem:[%s23239_s3 + $0x1cc0] sm:$0xff] }
 0x265   :  { %11776 = vmatprep.subr.bf16.mxu1 %v15399_v24  ;;  %v19158_v35 = vrot.slane %v14437_v0, %v23611_v10  ;;  %v5055_v11 = vld [vmem:[%s23239_s3 + $0x1ce0] sm:$0xff]  ;;  %v15231_v3 = vcombine.high %v4907_v23, %v4911_v32  ;;  %v15382_v37 = vcombine.low %v5059_v59, %v5063_v45  ;;  %v15230_v44 = vcombine.low %v4907_v23, %v4911_v32  ;;  %v2737_v45 = vld [vmem:[#allocation2 + $0xa8] sm:$0x66] }
 0x266   :  { %11728 = vmatpush1.bf16.msra.mxu0 %v15254_v49  ;;  %v4899_v19 = vld [vmem:[%s23239_s3 + $0x1800] sm:$0xff]  ;;  %v15375_v41 = vcombine.high %v5051_v38, %v5055_v11  ;;  %v15374_v63 = vcombine.low %v5051_v38, %v5055_v11 }
 0x267   :  { %11729 = vmatprep.subr.bf16.mxu0 %v15247_v57  ;;  %v19180_v1 = vcombine.high %v19167_v39, %v19158_v35  ;;  %v4903_v60 = vld [vmem:[%s23239_s3 + $0x1820] sm:$0xff] }
 0x268   :  { %11777 = vmatpush1.bf16.msra.mxu1 %v15398_v16  ;;  %v5043_v50 = vld [vmem:[%s23239_s3 + $0x1c80] sm:$0xff]  ;;  %v15223_v8 = vcombine.high %v4899_v19, %v4903_v60  ;;  %v15222_v40 = vcombine.low %v4899_v19, %v4903_v60  ;;  %v14380_v19 = vcombine.high %v2737_v45, %v2737_v45 }
 0x269   :  { %11778 = vmatprep.subr.bf16.mxu1 %v15391_v28  ;;  %v5047_v29 = vld [vmem:[%s23239_s3 + $0x1ca0] sm:$0xff] }
 0x26a   :  { %11730 = vmatpush1.bf16.msra.mxu0 %v15246_v5  ;;  %v5019_v47 = vld [vmem:[%s23239_s3 + $0x1bc0] sm:$0xff]  ;;  %v15367_v13 = vcombine.high %v5043_v50, %v5047_v29  ;;  %v15366_v2 = vcombine.low %v5043_v50, %v5047_v29  ;;  %v19263_v50 = vld [vmem:[#allocation2 + $0x68] ss:$0 sps:$4 sm:$0x66]  }
 0x26b   :  { %11711 = vmatmul.mubr.bf16.gmra.mxu1 %v19176_v42  ;;  %11731 = vmatprep.subr.bf16.mxu0 %v15239_v55  ;;  %v5023_v7 = vld [vmem:[%s23239_s3 + $0x1be0] sm:$0xff] }
 0x26c   :  { %11779 = vmatpush1.bf16.msra.mxu1 %v15390_v31  ;;  %11806 = vmatprep.mubr.bf16.mxu1 %v19180_v1  ;;  %v5035_v27 = vld [vmem:[%s23239_s3 + $0x1c40] sm:$0xff]  ;;  %v15343_v24 = vcombine.high %v5019_v47, %v5023_v7  ;;  %v15342_v52 = vcombine.low %v5019_v47, %v5023_v7 }
 0x26d   :  { %11780 = vmatprep.subr.bf16.mxu1 %v15383_v58  ;;  %v5039_v62 = vld [vmem:[%s23239_s3 + $0x1c60] sm:$0xff]  ;;  %v2733_v58 = vld [vmem:[#allocation2 + $0x78] sm:$0x66] }
 0x26e   :  { %11732 = vmatpush1.bf16.msra.mxu0 %v15238_v48  ;;  %v5011_v4 = vld [vmem:[%s23239_s3 + $0x1b80] sm:$0xff]  ;;  %v15359_v49 = vcombine.high %v5035_v27, %v5039_v62  ;;  %v15358_v34 = vcombine.low %v5035_v27, %v5039_v62  ;;  %v2735_v48 = vld [vmem:[#allocation2 + $0x90] sm:$0x66]  ;;  %v14374_v47 = vcombine.high %v2733_v58, %v2733_v58 }
 0x26f   :  { %11733 = vmatprep.subr.bf16.mxu0 %v15231_v3  ;;  %v5015_v54 = vld [vmem:[%s23239_s3 + $0x1ba0] sm:$0xff]  ;;  %v14376_v7 = vcombine.low %v2735_v48, %v2735_v48 }
 0x270   :  { %11781 = vmatpush1.bf16.msra.mxu1 %v15382_v37  ;;  %v5027_v51 = vld [vmem:[%s23239_s3 + $0x1c00] sm:$0xff]  ;;  %v15335_v53 = vcombine.high %v5011_v4, %v5015_v54  ;;  %v15334_v21 = vcombine.low %v5011_v4, %v5015_v54  ;;  %v14379_v37 = vcombine.low %v2737_v45, %v2737_v45 }
 0x271   :  { %11782 = vmatprep.subr.bf16.mxu1 %v15375_v41  ;;  %v5031_v56 = vld [vmem:[%s23239_s3 + $0x1c20] sm:$0xff] }
 0x272   :  { %11734 = vmatpush1.bf16.msra.mxu0 %v15230_v44  ;;  %v5003_v12 = vld [vmem:[%s23239_s3 + $0x1b40] sm:$0xff]  ;;  %v15351_v16 = vcombine.high %v5027_v51, %v5031_v56  ;;  %v15350_v28 = vcombine.low %v5027_v51, %v5031_v56  ;;  %v3432_v54 = vrot.slane %v14379_v37, 1 }
 0x273   :  { %11735 = vmatprep.subr.bf16.mxu0 %v15223_v8  ;;  %v5007_v57 = vld [vmem:[%s23239_s3 + $0x1b60] sm:$0xff] }
 0x274   :  { %11783 = vmatpush1.bf16.msra.mxu1 %v15374_v63  ;;  %v5147_v0 = vld [vmem:[%s23239_s3 + $0x1fc0] sm:$0xff]  ;;  %v15327_v61 = vcombine.high %v5003_v12, %v5007_v57  ;;  %v15326_v32 = vcombine.low %v5003_v12, %v5007_v57  ;;  %v14373_v63 = vcombine.low %v2733_v58, %v2733_v58  ;;  %v3425_v12 = vrot.slane %v19263_v50, 1  ;;  %v19297_v57 = vld [vmem:[#allocation2 + $0x2c] ss:$0 sps:$4 sm:$0x66]  }
 0x275   :  { %11784 = vmatprep.subr.bf16.mxu1 %v15367_v13  ;;  %v5151_v14 = vld [vmem:[%s23239_s3 + $0x1fe0] sm:$0xff]  ;;  %v14377_v13 = vcombine.high %v2735_v48, %v2735_v48 }
 0x276   :  { %11736 = vmatpush1.bf16.msra.mxu0 %v15222_v40  ;;  %v4995_v5 = vld [vmem:[%s23239_s3 + $0x1b00] sm:$0xff]  ;;  %v15471_v55 = vcombine.high %v5147_v0, %v5151_v14  ;;  %v15470_v60 = vcombine.low %v5147_v0, %v5151_v14  ;;  %v3426_v0 = vrot.slane %v14373_v63, 1  ;;  %v3427_v14 = vrot.slane %v14374_v47, 1 }
 0x277   :  { %11737 = vmatprep.subr.bf16.mxu0 %v15343_v24  ;;  %v4999_v59 = vld [vmem:[%s23239_s3 + $0x1b20] sm:$0xff]  ;;  %v19279_v24 = vld [vmem:[#allocation2 + $0xb0] ss:$0 sps:$4 sm:$0x66]  }
 0x278   :  { %11785 = vmatpush1.bf16.msra.mxu1 %v15366_v2  ;;  %v19247_v31 = vld [vmem:[%s23239_s3 + $0x1f80] sm:$0xff]  ;;  %v15319_v38 = vcombine.high %v4995_v5, %v4999_v59  ;;  %v15318_v40 = vcombine.low %v4995_v5, %v4999_v59  ;;  %v3954_v47 = vcombine.low %v3426_v0, %v3427_v14 }
 0x279   :  { %11786 = vmatprep.subr.bf16.mxu1 %v15359_v49  ;;  %v5143_v23 = vld [vmem:[%s23239_s3 + $0x1fa0] sm:$0xff]  ;;  %v3433_v49 = vrot.slane %v14380_v19, 1 }
 0x27a   :  { %11738 = vmatpush2.bf16.msra.mxu0 %v15342_v52  ;;  %v19255_v11 = vld [vmem:[%s23239_s3 + $0x1ac0] sm:$0xff]  ;;  %v15463_v41 = vcombine.high %v19247_v31, %v5143_v23  ;;  %v19281_v52 = vld [vmem:[#allocation2 + $0x14] ss:$0 sps:$4 sm:$0x66]   ;;  %v15462_v51 = vcombine.low %v19247_v31, %v5143_v23  ;;  %v3434_v23 = vrot.slane %v19279_v24, 1 }
 0x27b   :  { %11739 = vmatprep.subr.bf16.mxu0 %v15335_v53  ;;  %v19260_v3 = vld [vmem:[%s23239_s3 + $0x1ae0] sm:$0xff] }
 0x27c   :  { %11787 = vmatpush1.bf16.msra.mxu1 %v15358_v34  ;;  %v2731_v44 = vld [vmem:[#allocation2 + $0x60] sm:$0x66]  ;;  %v15311_v27 = vcombine.high %v19255_v11, %v19260_v3  ;;  %v19277_v62 = vld [vmem:[#allocation2 + $0x80] ss:$0 sps:$4 sm:$0x66]   ;;  %v15310_v59 = vcombine.low %v19255_v11, %v19260_v3 }
 0x27d   :  { %11788 = vmatprep.subr.bf16.mxu1 %v15351_v16  ;;  %v19268_v29 = vld [vmem:[%s23239_s3 + $0x1f40] sm:$0xff]  ;;  %v14370_v2 = vcombine.low %v2731_v44, %v2731_v44  ;;  %v14371_v4 = vcombine.high %v2731_v44, %v2731_v44  ;;  %v3428_v31 = vrot.slane %v19277_v62, 1  ;;  %v19329_v3 = vld [vmem:[#allocation2 + $0xb4] sm:$0x66] }
 0x27e   :  { %11740 = vmatpush2.bf16.msra.mxu0 %v15334_v21  ;;  %v19273_v8 = vld [vmem:[%s23239_s3 + $0x1f60] sm:$0xff] }
 0x27f   :  { %11741 = vmatprep.subr.bf16.mxu0 %v15327_v61  ;;  %v15455_v56 = vcombine.high %v19268_v29, %v19273_v8  ;;  %v19289_v53 = vld [vmem:[%s23239_s3 + $0x1a80] sm:$0xff]  ;;  %v3429_v61 = vrot.slane %v14376_v7, 1  ;;  %v15454_v5 = vcombine.low %v19268_v29, %v19273_v8  ;;  %v3423_v58 = vrot.slane %v14370_v2, 1  ;;  %v16071_v8 = vld [vmem:[#allocation2 + $0x5c] ss:$0 sps:$4 sm:$0x66]  }
 0x280   :  { %11789 = vmatpush1.bf16.msra.mxu1 %v15350_v28  ;;  %v19294_v34 = vld [vmem:[%s23239_s3 + $0x1aa0] sm:$0xff]  ;;  %v3430_v28 = vrot.slane %v14377_v13, 1  ;;  %v3424_v48 = vrot.slane %v14371_v4, 1  ;;  %v14392_v29 = vcombine.high %v19061_v15, %v19061_v15  ;;  %v14403_v2 = vcombine.low %v19329_v3, %v19329_v3 }
 0x281   :  { %11790 = vmatprep.subr.bf16.mxu1 %v15471_v55  ;;  %v19302_v16 = vld [vmem:[%s23239_s3 + $0x1f00] sm:$0xff]  ;;  %v14386_v15 = vcombine.high %v19042_v25, %v19042_v25  ;;  %v14389_v4 = vcombine.high %v19049_v46, %v19049_v46  ;;  %v3510_v0 = vrot.slane %v16071_v8, 1 }
 0x282   :  { %11742 = vmatpush2.bf16.msra.mxu0 %v15326_v32  ;;  %v19307_v21 = vld [vmem:[%s23239_s3 + $0x1f20] sm:$0xff]  ;;  %v15303_v32 = vcombine.high %v19289_v53, %v19294_v34  ;;  %v4030_v7 = vcombine.low %v3429_v61, %v3430_v28  ;;  %v3962_v61 = vrot.slane %v3954_v47, %v23611_v10 }
 0x283   :  { %11743 = vmatprep.subr.bf16.mxu0 %v15319_v38  ;;  %v19316_v45 = vld [vmem:[%s23239_s3 + $0x1ec0] sm:$0xff]  ;;  %v4106_v38 = vcombine.low %v3432_v54, %v3433_v49  ;;  %v15446_v37 = vcombine.low %v19302_v16, %v19307_v21  ;;  %v15447_v19 = vcombine.high %v19302_v16, %v19307_v21  ;;  %v3504_v49 = vrot.slane %v19297_v57, 1 }
 0x284   :  { %11791 = vmatpush2.bf16.msra.mxu1 %v15470_v60  ;;  %v19321_v55 = vld [vmem:[%s23239_s3 + $0x1ee0] sm:$0xff]  ;;  %v15302_v60 = vcombine.low %v19289_v53, %v19294_v34  ;;  %v14383_v57 = vcombine.high %v19036_v6, %v19036_v6  ;;  %v3509_v21 = vrot.slane %v14392_v29, 1  ;;  %v4038_v28 = vrot.slane %v4030_v7, %v23611_v10 }
 0x285   :  { %11792 = vmatprep.subr.bf16.mxu1 %v15463_v41  ;;  %v19327_v11 = vld [vmem:[#allocation2 + $0x84] sm:$0x66]  ;;  %v15439_v63 = vcombine.high %v19316_v45, %v19321_v55  ;;  %v19347_v13 = vld [vmem:[#allocation2 + $0x9c] sm:$0x66]  ;;  %v4114_v53 = vrot.slane %v4106_v38, %v23611_v10  ;;  %v3506_v38 = vrot.slane %v14389_v4, 1 }
 0x286   :  { %11744 = vmatpush2.bf16.msra.mxu0 %v15318_v40  ;;  %v4971_v41 = vld [vmem:[%s23239_s3 + $0x1a40] sm:$0xff]  ;;  %v3501_v40 = vrot.slane %v19281_v52, 1  ;;  %v14397_v34 = vcombine.low %v19327_v11, %v19327_v11  ;;  %v14400_v46 = vcombine.low %v19347_v13, %v19347_v13  ;;  %v3819_v4 = vcombine.low %v3509_v21, %v3510_v0 }
 0x287   :  { %11745 = vmatprep.subr.bf16.mxu0 %v15311_v27  ;;  %v4975_v44 = vld [vmem:[%s23239_s3 + $0x1a60] sm:$0xff]  ;;  %v19350_v27 = vld [vmem:[#allocation2 + $0x6c] sm:$0x66]  ;;  %v14452_v7 = vcombine.low %v4038_v28, %v4114_v53 }
 0x288   :  { %11793 = vmatpush2.bf16.msra.mxu1 %v15462_v51  ;;  %v16069_v54 = vld [vmem:[#allocation2 + $0x44] ss:$0 sps:$4 sm:$0x66]   ;;  %v15295_v51 = vcombine.high %v4971_v41, %v4975_v44  ;;  %v15294_v14 = vcombine.low %v4971_v41, %v4975_v44  ;;  %v15438_v41 = vcombine.low %v19316_v45, %v19321_v55 }
 0x289   :  { %11794 = vmatprep.subr.bf16.mxu1 %v15455_v56  ;;  %v3878_v56 = vcombine.low %v3423_v58, %v3424_v48  ;;  %v4963_v16 = vld [vmem:[%s23239_s3 + $0x1a00] sm:$0xff]  ;;  %v3520_v58 = vrot.slane %v14403_v2, 1  ;;  %v3503_v48 = vrot.slane %v14386_v15, 1  ;;  %v3517_v2 = vrot.slane %v14400_v46, 1 }
 0x28a   :  { %11746 = vmatpush2.bf16.msra.mxu0 %v15310_v59  ;;  %v4967_v25 = vld [vmem:[%s23239_s3 + $0x1a20] sm:$0xff]  ;;  %v14394_v59 = vcombine.low %v19350_v27, %v19350_v27  ;;  %v3500_v15 = vrot.slane %v14383_v57, 1  ;;  %v5577_v21 = vrot.slane %v14452_v7, %v23611_v10 }
 0x28b   :  { %11747 = vmatprep.subr.bf16.mxu0 %v15303_v32  ;;  %v5107_v32 = vld [vmem:[%s23239_s3 + $0x1e80] sm:$0xff]  ;;  %v15287_v44 = vcombine.high %v4963_v16, %v4967_v25  ;;  %v3886_v29 = vrot.slane %v3878_v56, %v23611_v10  ;;  %v15286_v55 = vcombine.low %v4963_v16, %v4967_v25  ;;  %v4107_v53 = vcombine.low %v3434_v23, %v3520_v58 }
 0x28c   :  { %11795 = vmatpush2.bf16.msra.mxu1 %v15454_v5  ;;  %v16058_v5 = vld [vmem:[#allocation2 + $0x98] ss:$0 sps:$4 sm:$0x66]   ;;  %v5111_v6 = vld [vmem:[%s23239_s3 + $0x1ea0] sm:$0xff]  ;;  %v3667_v46 = vcombine.low %v3503_v48, %v3504_v49  ;;  %v3591_v49 = vcombine.low %v3500_v15, %v3501_v40 }
 0x28d   :  { %11796 = vmatprep.subr.bf16.mxu1 %v15447_v19  ;;  %v3507_v19 = vrot.slane %v16069_v54, 1  ;;  %v5211_v8 = vld [vmem:[%s23239_s3 + $0x21c0] sm:$0xff]  ;;  %v15431_v45 = vcombine.high %v5107_v32, %v5111_v6  ;;  %v14450_v54 = vcombine.low %v3886_v29, %v3962_v61  ;;  %v4121_v40 = vrot.slane %v4107_v53, %v23611_v10  ;;  %v4180_v53 = vld [vmem:[%s23239_s3 + $0x188] sm:$0xff] }
 0x28e   :  { %11748 = vmatpush2.bf16.msra.mxu0 %v15302_v60  ;;  %v3514_v60 = vrot.slane %v14397_v34, 1  ;;  %v5215_v47 = vld [vmem:[%s23239_s3 + $0x21e0] sm:$0xff]  ;;  %v3511_v34 = vrot.slane %v14394_v59, 1  ;;  %v3674_v59 = vrot.slane %v3667_v46, %v23611_v10  ;;  %v4184_v46 = vld [vmem:[%s23239_s3 + $0x1a8] sm:$0xff] }
 0x28f   :  { %11749 = vmatprep.subr.bf16.mxu0 %v15295_v51  ;;  %v3431_v51 = vrot.slane %v16058_v5, 1  ;;  %v5103_v56 = vld [vmem:[%s23239_s3 + $0x1e60] sm:$0xff]  ;;  %v3743_v57 = vcombine.low %v3506_v38, %v3507_v19  ;;  %v15535_v16 = vcombine.high %v5211_v8, %v5215_v47  ;;  %v5563_v61 = vrot.slane %v14450_v54, %v23611_v10 }
 0x290   :  { %11797 = vmatpush2.bf16.msra.mxu1 %v15446_v37  ;;  %v5099_v37 = vld [vmem:[%s23239_s3 + $0x1e40] sm:$0xff]  ;;  %v3955_v25 = vcombine.low %v3428_v31, %v3514_v60  ;;  %v15534_v31 = vcombine.low %v5211_v8, %v5215_v47  ;;  %v3879_v52 = vcombine.low %v3425_v12, %v3511_v34  ;;  %v4188_v60 = vld [vmem:[%s23239_s3 + $0x1c8] sm:$0xff] }
 0x291   :  { %11798 = vmatprep.subr.bf16.mxu1 %v15439_v63  ;;  %v15430_v63 = vcombine.low %v5107_v32, %v5111_v6  ;;  %v5203_v0 = vld [vmem:[%s23239_s3 + $0x2180] sm:$0xff]  ;;  %v4031_v23 = vcombine.low %v3431_v51, %v3517_v2  ;;  %v15423_v62 = vcombine.high %v5099_v37, %v5103_v56  ;;  %v3750_v32 = vrot.slane %v3743_v57, %v23611_v10  ;;  %v4192_v8 = vld [vmem:[%s23239_s3 + $0x1e8] sm:$0xff] }
 0x292   :  { %11750 = vmatpush2.bf16.msra.mxu0 %v15294_v14  ;;  %v5207_v24 = vld [vmem:[%s23239_s3 + $0x21a0] sm:$0xff]  ;;  %v3826_v14 = vrot.slane %v3819_v4, %v23611_v10  ;;  %v19425_v6 = vcombine.low %v19116_v30, %v19105_v36  ;;  %v15422_v58 = vcombine.low %v5099_v37, %v5103_v56  ;;  %v3969_v38 = vrot.slane %v3955_v25, %v23611_v10 }
 0x293   :  { %11751 = vmatprep.subr.bf16.mxu0 %v15287_v44  ;;  %v5091_v28 = vld [vmem:[%s23239_s3 + $0x1e00] sm:$0xff]  ;;  %v15527_v48 = vcombine.high %v5203_v0, %v5207_v24  ;;  %v19428_v19 = vcombine.high %v5563_v61, %v5577_v21  ;;  %v4045_v50 = vrot.slane %v4031_v23, %v23611_v10  ;;  %v3598_v36 = vrot.slane %v3591_v49, %v23611_v10 }
 0x294   :  { %11799 = vmatpush2.bf16.msra.mxu1 %v15438_v41  ;;  %v5095_v5 = vld [vmem:[%s23239_s3 + $0x1e20] sm:$0xff]  ;;  %23760 = vst [vmem:[#allocation42_spill] sm:$0xff] %v19425_v6  ;;  %v5428_v30 = vcombine.low %v3750_v32, %v3826_v14  ;;  %v15526_v29 = vcombine.low %v5203_v0, %v5207_v24  ;;  %v3893_v47 = vrot.slane %v3879_v52, %v23611_v10 }
 0x295   :  { %11800 = vmatprep.subr.bf16.mxu1 %v15431_v45  ;;  %23761 = vst [vmem:[#allocation48_spill] sm:$0xff] %v19428_v19  ;;  %v5195_v12 = vld [vmem:[%s23239_s3 + $0x2140] sm:$0xff]  ;;  %v15415_v44 = vcombine.high %v5091_v28, %v5095_v5  ;;  %v14453_v7 = vcombine.low %v4045_v50, %v4121_v40  ;;  %v5427_v2 = vcombine.low %v3598_v36, %v3674_v59  ;;  %v4168_v36 = vld [vmem:[%s23239_s3 + $0x128] sm:$0xff] }
 0x296   :  { %11752 = vmatpush2.bf16.msra.mxu0 %v15286_v55  ;;  %v5199_v41 = vld [vmem:[%s23239_s3 + $0x2160] sm:$0xff]  ;;  %v15414_v4 = vcombine.low %v5091_v28, %v5095_v5  ;;  %v14451_v45 = vcombine.low %v3893_v47, %v3969_v38  ;;  %v19448_v55 = vrot.slane %v5428_v30, %v23611_v10  ;;  %v14513_v37 = vcombine.high %v4188_v60, %v4192_v8  ;;  %v4172_v28 = vld [vmem:[%s23239_s3 + $0x148] sm:$0xff] }
 0x297   :  { %11827 = vmatprep.subr.bf16.mxu0 %v15535_v16  ;;  %v15519_v15 = vcombine.high %v5195_v12, %v5199_v41  ;;  %v5187_v54 = vld [vmem:[%s23239_s3 + $0x2100] sm:$0xff]  ;;  %v5584_v56 = vrot.slane %v14453_v7, %v23611_v10  ;;  %v15518_v34 = vcombine.low %v5195_v12, %v5199_v41  ;;  %v19464_v57 = vrot.slane %v5427_v2, %v23611_v10  ;;  %v4176_v5 = vld [vmem:[%s23239_s3 + $0x168] sm:$0xff] }
 0x298   :  { %11801 = vmatpush2.bf16.msra.mxu1 %v15430_v63  ;;  %v5191_v51 = vld [vmem:[%s23239_s3 + $0x2120] sm:$0xff]  ;;  %v11437_v63 = vpop.f32.mrf.mxu0  ;;  %v19466_v16 = vcombine.low %v5563_v61, %v5577_v21  ;;  %v14512_v0 = vcombine.low %v4188_v60, %v4192_v8  ;;  %v5570_v24 = vrot.slane %v14451_v45, %v23611_v10  ;;  %v19481_v21 = vcombine.low %v19167_v39, %v19158_v35  ;;  %v11490_v39 = vpop.f32.mrf.mxu1  ;;  %v4164_v41 = vld [vmem:[%s23239_s3 + $0x108] sm:$0xff] }
 0x299   :  { %11802 = vmatprep.subr.bf16.mxu1 %v15423_v62  ;;  %11754 = vmatmul.mubr.bf16.vlgmr.msra.gmra.mxu0 %v19425_v6  ;;  %v15511_v25 = vcombine.high %v5187_v54, %v5191_v51  ;;  %v19471_v23 = vcombine.high %v19464_v57, %v19448_v55  ;;  %v5179_v49 = vld [vmem:[%s23239_s3 + $0x20c0] sm:$0xff]  ;;  %v14505_v62 = vcombine.high %v4180_v53, %v4184_v46  ;;  %v4156_v45 = vld [vmem:[%s23239_s3 + $0xc8] sm:$0xff] }
 0x29a   :  { %11763 = vmatprep.mubr.bf16.mxu0 %v19428_v19  ;;  %11828 = vmatpush1.bf16.msra.mxu0 %v15534_v31  ;;  %23762 = vst [vmem:[#allocation12_spill] sm:$0xff] %v19466_v16  ;;  %v5183_v14 = vld [vmem:[%s23239_s3 + $0x20e0] sm:$0xff]  ;;  %23764 = vst [vmem:[#allocation47_spill] sm:$0xff] %v19481_v21  ;;  %v19484_v31 = vcombine.high %v5570_v24, %v5584_v56  ;;  %v15510_v61 = vcombine.low %v5187_v54, %v5191_v51  ;;  %v11439_v35 = vpop.f32.mrf.mxu0  ;;  %v4160_v54 = vld [vmem:[%s23239_s3 + $0xe8] sm:$0xff] }
 0x29b   :  { %11829 = vmatprep.subr.bf16.mxu0 %v15527_v48  ;;  %23763 = vst [vmem:[#allocation46_spill] sm:$0xff] %v19471_v23  ;;  %v15503_v52 = vcombine.high %v5179_v49, %v5183_v14  ;;  %v19494_v40 = vadd.f32 %v11490_v39, %v11437_v63  ;;  %v14504_v59 = vcombine.low %v4180_v53, %v4184_v46  ;;  %v5171_v32 = vld [vmem:[%s23239_s3 + $0x2080] sm:$0xff]  ;;  %v11492_v48 = vpop.f32.mrf.mxu1  ;;  %v4148_v63 = vld [vmem:[%s23239_s3 + $0x88] sm:$0xff] }
 0x29c   :  { %11803 = vmatpush2.bf16.msra.mxu1 %v15422_v58  ;;  %23765 = vst [vmem:[#allocation52_spill] sm:$0xff] %v19484_v31  ;;  %v5175_v58 = vld [vmem:[%s23239_s3 + $0x20a0] sm:$0xff]  ;;  %v14497_v38 = vcombine.high %v4172_v28, %v4176_v5  ;;  %v19503_v50 = vadd.f32 %v11492_v48, %v11439_v35  ;;  %v15502_v12 = vcombine.low %v5179_v49, %v5183_v14  ;;  %v11441_v30 = vpop.f32.mrf.mxu0  ;;  %v4140_v35 = vld [vmem:[%s23239_s3 + $0x48] sm:$0xff] }
 0x29d   :  { %11804 = vmatprep.subr.bf16.mxu1 %v15415_v44  ;;  %v11494_v44 = vpop.f32.mrf.mxu1  ;;  %v14496_v8 = vcombine.low %v4172_v28, %v4176_v5  ;;  %v5163_v47 = vld [vmem:[%s23239_s3 + $0x2040] sm:$0xff]  ;;  %v19519_v2 = vcombine.low %v5570_v24, %v5584_v56  ;;  %v14481_v53 = vcombine.high %v4156_v45, %v4160_v54  ;;  %v14480_v49 = vcombine.low %v4156_v45, %v4160_v54  ;;  %v4144_v39 = vld [vmem:[%s23239_s3 + $0x68] sm:$0xff] }
 0x29e   :  { %11830 = vmatpush1.bf16.msra.mxu0 %v15526_v29  ;;  %v15495_v29 = vcombine.high %v5171_v32, %v5175_v58  ;;  %v19511_v60 = vadd.f32 %v11494_v44, %v11441_v30  ;;  %v5167_v7 = vld [vmem:[%s23239_s3 + $0x2060] sm:$0xff]  ;;  %v4132_v44 = vld [vmem:[%s23239_s3 + $0x8] sm:$0xff] }
 0x29f   :  { %11831 = vmatprep.subr.bf16.mxu0 %v15519_v15  ;;  %23766 = vst [vmem:[#allocation11_spill] sm:$0xff] %v19519_v2  ;;  %v14489_v15 = vcombine.high %v4164_v41, %v4168_v36  ;;  %v15487_v51 = vcombine.high %v5163_v47, %v5167_v7  ;;  %v5155_v56 = vld [vmem:[%s23239_s3 + $0x2000] sm:$0xff]  ;;  %v15486_v46 = vcombine.low %v5163_v47, %v5167_v7 }
 0x2a0   :  { %11805 = vmatpush2.bf16.msra.mxu1 %v15414_v4  ;;  %v15494_v4 = vcombine.low %v5171_v32, %v5175_v58  ;;  %v5275_v14 = vld [vmem:[%s23239_s3 + $0x23c0] sm:$0xff]  ;;  %v14464_v7 = vcombine.low %v4140_v35, %v4144_v39 }
 0x2a1   :  { %11880 = vmatprep.subr.bf16.mxu1 %v14513_v37  ;;  %11764 = vmatmul.mubr.bf16.gmra.mxu0 %v19466_v16  ;;  %v14488_v37 = vcombine.low %v4164_v41, %v4168_v36  ;;  %v5267_v58 = vld [vmem:[%s23239_s3 + $0x2380] sm:$0xff] }
 0x2a2   :  { %11832 = vmatpush1.bf16.msra.mxu0 %v15518_v34  ;;  %11859 = vmatprep.mubr.bf16.mxu0 %v19471_v23  ;;  %v5159_v34 = vld [vmem:[%s23239_s3 + $0x2020] sm:$0xff] }
 0x2a3   :  { %11807 = vmatmul.mubr.bf16.vlgmr.msra.gmra.mxu1 %v19481_v21  ;;  %11833 = vmatprep.subr.bf16.mxu0 %v15511_v25  ;;  %v4152_v25 = vld [vmem:[%s23239_s3 + $0xa8] sm:$0xff]  ;;  %v15479_v24 = vcombine.high %v5155_v56, %v5159_v34  ;;  %v15478_v5 = vcombine.low %v5155_v56, %v5159_v34  ;;  %v5271_v48 = vld [vmem:[%s23239_s3 + $0x23a0] sm:$0xff] }
 0x2a4   :  { %11816 = vmatprep.mubr.bf16.mxu1 %v19484_v31  ;;  %11881 = vmatpush1.bf16.msra.mxu1 %v14512_v0  ;;  %v19541_v0 = vpop.f32.mrf.mxu0  ;;  %v14472_v32 = vcombine.low %v4148_v63, %v4152_v25  ;;  %v15591_v47 = vcombine.high %v5267_v58, %v5271_v48  ;;  %v5263_v45 = vld [vmem:[%s23239_s3 + $0x2360] sm:$0xff]  ;;  %v15590_v34 = vcombine.low %v5267_v58, %v5271_v48  ;;  %v16079_v58 = vld [vmem:[#allocation2 + $0xbc] ss:$0 sps:$4 sm:$0x66]  }
 0x2a5   :  { %11882 = vmatprep.subr.bf16.mxu1 %v14505_v62  ;;  %23767 = vst [vmem:[#allocation13_spill] sm:$0xff] %v19541_v0  ;;  %v5279_v62 = vld [vmem:[%s23239_s3 + $0x23e0] sm:$0xff] }
 0x2a6   :  { %11834 = vmatpush1.bf16.msra.mxu0 %v15510_v61  ;;  %v14473_v61 = vcombine.high %v4148_v63, %v4152_v25  ;;  %v11447_v28 = vpop.f32.mrf.mxu0  ;;  %v15598_v30 = vcombine.low %v5275_v14, %v5279_v62 }
 0x2a7   :  { %11835 = vmatprep.subr.bf16.mxu0 %v15503_v52  ;;  %v19555_v52 = vpop.f32.mrf.mxu1 }
 0x2a8   :  { %11883 = vmatpush1.bf16.msra.mxu1 %v14504_v59  ;;  %23768 = vst [vmem:[#allocation49_spill] sm:$0xff] %v19555_v52  ;;  %v15599_v59 = vcombine.high %v5275_v14, %v5279_v62 }
 0x2a9   :  { %11884 = vmatprep.subr.bf16.mxu1 %v14497_v38  ;;  %v11449_v38 = vpop.f32.mrf.mxu0  ;;  %v11500_v41 = vpop.f32.mrf.mxu1 }
 0x2aa   :  { %11836 = vmatpush1.bf16.msra.mxu0 %v15502_v12  ;;  %v14465_v12 = vcombine.high %v4140_v35, %v4144_v39  ;;  %v19563_v36 = vadd.f32 %v11500_v41, %v11447_v28  ;;  %v4248_v28 = vld [vmem:[%s23239_s3 + $0x3a8] sm:$0xff]  ;;  %v5243_v39 = vld [vmem:[%s23239_s3 + $0x22c0] sm:$0xff] }
 0x2ab   :  { %11817 = vmatmul.mubr.bf16.gmra.mxu1 %v19519_v2  ;;  %11837 = vmatprep.subr.bf16.mxu0 %v15495_v29  ;;  %v4136_v29 = vld [vmem:[%s23239_s3 + $0x28] sm:$0xff]  ;;  %v11451_v54 = vpop.f32.mrf.mxu0 }
 0x2ac   :  { %11885 = vmatpush1.bf16.msra.mxu1 %v14496_v8  ;;  %11912 = vmatprep.mubr.bf16.mxu1 %v17800_v22  ;;  %v11502_v8 = vpop.f32.mrf.mxu1  ;;  %v14456_v25 = vcombine.low %v4132_v44, %v4136_v29  ;;  %v4236_v41 = vld [vmem:[%s23239_s3 + $0x348] sm:$0xff] }
 0x2ad   :  { %11886 = vmatprep.subr.bf16.mxu1 %v14489_v15  ;;  %v19571_v15 = vadd.f32 %v11502_v8, %v11449_v38  ;;  %v16075_v38 = vld [vmem:[#allocation2 + $0x8c] ss:$0 sps:$4 sm:$0x66]  }
 0x2ae   :  { %11838 = vmatpush1.bf16.msra.mxu0 %v15494_v4  ;;  %v5259_v4 = vld [vmem:[%s23239_s3 + $0x2340] sm:$0xff] }
 0x2af   :  { %11839 = vmatprep.subr.bf16.mxu0 %v15487_v51  ;;  %v14457_v51 = vcombine.high %v4132_v44, %v4136_v29  ;;  %v15583_v63 = vcombine.high %v5259_v4, %v5263_v45  ;;  %v15582_v62 = vcombine.low %v5259_v4, %v5263_v45  ;;  %v14398_v44 = vcombine.high %v19327_v11, %v19327_v11  ;;  %v16077_v29 = vld [vmem:[#allocation2 + $0xa4] ss:$0 sps:$4 sm:$0x66]  }
 0x2b0   :  { %11887 = vmatpush1.bf16.msra.mxu1 %v14488_v37  ;;  %v11504_v37 = vpop.f32.mrf.mxu1  ;;  %v5235_v4 = vld [vmem:[%s23239_s3 + $0x2280] sm:$0xff]  ;;  %v14395_v11 = vcombine.high %v19350_v27, %v19350_v27 }
 0x2b1   :  { %11888 = vmatprep.subr.bf16.mxu1 %v14481_v53  ;;  %v19579_v56 = vadd.f32 %v11504_v37, %v11451_v54  ;;  %v4252_v53 = vld [vmem:[%s23239_s3 + $0x3c8] sm:$0xff]  ;;  %v5239_v45 = vld [vmem:[%s23239_s3 + $0x22a0] sm:$0xff] }
 0x2b2   :  { %11840 = vmatpush1.bf16.msra.mxu0 %v15486_v46  ;;  %v4256_v46 = vld [vmem:[%s23239_s3 + $0x3e8] sm:$0xff]  ;;  %v15559_v27 = vcombine.high %v5235_v4, %v5239_v45 }
 0x2b3   :  { %11841 = vmatprep.subr.bf16.mxu0 %v15479_v24  ;;  %v5251_v24 = vld [vmem:[%s23239_s3 + $0x2300] sm:$0xff]  ;;  %v14577_v14 = vcombine.high %v4252_v53, %v4256_v46  ;;  %v14576_v35 = vcombine.low %v4252_v53, %v4256_v46  ;;  %v4232_v53 = vld [vmem:[%s23239_s3 + $0x328] sm:$0xff]  ;;  %v3515_v46 = vrot.slane %v14398_v44, 1 }
 0x2b4   :  { %11889 = vmatpush1.bf16.msra.mxu1 %v14480_v49  ;;  %v5255_v49 = vld [vmem:[%s23239_s3 + $0x2320] sm:$0xff] }
 0x2b5   :  { %11890 = vmatprep.subr.bf16.mxu1 %v14473_v61  ;;  %v4244_v61 = vld [vmem:[%s23239_s3 + $0x388] sm:$0xff] }
 0x2b6   :  { %11842 = vmatpush1.bf16.msra.mxu0 %v15478_v5  ;;  %v15575_v5 = vcombine.high %v5251_v24, %v5255_v49  ;;  %v14569_v48 = vcombine.high %v4244_v61, %v4248_v28 }
 0x2b7   :  { %11843 = vmatprep.subr.bf16.mxu0 %v15599_v59  ;;  %v5247_v59 = vld [vmem:[%s23239_s3 + $0x22e0] sm:$0xff] }
 0x2b8   :  { %11891 = vmatpush1.bf16.msra.mxu1 %v14472_v32  ;;  %v14404_v32 = vcombine.high %v19329_v3, %v19329_v3  ;;  %v14401_v3 = vcombine.high %v19347_v13, %v19347_v13  ;;  %v15567_v8 = vcombine.high %v5243_v39, %v5247_v59  ;;  %v15566_v37 = vcombine.low %v5243_v39, %v5247_v59  ;;  %v4220_v59 = vld [vmem:[%s23239_s3 + $0x2c8] sm:$0xff] }
 0x2b9   :  { %11892 = vmatprep.subr.bf16.mxu1 %v14465_v12  ;;  %v15574_v12 = vcombine.low %v5251_v24, %v5255_v49  ;;  %v3519_v24 = vrot.slane %v16077_v29, 1  ;;  %v15558_v39 = vcombine.low %v5235_v4, %v5239_v45 }
 0x2ba   :  { %11844 = vmatpush2.bf16.msra.mxu0 %v15598_v30  ;;  %v4240_v30 = vld [vmem:[%s23239_s3 + $0x368] sm:$0xff]  ;;  %v3521_v54 = vrot.slane %v14404_v32, 1 }
 0x2bb   :  { %11845 = vmatprep.subr.bf16.mxu0 %v15591_v47  ;;  %v16073_v47 = vld [vmem:[#allocation2 + $0x74] ss:$0 sps:$4 sm:$0x66]   ;;  %v14561_v13 = vcombine.high %v4236_v41, %v4240_v30  ;;  %v14560_v49 = vcombine.low %v4236_v41, %v4240_v30  ;;  %v4224_v32 = vld [vmem:[%s23239_s3 + $0x2e8] sm:$0xff]  ;;  %v5219_v41 = vld [vmem:[%s23239_s3 + $0x2200] sm:$0xff] }
 0x2bc   :  { %11893 = vmatpush1.bf16.msra.mxu1 %v14464_v7  ;;  %v14568_v7 = vcombine.low %v4244_v61, %v4248_v28  ;;  %v3512_v61 = vrot.slane %v14395_v11, 1  ;;  %v3513_v28 = vrot.slane %v16073_v47, 1  ;;  %v5223_v30 = vld [vmem:[%s23239_s3 + $0x2220] sm:$0xff]  ;;  %v14545_v29 = vcombine.high %v4220_v59, %v4224_v32  ;;  %v4212_v47 = vld [vmem:[%s23239_s3 + $0x288] sm:$0xff] }
 0x2bd   :  { %11894 = vmatprep.subr.bf16.mxu1 %v14457_v51  ;;  %v3522_v51 = vrot.slane %v16079_v58, 1  ;;  %v15543_v11 = vcombine.high %v5219_v41, %v5223_v30 }
 0x2be   :  { %11846 = vmatpush2.bf16.msra.mxu0 %v15590_v34  ;;  %v4228_v34 = vld [vmem:[%s23239_s3 + $0x308] sm:$0xff]  ;;  %v3895_v44 = vcombine.low %v3512_v61, %v3513_v28 }
 0x2bf   :  { %11847 = vmatprep.subr.bf16.mxu0 %v15583_v63  ;;  %v3516_v63 = vrot.slane %v16075_v38, 1  ;;  %v4312_v61 = vld [vmem:[%s23239_s3 + $0x5a8] sm:$0xff] }
 0x2c0   :  { %11895 = vmatpush1.bf16.msra.mxu1 %v14456_v25  ;;  %v3518_v25 = vrot.slane %v14401_v3, 1 }
 0x2c1   :  { %11896 = vmatprep.subr.bf16.mxu1 %v14577_v14  ;;  %v5227_v14 = vld [vmem:[%s23239_s3 + $0x2240] sm:$0xff]  ;;  %v3971_v58 = vcombine.low %v3515_v46, %v3516_v63  ;;  %v15542_v46 = vcombine.low %v5219_v41, %v5223_v30  ;;  %v4204_v63 = vld [vmem:[%s23239_s3 + $0x248] sm:$0xff] }
 0x2c2   :  { %11848 = vmatpush2.bf16.msra.mxu0 %v15582_v62  ;;  %v5231_v62 = vld [vmem:[%s23239_s3 + $0x2260] sm:$0xff]  ;;  %v4300_v41 = vld [vmem:[%s23239_s3 + $0x548] sm:$0xff] }
 0x2c3   :  { %11849 = vmatprep.subr.bf16.mxu0 %v15575_v5  ;;  %v4123_v5 = vcombine.low %v3521_v54, %v3522_v51  ;;  %v15551_v38 = vcombine.high %v5227_v14, %v5231_v62  ;;  %v3978_v4 = vrot.slane %v3971_v58, %v23611_v10  ;;  %v14544_v54 = vcombine.low %v4220_v59, %v4224_v32  ;;  %v4316_v51 = vld [vmem:[%s23239_s3 + $0x5c8] sm:$0xff]  ;;  %v19689_v58 = vpop.f32.mrf.mxu0 }
 0x2c4   :  { %11897 = vmatpush2.bf16.msra.mxu1 %v14576_v35  ;;  %v14553_v35 = vcombine.high %v4228_v34, %v4232_v53  ;;  %v19687_v32 = vcombine.low %v19464_v57, %v19448_v55 }
 0x2c5   :  { %11898 = vmatprep.subr.bf16.mxu1 %v14569_v48  ;;  %v4047_v48 = vcombine.low %v3518_v25, %v3519_v24  ;;  %v4130_v3 = vrot.slane %v4123_v5, %v23611_v10  ;;  %v4208_v25 = vld [vmem:[%s23239_s3 + $0x268] sm:$0xff] }
 0x2c6   :  { %11850 = vmatpush2.bf16.msra.mxu0 %v15574_v12  ;;  %v14552_v12 = vcombine.low %v4228_v34, %v4232_v53  ;;  %v14529_v28 = vcombine.high %v4204_v63, %v4208_v25  ;;  %v4196_v5 = vld [vmem:[%s23239_s3 + $0x208] sm:$0xff]  ;;  %23769 = vst [vmem:[#allocation15_spill] sm:$0xff] %v19687_v32 }
 0x2c7   :  { %11851 = vmatprep.subr.bf16.mxu0 %v15567_v8  ;;  %v15550_v8 = vcombine.low %v5227_v14, %v5231_v62  ;;  %v4054_v45 = vrot.slane %v4047_v48, %v23611_v10  ;;  %v4308_v62 = vld [vmem:[%s23239_s3 + $0x588] sm:$0xff] }
 0x2c8   :  { %11899 = vmatpush2.bf16.msra.mxu1 %v14568_v7  ;;  %v4216_v7 = vld [vmem:[%s23239_s3 + $0x2a8] sm:$0xff]  ;;  %v14633_v48 = vcombine.high %v4308_v62, %v4312_v61 }
 0x2c9   :  { %11900 = vmatprep.subr.bf16.mxu1 %v14561_v13  ;;  %v4320_v13 = vld [vmem:[%s23239_s3 + $0x5e8] sm:$0xff]  ;;  %v5590_v34 = vcombine.low %v4054_v45, %v4130_v3  ;;  %v14537_v53 = vcombine.high %v4212_v47, %v4216_v7  ;;  %v11543_v30 = vpop.f32.mrf.mxu0 }
 0x2ca   :  { %11852 = vmatpush2.bf16.msra.mxu0 %v15566_v37  ;;  %v3902_v37 = vrot.slane %v3895_v44, %v23611_v10  ;;  %v11544_v57 = vadd.f32 %v11543_v30, %v19494_v40  ;;  %v14632_v44 = vcombine.low %v4308_v62, %v4312_v61  ;;  %v4444_v3 = vld [vmem:[%s23239_s3 + $0x9c8] sm:$0xff] }
 0x2cb   :  { %11853 = vmatprep.subr.bf16.mxu0 %v15559_v27  ;;  %v14641_v27 = vcombine.high %v4316_v51, %v4320_v13  ;;  %v5604_v14 = vrot.slane %v5590_v34, %v23611_v10  ;;  %v4292_v40 = vld [vmem:[%s23239_s3 + $0x508] sm:$0xff] }
 0x2cc   :  { %11901 = vmatpush2.bf16.msra.mxu1 %v14560_v49  ;;  %v5589_v24 = vcombine.low %v3902_v37, %v3978_v4  ;;  %v14536_v49 = vcombine.low %v4212_v47, %v4216_v7  ;;  %v4296_v45 = vld [vmem:[%s23239_s3 + $0x528] sm:$0xff] }
 0x2cd   :  { %11902 = vmatprep.subr.bf16.mxu1 %v14553_v35  ;;  %v4200_v35 = vld [vmem:[%s23239_s3 + $0x228] sm:$0xff]  ;;  %v14616_v62 = vcombine.low %v4292_v40, %v4296_v45 }
 0x2ce   :  { %11854 = vmatpush2.bf16.msra.mxu0 %v15558_v39  ;;  %v14640_v39 = vcombine.low %v4316_v51, %v4320_v13  ;;  %v5597_v59 = vrot.slane %v5589_v24, %v23611_v10  ;;  %v4304_v10 = vld [vmem:[%s23239_s3 + $0x568] sm:$0xff]  ;;  %v14521_v55 = vcombine.high %v4196_v5, %v4200_v35  ;;  %v14520_v7 = vcombine.low %v4196_v5, %v4200_v35  ;;  %v19732_v24 = vpop.f32.mrf.mxu1  ;;  %v23772_v35 = vld [vmem:[#allocation30_spill] sm:$0xff] }
 0x2cf   :  { %11855 = vmatprep.subr.bf16.mxu0 %v15551_v38  ;;  %v14528_v38 = vcombine.low %v4204_v63, %v4208_v25  ;;  %v14625_v47 = vcombine.high %v4300_v41, %v4304_v10  ;;  %v14624_v13 = vcombine.low %v4300_v41, %v4304_v10  ;;  %v4436_v37 = vld [vmem:[%s23239_s3 + $0x988] sm:$0xff] }
 0x2d0   :  { %11903 = vmatpush2.bf16.msra.mxu1 %v14552_v12  ;;  %v19691_v12 = vcombine.high %v5597_v59, %v5604_v14  ;;  %v4288_v25 = vld [vmem:[%s23239_s3 + $0x4e8] sm:$0xff] }
 0x2d1   :  { %11904 = vmatprep.subr.bf16.mxu1 %v14545_v29  ;;  %v4448_v29 = vld [vmem:[%s23239_s3 + $0x9e8] sm:$0xff] }
 0x2d2   :  { %11856 = vmatpush2.bf16.msra.mxu0 %v15550_v8  ;;  %23770 = vst [vmem:[#allocation14_spill] sm:$0xff] %v19691_v12  ;;  %v11545_v8 = vpop.f32.mrf.mxu0  ;;  %v14768_v63 = vcombine.low %v4444_v3, %v4448_v29  ;;  %v4428_v61 = vld [vmem:[%s23239_s3 + $0x948] sm:$0xff] }
 0x2d3   :  { %11857 = vmatprep.subr.bf16.mxu0 %v15543_v11  ;;  %v11546_v4 = vadd.f32 %v11545_v8, %v19503_v50  ;;  %v4440_v50 = vld [vmem:[%s23239_s3 + $0x9a8] sm:$0xff] }
 0x2d4   :  { %11905 = vmatpush2.bf16.msra.mxu1 %v14544_v54  ;;  %v11547_v11 = vpop.f32.mrf.mxu0  ;;  %v14769_v54 = vcombine.high %v4444_v3, %v4448_v29  ;;  %v4276_v10 = vld [vmem:[%s23239_s3 + $0x488] sm:$0xff] }
 0x2d5   :  { %11906 = vmatprep.subr.bf16.mxu1 %v14537_v53  ;;  %v11548_v51 = vadd.f32 %v11547_v11, %v19511_v60  ;;  %v19724_v53 = vcombine.low %v5597_v59, %v5604_v14  ;;  %v4284_v60 = vld [vmem:[%s23239_s3 + $0x4c8] sm:$0xff]  ;;  %v11596_v5 = vpop.f32.mrf.mxu1 }
 0x2d6   :  { %11858 = vmatpush2.bf16.msra.mxu0 %v15542_v46  ;;  %v19722_v34 = vpop.f32.mrf.mxu0  ;;  %v14617_v46 = vcombine.high %v4292_v40, %v4296_v45  ;;  %v14609_v59 = vcombine.high %v4284_v60, %v4288_v25  ;;  %v4280_v30 = vld [vmem:[%s23239_s3 + $0x4a8] sm:$0xff]  ;;  %v14608_v8 = vcombine.low %v4284_v60, %v4288_v25 }
 0x2d7   :  { %11933 = vmatprep.subr.bf16.mxu0 %v14641_v27  ;;  %23771 = vst [vmem:[#allocation51_spill] sm:$0xff] %v19722_v34  ;;  %v14601_v40 = vcombine.high %v4276_v10, %v4280_v30  ;;  %v4272_v11 = vld [vmem:[%s23239_s3 + $0x468] sm:$0xff] }
 0x2d8   :  { %11907 = vmatpush2.bf16.msra.mxu1 %v14536_v49  ;;  %v11553_v27 = vpop.f32.mrf.mxu0  ;;  %v14761_v49 = vcombine.high %v4436_v37, %v4440_v50 }
 0x2d9   :  { %11908 = vmatprep.subr.bf16.mxu1 %v14529_v28  ;;  %11860 = vmatmul.mubr.bf16.vlgmr.msra.gmra.mxu0 %v19687_v32  ;;  %v11554_v14 = vadd.f32 %v11553_v27, %v19563_v36  ;;  %v4432_v28 = vld [vmem:[%s23239_s3 + $0x968] sm:$0xff]  ;;  %v23773_v36 = vld [vmem:[#allocation5_spill] sm:$0xff] }
 0x2da   :  { %11869 = vmatprep.mubr.bf16.mxu0 %v19691_v12  ;;  %11934 = vmatpush1.bf16.msra.mxu0 %v14640_v39  ;;  %v11555_v39 = vpop.f32.mrf.mxu0  ;;  %v14753_v3 = vcombine.high %v4428_v61, %v4432_v28  ;;  %v23776_v27 = vld [vmem:[#allocation32_spill] sm:$0xff] }
 0x2db   :  { %11935 = vmatprep.subr.bf16.mxu0 %v14633_v48  ;;  %v19744_v48 = vadd.f32 %v11596_v5, %v11544_v57  ;;  %v11556_v41 = vadd.f32 %v11555_v39, %v19571_v15  ;;  %v4420_v15 = vld [vmem:[%s23239_s3 + $0x908] sm:$0xff] }
 0x2dc   :  { %11909 = vmatpush2.bf16.msra.mxu1 %v14528_v38  ;;  %v14760_v38 = vcombine.low %v4436_v37, %v4440_v50  ;;  %v14600_v37 = vcombine.low %v4276_v10, %v4280_v30  ;;  %v4416_v50 = vld [vmem:[%s23239_s3 + $0x8e8] sm:$0xff] }
 0x2dd   :  { %11910 = vmatprep.subr.bf16.mxu1 %v14521_v55  ;;  %v11598_v55 = vpop.f32.mrf.mxu1 }
 0x2de   :  { %11936 = vmatpush1.bf16.msra.mxu0 %v14632_v44  ;;  %v11557_v44 = vpop.f32.mrf.mxu0  ;;  %v19754_v57 = vadd.f32 %v11598_v55, %v11546_v4  ;;  %v14752_v4 = vcombine.low %v4428_v61, %v4432_v28  ;;  %v4264_v61 = vld [vmem:[%s23239_s3 + $0x428] sm:$0xff] }
 0x2df   :  { %11937 = vmatprep.subr.bf16.mxu0 %v14625_v47  ;;  %v11558_v29 = vadd.f32 %v11557_v44, %v19579_v56  ;;  %v4424_v47 = vld [vmem:[%s23239_s3 + $0x928] sm:$0xff] }
 0x2e0   :  { %11911 = vmatpush2.bf16.msra.mxu1 %v14520_v7  ;;  %v11600_v7 = vpop.f32.mrf.mxu1  ;;  %v4268_v56 = vld [vmem:[%s23239_s3 + $0x448] sm:$0xff] }
 0x2e1   :  { %11986 = vmatprep.subr.bf16.mxu1 %v14769_v54  ;;  %11870 = vmatmul.mubr.bf16.gmra.mxu0 %v19724_v53  ;;  %v19763_v45 = vadd.f32 %v11600_v7, %v11548_v51  ;;  %v4412_v51 = vld [vmem:[%s23239_s3 + $0x8c8] sm:$0xff]  ;;  %v14593_v60 = vcombine.high %v4268_v56, %v4272_v11 }
 0x2e2   :  { %11938 = vmatpush1.bf16.msra.mxu0 %v14624_v13  ;;  %11965 = vmatprep.mubr.bf16.mxu0 %v17849_v17  ;;  %v19771_v54 = vpop.f32.mrf.mxu1  ;;  %v14745_v13 = vcombine.high %v4420_v15, %v4424_v47  ;;  %v14737_v5 = vcombine.high %v4412_v51, %v4416_v50  ;;  %v14736_v44 = vcombine.low %v4412_v51, %v4416_v50  ;;  %v4392_v51 = vld [vmem:[%s23239_s3 + $0x828] sm:$0xff] }
 0x2e3   :  { %11913 = vmatmul.mubr.bf16.vlgmr.msra.gmra.mxu1 %v23772_v35  ;;  %11939 = vmatprep.subr.bf16.mxu0 %v14617_v46  ;;  %23774 = vst [vmem:[#allocation56_spill] sm:$0xff] %v19771_v54 }
 0x2e4   :  { %11922 = vmatprep.mubr.bf16.mxu1 %v23773_v36  ;;  %11987 = vmatpush1.bf16.msra.mxu1 %v14768_v63  ;;  %v11606_v46 = vpop.f32.mrf.mxu1  ;;  %v23775_v63 = vld [vmem:[#allocation6_spill] sm:$0xff] }
 0x2e5   :  { %11988 = vmatprep.subr.bf16.mxu1 %v14761_v49  ;;  %v19780_v25 = vadd.f32 %v11606_v46, %v11554_v14  ;;  %v14744_v49 = vcombine.low %v4420_v15, %v4424_v47  ;;  %v14592_v14 = vcombine.low %v4268_v56, %v4272_v11  ;;  %v4396_v47 = vld [vmem:[%s23239_s3 + $0x848] sm:$0xff] }
 0x2e6   :  { %11940 = vmatpush1.bf16.msra.mxu0 %v14616_v62  ;;  %v4260_v62 = vld [vmem:[%s23239_s3 + $0x408] sm:$0xff]  ;;  %v11608_v28 = vpop.f32.mrf.mxu1 }
 0x2e7   :  { %11941 = vmatprep.subr.bf16.mxu0 %v14609_v59  ;;  %v19789_v39 = vadd.f32 %v11608_v28, %v11556_v41  ;;  %v4404_v59 = vld [vmem:[%s23239_s3 + $0x888] sm:$0xff]  ;;  %v14585_v30 = vcombine.high %v4260_v62, %v4264_v61  ;;  %v14584_v15 = vcombine.low %v4260_v62, %v4264_v61 }
 0x2e8   :  { %11989 = vmatpush1.bf16.msra.mxu1 %v14760_v38  ;;  %v4408_v38 = vld [vmem:[%s23239_s3 + $0x8a8] sm:$0xff]  ;;  %v11610_v10 = vpop.f32.mrf.mxu1 }
 0x2e9   :  { %11990 = vmatprep.subr.bf16.mxu1 %v14753_v3  ;;  %v19797_v55 = vadd.f32 %v11610_v10, %v11558_v29  ;;  %v4380_v41 = vld [vmem:[%s23239_s3 + $0x7c8] sm:$0xff] }
 0x2ea   :  { %11942 = vmatpush1.bf16.msra.mxu0 %v14608_v8  ;;  %v4384_v3 = vld [vmem:[%s23239_s3 + $0x7e8] sm:$0xff]  ;;  %v14729_v8 = vcombine.high %v4404_v59, %v4408_v38 }
 0x2eb   :  { %11923 = vmatmul.mubr.bf16.gmra.mxu1 %v23775_v63  ;;  %11943 = vmatprep.subr.bf16.mxu0 %v14601_v40  ;;  %v4400_v29 = vld [vmem:[%s23239_s3 + $0x868] sm:$0xff]  ;;  %v14705_v7 = vcombine.high %v4380_v41, %v4384_v3  ;;  %v14728_v40 = vcombine.low %v4404_v59, %v4408_v38 }
 0x2ec   :  { %11991 = vmatpush1.bf16.msra.mxu1 %v14752_v4  ;;  %12018 = vmatprep.mubr.bf16.mxu1 %v23776_v27  ;;  %v4372_v4 = vld [vmem:[%s23239_s3 + $0x788] sm:$0xff]  ;;  %v14721_v11 = vcombine.high %v4396_v47, %v4400_v29  ;;  %v14720_v46 = vcombine.low %v4396_v47, %v4400_v29 }
 0x2ed   :  { %11992 = vmatprep.subr.bf16.mxu1 %v14745_v13  ;;  %v4376_v56 = vld [vmem:[%s23239_s3 + $0x7a8] sm:$0xff]  ;;  %v14704_v13 = vcombine.low %v4380_v41, %v4384_v3 }
 0x2ee   :  { %11944 = vmatpush1.bf16.msra.mxu0 %v14600_v37  ;;  %v4388_v37 = vld [vmem:[%s23239_s3 + $0x808] sm:$0xff]  ;;  %v14697_v50 = vcombine.high %v4372_v4, %v4376_v56  ;;  %v14696_v61 = vcombine.low %v4372_v4, %v4376_v56 }
 0x2ef   :  { %11945 = vmatprep.subr.bf16.mxu0 %v14593_v60  ;;  %v4364_v60 = vld [vmem:[%s23239_s3 + $0x748] sm:$0xff]  ;;  %v14713_v62 = vcombine.high %v4388_v37, %v4392_v51  ;;  %v14712_v59 = vcombine.low %v4388_v37, %v4392_v51 }
 0x2f0   :  { %11993 = vmatpush1.bf16.msra.mxu1 %v14744_v49  ;;  %v4368_v49 = vld [vmem:[%s23239_s3 + $0x768] sm:$0xff] }
 0x2f1   :  { %11994 = vmatprep.subr.bf16.mxu1 %v14737_v5  ;;  %v4508_v28 = vld [vmem:[%s23239_s3 + $0xbc8] sm:$0xff] }
 0x2f2   :  { %11946 = vmatpush1.bf16.msra.mxu0 %v14592_v14  ;;  %v4512_v5 = vld [vmem:[%s23239_s3 + $0xbe8] sm:$0xff]  ;;  %v14689_v14 = vcombine.high %v4364_v60, %v4368_v49 }
 0x2f3   :  { %11947 = vmatprep.subr.bf16.mxu0 %v14585_v30  ;;  %v4356_v38 = vld [vmem:[%s23239_s3 + $0x708] sm:$0xff]  ;;  %v14833_v30 = vcombine.high %v4508_v28, %v4512_v5 }
 0x2f4   :  { %11995 = vmatpush1.bf16.msra.mxu1 %v14736_v44  ;;  %v4360_v10 = vld [vmem:[%s23239_s3 + $0x728] sm:$0xff]  ;;  %v14688_v44 = vcombine.low %v4364_v60, %v4368_v49 }
 0x2f5   :  { %11996 = vmatprep.subr.bf16.mxu1 %v14729_v8  ;;  %v4500_v41 = vld [vmem:[%s23239_s3 + $0xb88] sm:$0xff]  ;;  %v14681_v8 = vcombine.high %v4356_v38, %v4360_v10 }
 0x2f6   :  { %11948 = vmatpush1.bf16.msra.mxu0 %v14584_v15  ;;  %v4504_v3 = vld [vmem:[%s23239_s3 + $0xba8] sm:$0xff]  ;;  %v14832_v15 = vcombine.low %v4508_v28, %v4512_v5 }
 0x2f7   :  { %11949 = vmatprep.subr.bf16.mxu0 %v14705_v7  ;;  %v4348_v47 = vld [vmem:[%s23239_s3 + $0x6c8] sm:$0xff]  ;;  %v14825_v7 = vcombine.high %v4500_v41, %v4504_v3 }
 0x2f8   :  { %11997 = vmatpush1.bf16.msra.mxu1 %v14728_v40  ;;  %v4352_v29 = vld [vmem:[%s23239_s3 + $0x6e8] sm:$0xff]  ;;  %v14680_v40 = vcombine.low %v4356_v38, %v4360_v10 }
 0x2f9   :  { %11998 = vmatprep.subr.bf16.mxu1 %v14721_v11  ;;  %v4492_v4 = vld [vmem:[%s23239_s3 + $0xb48] sm:$0xff]  ;;  %v14673_v11 = vcombine.high %v4348_v47, %v4352_v29 }
 0x2fa   :  { %11950 = vmatpush2.bf16.msra.mxu0 %v14704_v13  ;;  %v4496_v56 = vld [vmem:[%s23239_s3 + $0xb68] sm:$0xff]  ;;  %v14824_v13 = vcombine.low %v4500_v41, %v4504_v3 }
 0x2fb   :  { %11951 = vmatprep.subr.bf16.mxu0 %v14697_v50  ;;  %v4340_v37 = vld [vmem:[%s23239_s3 + $0x688] sm:$0xff]  ;;  %v14817_v50 = vcombine.high %v4492_v4, %v4496_v56 }
 0x2fc   :  { %11999 = vmatpush1.bf16.msra.mxu1 %v14720_v46  ;;  %v4344_v51 = vld [vmem:[%s23239_s3 + $0x6a8] sm:$0xff]  ;;  %v14672_v46 = vcombine.low %v4348_v47, %v4352_v29 }
 0x2fd   :  { %12000 = vmatprep.subr.bf16.mxu1 %v14713_v62  ;;  %v4484_v60 = vld [vmem:[%s23239_s3 + $0xb08] sm:$0xff]  ;;  %v14665_v62 = vcombine.high %v4340_v37, %v4344_v51 }
 0x2fe   :  { %11952 = vmatpush2.bf16.msra.mxu0 %v14696_v61  ;;  %v4488_v49 = vld [vmem:[%s23239_s3 + $0xb28] sm:$0xff]  ;;  %v14816_v61 = vcombine.low %v4492_v4, %v4496_v56 }
 0x2ff   :  { %11953 = vmatprep.subr.bf16.mxu0 %v14689_v14  ;;  %v4332_v28 = vld [vmem:[%s23239_s3 + $0x648] sm:$0xff]  ;;  %v14809_v14 = vcombine.high %v4484_v60, %v4488_v49 }
 0x300   :  { %12001 = vmatpush1.bf16.msra.mxu1 %v14712_v59  ;;  %v4336_v5 = vld [vmem:[%s23239_s3 + $0x668] sm:$0xff]  ;;  %v14664_v59 = vcombine.low %v4340_v37, %v4344_v51 }
 0x301   :  { %12002 = vmatprep.subr.bf16.mxu1 %v14833_v30  ;;  %v4476_v38 = vld [vmem:[%s23239_s3 + $0xac8] sm:$0xff]  ;;  %v14657_v30 = vcombine.high %v4332_v28, %v4336_v5 }
 0x302   :  { %11954 = vmatpush2.bf16.msra.mxu0 %v14688_v44  ;;  %v4480_v10 = vld [vmem:[%s23239_s3 + $0xae8] sm:$0xff]  ;;  %v14808_v44 = vcombine.low %v4484_v60, %v4488_v49 }
 0x303   :  { %11955 = vmatprep.subr.bf16.mxu0 %v14681_v8  ;;  %v4324_v41 = vld [vmem:[%s23239_s3 + $0x608] sm:$0xff]  ;;  %v14801_v8 = vcombine.high %v4476_v38, %v4480_v10 }
 0x304   :  { %12003 = vmatpush2.bf16.msra.mxu1 %v14832_v15  ;;  %v4328_v3 = vld [vmem:[%s23239_s3 + $0x628] sm:$0xff]  ;;  %v14656_v15 = vcombine.low %v4332_v28, %v4336_v5 }
 0x305   :  { %12004 = vmatprep.subr.bf16.mxu1 %v14825_v7  ;;  %v4468_v47 = vld [vmem:[%s23239_s3 + $0xa88] sm:$0xff]  ;;  %v14649_v7 = vcombine.high %v4324_v41, %v4328_v3 }
 0x306   :  { %11956 = vmatpush2.bf16.msra.mxu0 %v14680_v40  ;;  %v4472_v29 = vld [vmem:[%s23239_s3 + $0xaa8] sm:$0xff]  ;;  %v14800_v40 = vcombine.low %v4476_v38, %v4480_v10 }
 0x307   :  { %11957 = vmatprep.subr.bf16.mxu0 %v14673_v11  ;;  %v4572_v4 = vld [vmem:[%s23239_s3 + $0xdc8] sm:$0xff]  ;;  %v14793_v11 = vcombine.high %v4468_v47, %v4472_v29 }
 0x308   :  { %12005 = vmatpush2.bf16.msra.mxu1 %v14824_v13  ;;  %v4576_v56 = vld [vmem:[%s23239_s3 + $0xde8] sm:$0xff]  ;;  %v14648_v13 = vcombine.low %v4324_v41, %v4328_v3  ;;  %v23778_v41 = vld [vmem:[#allocation33_spill] sm:$0xff] }
 0x309   :  { %12006 = vmatprep.subr.bf16.mxu1 %v14817_v50  ;;  %v4460_v37 = vld [vmem:[%s23239_s3 + $0xa48] sm:$0xff]  ;;  %v14897_v50 = vcombine.high %v4572_v4, %v4576_v56  ;;  %v14896_v5 = vcombine.low %v4572_v4, %v4576_v56 }
 0x30a   :  { %11958 = vmatpush2.bf16.msra.mxu0 %v14672_v46  ;;  %v4464_v51 = vld [vmem:[%s23239_s3 + $0xa68] sm:$0xff]  ;;  %v14792_v46 = vcombine.low %v4468_v47, %v4472_v29 }
 0x30b   :  { %11959 = vmatprep.subr.bf16.mxu0 %v14665_v62  ;;  %v4564_v60 = vld [vmem:[%s23239_s3 + $0xd88] sm:$0xff]  ;;  %v14785_v62 = vcombine.high %v4460_v37, %v4464_v51  ;;  %v14784_v38 = vcombine.low %v4460_v37, %v4464_v51 }
 0x30c   :  { %12007 = vmatpush2.bf16.msra.mxu1 %v14816_v61  ;;  %v4568_v49 = vld [vmem:[%s23239_s3 + $0xda8] sm:$0xff] }
 0x30d   :  { %12008 = vmatprep.subr.bf16.mxu1 %v14809_v14  ;;  %v4452_v61 = vld [vmem:[%s23239_s3 + $0xa08] sm:$0xff]  ;;  %v19919_v14 = vpop.f32.mrf.mxu0  ;;  %v14888_v47 = vcombine.low %v4564_v60, %v4568_v49 }
 0x30e   :  { %11960 = vmatpush2.bf16.msra.mxu0 %v14664_v59  ;;  %v4456_v28 = vld [vmem:[%s23239_s3 + $0xa28] sm:$0xff]  ;;  %23777 = vst [vmem:[#allocation54_spill] sm:$0xff] %v19919_v14  ;;  %v14889_v59 = vcombine.high %v4564_v60, %v4568_v49 }
 0x30f   :  { %11961 = vmatprep.subr.bf16.mxu0 %v14657_v30  ;;  %v4556_v10 = vld [vmem:[%s23239_s3 + $0xd48] sm:$0xff]  ;;  %v14777_v3 = vcombine.high %v4452_v61, %v4456_v28  ;;  %v14776_v56 = vcombine.low %v4452_v61, %v4456_v28 }
 0x310   :  { %12009 = vmatpush2.bf16.msra.mxu1 %v14808_v44  ;;  %v4560_v30 = vld [vmem:[%s23239_s3 + $0xd68] sm:$0xff] }
 0x311   :  { %12010 = vmatprep.subr.bf16.mxu1 %v14801_v8  ;;  %v4700_v29 = vld [vmem:[%s23239_s3 + $0x11c8] sm:$0xff]  ;;  %v14881_v4 = vcombine.high %v4556_v10, %v4560_v30 }
 0x312   :  { %11962 = vmatpush2.bf16.msra.mxu0 %v14656_v15  ;;  %v23779_v15 = vld [vmem:[#allocation36_spill] sm:$0xff] }
 0x313   :  { %11963 = vmatprep.subr.bf16.mxu0 %v14649_v7  ;;  %v4704_v7 = vld [vmem:[%s23239_s3 + $0x11e8] sm:$0xff] }
 0x314   :  { %12011 = vmatpush2.bf16.msra.mxu1 %v14800_v40  ;;  %v15025_v51 = vcombine.high %v4700_v29, %v4704_v7  ;;  %v4692_v60 = vld [vmem:[%s23239_s3 + $0x1188] sm:$0xff]  ;;  %v15024_v61 = vcombine.low %v4700_v29, %v4704_v7 }
 0x315   :  { %12012 = vmatprep.subr.bf16.mxu1 %v14793_v11  ;;  %v4544_v28 = vld [vmem:[%s23239_s3 + $0xce8] sm:$0xff] }
 0x316   :  { %11964 = vmatpush2.bf16.msra.mxu0 %v14648_v13  ;;  %v4552_v13 = vld [vmem:[%s23239_s3 + $0xd28] sm:$0xff] }
 0x317   :  { %12039 = vmatprep.subr.bf16.mxu0 %v14897_v50  ;;  %v4688_v29 = vld [vmem:[%s23239_s3 + $0x1168] sm:$0xff] }
 0x318   :  { %12013 = vmatpush2.bf16.msra.mxu1 %v14792_v46  ;;  %v11649_v44 = vpop.f32.mrf.mxu0  ;;  %v14880_v46 = vcombine.low %v4556_v10, %v4560_v30 }
 0x319   :  { %12014 = vmatprep.subr.bf16.mxu1 %v14785_v62  ;;  %11966 = vmatmul.mubr.bf16.vlgmr.msra.gmra.mxu0 %v23778_v41  ;;  %v11650_v8 = vadd.f32 %v11649_v44, %v19744_v48  ;;  %v4548_v48 = vld [vmem:[%s23239_s3 + $0xd08] sm:$0xff]  ;;  %v23783_v44 = vld [vmem:[#allocation9_spill] sm:$0xff] }
 0x31a   :  { %11975 = vmatprep.mubr.bf16.mxu0 %v23779_v15  ;;  %12040 = vmatpush1.bf16.msra.mxu0 %v14896_v5  ;;  %v11651_v40 = vpop.f32.mrf.mxu0  ;;  %v14873_v62 = vcombine.high %v4548_v48, %v4552_v13  ;;  %v19958_v5 = vpop.f32.mrf.mxu1 }
 0x31b   :  { %12041 = vmatprep.subr.bf16.mxu0 %v14889_v59  ;;  %v11652_v11 = vadd.f32 %v11651_v40, %v19754_v57  ;;  %v4696_v57 = vld [vmem:[%s23239_s3 + $0x11a8] sm:$0xff]  ;;  %23781 = vst [vmem:[#allocation53_spill] sm:$0xff] %v19958_v5  ;;  %v23784_v40 = vld [vmem:[#allocation41_spill] sm:$0xff] }
 0x31c   :  { %12015 = vmatpush2.bf16.msra.mxu1 %v14784_v38  ;;  %v11653_v37 = vpop.f32.mrf.mxu0  ;;  %v23782_v38 = vld [vmem:[#allocation34_spill] sm:$0xff]  ;;  %v15017_v10 = vcombine.high %v4692_v60, %v4696_v57 }
 0x31d   :  { %12016 = vmatprep.subr.bf16.mxu1 %v14777_v3  ;;  %v11654_v50 = vadd.f32 %v11653_v37, %v19763_v45  ;;  %v4540_v45 = vld [vmem:[%s23239_s3 + $0xcc8] sm:$0xff]  ;;  %v14872_v3 = vcombine.low %v4548_v48, %v4552_v13  ;;  %v15016_v48 = vcombine.low %v4692_v60, %v4696_v57 }
 0x31e   :  { %12042 = vmatpush1.bf16.msra.mxu0 %v14888_v47  ;;  %v19950_v49 = vpop.f32.mrf.mxu0  ;;  %v4684_v47 = vld [vmem:[%s23239_s3 + $0x1148] sm:$0xff]  ;;  %v14864_v60 = vcombine.low %v4540_v45, %v4544_v28 }
 0x31f   :  { %23780 = vst [vmem:[#allocation18_spill] sm:$0xff] %v19950_v49  ;;  %12043 = vmatprep.subr.bf16.mxu0 %v14881_v4  ;;  %v15009_v49 = vcombine.high %v4684_v47, %v4688_v29  ;;  %v4680_v57 = vld [vmem:[%s23239_s3 + $0x1128] sm:$0xff] }
 0x320   :  { %12017 = vmatpush2.bf16.msra.mxu1 %v14776_v56  ;;  %v11659_v59 = vpop.f32.mrf.mxu0  ;;  %v14865_v56 = vcombine.high %v4540_v45, %v4544_v28  ;;  %v4528_v45 = vld [vmem:[%s23239_s3 + $0xc68] sm:$0xff] }
 0x321   :  { %12092 = vmatprep.subr.bf16.mxu1 %v15025_v51  ;;  %11976 = vmatmul.mubr.bf16.gmra.mxu0 %v23782_v38  ;;  %v11660_v30 = vadd.f32 %v11659_v59, %v19780_v25  ;;  %v23785_v25 = vld [vmem:[#allocation39_spill] sm:$0xff]  ;;  %v4532_v51 = vld [vmem:[%s23239_s3 + $0xc88] sm:$0xff] }
 0x322   :  { %12044 = vmatpush1.bf16.msra.mxu0 %v14880_v46  ;;  %12071 = vmatprep.mubr.bf16.mxu0 %v23783_v44  ;;  %v11661_v4 = vpop.f32.mrf.mxu0  ;;  %v4536_v46 = vld [vmem:[%s23239_s3 + $0xca8] sm:$0xff] }
 0x323   :  { %v11702_v7 = vpop.f32.mrf.mxu1  ;;  %12019 = vmatmul.mubr.bf16.vlgmr.msra.gmra.mxu1 %v23784_v40  ;;  %12045 = vmatprep.subr.bf16.mxu0 %v14873_v62  ;;  %v11662_v13 = vadd.f32 %v11661_v4, %v19789_v39  ;;  %v4676_v39 = vld [vmem:[%s23239_s3 + $0x1108] sm:$0xff]  ;;  %v14857_v4 = vcombine.high %v4532_v51, %v4536_v46 }
 0x324   :  { %v19970_v37 = vadd.f32 %v11702_v7, %v11650_v8  ;;  %12028 = vmatprep.mubr.bf16.mxu1 %v23785_v25  ;;  %12093 = vmatpush1.bf16.msra.mxu1 %v15024_v61  ;;  %v11663_v62 = vpop.f32.mrf.mxu0 }
 0x325   :  { %v11704_v59 = vpop.f32.mrf.mxu1  ;;  %12094 = vmatprep.subr.bf16.mxu1 %v15017_v10  ;;  %v11664_v7 = vadd.f32 %v11663_v62, %v19797_v55  ;;  %v4524_v55 = vld [vmem:[%s23239_s3 + $0xc48] sm:$0xff] }
 0x326   :  { %v19980_v8 = vadd.f32 %v11704_v59, %v11652_v11  ;;  %12046 = vmatpush1.bf16.msra.mxu0 %v14872_v3  ;;  %v15008_v11 = vcombine.low %v4684_v47, %v4688_v29  ;;  %v15001_v3 = vcombine.high %v4676_v39, %v4680_v57  ;;  %v14856_v59 = vcombine.low %v4532_v51, %v4536_v46  ;;  %v4672_v47 = vld [vmem:[%s23239_s3 + $0x10e8] sm:$0xff] }
 0x327   :  { %v11706_v61 = vpop.f32.mrf.mxu1  ;;  %12047 = vmatprep.subr.bf16.mxu0 %v14865_v56  ;;  %v23787_v56 = vld [vmem:[#allocation7_spill] sm:$0xff]  ;;  %v4516_v51 = vld [vmem:[%s23239_s3 + $0xc08] sm:$0xff] }
 0x328   :  { %v19989_v10 = vadd.f32 %v11706_v61, %v11654_v50  ;;  %12095 = vmatpush1.bf16.msra.mxu1 %v15016_v48  ;;  %v4668_v50 = vld [vmem:[%s23239_s3 + $0x10c8] sm:$0xff]  ;;  %v14849_v48 = vcombine.high %v4524_v55, %v4528_v45 }
 0x329   :  { %v19997_v28 = vpop.f32.mrf.mxu1  ;;  %12096 = vmatprep.subr.bf16.mxu1 %v15009_v49  ;;  %v23788_v49 = vld [vmem:[#allocation45_spill] sm:$0xff]  ;;  %v4520_v46 = vld [vmem:[%s23239_s3 + $0xc28] sm:$0xff] }
 0x32a   :  { %23786 = vst [vmem:[#allocation16_spill] sm:$0xff] %v19997_v28  ;;  %12048 = vmatpush1.bf16.msra.mxu0 %v14864_v60  ;;  %v15000_v60 = vcombine.low %v4676_v39, %v4680_v57  ;;  %v14993_v28 = vcombine.high %v4668_v50, %v4672_v47  ;;  %v4664_v39 = vld [vmem:[%s23239_s3 + $0x10a8] sm:$0xff] }
 0x32b   :  { %v11712_v29 = vpop.f32.mrf.mxu1  ;;  %12029 = vmatmul.mubr.bf16.gmra.mxu1 %v23787_v56  ;;  %12049 = vmatprep.subr.bf16.mxu0 %v14857_v4  ;;  %v4660_v4 = vld [vmem:[%s23239_s3 + $0x1088] sm:$0xff] }
 0x32c   :  { %v20006_v62 = vadd.f32 %v11712_v29, %v11660_v30  ;;  %12097 = vmatpush1.bf16.msra.mxu1 %v15008_v11  ;;  %12124 = vmatprep.mubr.bf16.mxu1 %v23788_v49  ;;  %v14848_v30 = vcombine.low %v4524_v55, %v4528_v45  ;;  %v14841_v11 = vcombine.high %v4516_v51, %v4520_v46  ;;  %v4640_v55 = vld [vmem:[%s23239_s3 + $0xfe8] sm:$0xff] }
 0x32d   :  { %v11714_v61 = vpop.f32.mrf.mxu1  ;;  %12098 = vmatprep.subr.bf16.mxu1 %v15001_v3  ;;  %v14992_v3 = vcombine.low %v4668_v50, %v4672_v47  ;;  %v14985_v45 = vcombine.high %v4660_v4, %v4664_v39  ;;  %v14984_v47 = vcombine.low %v4660_v4, %v4664_v39 }
 0x32e   :  { %v20015_v54 = vadd.f32 %v11714_v61, %v11662_v13  ;;  %12050 = vmatpush1.bf16.msra.mxu0 %v14856_v59  ;;  %v4636_v13 = vld [vmem:[%s23239_s3 + $0xfc8] sm:$0xff]  ;;  %v14840_v59 = vcombine.low %v4516_v51, %v4520_v46 }
 0x32f   :  { %v11716_v57 = vpop.f32.mrf.mxu1  ;;  %12051 = vmatprep.subr.bf16.mxu0 %v14849_v48  ;;  %v4652_v48 = vld [vmem:[%s23239_s3 + $0x1048] sm:$0xff]  ;;  %v14961_v50 = vcombine.high %v4636_v13, %v4640_v55  ;;  %v14960_v46 = vcombine.low %v4636_v13, %v4640_v55 }
 0x330   :  { %v20023_v29 = vadd.f32 %v11716_v57, %v11664_v7  ;;  %12099 = vmatpush1.bf16.msra.mxu1 %v15000_v60  ;;  %v4656_v7 = vld [vmem:[%s23239_s3 + $0x1068] sm:$0xff] }
 0x331   :  { %12100 = vmatprep.subr.bf16.mxu1 %v14993_v28  ;;  %v4628_v60 = vld [vmem:[%s23239_s3 + $0xf88] sm:$0xff]  ;;  %v14977_v51 = vcombine.high %v4652_v48, %v4656_v7  ;;  %v14976_v39 = vcombine.low %v4652_v48, %v4656_v7 }
 0x332   :  { %12052 = vmatpush1.bf16.msra.mxu0 %v14848_v30  ;;  %v4632_v28 = vld [vmem:[%s23239_s3 + $0xfa8] sm:$0xff] }
 0x333   :  { %12053 = vmatprep.subr.bf16.mxu0 %v14841_v11  ;;  %v4644_v61 = vld [vmem:[%s23239_s3 + $0x1008] sm:$0xff]  ;;  %v14953_v4 = vcombine.high %v4628_v60, %v4632_v28  ;;  %v14952_v13 = vcombine.low %v4628_v60, %v4632_v28 }
 0x334   :  { %12101 = vmatpush1.bf16.msra.mxu1 %v14992_v3  ;;  %v4648_v30 = vld [vmem:[%s23239_s3 + $0x1028] sm:$0xff] }
 0x335   :  { %12102 = vmatprep.subr.bf16.mxu1 %v14985_v45  ;;  %v4620_v57 = vld [vmem:[%s23239_s3 + $0xf48] sm:$0xff]  ;;  %v14969_v3 = vcombine.high %v4644_v61, %v4648_v30  ;;  %v14968_v48 = vcombine.low %v4644_v61, %v4648_v30 }
 0x336   :  { %12054 = vmatpush1.bf16.msra.mxu0 %v14840_v59  ;;  %v4624_v11 = vld [vmem:[%s23239_s3 + $0xf68] sm:$0xff] }
 0x337   :  { %12055 = vmatprep.subr.bf16.mxu0 %v14961_v50  ;;  %v4764_v55 = vld [vmem:[%s23239_s3 + $0x13c8] sm:$0xff]  ;;  %v14945_v59 = vcombine.high %v4620_v57, %v4624_v11  ;;  %v14944_v60 = vcombine.low %v4620_v57, %v4624_v11 }
 0x338   :  { %12103 = vmatpush1.bf16.msra.mxu1 %v14984_v47  ;;  %v4768_v45 = vld [vmem:[%s23239_s3 + $0x13e8] sm:$0xff] }
 0x339   :  { %12104 = vmatprep.subr.bf16.mxu1 %v14977_v51  ;;  %v4612_v7 = vld [vmem:[%s23239_s3 + $0xf08] sm:$0xff]  ;;  %v15089_v47 = vcombine.high %v4764_v55, %v4768_v45  ;;  %v15088_v61 = vcombine.low %v4764_v55, %v4768_v45 }
 0x33a   :  { %12056 = vmatpush2.bf16.msra.mxu0 %v14960_v46  ;;  %v4616_v50 = vld [vmem:[%s23239_s3 + $0xf28] sm:$0xff] }
 0x33b   :  { %12057 = vmatprep.subr.bf16.mxu0 %v14953_v4  ;;  %v4756_v28 = vld [vmem:[%s23239_s3 + $0x1388] sm:$0xff]  ;;  %v14937_v46 = vcombine.high %v4612_v7, %v4616_v50  ;;  %v14936_v57 = vcombine.low %v4612_v7, %v4616_v50 }
 0x33c   :  { %12105 = vmatpush1.bf16.msra.mxu1 %v14976_v39  ;;  %v4760_v51 = vld [vmem:[%s23239_s3 + $0x13a8] sm:$0xff] }
 0x33d   :  { %12106 = vmatprep.subr.bf16.mxu1 %v14969_v3  ;;  %v4604_v30 = vld [vmem:[%s23239_s3 + $0xec8] sm:$0xff]  ;;  %v15081_v39 = vcombine.high %v4756_v28, %v4760_v51  ;;  %v15080_v55 = vcombine.low %v4756_v28, %v4760_v51 }
 0x33e   :  { %12058 = vmatpush2.bf16.msra.mxu0 %v14952_v13  ;;  %v4608_v4 = vld [vmem:[%s23239_s3 + $0xee8] sm:$0xff] }
 0x33f   :  { %12059 = vmatprep.subr.bf16.mxu0 %v14945_v59  ;;  %v4748_v11 = vld [vmem:[%s23239_s3 + $0x1348] sm:$0xff]  ;;  %v14929_v13 = vcombine.high %v4604_v30, %v4608_v4  ;;  %v14928_v7 = vcombine.low %v4604_v30, %v4608_v4 }
 0x340   :  { %12107 = vmatpush1.bf16.msra.mxu1 %v14968_v48  ;;  %v4752_v3 = vld [vmem:[%s23239_s3 + $0x1368] sm:$0xff] }
 0x341   :  { %12108 = vmatprep.subr.bf16.mxu1 %v15089_v47  ;;  %v4596_v45 = vld [vmem:[%s23239_s3 + $0xe88] sm:$0xff]  ;;  %v15073_v48 = vcombine.high %v4748_v11, %v4752_v3  ;;  %v15072_v28 = vcombine.low %v4748_v11, %v4752_v3 }
 0x342   :  { %12060 = vmatpush2.bf16.msra.mxu0 %v14944_v60  ;;  %v4600_v59 = vld [vmem:[%s23239_s3 + $0xea8] sm:$0xff] }
 0x343   :  { %12061 = vmatprep.subr.bf16.mxu0 %v14937_v46  ;;  %v4740_v50 = vld [vmem:[%s23239_s3 + $0x1308] sm:$0xff]  ;;  %v14921_v60 = vcombine.high %v4596_v45, %v4600_v59  ;;  %v14920_v30 = vcombine.low %v4596_v45, %v4600_v59 }
 0x344   :  { %12109 = vmatpush2.bf16.msra.mxu1 %v15088_v61  ;;  %v4744_v47 = vld [vmem:[%s23239_s3 + $0x1328] sm:$0xff] }
 0x345   :  { %12110 = vmatprep.subr.bf16.mxu1 %v15081_v39  ;;  %v4588_v51 = vld [vmem:[%s23239_s3 + $0xe48] sm:$0xff]  ;;  %v15065_v61 = vcombine.high %v4740_v50, %v4744_v47  ;;  %v15064_v11 = vcombine.low %v4740_v50, %v4744_v47 }
 0x346   :  { %12062 = vmatpush2.bf16.msra.mxu0 %v14936_v57  ;;  %v4592_v46 = vld [vmem:[%s23239_s3 + $0xe68] sm:$0xff] }
 0x347   :  { %12063 = vmatprep.subr.bf16.mxu0 %v14929_v13  ;;  %v4732_v4 = vld [vmem:[%s23239_s3 + $0x12c8] sm:$0xff]  ;;  %v14913_v57 = vcombine.high %v4588_v51, %v4592_v46  ;;  %v14912_v45 = vcombine.low %v4588_v51, %v4592_v46 }
 0x348   :  { %12111 = vmatpush2.bf16.msra.mxu1 %v15080_v55  ;;  %v4736_v39 = vld [vmem:[%s23239_s3 + $0x12e8] sm:$0xff] }
 0x349   :  { %12112 = vmatprep.subr.bf16.mxu1 %v15073_v48  ;;  %v4580_v3 = vld [vmem:[%s23239_s3 + $0xe08] sm:$0xff]  ;;  %v15057_v55 = vcombine.high %v4732_v4, %v4736_v39  ;;  %v15056_v50 = vcombine.low %v4732_v4, %v4736_v39 }
 0x34a   :  { %12064 = vmatpush2.bf16.msra.mxu0 %v14928_v7  ;;  %v4584_v13 = vld [vmem:[%s23239_s3 + $0xe28] sm:$0xff] }
 0x34b   :  { %12065 = vmatprep.subr.bf16.mxu0 %v14921_v60  ;;  %v4724_v59 = vld [vmem:[%s23239_s3 + $0x1288] sm:$0xff]  ;;  %v14905_v7 = vcombine.high %v4580_v3, %v4584_v13  ;;  %v14904_v51 = vcombine.low %v4580_v3, %v4584_v13 }
 0x34c   :  { %12113 = vmatpush2.bf16.msra.mxu1 %v15072_v28  ;;  %v4728_v48 = vld [vmem:[%s23239_s3 + $0x12a8] sm:$0xff] }
 0x34d   :  { %12114 = vmatprep.subr.bf16.mxu1 %v15065_v61  ;;  %v4828_v47 = vld [vmem:[%s23239_s3 + $0x15c8] sm:$0xff]  ;;  %v15049_v28 = vcombine.high %v4724_v59, %v4728_v48  ;;  %v15048_v4 = vcombine.low %v4724_v59, %v4728_v48 }
 0x34e   :  { %12066 = vmatpush2.bf16.msra.mxu0 %v14920_v30  ;;  %v4832_v60 = vld [vmem:[%s23239_s3 + $0x15e8] sm:$0xff] }
 0x34f   :  { %12067 = vmatprep.subr.bf16.mxu0 %v14913_v57  ;;  %v4716_v46 = vld [vmem:[%s23239_s3 + $0x1248] sm:$0xff]  ;;  %v15153_v30 = vcombine.high %v4828_v47, %v4832_v60 }
 0x350   :  { %12115 = vmatpush2.bf16.msra.mxu1 %v15064_v11  ;;  %v4720_v61 = vld [vmem:[%s23239_s3 + $0x1268] sm:$0xff] }
 0x351   :  { %12116 = vmatprep.subr.bf16.mxu1 %v15057_v55  ;;  %v4820_v39 = vld [vmem:[%s23239_s3 + $0x1588] sm:$0xff]  ;;  %v15041_v11 = vcombine.high %v4716_v46, %v4720_v61  ;;  %v15152_v55 = vcombine.low %v4828_v47, %v4832_v60  ;;  %v15040_v48 = vcombine.low %v4716_v46, %v4720_v61  ;;  %v23791_v60 = vld [vmem:[#allocation10_spill] sm:$0xff] }
 0x352   :  { %12068 = vmatpush2.bf16.msra.mxu0 %v14912_v45  ;;  %v4824_v57 = vld [vmem:[%s23239_s3 + $0x15a8] sm:$0xff]  ;;  %v20145_v45 = vpop.f32.mrf.mxu0 }
 0x353   :  { %12069 = vmatprep.subr.bf16.mxu0 %v14905_v7  ;;  %v4708_v3 = vld [vmem:[%s23239_s3 + $0x1208] sm:$0xff]  ;;  %23789 = vst [vmem:[#allocation19_spill] sm:$0xff] %v20145_v45  ;;  %v15145_v59 = vcombine.high %v4820_v39, %v4824_v57 }
 0x354   :  { %12117 = vmatpush2.bf16.msra.mxu1 %v15056_v50  ;;  %v4712_v13 = vld [vmem:[%s23239_s3 + $0x1228] sm:$0xff] }
 0x355   :  { %12118 = vmatprep.subr.bf16.mxu1 %v15049_v28  ;;  %v4812_v7 = vld [vmem:[%s23239_s3 + $0x1548] sm:$0xff]  ;;  %v15033_v34 = vcombine.high %v4708_v3, %v4712_v13  ;;  %v15032_v52 = vcombine.low %v4708_v3, %v4712_v13 }
 0x356   :  { %12070 = vmatpush2.bf16.msra.mxu0 %v14904_v51  ;;  %v4816_v50 = vld [vmem:[%s23239_s3 + $0x1568] sm:$0xff]  ;;  %v23790_v51 = vld [vmem:[#allocation38_spill] sm:$0xff] }
 0x357   :  { %12145 = vmatprep.subr.bf16.mxu0 %v15153_v30  ;;  %v15144_v30 = vcombine.low %v4820_v39, %v4824_v57  ;;  %v4956_v46 = vld [vmem:[%s23239_s3 + $0x19c8] sm:$0xff] }
 0x358   :  { %12119 = vmatpush2.bf16.msra.mxu1 %v15048_v4  ;;  %v4960_v61 = vld [vmem:[%s23239_s3 + $0x19e8] sm:$0xff] }
 0x359   :  { %12120 = vmatprep.subr.bf16.mxu1 %v15041_v11  ;;  %v11755_v28 = vpop.f32.mrf.mxu0  ;;  %12072 = vmatmul.mubr.bf16.vlgmr.msra.gmra.mxu0 %v23790_v51  ;;  %v15137_v11 = vcombine.high %v4812_v7, %v4816_v50  ;;  %v4808_v39 = vld [vmem:[%s23239_s3 + $0x1528] sm:$0xff] }
 0x35a   :  { %v11756_v47 = vadd.f32 %v11755_v28, %v19970_v37  ;;  %12081 = vmatprep.mubr.bf16.mxu0 %v23791_v60  ;;  %12146 = vmatpush1.bf16.msra.mxu0 %v15152_v55  ;;  %v4804_v37 = vld [vmem:[%s23239_s3 + $0x1508] sm:$0xff]  ;;  %v15281_v55 = vcombine.high %v4956_v46, %v4960_v61 }
 0x35b   :  { %v11757_v4 = vpop.f32.mrf.mxu0  ;;  %12147 = vmatprep.subr.bf16.mxu0 %v15145_v59  ;;  %v15136_v59 = vcombine.low %v4812_v7, %v4816_v50  ;;  %v4948_v3 = vld [vmem:[%s23239_s3 + $0x1988] sm:$0xff]  ;;  %v20184_v50 = vpop.f32.mrf.mxu1 }
 0x35c   :  { %12121 = vmatpush2.bf16.msra.mxu1 %v15040_v48  ;;  %v11758_v0 = vadd.f32 %v11757_v4, %v19980_v8  ;;  %v4952_v8 = vld [vmem:[%s23239_s3 + $0x19a8] sm:$0xff]  ;;  %v15129_v48 = vcombine.high %v4804_v37, %v4808_v39  ;;  %23793 = vst [vmem:[#allocation55_spill] sm:$0xff] %v20184_v50 }
 0x35d   :  { %12122 = vmatprep.subr.bf16.mxu1 %v15033_v34  ;;  %v11759_v57 = vpop.f32.mrf.mxu0  ;;  %v15280_v34 = vcombine.low %v4956_v46, %v4960_v61  ;;  %v4800_v7 = vld [vmem:[%s23239_s3 + $0x14e8] sm:$0xff]  ;;  %v15128_v46 = vcombine.low %v4804_v37, %v4808_v39 }
 0x35e   :  { %v11760_v28 = vadd.f32 %v11759_v57, %v19989_v10  ;;  %12148 = vmatpush1.bf16.msra.mxu0 %v15144_v30  ;;  %v4796_v10 = vld [vmem:[%s23239_s3 + $0x14c8] sm:$0xff]  ;;  %v15273_v57 = vcombine.high %v4948_v3, %v4952_v8 }
 0x35f   :  { %v20176_v13 = vpop.f32.mrf.mxu0  ;;  %12149 = vmatprep.subr.bf16.mxu0 %v15137_v11  ;;  %v23794_v4 = vld [vmem:[#allocation8_spill] sm:$0xff]  ;;  %v15121_v45 = vcombine.high %v4796_v10, %v4800_v7 }
 0x360   :  { %23792 = vst [vmem:[#allocation17_spill] sm:$0xff] %v20176_v13  ;;  %12123 = vmatpush2.bf16.msra.mxu1 %v15032_v52  ;;  %v23795_v52 = vld [vmem:[#allocation40_spill] sm:$0xff] }
 0x361   :  { %12198 = vmatprep.subr.bf16.mxu1 %v15281_v55  ;;  %v11765_v30 = vpop.f32.mrf.mxu0  ;;  %12082 = vmatmul.mubr.bf16.gmra.mxu0 %v23794_v4  ;;  %v4940_v61 = vld [vmem:[%s23239_s3 + $0x1948] sm:$0xff] }
 0x362   :  { %v11766_v11 = vadd.f32 %v11765_v30, %v20006_v62  ;;  %12150 = vmatpush1.bf16.msra.mxu0 %v15136_v59  ;;  %12177 = vmatprep.mubr.bf16.mxu0 %v23795_v52  ;;  %v4944_v13 = vld [vmem:[%s23239_s3 + $0x1968] sm:$0xff]  ;;  %v15272_v62 = vcombine.low %v4948_v3, %v4952_v8  ;;  %v15120_v3 = vcombine.low %v4796_v10, %v4800_v7 }
 0x363   :  { %v11808_v50 = vpop.f32.mrf.mxu1  ;;  %12125 = vmatmul.mubr.bf16.vlgmr.msra.gmra.mxu1 %v18612_v26  ;;  %v11767_v55 = vpop.f32.mrf.mxu0  ;;  %12151 = vmatprep.subr.bf16.mxu0 %v15129_v48  ;;  %v4788_v39 = vld [vmem:[%s23239_s3 + $0x1488] sm:$0xff]  ;;  %v15265_v14 = vcombine.high %v4940_v61, %v4944_v13 }
 0x364   :  { %v20196_v5 = vadd.f32 %v11808_v50, %v11756_v47  ;;  %12134 = vmatprep.mubr.bf16.mxu1 %v19055_v43  ;;  %12199 = vmatpush1.bf16.msra.mxu1 %v15280_v34  ;;  %v11768_v37 = vadd.f32 %v11767_v55, %v20015_v54  ;;  %v4792_v59 = vld [vmem:[%s23239_s3 + $0x14a8] sm:$0xff] }
 0x365   :  { %v11810_v30 = vpop.f32.mrf.mxu1  ;;  %12200 = vmatprep.subr.bf16.mxu1 %v15273_v57  ;;  %v11769_v48 = vpop.f32.mrf.mxu0  ;;  %v4932_v54 = vld [vmem:[%s23239_s3 + $0x1908] sm:$0xff]  ;;  %v15113_v55 = vcombine.high %v4788_v39, %v4792_v59 }
 0x366   :  { %v20206_v47 = vadd.f32 %v11810_v30, %v11758_v0  ;;  %v11770_v50 = vadd.f32 %v11769_v48, %v20023_v29  ;;  %12152 = vmatpush1.bf16.msra.mxu0 %v15128_v46  ;;  %v4936_v8 = vld [vmem:[%s23239_s3 + $0x1928] sm:$0xff]  ;;  %v15264_v0 = vcombine.low %v4940_v61, %v4944_v13  ;;  %v15112_v30 = vcombine.low %v4788_v39, %v4792_v59 }
 0x367   :  { %v11812_v34 = vpop.f32.mrf.mxu1  ;;  %12153 = vmatprep.subr.bf16.mxu0 %v15121_v45  ;;  %v4780_v29 = vld [vmem:[%s23239_s3 + $0x1448] sm:$0xff]  ;;  %v15257_v46 = vcombine.high %v4932_v54, %v4936_v8 }
 0x368   :  { %v20215_v57 = vadd.f32 %v11812_v34, %v11760_v28  ;;  %12201 = vmatpush1.bf16.msra.mxu1 %v15272_v62  ;;  %v4784_v10 = vld [vmem:[%s23239_s3 + $0x1468] sm:$0xff] }
 0x369   :  { %v20223_v7 = vpop.f32.mrf.mxu1  ;;  %12202 = vmatprep.subr.bf16.mxu1 %v15265_v14  ;;  %v4924_v45 = vld [vmem:[%s23239_s3 + $0x18c8] sm:$0xff]  ;;  %v15105_v61 = vcombine.high %v4780_v29, %v4784_v10  ;;  %v15256_v14 = vcombine.low %v4932_v54, %v4936_v8 }
 0x36a   :  { %23796 = vst [vmem:[#allocation59_spill] sm:$0xff] %v20223_v7  ;;  %12154 = vmatpush1.bf16.msra.mxu0 %v15120_v3  ;;  %v4928_v28 = vld [vmem:[%s23239_s3 + $0x18e8] sm:$0xff] }
 0x36b   :  { %v11818_v13 = vpop.f32.mrf.mxu1  ;;  %12135 = vmatmul.mubr.bf16.gmra.mxu1 %v19111_v18  ;;  %12155 = vmatprep.subr.bf16.mxu0 %v15113_v55  ;;  %v4772_v39 = vld [vmem:[%s23239_s3 + $0x1408] sm:$0xff]  ;;  %v15249_v3 = vcombine.high %v4924_v45, %v4928_v28 }
 0x36c   :  { %v20232_v62 = vadd.f32 %v11818_v13, %v11766_v11  ;;  %12203 = vmatpush1.bf16.msra.mxu1 %v15264_v0  ;;  %12230 = vmatprep.mubr.bf16.mxu1 %v19126_v33  ;;  %v4776_v59 = vld [vmem:[%s23239_s3 + $0x1428] sm:$0xff]  ;;  %v15104_v11 = vcombine.low %v4780_v29, %v4784_v10 }
 0x36d   :  { %v11820_v48 = vpop.f32.mrf.mxu1  ;;  %12204 = vmatprep.subr.bf16.mxu1 %v15257_v46  ;;  %v4916_v55 = vld [vmem:[%s23239_s3 + $0x1888] sm:$0xff]  ;;  %v15097_v0 = vcombine.high %v4772_v39, %v4776_v59  ;;  %v15248_v46 = vcombine.low %v4924_v45, %v4928_v28 }
 0x36e   :  { %v20241_v34 = vadd.f32 %v11820_v48, %v11768_v37  ;;  %12156 = vmatpush1.bf16.msra.mxu0 %v15112_v30  ;;  %v4920_v54 = vld [vmem:[%s23239_s3 + $0x18a8] sm:$0xff]  ;;  %v15096_v30 = vcombine.low %v4772_v39, %v4776_v59 }
 0x36f   :  { %v11822_v8 = vpop.f32.mrf.mxu1  ;;  %12157 = vmatprep.subr.bf16.mxu0 %v15105_v61  ;;  %v4892_v37 = vld [vmem:[%s23239_s3 + $0x17c8] sm:$0xff]  ;;  %v15241_v10 = vcombine.high %v4916_v55, %v4920_v54  ;;  %v15240_v28 = vcombine.low %v4916_v55, %v4920_v54 }
 0x370   :  { %v20249_v13 = vadd.f32 %v11822_v8, %v11770_v50  ;;  %12205 = vmatpush1.bf16.msra.mxu1 %v15256_v14  ;;  %v4896_v29 = vld [vmem:[%s23239_s3 + $0x17e8] sm:$0xff] }
 0x371   :  { %12206 = vmatprep.subr.bf16.mxu1 %v15249_v3  ;;  %v4908_v61 = vld [vmem:[%s23239_s3 + $0x1848] sm:$0xff]  ;;  %v15217_v45 = vcombine.high %v4892_v37, %v4896_v29  ;;  %v15216_v48 = vcombine.low %v4892_v37, %v4896_v29 }
 0x372   :  { %12158 = vmatpush1.bf16.msra.mxu0 %v15104_v11  ;;  %v4912_v50 = vld [vmem:[%s23239_s3 + $0x1868] sm:$0xff] }
 0x373   :  { %12159 = vmatprep.subr.bf16.mxu0 %v15097_v0  ;;  %v4884_v14 = vld [vmem:[%s23239_s3 + $0x1788] sm:$0xff]  ;;  %v15233_v59 = vcombine.high %v4908_v61, %v4912_v50  ;;  %v15232_v54 = vcombine.low %v4908_v61, %v4912_v50 }
 0x374   :  { %12207 = vmatpush1.bf16.msra.mxu1 %v15248_v46  ;;  %v4888_v39 = vld [vmem:[%s23239_s3 + $0x17a8] sm:$0xff] }
 0x375   :  { %12208 = vmatprep.subr.bf16.mxu1 %v15241_v10  ;;  %v4900_v3 = vld [vmem:[%s23239_s3 + $0x1808] sm:$0xff]  ;;  %v15209_v55 = vcombine.high %v4884_v14, %v4888_v39  ;;  %v15208_v37 = vcombine.low %v4884_v14, %v4888_v39 }
 0x376   :  { %12160 = vmatpush1.bf16.msra.mxu0 %v15096_v30  ;;  %v4904_v11 = vld [vmem:[%s23239_s3 + $0x1828] sm:$0xff] }
 0x377   :  { %12161 = vmatprep.subr.bf16.mxu0 %v15217_v45  ;;  %v4876_v8 = vld [vmem:[%s23239_s3 + $0x1748] sm:$0xff]  ;;  %v15225_v46 = vcombine.high %v4900_v3, %v4904_v11  ;;  %v15224_v61 = vcombine.low %v4900_v3, %v4904_v11 }
 0x378   :  { %12209 = vmatpush1.bf16.msra.mxu1 %v15240_v28  ;;  %v4880_v0 = vld [vmem:[%s23239_s3 + $0x1768] sm:$0xff] }
 0x379   :  { %12210 = vmatprep.subr.bf16.mxu1 %v15233_v59  ;;  %v5020_v29 = vld [vmem:[%s23239_s3 + $0x1bc8] sm:$0xff]  ;;  %v15201_v30 = vcombine.high %v4876_v8, %v4880_v0  ;;  %v15200_v14 = vcombine.low %v4876_v8, %v4880_v0 }
 0x37a   :  { %12162 = vmatpush2.bf16.msra.mxu0 %v15216_v48  ;;  %v5024_v10 = vld [vmem:[%s23239_s3 + $0x1be8] sm:$0xff] }
 0x37b   :  { %12163 = vmatprep.subr.bf16.mxu0 %v15209_v55  ;;  %v4868_v50 = vld [vmem:[%s23239_s3 + $0x1708] sm:$0xff]  ;;  %v15345_v28 = vcombine.high %v5020_v29, %v5024_v10  ;;  %v15344_v3 = vcombine.low %v5020_v29, %v5024_v10 }
 0x37c   :  { %12211 = vmatpush1.bf16.msra.mxu1 %v15232_v54  ;;  %v4872_v45 = vld [vmem:[%s23239_s3 + $0x1728] sm:$0xff] }
 0x37d   :  { %12212 = vmatprep.subr.bf16.mxu1 %v15225_v46  ;;  %v5012_v39 = vld [vmem:[%s23239_s3 + $0x1b88] sm:$0xff]  ;;  %v15193_v48 = vcombine.high %v4868_v50, %v4872_v45  ;;  %v15192_v8 = vcombine.low %v4868_v50, %v4872_v45 }
 0x37e   :  { %12164 = vmatpush2.bf16.msra.mxu0 %v15208_v37  ;;  %v5016_v59 = vld [vmem:[%s23239_s3 + $0x1ba8] sm:$0xff] }
 0x37f   :  { %12165 = vmatprep.subr.bf16.mxu0 %v15201_v30  ;;  %v4860_v11 = vld [vmem:[%s23239_s3 + $0x16c8] sm:$0xff]  ;;  %v15337_v54 = vcombine.high %v5012_v39, %v5016_v59  ;;  %v15336_v29 = vcombine.low %v5012_v39, %v5016_v59 }
 0x380   :  { %12213 = vmatpush1.bf16.msra.mxu1 %v15224_v61  ;;  %v4864_v55 = vld [vmem:[%s23239_s3 + $0x16e8] sm:$0xff] }
 0x381   :  { %12214 = vmatprep.subr.bf16.mxu1 %v15345_v28  ;;  %v5004_v0 = vld [vmem:[%s23239_s3 + $0x1b48] sm:$0xff]  ;;  %v15185_v37 = vcombine.high %v4860_v11, %v4864_v55  ;;  %v15184_v50 = vcombine.low %v4860_v11, %v4864_v55 }
 0x382   :  { %12166 = vmatpush2.bf16.msra.mxu0 %v15200_v14  ;;  %v5008_v46 = vld [vmem:[%s23239_s3 + $0x1b68] sm:$0xff] }
 0x383   :  { %12167 = vmatprep.subr.bf16.mxu0 %v15193_v48  ;;  %v4852_v10 = vld [vmem:[%s23239_s3 + $0x1688] sm:$0xff]  ;;  %v15329_v61 = vcombine.high %v5004_v0, %v5008_v46  ;;  %v15328_v39 = vcombine.low %v5004_v0, %v5008_v46 }
 0x384   :  { %12215 = vmatpush2.bf16.msra.mxu1 %v15344_v3  ;;  %v4856_v30 = vld [vmem:[%s23239_s3 + $0x16a8] sm:$0xff] }
 0x385   :  { %12216 = vmatprep.subr.bf16.mxu1 %v15337_v54  ;;  %v4996_v45 = vld [vmem:[%s23239_s3 + $0x1b08] sm:$0xff]  ;;  %v15177_v14 = vcombine.high %v4852_v10, %v4856_v30  ;;  %v15176_v11 = vcombine.low %v4852_v10, %v4856_v30 }
 0x386   :  { %12168 = vmatpush2.bf16.msra.mxu0 %v15192_v8  ;;  %v5000_v28 = vld [vmem:[%s23239_s3 + $0x1b28] sm:$0xff] }
 0x387   :  { %12169 = vmatprep.subr.bf16.mxu0 %v15185_v37  ;;  %v4844_v59 = vld [vmem:[%s23239_s3 + $0x1648] sm:$0xff]  ;;  %v15321_v3 = vcombine.high %v4996_v45, %v5000_v28  ;;  %v15320_v0 = vcombine.low %v4996_v45, %v5000_v28 }
 0x388   :  { %12217 = vmatpush2.bf16.msra.mxu1 %v15336_v29  ;;  %v4848_v48 = vld [vmem:[%s23239_s3 + $0x1668] sm:$0xff] }
 0x389   :  { %12218 = vmatprep.subr.bf16.mxu1 %v15329_v61  ;;  %v4988_v55 = vld [vmem:[%s23239_s3 + $0x1ac8] sm:$0xff]  ;;  %v15169_v8 = vcombine.high %v4844_v59, %v4848_v48  ;;  %v15168_v10 = vcombine.low %v4844_v59, %v4848_v48 }
 0x38a   :  { %12170 = vmatpush2.bf16.msra.mxu0 %v15184_v50  ;;  %v4992_v54 = vld [vmem:[%s23239_s3 + $0x1ae8] sm:$0xff] }
 0x38b   :  { %12171 = vmatprep.subr.bf16.mxu0 %v15177_v14  ;;  %v4836_v46 = vld [vmem:[%s23239_s3 + $0x1608] sm:$0xff]  ;;  %v15313_v29 = vcombine.high %v4988_v55, %v4992_v54  ;;  %v15312_v45 = vcombine.low %v4988_v55, %v4992_v54 }
 0x38c   :  { %12219 = vmatpush2.bf16.msra.mxu1 %v15328_v39  ;;  %v4840_v37 = vld [vmem:[%s23239_s3 + $0x1628] sm:$0xff] }
 0x38d   :  { %12220 = vmatprep.subr.bf16.mxu1 %v15321_v3  ;;  %v4980_v30 = vld [vmem:[%s23239_s3 + $0x1a88] sm:$0xff]  ;;  %v15161_v50 = vcombine.high %v4836_v46, %v4840_v37  ;;  %v15160_v59 = vcombine.low %v4836_v46, %v4840_v37 }
 0x38e   :  { %12172 = vmatpush2.bf16.msra.mxu0 %v15176_v11  ;;  %v4984_v61 = vld [vmem:[%s23239_s3 + $0x1aa8] sm:$0xff] }
 0x38f   :  { %12173 = vmatprep.subr.bf16.mxu0 %v15169_v8  ;;  %v5084_v28 = vld [vmem:[%s23239_s3 + $0x1dc8] sm:$0xff]  ;;  %v15305_v39 = vcombine.high %v4980_v30, %v4984_v61  ;;  %v15304_v55 = vcombine.low %v4980_v30, %v4984_v61 }
 0x390   :  { %12221 = vmatpush2.bf16.msra.mxu1 %v15320_v0  ;;  %v5088_v14 = vld [vmem:[%s23239_s3 + $0x1de8] sm:$0xff] }
 0x391   :  { %12222 = vmatprep.subr.bf16.mxu1 %v15313_v29  ;;  %v4972_v48 = vld [vmem:[%s23239_s3 + $0x1a48] sm:$0xff]  ;;  %v15409_v11 = vcombine.high %v5084_v28, %v5088_v14  ;;  %v15408_v29 = vcombine.low %v5084_v28, %v5088_v14 }
 0x392   :  { %12174 = vmatpush2.bf16.msra.mxu0 %v15168_v10  ;;  %v4976_v3 = vld [vmem:[%s23239_s3 + $0x1a68] sm:$0xff]  ;;  %v20371_v10 = vpop.f32.mrf.mxu0 }
 0x393   :  { %12175 = vmatprep.subr.bf16.mxu0 %v15161_v50  ;;  %v5076_v54 = vld [vmem:[%s23239_s3 + $0x1d88] sm:$0xff]  ;;  %v15297_v0 = vcombine.high %v4972_v48, %v4976_v3  ;;  %23797 = vst [vmem:[#allocation57_spill] sm:$0xff] %v20371_v10  ;;  %v15296_v61 = vcombine.low %v4972_v48, %v4976_v3 }
 0x394   :  { %12223 = vmatpush2.bf16.msra.mxu1 %v15312_v45  ;;  %v5080_v8 = vld [vmem:[%s23239_s3 + $0x1da8] sm:$0xff] }
 0x395   :  { %12224 = vmatprep.subr.bf16.mxu1 %v15305_v39  ;;  %v4964_v46 = vld [vmem:[%s23239_s3 + $0x1a08] sm:$0xff]  ;;  %v15401_v30 = vcombine.high %v5076_v54, %v5080_v8  ;;  %v15400_v14 = vcombine.low %v5076_v54, %v5080_v8 }
 0x396   :  { %12176 = vmatpush2.bf16.msra.mxu0 %v15160_v59  ;;  %v4968_v37 = vld [vmem:[%s23239_s3 + $0x1a28] sm:$0xff] }
 0x397   :  { %12251 = vmatprep.subr.bf16.mxu0 %v15409_v11  ;;  %v5068_v50 = vld [vmem:[%s23239_s3 + $0x1d48] sm:$0xff]  ;;  %v15289_v59 = vcombine.high %v4964_v46, %v4968_v37 }
 0x398   :  { %12225 = vmatpush2.bf16.msra.mxu1 %v15304_v55  ;;  %v5072_v45 = vld [vmem:[%s23239_s3 + $0x1d68] sm:$0xff] }
 0x399   :  { %12226 = vmatprep.subr.bf16.mxu1 %v15297_v0  ;;  %v11861_v39 = vpop.f32.mrf.mxu0  ;;  %12178 = vmatmul.mubr.bf16.vlgmr.msra.gmra.mxu0 %v18779_v20  ;;  %v5212_v48 = vld [vmem:[%s23239_s3 + $0x21c8] sm:$0xff]  ;;  %v15393_v55 = vcombine.high %v5068_v50, %v5072_v45  ;;  %v15288_v0 = vcombine.low %v4964_v46, %v4968_v37  ;;  %v15392_v7 = vcombine.low %v5068_v50, %v5072_v45 }
 0x39a   :  { %v20381_v28 = vadd.f32 %v11861_v39, %v20196_v5  ;;  %12187 = vmatprep.mubr.bf16.mxu0 %v19135_v9  ;;  %12252 = vmatpush1.bf16.msra.mxu0 %v15408_v29  ;;  %v5216_v3 = vld [vmem:[%s23239_s3 + $0x21e8] sm:$0xff] }
 0x39b   :  { %v20390_v11 = vpop.f32.mrf.mxu0  ;;  %12253 = vmatprep.subr.bf16.mxu0 %v15401_v30  ;;  %v5060_v5 = vld [vmem:[%s23239_s3 + $0x1d08] sm:$0xff]  ;;  %v15537_v29 = vcombine.high %v5212_v48, %v5216_v3 }
 0x39c   :  { %12227 = vmatpush2.bf16.msra.mxu1 %v15296_v61  ;;  %v5064_v54 = vld [vmem:[%s23239_s3 + $0x1d28] sm:$0xff] }
 0x39d   :  { %12228 = vmatprep.subr.bf16.mxu1 %v15289_v59  ;;  %v11865_v8 = vpop.f32.mrf.mxu0  ;;  %v5204_v46 = vld [vmem:[%s23239_s3 + $0x2188] sm:$0xff]  ;;  %v15385_v61 = vcombine.high %v5060_v5, %v5064_v54  ;;  %v15536_v59 = vcombine.low %v5212_v48, %v5216_v3  ;;  %v15384_v48 = vcombine.low %v5060_v5, %v5064_v54 }
 0x39e   :  { %v20399_v39 = vadd.f32 %v11865_v8, %v20215_v57  ;;  %12254 = vmatpush1.bf16.msra.mxu0 %v15400_v14  ;;  %v5208_v37 = vld [vmem:[%s23239_s3 + $0x21a8] sm:$0xff] }
 0x39f   :  { %v20407_v30 = vpop.f32.mrf.mxu0  ;;  %12255 = vmatprep.subr.bf16.mxu0 %v15393_v55  ;;  %v5052_v57 = vld [vmem:[%s23239_s3 + $0x1cc8] sm:$0xff]  ;;  %v15529_v14 = vcombine.high %v5204_v46, %v5208_v37 }
 0x3a0   :  { %23798 = vst [vmem:[#allocation74_spill] sm:$0xff] %v20399_v39  ;;  %23799 = vst [vmem:[#allocation20_spill] sm:$0xff] %v20407_v30  ;;  %12229 = vmatpush2.bf16.msra.mxu1 %v15288_v0  ;;  %v5056_v50 = vld [vmem:[%s23239_s3 + $0x1ce8] sm:$0xff] }
 0x3a1   :  { %12304 = vmatprep.subr.bf16.mxu1 %v15537_v29  ;;  %v11871_v45 = vpop.f32.mrf.mxu0  ;;  %12188 = vmatmul.mubr.bf16.gmra.mxu0 %v19176_v42  ;;  %v5196_v3 = vld [vmem:[%s23239_s3 + $0x2148] sm:$0xff]  ;;  %v15377_v29 = vcombine.high %v5052_v57, %v5056_v50 }
 0x3a2   :  { %v20417_v8 = vadd.f32 %v11871_v45, %v20232_v62  ;;  %12256 = vmatpush1.bf16.msra.mxu0 %v15392_v7  ;;  %12283 = vmatprep.mubr.bf16.mxu0 %v19180_v1  ;;  %v5200_v55 = vld [vmem:[%s23239_s3 + $0x2168] sm:$0xff]  ;;  %v15528_v7 = vcombine.low %v5204_v46, %v5208_v37 }
 0x3a3   :  { %12231 = vmatmul.mubr.bf16.vlgmr.msra.gmra.mxu1 %v19425_v6  ;;  %v11873_v0 = vpop.f32.mrf.mxu0  ;;  %12257 = vmatprep.subr.bf16.mxu0 %v15385_v61  ;;  %v5044_v5 = vld [vmem:[%s23239_s3 + $0x1c88] sm:$0xff]  ;;  %v15521_v30 = vcombine.high %v5196_v3, %v5200_v55  ;;  %v4181_v6 = vld [vmem:[%s23239_s3 + $0x190] sm:$0xff] }
 0x3a4   :  { %23800 = vst [vmem:[#allocation22_spill] sm:$0xff] %v20417_v8  ;;  %12240 = vmatprep.mubr.bf16.mxu1 %v19428_v19  ;;  %12305 = vmatpush1.bf16.msra.mxu1 %v15536_v59  ;;  %v20429_v62 = vadd.f32 %v11873_v0, %v20241_v34  ;;  %v5048_v54 = vld [vmem:[%s23239_s3 + $0x1ca8] sm:$0xff]  ;;  %v15376_v59 = vcombine.low %v5052_v57, %v5056_v50  ;;  %v4189_v19 = vld [vmem:[%s23239_s3 + $0x1d0] sm:$0xff] }
 0x3a5   :  { %12306 = vmatprep.subr.bf16.mxu1 %v15529_v14  ;;  %v11875_v45 = vpop.f32.mrf.mxu0  ;;  %v5188_v34 = vld [vmem:[%s23239_s3 + $0x2108] sm:$0xff]  ;;  %v15369_v37 = vcombine.high %v5044_v5, %v5048_v54  ;;  %v15520_v0 = vcombine.low %v5196_v3, %v5200_v55  ;;  %v15368_v50 = vcombine.low %v5044_v5, %v5048_v54 }
 0x3a6   :  { %23801 = vst [vmem:[#allocation21_spill] sm:$0xff] %v20429_v62  ;;  %v20438_v61 = vadd.f32 %v11875_v45, %v20249_v13  ;;  %12258 = vmatpush1.bf16.msra.mxu0 %v15384_v48  ;;  %v5192_v46 = vld [vmem:[%s23239_s3 + $0x2128] sm:$0xff] }
 0x3a7   :  { %12259 = vmatprep.subr.bf16.mxu0 %v15377_v29  ;;  %v5036_v14 = vld [vmem:[%s23239_s3 + $0x1c48] sm:$0xff]  ;;  %v15513_v57 = vcombine.high %v5188_v34, %v5192_v46  ;;  %v15512_v29 = vcombine.low %v5188_v34, %v5192_v46 }
 0x3a8   :  { %23802 = vst [vmem:[#allocation58_spill] sm:$0xff] %v20438_v61  ;;  %12307 = vmatpush1.bf16.msra.mxu1 %v15528_v7  ;;  %v5040_v13 = vld [vmem:[%s23239_s3 + $0x1c68] sm:$0xff] }
 0x3a9   :  { %12308 = vmatprep.subr.bf16.mxu1 %v15521_v30  ;;  %v5180_v48 = vld [vmem:[%s23239_s3 + $0x20c8] sm:$0xff]  ;;  %v15361_v55 = vcombine.high %v5036_v14, %v5040_v13  ;;  %v15360_v54 = vcombine.low %v5036_v14, %v5040_v13 }
 0x3aa   :  { %12260 = vmatpush1.bf16.msra.mxu0 %v15376_v59  ;;  %v5184_v3 = vld [vmem:[%s23239_s3 + $0x20e8] sm:$0xff] }
 0x3ab   :  { %12241 = vmatmul.mubr.bf16.gmra.mxu1 %v19466_v16  ;;  %12261 = vmatprep.subr.bf16.mxu0 %v15369_v37  ;;  %v5028_v30 = vld [vmem:[%s23239_s3 + $0x1c08] sm:$0xff]  ;;  %v15505_v5 = vcombine.high %v5180_v48, %v5184_v3  ;;  %v15504_v46 = vcombine.low %v5180_v48, %v5184_v3 }
 0x3ac   :  { %12309 = vmatpush1.bf16.msra.mxu1 %v15520_v0  ;;  %12336 = vmatprep.mubr.bf16.mxu1 %v19471_v23  ;;  %v5032_v7 = vld [vmem:[%s23239_s3 + $0x1c28] sm:$0xff] }
 0x3ad   :  { %12310 = vmatprep.subr.bf16.mxu1 %v15513_v57  ;;  %v5172_v45 = vld [vmem:[%s23239_s3 + $0x2088] sm:$0xff]  ;;  %v15353_v34 = vcombine.high %v5028_v30, %v5032_v7  ;;  %v15352_v13 = vcombine.low %v5028_v30, %v5032_v7 }
 0x3ae   :  { %12262 = vmatpush1.bf16.msra.mxu0 %v15368_v50  ;;  %v5176_v59 = vld [vmem:[%s23239_s3 + $0x20a8] sm:$0xff] }
 0x3af   :  { %12263 = vmatprep.subr.bf16.mxu0 %v15361_v55  ;;  %v5148_v37 = vld [vmem:[%s23239_s3 + $0x1fc8] sm:$0xff]  ;;  %v15497_v14 = vcombine.high %v5172_v45, %v5176_v59  ;;  %v15496_v3 = vcombine.low %v5172_v45, %v5176_v59 }
 0x3b0   :  { %12311 = vmatpush1.bf16.msra.mxu1 %v15512_v29  ;;  %v5152_v0 = vld [vmem:[%s23239_s3 + $0x1fe8] sm:$0xff] }
 0x3b1   :  { %12312 = vmatprep.subr.bf16.mxu1 %v15505_v5  ;;  %v5164_v57 = vld [vmem:[%s23239_s3 + $0x2048] sm:$0xff]  ;;  %v15473_v48 = vcombine.high %v5148_v37, %v5152_v0  ;;  %v15472_v7 = vcombine.low %v5148_v37, %v5152_v0 }
 0x3b2   :  { %12264 = vmatpush1.bf16.msra.mxu0 %v15360_v54  ;;  %v5168_v50 = vld [vmem:[%s23239_s3 + $0x2068] sm:$0xff] }
 0x3b3   :  { %12265 = vmatprep.subr.bf16.mxu0 %v15353_v34  ;;  %v5140_v55 = vld [vmem:[%s23239_s3 + $0x1f88] sm:$0xff]  ;;  %v15489_v30 = vcombine.high %v5164_v57, %v5168_v50  ;;  %v15488_v59 = vcombine.low %v5164_v57, %v5168_v50 }
 0x3b4   :  { %12313 = vmatpush1.bf16.msra.mxu1 %v15504_v46  ;;  %v5144_v29 = vld [vmem:[%s23239_s3 + $0x1fa8] sm:$0xff] }
 0x3b5   :  { %12314 = vmatprep.subr.bf16.mxu1 %v15497_v14  ;;  %v5156_v5 = vld [vmem:[%s23239_s3 + $0x2008] sm:$0xff]  ;;  %v15465_v45 = vcombine.high %v5140_v55, %v5144_v29  ;;  %v15464_v0 = vcombine.low %v5140_v55, %v5144_v29 }
 0x3b6   :  { %12266 = vmatpush1.bf16.msra.mxu0 %v15352_v13  ;;  %v5160_v54 = vld [vmem:[%s23239_s3 + $0x2028] sm:$0xff] }
 0x3b7   :  { %12267 = vmatprep.subr.bf16.mxu0 %v15473_v48  ;;  %v5132_v34 = vld [vmem:[%s23239_s3 + $0x1f48] sm:$0xff]  ;;  %v15481_v37 = vcombine.high %v5156_v5, %v5160_v54  ;;  %v15480_v50 = vcombine.low %v5156_v5, %v5160_v54 }
 0x3b8   :  { %12315 = vmatpush1.bf16.msra.mxu1 %v15496_v3  ;;  %v5136_v46 = vld [vmem:[%s23239_s3 + $0x1f68] sm:$0xff] }
 0x3b9   :  { %12316 = vmatprep.subr.bf16.mxu1 %v15489_v30  ;;  %v5276_v14 = vld [vmem:[%s23239_s3 + $0x23c8] sm:$0xff]  ;;  %v15457_v57 = vcombine.high %v5132_v34, %v5136_v46  ;;  %v15456_v29 = vcombine.low %v5132_v34, %v5136_v46 }
 0x3ba   :  { %12268 = vmatpush2.bf16.msra.mxu0 %v15472_v7  ;;  %v5280_v13 = vld [vmem:[%s23239_s3 + $0x23e8] sm:$0xff] }
 0x3bb   :  { %12269 = vmatprep.subr.bf16.mxu0 %v15465_v45  ;;  %v5124_v48 = vld [vmem:[%s23239_s3 + $0x1f08] sm:$0xff]  ;;  %v15601_v55 = vcombine.high %v5276_v14, %v5280_v13  ;;  %v15600_v54 = vcombine.low %v5276_v14, %v5280_v13  ;;  %v20532_v14 = vpop.f32.mrf.mxu1 }
 0x3bc   :  { %12317 = vmatpush1.bf16.msra.mxu1 %v15488_v59  ;;  %v5128_v3 = vld [vmem:[%s23239_s3 + $0x1f28] sm:$0xff]  ;;  %23803 = vst [vmem:[#allocation25_spill] sm:$0xff] %v20532_v14 }
 0x3bd   :  { %12318 = vmatprep.subr.bf16.mxu1 %v15481_v37  ;;  %v5268_v30 = vld [vmem:[%s23239_s3 + $0x2388] sm:$0xff]  ;;  %v15449_v5 = vcombine.high %v5124_v48, %v5128_v3  ;;  %v15448_v46 = vcombine.low %v5124_v48, %v5128_v3  ;;  %v20540_v3 = vpop.f32.mrf.mxu1 }
 0x3be   :  { %12270 = vmatpush2.bf16.msra.mxu0 %v15464_v0  ;;  %v5272_v7 = vld [vmem:[%s23239_s3 + $0x23a8] sm:$0xff] }
 0x3bf   :  { %12271 = vmatprep.subr.bf16.mxu0 %v15457_v57  ;;  %v5116_v45 = vld [vmem:[%s23239_s3 + $0x1ec8] sm:$0xff]  ;;  %v15593_v34 = vcombine.high %v5268_v30, %v5272_v7  ;;  %v15592_v57 = vcombine.low %v5268_v30, %v5272_v7 }
 0x3c0   :  { %12319 = vmatpush1.bf16.msra.mxu1 %v15480_v50  ;;  %v5120_v59 = vld [vmem:[%s23239_s3 + $0x1ee8] sm:$0xff] }
 0x3c1   :  { %12320 = vmatprep.subr.bf16.mxu1 %v15601_v55  ;;  %v5260_v37 = vld [vmem:[%s23239_s3 + $0x2348] sm:$0xff]  ;;  %v15441_v13 = vcombine.high %v5116_v45, %v5120_v59 }
 0x3c2   :  { %12272 = vmatpush2.bf16.msra.mxu0 %v15456_v29  ;;  %v5264_v0 = vld [vmem:[%s23239_s3 + $0x2368] sm:$0xff]  ;;  %v15440_v29 = vcombine.low %v5116_v45, %v5120_v59  ;;  %v20554_v59 = vpop.f32.mrf.mxu1 }
 0x3c3   :  { %12273 = vmatprep.subr.bf16.mxu0 %v15449_v5  ;;  %v5108_v50 = vld [vmem:[%s23239_s3 + $0x1e88] sm:$0xff]  ;;  %v15585_v55 = vcombine.high %v5260_v37, %v5264_v0 }
 0x3c4   :  { %12321 = vmatpush2.bf16.msra.mxu1 %v15600_v54  ;;  %v5112_v48 = vld [vmem:[%s23239_s3 + $0x1ea8] sm:$0xff]  ;;  %v15584_v54 = vcombine.low %v5260_v37, %v5264_v0 }
 0x3c5   :  { %12322 = vmatprep.subr.bf16.mxu1 %v15593_v34  ;;  %v5252_v5 = vld [vmem:[%s23239_s3 + $0x2308] sm:$0xff]  ;;  %v15433_v7 = vcombine.high %v5108_v50, %v5112_v48 }
 0x3c6   :  { %12274 = vmatpush2.bf16.msra.mxu0 %v15448_v46  ;;  %v5256_v30 = vld [vmem:[%s23239_s3 + $0x2328] sm:$0xff]  ;;  %v15432_v46 = vcombine.low %v5108_v50, %v5112_v48  ;;  %v11918_v48 = vpop.f32.mrf.mxu1 }
 0x3c7   :  { %12275 = vmatprep.subr.bf16.mxu0 %v15441_v13  ;;  %v5100_v23 = vld [vmem:[%s23239_s3 + $0x1e48] sm:$0xff]  ;;  %v15577_v34 = vcombine.high %v5252_v5, %v5256_v30 }
 0x3c8   :  { %12323 = vmatpush2.bf16.msra.mxu1 %v15592_v57  ;;  %v5104_v45 = vld [vmem:[%s23239_s3 + $0x1e68] sm:$0xff]  ;;  %v15576_v57 = vcombine.low %v5252_v5, %v5256_v30 }
 0x3c9   :  { %12324 = vmatprep.subr.bf16.mxu1 %v15585_v55  ;;  %v5244_v13 = vld [vmem:[%s23239_s3 + $0x22c8] sm:$0xff]  ;;  %v15425_v0 = vcombine.high %v5100_v23, %v5104_v45 }
 0x3ca   :  { %12276 = vmatpush2.bf16.msra.mxu0 %v15440_v29  ;;  %v5248_v37 = vld [vmem:[%s23239_s3 + $0x22e8] sm:$0xff]  ;;  %v15424_v29 = vcombine.low %v5100_v23, %v5104_v45  ;;  %v4193_v23 = vld [vmem:[%s23239_s3 + $0x1f0] sm:$0xff]  ;;  %v20580_v45 = vpop.f32.mrf.mxu1 }
 0x3cb   :  { %12277 = vmatprep.subr.bf16.mxu0 %v15433_v7  ;;  %v5092_v16 = vld [vmem:[%s23239_s3 + $0x1e08] sm:$0xff]  ;;  %v15569_v55 = vcombine.high %v5244_v13, %v5248_v37 }
 0x3cc   :  { %12325 = vmatpush2.bf16.msra.mxu1 %v15584_v54  ;;  %v5096_v50 = vld [vmem:[%s23239_s3 + $0x1e28] sm:$0xff]  ;;  %v15568_v54 = vcombine.low %v5244_v13, %v5248_v37  ;;  %v14515_v37 = vcombine.high %v4189_v19, %v4193_v23 }
 0x3cd   :  { %12326 = vmatprep.subr.bf16.mxu1 %v15577_v34  ;;  %v5236_v7 = vld [vmem:[%s23239_s3 + $0x2288] sm:$0xff]  ;;  %v15417_v30 = vcombine.high %v5092_v16, %v5096_v50 }
 0x3ce   :  { %12278 = vmatpush2.bf16.msra.mxu0 %v15432_v46  ;;  %v5240_v5 = vld [vmem:[%s23239_s3 + $0x22a8] sm:$0xff]  ;;  %v15416_v46 = vcombine.low %v5092_v16, %v5096_v50  ;;  %v4185_v16 = vld [vmem:[%s23239_s3 + $0x1b0] sm:$0xff]  ;;  %v11924_v50 = vpop.f32.mrf.mxu1 }
 0x3cf   :  { %12279 = vmatprep.subr.bf16.mxu0 %v15425_v0  ;;  %v15561_v34 = vcombine.high %v5236_v7, %v5240_v5  ;;  %v5228_v0 = vld [vmem:[%s23239_s3 + $0x2248] sm:$0xff] }
 0x3d0   :  { %12327 = vmatpush2.bf16.msra.mxu1 %v15576_v57  ;;  %v5232_v13 = vld [vmem:[%s23239_s3 + $0x2268] sm:$0xff]  ;;  %v15560_v57 = vcombine.low %v5236_v7, %v5240_v5  ;;  %v14514_v5 = vcombine.low %v4189_v19, %v4193_v23  ;;  %v11926_v62 = vpop.f32.mrf.mxu1 }
 0x3d1   :  { %12328 = vmatprep.subr.bf16.mxu1 %v15569_v55  ;;  %v15553_v55 = vcombine.high %v5228_v0, %v5232_v13  ;;  %v5224_v7 = vld [vmem:[%s23239_s3 + $0x2228] sm:$0xff]  ;;  %v15552_v61 = vcombine.low %v5228_v0, %v5232_v13  ;;  %v14506_v0 = vcombine.low %v4181_v6, %v4185_v16  ;;  %v4317_v13 = vld [vmem:[%s23239_s3 + $0x5d0] sm:$0xff] }
 0x3d2   :  { %12280 = vmatpush2.bf16.msra.mxu0 %v15424_v29  ;;  %v5220_v29 = vld [vmem:[%s23239_s3 + $0x2208] sm:$0xff] }
 0x3d3   :  { %12281 = vmatprep.subr.bf16.mxu0 %v15417_v30  ;;  %v20600_v30 = vpop.f32.mrf.mxu0  ;;  %v15545_v19 = vcombine.high %v5220_v29, %v5224_v7 }
 0x3d4   :  { %12329 = vmatpush2.bf16.msra.mxu1 %v15568_v54  ;;  %23804 = vst [vmem:[#allocation65_spill] sm:$0xff] %v20600_v30  ;;  %v14507_v54 = vcombine.high %v4181_v6, %v4185_v16  ;;  %v4169_v6 = vld [vmem:[%s23239_s3 + $0x130] sm:$0xff] }
 0x3d5   :  { %12330 = vmatprep.subr.bf16.mxu1 %v15561_v34  ;;  %v4173_v34 = vld [vmem:[%s23239_s3 + $0x150] sm:$0xff] }
 0x3d6   :  { %12282 = vmatpush2.bf16.msra.mxu0 %v15416_v46  ;;  %v4177_v46 = vld [vmem:[%s23239_s3 + $0x170] sm:$0xff] }
 0x3d7   :  { %12357 = vmatprep.subr.bf16.mxu0 %v14515_v37  ;;  %v4321_v37 = vld [vmem:[%s23239_s3 + $0x5f0] sm:$0xff]  ;;  %v14498_v30 = vcombine.low %v4173_v34, %v4177_v46 }
 0x3d8   :  { %12331 = vmatpush2.bf16.msra.mxu1 %v15560_v57  ;;  %v14642_v8 = vcombine.low %v4317_v13, %v4321_v37 }
 0x3d9   :  { %12332 = vmatprep.subr.bf16.mxu1 %v15553_v55  ;;  %v11967_v14 = vpop.f32.mrf.mxu0  ;;  %12284 = vmatmul.mubr.bf16.vlgmr.msra.gmra.mxu0 %v19481_v21  ;;  %v14499_v55 = vcombine.high %v4173_v34, %v4177_v46  ;;  %v15544_v21 = vcombine.low %v5220_v29, %v5224_v7  ;;  %v4313_v29 = vld [vmem:[%s23239_s3 + $0x5b0] sm:$0xff] }
 0x3da   :  { %v11968_v23 = vadd.f32 %v11967_v14, %v20540_v3  ;;  %12293 = vmatprep.mubr.bf16.mxu0 %v19484_v31  ;;  %12358 = vmatpush1.bf16.msra.mxu0 %v14514_v5  ;;  %v4165_v14 = vld [vmem:[%s23239_s3 + $0x110] sm:$0xff]  ;;  %v11928_v3 = vpop.f32.mrf.mxu1  ;;  %v14643_v5 = vcombine.high %v4317_v13, %v4321_v37 }
 0x3db   :  { %v11969_v57 = vpop.f32.mrf.mxu0  ;;  %12359 = vmatprep.subr.bf16.mxu0 %v14507_v54  ;;  %v14491_v54 = vcombine.high %v4165_v14, %v4169_v6  ;;  %v4301_v13 = vld [vmem:[%s23239_s3 + $0x550] sm:$0xff] }
 0x3dc   :  { %12333 = vmatpush2.bf16.msra.mxu1 %v15552_v61  ;;  %v4309_v61 = vld [vmem:[%s23239_s3 + $0x590] sm:$0xff]  ;;  %v11930_v34 = vpop.f32.mrf.mxu1 }
 0x3dd   :  { %12334 = vmatprep.subr.bf16.mxu1 %v15545_v19  ;;  %v11971_v16 = vpop.f32.mrf.mxu0  ;;  %v4157_v19 = vld [vmem:[%s23239_s3 + $0xd0] sm:$0xff] }
 0x3de   :  { %v11972_v31 = vadd.f32 %v11971_v16, %v11918_v48  ;;  %12360 = vmatpush1.bf16.msra.mxu0 %v14506_v0  ;;  %v4161_v48 = vld [vmem:[%s23239_s3 + $0xf0] sm:$0xff]  ;;  %v14635_v0 = vcombine.high %v4309_v61, %v4313_v29 }
 0x3df   :  { %v11973_v7 = vpop.f32.mrf.mxu0  ;;  %12361 = vmatprep.subr.bf16.mxu0 %v14499_v55  ;;  %v4305_v37 = vld [vmem:[%s23239_s3 + $0x570] sm:$0xff] }
 0x3e0   :  { %12335 = vmatpush2.bf16.msra.mxu1 %v15544_v21  ;;  %v14490_v21 = vcombine.low %v4165_v14, %v4169_v6  ;;  %v4149_v6 = vld [vmem:[%s23239_s3 + $0x90] sm:$0xff] }
 0x3e1   :  { %12410 = vmatprep.subr.bf16.mxu1 %v14643_v5  ;;  %v11977_v46 = vpop.f32.mrf.mxu0  ;;  %12294 = vmatmul.mubr.bf16.gmra.mxu0 %v19519_v2  ;;  %v14634_v5 = vcombine.low %v4309_v61, %v4313_v29  ;;  %v14483_v2 = vcombine.high %v4157_v19, %v4161_v48 }
 0x3e2   :  { %v11978_v16 = vadd.f32 %v11977_v46, %v11924_v50  ;;  %12362 = vmatpush1.bf16.msra.mxu0 %v14498_v30  ;;  %12389 = vmatprep.mubr.bf16.mxu0 %v17800_v22  ;;  %v11970_v50 = vadd.f32 %v11969_v57, %v20554_v59  ;;  %v4153_v46 = vld [vmem:[%s23239_s3 + $0xb0] sm:$0xff] }
 0x3e3   :  { %v12020_v55 = vpop.f32.mrf.mxu1  ;;  %12337 = vmatmul.mubr.bf16.vlgmr.msra.gmra.mxu1 %v19687_v32  ;;  %v11979_v10 = vpop.f32.mrf.mxu0  ;;  %12363 = vmatprep.subr.bf16.mxu0 %v14491_v54  ;;  %v14627_v54 = vcombine.high %v4301_v13, %v4305_v37 }
 0x3e4   :  { %v20645_v30 = vadd.f32 %v12020_v55, %v11968_v23  ;;  %12346 = vmatprep.mubr.bf16.mxu1 %v19691_v12  ;;  %12411 = vmatpush1.bf16.msra.mxu1 %v14642_v8  ;;  %v11980_v14 = vadd.f32 %v11979_v10, %v11926_v62  ;;  %v14482_v23 = vcombine.low %v4157_v19, %v4161_v48  ;;  %v4293_v10 = vld [vmem:[%s23239_s3 + $0x510] sm:$0xff] }
 0x3e5   :  { %v12022_v61 = vpop.f32.mrf.mxu1  ;;  %12412 = vmatprep.subr.bf16.mxu1 %v14635_v0  ;;  %v11981_v29 = vpop.f32.mrf.mxu0  ;;  %v4297_v8 = vld [vmem:[%s23239_s3 + $0x530] sm:$0xff]  ;;  %v14475_v55 = vcombine.high %v4149_v6, %v4153_v46  ;;  %v11974_v0 = vadd.f32 %v11973_v7, %v20580_v45  ;;  %v14474_v45 = vcombine.low %v4149_v6, %v4153_v46 }
 0x3e6   :  { %v20654_v32 = vadd.f32 %v12022_v61, %v11970_v50  ;;  %v11982_v59 = vadd.f32 %v11981_v29, %v11928_v3  ;;  %12364 = vmatpush1.bf16.msra.mxu0 %v14490_v21  ;;  %v14626_v3 = vcombine.low %v4301_v13, %v4305_v37  ;;  %v4141_v19 = vld [vmem:[%s23239_s3 + $0x50] sm:$0xff]  ;;  %v14619_v61 = vcombine.high %v4293_v10, %v4297_v8 }
 0x3e7   :  { %v12024_v62 = vpop.f32.mrf.mxu1  ;;  %v11983_v57 = vpop.f32.mrf.mxu0  ;;  %12365 = vmatprep.subr.bf16.mxu0 %v14483_v2  ;;  %v4145_v48 = vld [vmem:[%s23239_s3 + $0x70] sm:$0xff] }
 0x3e8   :  { %v20663_v12 = vadd.f32 %v12024_v62, %v11972_v31  ;;  %12413 = vmatpush1.bf16.msra.mxu1 %v14634_v5  ;;  %v11984_v21 = vadd.f32 %v11983_v57, %v11930_v34  ;;  %v4285_v31 = vld [vmem:[%s23239_s3 + $0x4d0] sm:$0xff]  ;;  %v14467_v13 = vcombine.high %v4141_v19, %v4145_v48  ;;  %v14618_v5 = vcombine.low %v4293_v10, %v4297_v8 }
 0x3e9   :  { %v12026_v50 = vpop.f32.mrf.mxu1  ;;  %12414 = vmatprep.subr.bf16.mxu1 %v14627_v54  ;;  %v4289_v7 = vld [vmem:[%s23239_s3 + $0x4f0] sm:$0xff] }
 0x3ea   :  { %v20671_v2 = vadd.f32 %v12026_v50, %v11974_v0  ;;  %12366 = vmatpush1.bf16.msra.mxu0 %v14482_v23  ;;  %v4133_v6 = vld [vmem:[%s23239_s3 + $0x10] sm:$0xff]  ;;  %v14611_v54 = vcombine.high %v4285_v31, %v4289_v7  ;;  %v14610_v0 = vcombine.low %v4285_v31, %v4289_v7 }
 0x3eb   :  { %v12030_v34 = vpop.f32.mrf.mxu1  ;;  %12347 = vmatmul.mubr.bf16.gmra.mxu1 %v19724_v53  ;;  %12367 = vmatprep.subr.bf16.mxu0 %v14475_v55  ;;  %v4137_v46 = vld [vmem:[%s23239_s3 + $0x30] sm:$0xff] }
 0x3ec   :  { %v20680_v37 = vadd.f32 %v12030_v34, %v11978_v16  ;;  %12415 = vmatpush1.bf16.msra.mxu1 %v14626_v3  ;;  %12442 = vmatprep.mubr.bf16.mxu1 %v17849_v17  ;;  %v14466_v16 = vcombine.low %v4141_v19, %v4145_v48  ;;  %v4277_v62 = vld [vmem:[%s23239_s3 + $0x490] sm:$0xff]  ;;  %v14459_v57 = vcombine.high %v4133_v6, %v4137_v46 }
 0x3ed   :  { %v12032_v29 = vpop.f32.mrf.mxu1  ;;  %12416 = vmatprep.subr.bf16.mxu1 %v14619_v61  ;;  %v4281_v10 = vld [vmem:[%s23239_s3 + $0x4b0] sm:$0xff]  ;;  %v14458_v61 = vcombine.low %v4133_v6, %v4137_v46 }
 0x3ee   :  { %v20689_v23 = vadd.f32 %v12032_v29, %v11980_v14  ;;  %12368 = vmatpush1.bf16.msra.mxu0 %v14474_v45  ;;  %v4253_v14 = vld [vmem:[%s23239_s3 + $0x3d0] sm:$0xff]  ;;  %v14603_v48 = vcombine.high %v4277_v62, %v4281_v10  ;;  %v14602_v7 = vcombine.low %v4277_v62, %v4281_v10 }
 0x3ef   :  { %v12034_v8 = vpop.f32.mrf.mxu1  ;;  %12369 = vmatprep.subr.bf16.mxu0 %v14467_v13  ;;  %v4257_v3 = vld [vmem:[%s23239_s3 + $0x3f0] sm:$0xff] }
 0x3f0   :  { %v20697_v55 = vadd.f32 %v12034_v8, %v11982_v59  ;;  %12417 = vmatpush1.bf16.msra.mxu1 %v14618_v5  ;;  %v4269_v59 = vld [vmem:[%s23239_s3 + $0x450] sm:$0xff]  ;;  %v14579_v31 = vcombine.high %v4253_v14, %v4257_v3  ;;  %v14578_v5 = vcombine.low %v4253_v14, %v4257_v3 }
 0x3f1   :  { %v12036_v19 = vpop.f32.mrf.mxu1  ;;  %12418 = vmatprep.subr.bf16.mxu1 %v14611_v54  ;;  %v4273_v45 = vld [vmem:[%s23239_s3 + $0x470] sm:$0xff] }
 0x3f2   :  { %v20705_v50 = vadd.f32 %v12036_v19, %v11984_v21  ;;  %12370 = vmatpush1.bf16.msra.mxu0 %v14466_v16  ;;  %v4245_v34 = vld [vmem:[%s23239_s3 + $0x390] sm:$0xff]  ;;  %v14595_v13 = vcombine.high %v4269_v59, %v4273_v45  ;;  %v14594_v54 = vcombine.low %v4269_v59, %v4273_v45 }
 0x3f3   :  { %12371 = vmatprep.subr.bf16.mxu0 %v14459_v57  ;;  %v4249_v21 = vld [vmem:[%s23239_s3 + $0x3b0] sm:$0xff] }
 0x3f4   :  { %12419 = vmatpush1.bf16.msra.mxu1 %v14610_v0  ;;  %v4261_v6 = vld [vmem:[%s23239_s3 + $0x410] sm:$0xff]  ;;  %v14571_v29 = vcombine.high %v4245_v34, %v4249_v21  ;;  %v14570_v8 = vcombine.low %v4245_v34, %v4249_v21 }
 0x3f5   :  { %12420 = vmatprep.subr.bf16.mxu1 %v14603_v48  ;;  %v4265_v46 = vld [vmem:[%s23239_s3 + $0x430] sm:$0xff] }
 0x3f6   :  { %12372 = vmatpush1.bf16.msra.mxu0 %v14458_v61  ;;  %v4237_v16 = vld [vmem:[%s23239_s3 + $0x350] sm:$0xff]  ;;  %v14587_v10 = vcombine.high %v4261_v6, %v4265_v46  ;;  %v14586_v3 = vcombine.low %v4261_v6, %v4265_v46 }
 0x3f7   :  { %12373 = vmatprep.subr.bf16.mxu0 %v14579_v31  ;;  %v4241_v62 = vld [vmem:[%s23239_s3 + $0x370] sm:$0xff] }
 0x3f8   :  { %12421 = vmatpush1.bf16.msra.mxu1 %v14602_v7  ;;  %v4381_v57 = vld [vmem:[%s23239_s3 + $0x7d0] sm:$0xff]  ;;  %v14563_v14 = vcombine.high %v4237_v16, %v4241_v62  ;;  %v14562_v59 = vcombine.low %v4237_v16, %v4241_v62 }
 0x3f9   :  { %12422 = vmatprep.subr.bf16.mxu1 %v14595_v13  ;;  %v4385_v0 = vld [vmem:[%s23239_s3 + $0x7f0] sm:$0xff] }
 0x3fa   :  { %12374 = vmatpush2.bf16.msra.mxu0 %v14578_v5  ;;  %v4229_v19 = vld [vmem:[%s23239_s3 + $0x310] sm:$0xff]  ;;  %v14707_v61 = vcombine.high %v4381_v57, %v4385_v0  ;;  %v14706_v34 = vcombine.low %v4381_v57, %v4385_v0 }
 0x3fb   :  { %12375 = vmatprep.subr.bf16.mxu0 %v14571_v29  ;;  %v4233_v48 = vld [vmem:[%s23239_s3 + $0x330] sm:$0xff] }
 0x3fc   :  { %12423 = vmatpush1.bf16.msra.mxu1 %v14594_v54  ;;  %v4373_v45 = vld [vmem:[%s23239_s3 + $0x790] sm:$0xff]  ;;  %v14555_v7 = vcombine.high %v4229_v19, %v4233_v48  ;;  %v14554_v6 = vcombine.low %v4229_v19, %v4233_v48 }
 0x3fd   :  { %12424 = vmatprep.subr.bf16.mxu1 %v14587_v10  ;;  %v4377_v31 = vld [vmem:[%s23239_s3 + $0x7b0] sm:$0xff] }
 0x3fe   :  { %12376 = vmatpush2.bf16.msra.mxu0 %v14570_v8  ;;  %v4221_v21 = vld [vmem:[%s23239_s3 + $0x2d0] sm:$0xff]  ;;  %v14699_v5 = vcombine.high %v4373_v45, %v4377_v31  ;;  %v14698_v16 = vcombine.low %v4373_v45, %v4377_v31 }
 0x3ff   :  { %12377 = vmatprep.subr.bf16.mxu0 %v14563_v14  ;;  %v4225_v13 = vld [vmem:[%s23239_s3 + $0x2f0] sm:$0xff] }
 0x400   :  { %12425 = vmatpush1.bf16.msra.mxu1 %v14586_v3  ;;  %v4365_v46 = vld [vmem:[%s23239_s3 + $0x750] sm:$0xff]  ;;  %v14547_v54 = vcombine.high %v4221_v21, %v4225_v13  ;;  %v14546_v57 = vcombine.low %v4221_v21, %v4225_v13 }
 0x401   :  { %12426 = vmatprep.subr.bf16.mxu1 %v14707_v61  ;;  %v4369_v29 = vld [vmem:[%s23239_s3 + $0x770] sm:$0xff] }
 0x402   :  { %12378 = vmatpush2.bf16.msra.mxu0 %v14562_v59  ;;  %v4213_v62 = vld [vmem:[%s23239_s3 + $0x290] sm:$0xff]  ;;  %v14691_v8 = vcombine.high %v4365_v46, %v4369_v29  ;;  %v14690_v19 = vcombine.low %v4365_v46, %v4369_v29 }
 0x403   :  { %12379 = vmatprep.subr.bf16.mxu0 %v14555_v7  ;;  %v4217_v10 = vld [vmem:[%s23239_s3 + $0x2b0] sm:$0xff] }
 0x404   :  { %12427 = vmatpush2.bf16.msra.mxu1 %v14706_v34  ;;  %v4357_v0 = vld [vmem:[%s23239_s3 + $0x710] sm:$0xff]  ;;  %v14539_v3 = vcombine.high %v4213_v62, %v4217_v10  ;;  %v14538_v45 = vcombine.low %v4213_v62, %v4217_v10 }
 0x405   :  { %12428 = vmatprep.subr.bf16.mxu1 %v14699_v5  ;;  %v4361_v14 = vld [vmem:[%s23239_s3 + $0x730] sm:$0xff] }
 0x406   :  { %12380 = vmatpush2.bf16.msra.mxu0 %v14554_v6  ;;  %v4205_v48 = vld [vmem:[%s23239_s3 + $0x250] sm:$0xff]  ;;  %v14683_v59 = vcombine.high %v4357_v0, %v4361_v14  ;;  %v14682_v21 = vcombine.low %v4357_v0, %v4361_v14 }
 0x407   :  { %12381 = vmatprep.subr.bf16.mxu0 %v14547_v54  ;;  %v4209_v61 = vld [vmem:[%s23239_s3 + $0x270] sm:$0xff] }
 0x408   :  { %12429 = vmatpush2.bf16.msra.mxu1 %v14698_v16  ;;  %v4349_v31 = vld [vmem:[%s23239_s3 + $0x6d0] sm:$0xff]  ;;  %v14531_v34 = vcombine.high %v4205_v48, %v4209_v61  ;;  %v14530_v46 = vcombine.low %v4205_v48, %v4209_v61 }
 0x409   :  { %12430 = vmatprep.subr.bf16.mxu1 %v14691_v8  ;;  %v4353_v7 = vld [vmem:[%s23239_s3 + $0x6f0] sm:$0xff] }
 0x40a   :  { %12382 = vmatpush2.bf16.msra.mxu0 %v14546_v57  ;;  %v4197_v13 = vld [vmem:[%s23239_s3 + $0x210] sm:$0xff]  ;;  %v14675_v6 = vcombine.high %v4349_v31, %v4353_v7  ;;  %v14674_v62 = vcombine.low %v4349_v31, %v4353_v7 }
 0x40b   :  { %12383 = vmatprep.subr.bf16.mxu0 %v14539_v3  ;;  %v4201_v5 = vld [vmem:[%s23239_s3 + $0x230] sm:$0xff] }
 0x40c   :  { %12431 = vmatpush2.bf16.msra.mxu1 %v14690_v19  ;;  %v4341_v29 = vld [vmem:[%s23239_s3 + $0x690] sm:$0xff]  ;;  %v14523_v16 = vcombine.high %v4197_v13, %v4201_v5  ;;  %v14522_v0 = vcombine.low %v4197_v13, %v4201_v5 }
 0x40d   :  { %12432 = vmatprep.subr.bf16.mxu1 %v14683_v59  ;;  %v4345_v54 = vld [vmem:[%s23239_s3 + $0x6b0] sm:$0xff] }
 0x40e   :  { %12384 = vmatpush2.bf16.msra.mxu0 %v14538_v45  ;;  %v4445_v10 = vld [vmem:[%s23239_s3 + $0x9d0] sm:$0xff]  ;;  %v14667_v57 = vcombine.high %v4341_v29, %v4345_v54  ;;  %v14666_v48 = vcombine.low %v4341_v29, %v4345_v54 }
 0x40f   :  { %12385 = vmatprep.subr.bf16.mxu0 %v14531_v34  ;;  %v4449_v8 = vld [vmem:[%s23239_s3 + $0x9f0] sm:$0xff] }
 0x410   :  { %12433 = vmatpush2.bf16.msra.mxu1 %v14682_v21  ;;  %v4333_v14 = vld [vmem:[%s23239_s3 + $0x650] sm:$0xff]  ;;  %v14771_v19 = vcombine.high %v4445_v10, %v4449_v8  ;;  %v14770_v34 = vcombine.low %v4445_v10, %v4449_v8 }
 0x411   :  { %12434 = vmatprep.subr.bf16.mxu1 %v14675_v6  ;;  %v4337_v3 = vld [vmem:[%s23239_s3 + $0x670] sm:$0xff] }
 0x412   :  { %12386 = vmatpush2.bf16.msra.mxu0 %v14530_v46  ;;  %v4437_v61 = vld [vmem:[%s23239_s3 + $0x990] sm:$0xff]  ;;  %v14659_v45 = vcombine.high %v4333_v14, %v4337_v3  ;;  %v14658_v13 = vcombine.low %v4333_v14, %v4337_v3 }
 0x413   :  { %12387 = vmatprep.subr.bf16.mxu0 %v14523_v16  ;;  %v4441_v59 = vld [vmem:[%s23239_s3 + $0x9b0] sm:$0xff] }
 0x414   :  { %12435 = vmatpush2.bf16.msra.mxu1 %v14674_v62  ;;  %v4325_v31 = vld [vmem:[%s23239_s3 + $0x610] sm:$0xff]  ;;  %v14763_v21 = vcombine.high %v4437_v61, %v4441_v59  ;;  %v14762_v16 = vcombine.low %v4437_v61, %v4441_v59 }
 0x415   :  { %12436 = vmatprep.subr.bf16.mxu1 %v14667_v57  ;;  %v4329_v7 = vld [vmem:[%s23239_s3 + $0x630] sm:$0xff] }
 0x416   :  { %12388 = vmatpush2.bf16.msra.mxu0 %v14522_v0  ;;  %v4429_v5 = vld [vmem:[%s23239_s3 + $0x950] sm:$0xff]  ;;  %v14651_v29 = vcombine.high %v4325_v31, %v4329_v7  ;;  %v14650_v0 = vcombine.low %v4325_v31, %v4329_v7 }
 0x417   :  { %12463 = vmatprep.subr.bf16.mxu0 %v14771_v19  ;;  %v4433_v6 = vld [vmem:[%s23239_s3 + $0x970] sm:$0xff] }
 0x418   :  { %12437 = vmatpush2.bf16.msra.mxu1 %v14666_v48  ;;  %v4573_v62 = vld [vmem:[%s23239_s3 + $0xdd0] sm:$0xff]  ;;  %v14755_v57 = vcombine.high %v4429_v5, %v4433_v6  ;;  %v14754_v59 = vcombine.low %v4429_v5, %v4433_v6 }
 0x419   :  { %12438 = vmatprep.subr.bf16.mxu1 %v14659_v45  ;;  %v12073_v46 = vpop.f32.mrf.mxu0  ;;  %12390 = vmatmul.mubr.bf16.vlgmr.msra.gmra.mxu0 %v23772_v35  ;;  %v4577_v10 = vld [vmem:[%s23239_s3 + $0xdf0] sm:$0xff] }
 0x41a   :  { %v12074_v54 = vadd.f32 %v12073_v46, %v20645_v30  ;;  %12399 = vmatprep.mubr.bf16.mxu0 %v23773_v36  ;;  %12464 = vmatpush1.bf16.msra.mxu0 %v14770_v34  ;;  %v4421_v30 = vld [vmem:[%s23239_s3 + $0x910] sm:$0xff]  ;;  %v14899_v48 = vcombine.high %v4573_v62, %v4577_v10  ;;  %v14898_v34 = vcombine.low %v4573_v62, %v4577_v10 }
 0x41b   :  { %v12075_v8 = vpop.f32.mrf.mxu0  ;;  %12465 = vmatprep.subr.bf16.mxu0 %v14763_v21  ;;  %v4425_v3 = vld [vmem:[%s23239_s3 + $0x930] sm:$0xff] }
 0x41c   :  { %12439 = vmatpush2.bf16.msra.mxu1 %v14658_v13  ;;  %v12076_v14 = vadd.f32 %v12075_v8, %v20654_v32  ;;  %v4565_v45 = vld [vmem:[%s23239_s3 + $0xd90] sm:$0xff]  ;;  %v14747_v7 = vcombine.high %v4421_v30, %v4425_v3 }
 0x41d   :  { %12440 = vmatprep.subr.bf16.mxu1 %v14651_v29  ;;  %v12077_v19 = vpop.f32.mrf.mxu0  ;;  %v4569_v32 = vld [vmem:[%s23239_s3 + $0xdb0] sm:$0xff]  ;;  %v14746_v29 = vcombine.low %v4421_v30, %v4425_v3 }
 0x41e   :  { %v12078_v61 = vadd.f32 %v12077_v19, %v20663_v12  ;;  %12466 = vmatpush1.bf16.msra.mxu0 %v14762_v16  ;;  %v4413_v12 = vld [vmem:[%s23239_s3 + $0x8d0] sm:$0xff]  ;;  %v14891_v6 = vcombine.high %v4565_v45, %v4569_v32 }
 0x41f   :  { %v12079_v31 = vpop.f32.mrf.mxu0  ;;  %12467 = vmatprep.subr.bf16.mxu0 %v14755_v57  ;;  %v4417_v13 = vld [vmem:[%s23239_s3 + $0x8f0] sm:$0xff] }
 0x420   :  { %12441 = vmatpush2.bf16.msra.mxu1 %v14650_v0  ;;  %v12080_v21 = vadd.f32 %v12079_v31, %v20671_v2  ;;  %v4557_v2 = vld [vmem:[%s23239_s3 + $0xd50] sm:$0xff]  ;;  %v14739_v8 = vcombine.high %v4413_v12, %v4417_v13 }
 0x421   :  { %12516 = vmatprep.subr.bf16.mxu1 %v14899_v48  ;;  %v12083_v5 = vpop.f32.mrf.mxu0  ;;  %12400 = vmatmul.mubr.bf16.gmra.mxu0 %v23775_v63  ;;  %v4561_v16 = vld [vmem:[%s23239_s3 + $0xd70] sm:$0xff] }
 0x422   :  { %v12084_v46 = vadd.f32 %v12083_v5, %v20680_v37  ;;  %12468 = vmatpush1.bf16.msra.mxu0 %v14754_v59  ;;  %12495 = vmatprep.mubr.bf16.mxu0 %v23776_v27  ;;  %v14890_v37 = vcombine.low %v4565_v45, %v4569_v32  ;;  %v4405_v30 = vld [vmem:[%s23239_s3 + $0x890] sm:$0xff]  ;;  %v14883_v59 = vcombine.high %v4557_v2, %v4561_v16 }
 0x423   :  { %v12126_v62 = vpop.f32.mrf.mxu1  ;;  %12443 = vmatmul.mubr.bf16.vlgmr.msra.gmra.mxu1 %v23778_v41  ;;  %v12085_v10 = vpop.f32.mrf.mxu0  ;;  %12469 = vmatprep.subr.bf16.mxu0 %v14747_v7  ;;  %v4409_v3 = vld [vmem:[%s23239_s3 + $0x8b0] sm:$0xff]  ;;  %v14738_v45 = vcombine.low %v4413_v12, %v4417_v13 }
 0x424   :  { %v20867_v57 = vadd.f32 %v12126_v62, %v12074_v54  ;;  %12452 = vmatprep.mubr.bf16.mxu1 %v23779_v15  ;;  %12517 = vmatpush1.bf16.msra.mxu1 %v14898_v34  ;;  %v12086_v0 = vadd.f32 %v12085_v10, %v20689_v23  ;;  %v4549_v23 = vld [vmem:[%s23239_s3 + $0xd10] sm:$0xff]  ;;  %v14731_v5 = vcombine.high %v4405_v30, %v4409_v3 }
 0x425   :  { %v12128_v19 = vpop.f32.mrf.mxu1  ;;  %12518 = vmatprep.subr.bf16.mxu1 %v14891_v6  ;;  %v12087_v48 = vpop.f32.mrf.mxu0  ;;  %v4553_v32 = vld [vmem:[%s23239_s3 + $0xd30] sm:$0xff] }
 0x426   :  { %v20877_v54 = vadd.f32 %v12128_v19, %v12076_v14  ;;  %v12088_v31 = vadd.f32 %v12087_v48, %v20697_v55  ;;  %12470 = vmatpush1.bf16.msra.mxu0 %v14746_v29  ;;  %v14882_v14 = vcombine.low %v4557_v2, %v4561_v16  ;;  %v4397_v12 = vld [vmem:[%s23239_s3 + $0x850] sm:$0xff]  ;;  %v14875_v62 = vcombine.high %v4549_v23, %v4553_v32 }
 0x427   :  { %v12130_v7 = vpop.f32.mrf.mxu1  ;;  %v12089_v34 = vpop.f32.mrf.mxu0  ;;  %12471 = vmatprep.subr.bf16.mxu0 %v14739_v8  ;;  %v4401_v13 = vld [vmem:[%s23239_s3 + $0x870] sm:$0xff] }
 0x428   :  { %v20886_v6 = vadd.f32 %v12130_v7, %v12078_v61  ;;  %12519 = vmatpush1.bf16.msra.mxu1 %v14890_v37  ;;  %v12090_v55 = vadd.f32 %v12089_v34, %v20705_v50  ;;  %v14730_v61 = vcombine.low %v4405_v30, %v4409_v3  ;;  %v4541_v2 = vld [vmem:[%s23239_s3 + $0xcd0] sm:$0xff]  ;;  %v14723_v8 = vcombine.high %v4397_v12, %v4401_v13 }
 0x429   :  { %v12132_v29 = vpop.f32.mrf.mxu1  ;;  %12520 = vmatprep.subr.bf16.mxu1 %v14883_v59  ;;  %v4545_v50 = vld [vmem:[%s23239_s3 + $0xcf0] sm:$0xff] }
 0x42a   :  { %v20895_v10 = vadd.f32 %v12132_v29, %v12080_v21  ;;  %12472 = vmatpush1.bf16.msra.mxu0 %v14738_v45  ;;  %v14874_v21 = vcombine.low %v4549_v23, %v4553_v32  ;;  %v4389_v30 = vld [vmem:[%s23239_s3 + $0x810] sm:$0xff]  ;;  %v14867_v48 = vcombine.high %v4541_v2, %v4545_v50 }
 0x42b   :  { %v12136_v16 = vpop.f32.mrf.mxu1  ;;  %12453 = vmatmul.mubr.bf16.gmra.mxu1 %v23782_v38  ;;  %12473 = vmatprep.subr.bf16.mxu0 %v14731_v5  ;;  %v4393_v3 = vld [vmem:[%s23239_s3 + $0x830] sm:$0xff]  ;;  %v14866_v5 = vcombine.low %v4541_v2, %v4545_v50 }
 0x42c   :  { %v20904_v37 = vadd.f32 %v12136_v16, %v12084_v46  ;;  %12521 = vmatpush1.bf16.msra.mxu1 %v14882_v14  ;;  %12548 = vmatprep.mubr.bf16.mxu1 %v23783_v44  ;;  %v14722_v46 = vcombine.low %v4397_v12, %v4401_v13  ;;  %v4533_v45 = vld [vmem:[%s23239_s3 + $0xc90] sm:$0xff]  ;;  %v14715_v7 = vcombine.high %v4389_v30, %v4393_v3 }
 0x42d   :  { %v12138_v19 = vpop.f32.mrf.mxu1  ;;  %12522 = vmatprep.subr.bf16.mxu1 %v14875_v62  ;;  %v4537_v23 = vld [vmem:[%s23239_s3 + $0xcb0] sm:$0xff]  ;;  %v14714_v62 = vcombine.low %v4389_v30, %v4393_v3 }
 0x42e   :  { %v20913_v59 = vadd.f32 %v12138_v19, %v12086_v0  ;;  %12474 = vmatpush1.bf16.msra.mxu0 %v14730_v61  ;;  %v4509_v0 = vld [vmem:[%s23239_s3 + $0xbd0] sm:$0xff]  ;;  %v14859_v13 = vcombine.high %v4533_v45, %v4537_v23  ;;  %v14858_v50 = vcombine.low %v4533_v45, %v4537_v23 }
 0x42f   :  { %v12140_v32 = vpop.f32.mrf.mxu1  ;;  %12475 = vmatprep.subr.bf16.mxu0 %v14723_v8  ;;  %v4513_v14 = vld [vmem:[%s23239_s3 + $0xbf0] sm:$0xff] }
 0x430   :  { %v20921_v34 = vadd.f32 %v12140_v32, %v12088_v31  ;;  %12523 = vmatpush1.bf16.msra.mxu1 %v14874_v21  ;;  %v4525_v31 = vld [vmem:[%s23239_s3 + $0xc50] sm:$0xff]  ;;  %v14835_v2 = vcombine.high %v4509_v0, %v4513_v14  ;;  %v14834_v21 = vcombine.low %v4509_v0, %v4513_v14 }
 0x431   :  { %v12142_v12 = vpop.f32.mrf.mxu1  ;;  %12524 = vmatprep.subr.bf16.mxu1 %v14867_v48  ;;  %v4529_v61 = vld [vmem:[%s23239_s3 + $0xc70] sm:$0xff] }
 0x432   :  { %v20929_v29 = vadd.f32 %v12142_v12, %v12090_v55  ;;  %12476 = vmatpush1.bf16.msra.mxu0 %v14722_v46  ;;  %v4501_v16 = vld [vmem:[%s23239_s3 + $0xb90] sm:$0xff]  ;;  %v14851_v8 = vcombine.high %v4525_v31, %v4529_v61  ;;  %v14850_v48 = vcombine.low %v4525_v31, %v4529_v61 }
 0x433   :  { %12477 = vmatprep.subr.bf16.mxu0 %v14715_v7  ;;  %v4505_v55 = vld [vmem:[%s23239_s3 + $0xbb0] sm:$0xff] }
 0x434   :  { %12525 = vmatpush1.bf16.msra.mxu1 %v14866_v5  ;;  %v4517_v30 = vld [vmem:[%s23239_s3 + $0xc10] sm:$0xff]  ;;  %v14827_v19 = vcombine.high %v4501_v16, %v4505_v55  ;;  %v14826_v32 = vcombine.low %v4501_v16, %v4505_v55 }
 0x435   :  { %12526 = vmatprep.subr.bf16.mxu1 %v14859_v13  ;;  %v4521_v3 = vld [vmem:[%s23239_s3 + $0xc30] sm:$0xff] }
 0x436   :  { %12478 = vmatpush1.bf16.msra.mxu0 %v14714_v62  ;;  %v4493_v46 = vld [vmem:[%s23239_s3 + $0xb50] sm:$0xff]  ;;  %v14843_v23 = vcombine.high %v4517_v30, %v4521_v3  ;;  %v14842_v14 = vcombine.low %v4517_v30, %v4521_v3 }
 0x437   :  { %12479 = vmatprep.subr.bf16.mxu0 %v14835_v2  ;;  %v4497_v45 = vld [vmem:[%s23239_s3 + $0xb70] sm:$0xff] }
 0x438   :  { %12527 = vmatpush1.bf16.msra.mxu1 %v14858_v50  ;;  %v4637_v7 = vld [vmem:[%s23239_s3 + $0xfd0] sm:$0xff]  ;;  %v14819_v0 = vcombine.high %v4493_v46, %v4497_v45  ;;  %v14818_v31 = vcombine.low %v4493_v46, %v4497_v45 }
 0x439   :  { %12528 = vmatprep.subr.bf16.mxu1 %v14851_v8  ;;  %v4641_v5 = vld [vmem:[%s23239_s3 + $0xff0] sm:$0xff] }
 0x43a   :  { %12480 = vmatpush2.bf16.msra.mxu0 %v14834_v21  ;;  %v4485_v12 = vld [vmem:[%s23239_s3 + $0xb10] sm:$0xff]  ;;  %v14963_v62 = vcombine.high %v4637_v7, %v4641_v5  ;;  %v14962_v16 = vcombine.low %v4637_v7, %v4641_v5 }
 0x43b   :  { %12481 = vmatprep.subr.bf16.mxu0 %v14827_v19  ;;  %v4489_v13 = vld [vmem:[%s23239_s3 + $0xb30] sm:$0xff] }
 0x43c   :  { %12529 = vmatpush1.bf16.msra.mxu1 %v14850_v48  ;;  %v4629_v61 = vld [vmem:[%s23239_s3 + $0xf90] sm:$0xff]  ;;  %v14811_v50 = vcombine.high %v4485_v12, %v4489_v13  ;;  %v14810_v30 = vcombine.low %v4485_v12, %v4489_v13 }
 0x43d   :  { %12530 = vmatprep.subr.bf16.mxu1 %v14843_v23  ;;  %v4633_v2 = vld [vmem:[%s23239_s3 + $0xfb0] sm:$0xff] }
 0x43e   :  { %12482 = vmatpush2.bf16.msra.mxu0 %v14826_v32  ;;  %v4477_v55 = vld [vmem:[%s23239_s3 + $0xad0] sm:$0xff]  ;;  %v14955_v21 = vcombine.high %v4629_v61, %v4633_v2  ;;  %v14954_v46 = vcombine.low %v4629_v61, %v4633_v2 }
 0x43f   :  { %12483 = vmatprep.subr.bf16.mxu0 %v14819_v0  ;;  %v4481_v8 = vld [vmem:[%s23239_s3 + $0xaf0] sm:$0xff] }
 0x440   :  { %12531 = vmatpush1.bf16.msra.mxu1 %v14842_v14  ;;  %v4621_v3 = vld [vmem:[%s23239_s3 + $0xf50] sm:$0xff]  ;;  %v14803_v48 = vcombine.high %v4477_v55, %v4481_v8  ;;  %v14802_v7 = vcombine.low %v4477_v55, %v4481_v8 }
 0x441   :  { %12532 = vmatprep.subr.bf16.mxu1 %v14963_v62  ;;  %v4625_v19 = vld [vmem:[%s23239_s3 + $0xf70] sm:$0xff] }
 0x442   :  { %12484 = vmatpush2.bf16.msra.mxu0 %v14818_v31  ;;  %v4469_v45 = vld [vmem:[%s23239_s3 + $0xa90] sm:$0xff]  ;;  %v14947_v32 = vcombine.high %v4621_v3, %v4625_v19  ;;  %v14946_v12 = vcombine.low %v4621_v3, %v4625_v19 }
 0x443   :  { %12485 = vmatprep.subr.bf16.mxu0 %v14811_v50  ;;  %v4473_v23 = vld [vmem:[%s23239_s3 + $0xab0] sm:$0xff] }
 0x444   :  { %12533 = vmatpush2.bf16.msra.mxu1 %v14962_v16  ;;  %v4613_v5 = vld [vmem:[%s23239_s3 + $0xf10] sm:$0xff]  ;;  %v14795_v14 = vcombine.high %v4469_v45, %v4473_v23  ;;  %v14794_v61 = vcombine.low %v4469_v45, %v4473_v23 }
 0x445   :  { %12534 = vmatprep.subr.bf16.mxu1 %v14955_v21  ;;  %v4617_v0 = vld [vmem:[%s23239_s3 + $0xf30] sm:$0xff] }
 0x446   :  { %12486 = vmatpush2.bf16.msra.mxu0 %v14810_v30  ;;  %v4461_v13 = vld [vmem:[%s23239_s3 + $0xa50] sm:$0xff]  ;;  %v14939_v31 = vcombine.high %v4613_v5, %v4617_v0  ;;  %v14938_v55 = vcombine.low %v4613_v5, %v4617_v0 }
 0x447   :  { %12487 = vmatprep.subr.bf16.mxu0 %v14803_v48  ;;  %v4465_v62 = vld [vmem:[%s23239_s3 + $0xa70] sm:$0xff] }
 0x448   :  { %12535 = vmatpush2.bf16.msra.mxu1 %v14954_v46  ;;  %v4605_v2 = vld [vmem:[%s23239_s3 + $0xed0] sm:$0xff]  ;;  %v14787_v16 = vcombine.high %v4461_v13, %v4465_v62  ;;  %v14786_v3 = vcombine.low %v4461_v13, %v4465_v62 }
 0x449   :  { %12536 = vmatprep.subr.bf16.mxu1 %v14947_v32  ;;  %v4609_v50 = vld [vmem:[%s23239_s3 + $0xef0] sm:$0xff] }
 0x44a   :  { %12488 = vmatpush2.bf16.msra.mxu0 %v14802_v7  ;;  %v4453_v8 = vld [vmem:[%s23239_s3 + $0xa10] sm:$0xff]  ;;  %v14931_v30 = vcombine.high %v4605_v2, %v4609_v50  ;;  %v14930_v45 = vcombine.low %v4605_v2, %v4609_v50 }
 0x44b   :  { %12489 = vmatprep.subr.bf16.mxu0 %v14795_v14  ;;  %v4457_v21 = vld [vmem:[%s23239_s3 + $0xa30] sm:$0xff] }
 0x44c   :  { %12537 = vmatpush2.bf16.msra.mxu1 %v14946_v12  ;;  %v4597_v19 = vld [vmem:[%s23239_s3 + $0xe90] sm:$0xff]  ;;  %v14779_v46 = vcombine.high %v4453_v8, %v4457_v21  ;;  %v14778_v5 = vcombine.low %v4453_v8, %v4457_v21 }
 0x44d   :  { %12538 = vmatprep.subr.bf16.mxu1 %v14939_v31  ;;  %v4601_v48 = vld [vmem:[%s23239_s3 + $0xeb0] sm:$0xff] }
 0x44e   :  { %12490 = vmatpush2.bf16.msra.mxu0 %v14794_v61  ;;  %v4701_v23 = vld [vmem:[%s23239_s3 + $0x11d0] sm:$0xff]  ;;  %v14923_v7 = vcombine.high %v4597_v19, %v4601_v48  ;;  %v14922_v13 = vcombine.low %v4597_v19, %v4601_v48 }
 0x44f   :  { %12491 = vmatprep.subr.bf16.mxu0 %v14787_v16  ;;  %v4705_v32 = vld [vmem:[%s23239_s3 + $0x11f0] sm:$0xff] }
 0x450   :  { %12539 = vmatpush2.bf16.msra.mxu1 %v14938_v55  ;;  %v4589_v0 = vld [vmem:[%s23239_s3 + $0xe50] sm:$0xff]  ;;  %v15027_v12 = vcombine.high %v4701_v23, %v4705_v32  ;;  %v15026_v16 = vcombine.low %v4701_v23, %v4705_v32 }
 0x451   :  { %12540 = vmatprep.subr.bf16.mxu1 %v14931_v30  ;;  %v4593_v14 = vld [vmem:[%s23239_s3 + $0xe70] sm:$0xff] }
 0x452   :  { %12492 = vmatpush2.bf16.msra.mxu0 %v14786_v3  ;;  %v4693_v62 = vld [vmem:[%s23239_s3 + $0x1190] sm:$0xff]  ;;  %v14915_v61 = vcombine.high %v4589_v0, %v4593_v14  ;;  %v14914_v8 = vcombine.low %v4589_v0, %v4593_v14 }
 0x453   :  { %12493 = vmatprep.subr.bf16.mxu0 %v14779_v46  ;;  %v4697_v31 = vld [vmem:[%s23239_s3 + $0x11b0] sm:$0xff] }
 0x454   :  { %12541 = vmatpush2.bf16.msra.mxu1 %v14930_v45  ;;  %v4581_v2 = vld [vmem:[%s23239_s3 + $0xe10] sm:$0xff]  ;;  %v15019_v55 = vcombine.high %v4693_v62, %v4697_v31  ;;  %v15018_v46 = vcombine.low %v4693_v62, %v4697_v31 }
 0x455   :  { %12542 = vmatprep.subr.bf16.mxu1 %v14923_v7  ;;  %v4585_v50 = vld [vmem:[%s23239_s3 + $0xe30] sm:$0xff] }
 0x456   :  { %12494 = vmatpush2.bf16.msra.mxu0 %v14778_v5  ;;  %v4685_v21 = vld [vmem:[%s23239_s3 + $0x1150] sm:$0xff]  ;;  %v14907_v19 = vcombine.high %v4581_v2, %v4585_v50  ;;  %v14906_v5 = vcombine.low %v4581_v2, %v4585_v50 }
 0x457   :  { %12569 = vmatprep.subr.bf16.mxu0 %v15027_v12  ;;  %v4689_v30 = vld [vmem:[%s23239_s3 + $0x1170] sm:$0xff] }
 0x458   :  { %12543 = vmatpush2.bf16.msra.mxu1 %v14922_v13  ;;  %v4829_v45 = vld [vmem:[%s23239_s3 + $0x15d0] sm:$0xff]  ;;  %v15011_v7 = vcombine.high %v4685_v21, %v4689_v30  ;;  %v15010_v31 = vcombine.low %v4685_v21, %v4689_v30 }
 0x459   :  { %12544 = vmatprep.subr.bf16.mxu1 %v14915_v61  ;;  %v12179_v3 = vpop.f32.mrf.mxu0  ;;  %12496 = vmatmul.mubr.bf16.vlgmr.msra.gmra.mxu0 %v23784_v40  ;;  %v4833_v23 = vld [vmem:[%s23239_s3 + $0x15f0] sm:$0xff] }
 0x45a   :  { %v12180_v48 = vadd.f32 %v12179_v3, %v20867_v57  ;;  %12505 = vmatprep.mubr.bf16.mxu0 %v23785_v25  ;;  %12570 = vmatpush1.bf16.msra.mxu0 %v15026_v16  ;;  %v4677_v57 = vld [vmem:[%s23239_s3 + $0x1110] sm:$0xff]  ;;  %v15155_v13 = vcombine.high %v4829_v45, %v4833_v23  ;;  %v15154_v16 = vcombine.low %v4829_v45, %v4833_v23 }
 0x45b   :  { %v12181_v32 = vpop.f32.mrf.mxu0  ;;  %12571 = vmatprep.subr.bf16.mxu0 %v15019_v55  ;;  %v4681_v14 = vld [vmem:[%s23239_s3 + $0x1130] sm:$0xff] }
 0x45c   :  { %12545 = vmatpush2.bf16.msra.mxu1 %v14914_v8  ;;  %v12182_v0 = vadd.f32 %v12181_v32, %v20877_v54  ;;  %v4821_v61 = vld [vmem:[%s23239_s3 + $0x1590] sm:$0xff]  ;;  %v15003_v50 = vcombine.high %v4677_v57, %v4681_v14 }
 0x45d   :  { %12546 = vmatprep.subr.bf16.mxu1 %v14907_v19  ;;  %v12183_v12 = vpop.f32.mrf.mxu0  ;;  %v4825_v54 = vld [vmem:[%s23239_s3 + $0x15b0] sm:$0xff]  ;;  %v15002_v19 = vcombine.low %v4677_v57, %v4681_v14 }
 0x45e   :  { %v12184_v62 = vadd.f32 %v12183_v12, %v20886_v6  ;;  %12572 = vmatpush1.bf16.msra.mxu0 %v15018_v46  ;;  %v4669_v6 = vld [vmem:[%s23239_s3 + $0x10d0] sm:$0xff]  ;;  %v15147_v30 = vcombine.high %v4821_v61, %v4825_v54 }
 0x45f   :  { %v12185_v2 = vpop.f32.mrf.mxu0  ;;  %12573 = vmatprep.subr.bf16.mxu0 %v15011_v7  ;;  %v4673_v8 = vld [vmem:[%s23239_s3 + $0x10f0] sm:$0xff] }
 0x460   :  { %12547 = vmatpush2.bf16.msra.mxu1 %v14906_v5  ;;  %v12186_v55 = vadd.f32 %v12185_v2, %v20895_v10  ;;  %v4813_v10 = vld [vmem:[%s23239_s3 + $0x1550] sm:$0xff]  ;;  %v14995_v32 = vcombine.high %v4669_v6, %v4673_v8 }
 0x461   :  { %12622 = vmatprep.subr.bf16.mxu1 %v15155_v13  ;;  %v12189_v21 = vpop.f32.mrf.mxu0  ;;  %12506 = vmatmul.mubr.bf16.gmra.mxu0 %v23787_v56  ;;  %v4817_v46 = vld [vmem:[%s23239_s3 + $0x1570] sm:$0xff] }
 0x462   :  { %v12190_v3 = vadd.f32 %v12189_v21, %v20904_v37  ;;  %12574 = vmatpush1.bf16.msra.mxu0 %v15010_v31  ;;  %12601 = vmatprep.mubr.bf16.mxu0 %v23788_v49  ;;  %v15146_v37 = vcombine.low %v4821_v61, %v4825_v54  ;;  %v4661_v57 = vld [vmem:[%s23239_s3 + $0x1090] sm:$0xff]  ;;  %v15139_v31 = vcombine.high %v4813_v10, %v4817_v46 }
 0x463   :  { %v12232_v45 = vpop.f32.mrf.mxu1  ;;  %12549 = vmatmul.mubr.bf16.vlgmr.msra.gmra.mxu1 %v23790_v51  ;;  %v12191_v23 = vpop.f32.mrf.mxu0  ;;  %12575 = vmatprep.subr.bf16.mxu0 %v15003_v50  ;;  %v4665_v14 = vld [vmem:[%s23239_s3 + $0x10b0] sm:$0xff]  ;;  %v14994_v61 = vcombine.low %v4669_v6, %v4673_v8 }
 0x464   :  { %v21091_v7 = vadd.f32 %v12232_v45, %v12180_v48  ;;  %12558 = vmatprep.mubr.bf16.mxu1 %v23791_v60  ;;  %12623 = vmatpush1.bf16.msra.mxu1 %v15154_v16  ;;  %v12192_v5 = vadd.f32 %v12191_v23, %v20913_v59  ;;  %v4805_v59 = vld [vmem:[%s23239_s3 + $0x1510] sm:$0xff]  ;;  %v14987_v21 = vcombine.high %v4661_v57, %v4665_v14 }
 0x465   :  { %v12234_v12 = vpop.f32.mrf.mxu1  ;;  %12624 = vmatprep.subr.bf16.mxu1 %v15147_v30  ;;  %v12193_v13 = vpop.f32.mrf.mxu0  ;;  %v4809_v54 = vld [vmem:[%s23239_s3 + $0x1530] sm:$0xff] }
 0x466   :  { %v21101_v48 = vadd.f32 %v12234_v12, %v12182_v0  ;;  %v12194_v2 = vadd.f32 %v12193_v13, %v20921_v34  ;;  %12576 = vmatpush1.bf16.msra.mxu0 %v15002_v19  ;;  %v15138_v0 = vcombine.low %v4813_v10, %v4817_v46  ;;  %v4653_v6 = vld [vmem:[%s23239_s3 + $0x1050] sm:$0xff]  ;;  %v15131_v45 = vcombine.high %v4805_v59, %v4809_v54 }
 0x467   :  { %v12236_v50 = vpop.f32.mrf.mxu1  ;;  %v12195_v16 = vpop.f32.mrf.mxu0  ;;  %12577 = vmatprep.subr.bf16.mxu0 %v14995_v32  ;;  %v4657_v8 = vld [vmem:[%s23239_s3 + $0x1070] sm:$0xff] }
 0x468   :  { %v21110_v30 = vadd.f32 %v12236_v50, %v12184_v62  ;;  %12625 = vmatpush1.bf16.msra.mxu1 %v15146_v37  ;;  %v12196_v34 = vadd.f32 %v12195_v16, %v20929_v29  ;;  %v14986_v62 = vcombine.low %v4661_v57, %v4665_v14  ;;  %v4797_v10 = vld [vmem:[%s23239_s3 + $0x14d0] sm:$0xff]  ;;  %v14979_v32 = vcombine.high %v4653_v6, %v4657_v8 }
 0x469   :  { %v12238_v19 = vpop.f32.mrf.mxu1  ;;  %12626 = vmatprep.subr.bf16.mxu1 %v15139_v31  ;;  %v4801_v29 = vld [vmem:[%s23239_s3 + $0x14f0] sm:$0xff] }
 0x46a   :  { %v21119_v23 = vadd.f32 %v12238_v19, %v12186_v55  ;;  %12578 = vmatpush1.bf16.msra.mxu0 %v14994_v61  ;;  %v15130_v55 = vcombine.low %v4805_v59, %v4809_v54  ;;  %v4645_v57 = vld [vmem:[%s23239_s3 + $0x1010] sm:$0xff]  ;;  %v15123_v13 = vcombine.high %v4797_v10, %v4801_v29 }
 0x46b   :  { %v12242_v46 = vpop.f32.mrf.mxu1  ;;  %12559 = vmatmul.mubr.bf16.gmra.mxu1 %v23794_v4  ;;  %12579 = vmatprep.subr.bf16.mxu0 %v14987_v21  ;;  %v4649_v14 = vld [vmem:[%s23239_s3 + $0x1030] sm:$0xff]  ;;  %v15122_v21 = vcombine.low %v4797_v10, %v4801_v29 }
 0x46c   :  { %v21128_v37 = vadd.f32 %v12242_v46, %v12190_v3  ;;  %12627 = vmatpush1.bf16.msra.mxu1 %v15138_v0  ;;  %12654 = vmatprep.mubr.bf16.mxu1 %v23795_v52  ;;  %v14978_v3 = vcombine.low %v4653_v6, %v4657_v8  ;;  %v4789_v61 = vld [vmem:[%s23239_s3 + $0x1490] sm:$0xff]  ;;  %v14971_v50 = vcombine.high %v4645_v57, %v4649_v14 }
 0x46d   :  { %v12244_v12 = vpop.f32.mrf.mxu1  ;;  %12628 = vmatprep.subr.bf16.mxu1 %v15131_v45  ;;  %v4793_v59 = vld [vmem:[%s23239_s3 + $0x14b0] sm:$0xff]  ;;  %v14970_v45 = vcombine.low %v4645_v57, %v4649_v14 }
 0x46e   :  { %v21137_v31 = vadd.f32 %v12244_v12, %v12192_v5  ;;  %12580 = vmatpush1.bf16.msra.mxu0 %v14986_v62  ;;  %v4765_v5 = vld [vmem:[%s23239_s3 + $0x13d0] sm:$0xff]  ;;  %v15115_v8 = vcombine.high %v4789_v61, %v4793_v59  ;;  %v15114_v29 = vcombine.low %v4789_v61, %v4793_v59 }
 0x46f   :  { %v12246_v54 = vpop.f32.mrf.mxu1  ;;  %12581 = vmatprep.subr.bf16.mxu0 %v14979_v32  ;;  %v4769_v0 = vld [vmem:[%s23239_s3 + $0x13f0] sm:$0xff] }
 0x470   :  { %v21145_v16 = vadd.f32 %v12246_v54, %v12194_v2  ;;  %12629 = vmatpush1.bf16.msra.mxu1 %v15130_v55  ;;  %v4781_v2 = vld [vmem:[%s23239_s3 + $0x1450] sm:$0xff]  ;;  %v15091_v10 = vcombine.high %v4765_v5, %v4769_v0  ;;  %v15090_v55 = vcombine.low %v4765_v5, %v4769_v0 }
 0x471   :  { %v12248_v6 = vpop.f32.mrf.mxu1  ;;  %12630 = vmatprep.subr.bf16.mxu1 %v15123_v13  ;;  %v4785_v62 = vld [vmem:[%s23239_s3 + $0x1470] sm:$0xff] }
 0x472   :  { %v21153_v19 = vadd.f32 %v12248_v6, %v12196_v34  ;;  %12582 = vmatpush1.bf16.msra.mxu0 %v14978_v3  ;;  %v4757_v46 = vld [vmem:[%s23239_s3 + $0x1390] sm:$0xff]  ;;  %v15107_v32 = vcombine.high %v4781_v2, %v4785_v62  ;;  %v15106_v13 = vcombine.low %v4781_v2, %v4785_v62 }
 0x473   :  { %12583 = vmatprep.subr.bf16.mxu0 %v14971_v50  ;;  %v4761_v34 = vld [vmem:[%s23239_s3 + $0x13b0] sm:$0xff] }
 0x474   :  { %12631 = vmatpush1.bf16.msra.mxu1 %v15122_v21  ;;  %v4773_v57 = vld [vmem:[%s23239_s3 + $0x1410] sm:$0xff]  ;;  %v15083_v12 = vcombine.high %v4757_v46, %v4761_v34  ;;  %v15082_v54 = vcombine.low %v4757_v46, %v4761_v34 }
 0x475   :  { %12632 = vmatprep.subr.bf16.mxu1 %v15115_v8  ;;  %v4777_v14 = vld [vmem:[%s23239_s3 + $0x1430] sm:$0xff] }
 0x476   :  { %12584 = vmatpush1.bf16.msra.mxu0 %v14970_v45  ;;  %v4749_v3 = vld [vmem:[%s23239_s3 + $0x1350] sm:$0xff]  ;;  %v15099_v59 = vcombine.high %v4773_v57, %v4777_v14  ;;  %v15098_v0 = vcombine.low %v4773_v57, %v4777_v14 }
 0x477   :  { %12585 = vmatprep.subr.bf16.mxu0 %v15091_v10  ;;  %v4753_v61 = vld [vmem:[%s23239_s3 + $0x1370] sm:$0xff] }
 0x478   :  { %12633 = vmatpush1.bf16.msra.mxu1 %v15114_v29  ;;  %v4893_v50 = vld [vmem:[%s23239_s3 + $0x17d0] sm:$0xff]  ;;  %v15075_v5 = vcombine.high %v4749_v3, %v4753_v61  ;;  %v15074_v2 = vcombine.low %v4749_v3, %v4753_v61 }
 0x479   :  { %12634 = vmatprep.subr.bf16.mxu1 %v15107_v32  ;;  %v4897_v21 = vld [vmem:[%s23239_s3 + $0x17f0] sm:$0xff] }
 0x47a   :  { %12586 = vmatpush2.bf16.msra.mxu0 %v15090_v55  ;;  %v4741_v6 = vld [vmem:[%s23239_s3 + $0x1310] sm:$0xff]  ;;  %v15219_v45 = vcombine.high %v4893_v50, %v4897_v21  ;;  %v15218_v46 = vcombine.low %v4893_v50, %v4897_v21 }
 0x47b   :  { %12587 = vmatprep.subr.bf16.mxu0 %v15083_v12  ;;  %v4745_v8 = vld [vmem:[%s23239_s3 + $0x1330] sm:$0xff] }
 0x47c   :  { %12635 = vmatpush1.bf16.msra.mxu1 %v15106_v13  ;;  %v4885_v62 = vld [vmem:[%s23239_s3 + $0x1790] sm:$0xff]  ;;  %v15067_v29 = vcombine.high %v4741_v6, %v4745_v8  ;;  %v15066_v57 = vcombine.low %v4741_v6, %v4745_v8 }
 0x47d   :  { %12636 = vmatprep.subr.bf16.mxu1 %v15099_v59  ;;  %v4889_v10 = vld [vmem:[%s23239_s3 + $0x17b0] sm:$0xff] }
 0x47e   :  { %12588 = vmatpush2.bf16.msra.mxu0 %v15082_v54  ;;  %v4733_v34 = vld [vmem:[%s23239_s3 + $0x12d0] sm:$0xff]  ;;  %v15211_v55 = vcombine.high %v4885_v62, %v4889_v10  ;;  %v15210_v3 = vcombine.low %v4885_v62, %v4889_v10 }
 0x47f   :  { %12589 = vmatprep.subr.bf16.mxu0 %v15075_v5  ;;  %v4737_v32 = vld [vmem:[%s23239_s3 + $0x12f0] sm:$0xff] }
 0x480   :  { %12637 = vmatpush1.bf16.msra.mxu1 %v15098_v0  ;;  %v4877_v14 = vld [vmem:[%s23239_s3 + $0x1750] sm:$0xff]  ;;  %v15059_v13 = vcombine.high %v4733_v34, %v4737_v32  ;;  %v15058_v50 = vcombine.low %v4733_v34, %v4737_v32 }
 0x481   :  { %12638 = vmatprep.subr.bf16.mxu1 %v15219_v45  ;;  %v4881_v12 = vld [vmem:[%s23239_s3 + $0x1770] sm:$0xff] }
 0x482   :  { %12590 = vmatpush2.bf16.msra.mxu0 %v15074_v2  ;;  %v4725_v61 = vld [vmem:[%s23239_s3 + $0x1290] sm:$0xff]  ;;  %v15203_v54 = vcombine.high %v4877_v14, %v4881_v12  ;;  %v15202_v6 = vcombine.low %v4877_v14, %v4881_v12 }
 0x483   :  { %12591 = vmatprep.subr.bf16.mxu0 %v15067_v29  ;;  %v4729_v59 = vld [vmem:[%s23239_s3 + $0x12b0] sm:$0xff] }
 0x484   :  { %12639 = vmatpush2.bf16.msra.mxu1 %v15218_v46  ;;  %v4869_v21 = vld [vmem:[%s23239_s3 + $0x1710] sm:$0xff]  ;;  %v15051_v0 = vcombine.high %v4725_v61, %v4729_v59  ;;  %v15050_v62 = vcombine.low %v4725_v61, %v4729_v59 }
 0x485   :  { %12640 = vmatprep.subr.bf16.mxu1 %v15211_v55  ;;  %v4873_v5 = vld [vmem:[%s23239_s3 + $0x1730] sm:$0xff] }
 0x486   :  { %12592 = vmatpush2.bf16.msra.mxu0 %v15066_v57  ;;  %v4717_v8 = vld [vmem:[%s23239_s3 + $0x1250] sm:$0xff]  ;;  %v15195_v2 = vcombine.high %v4869_v21, %v4873_v5  ;;  %v15194_v34 = vcombine.low %v4869_v21, %v4873_v5 }
 0x487   :  { %12593 = vmatprep.subr.bf16.mxu0 %v15059_v13  ;;  %v4721_v45 = vld [vmem:[%s23239_s3 + $0x1270] sm:$0xff] }
 0x488   :  { %12641 = vmatpush2.bf16.msra.mxu1 %v15210_v3  ;;  %v4861_v10 = vld [vmem:[%s23239_s3 + $0x16d0] sm:$0xff]  ;;  %v15043_v46 = vcombine.high %v4717_v8, %v4721_v45  ;;  %v15042_v14 = vcombine.low %v4717_v8, %v4721_v45 }
 0x489   :  { %12642 = vmatprep.subr.bf16.mxu1 %v15203_v54  ;;  %v4865_v29 = vld [vmem:[%s23239_s3 + $0x16f0] sm:$0xff] }
 0x48a   :  { %12594 = vmatpush2.bf16.msra.mxu0 %v15058_v50  ;;  %v4709_v32 = vld [vmem:[%s23239_s3 + $0x1210] sm:$0xff]  ;;  %v15187_v57 = vcombine.high %v4861_v10, %v4865_v29  ;;  %v15186_v61 = vcombine.low %v4861_v10, %v4865_v29 }
 0x48b   :  { %12595 = vmatprep.subr.bf16.mxu0 %v15051_v0  ;;  %v4713_v55 = vld [vmem:[%s23239_s3 + $0x1230] sm:$0xff] }
 0x48c   :  { %12643 = vmatpush2.bf16.msra.mxu1 %v15202_v6  ;;  %v4853_v12 = vld [vmem:[%s23239_s3 + $0x1690] sm:$0xff]  ;;  %v15035_v3 = vcombine.high %v4709_v32, %v4713_v55  ;;  %v15034_v21 = vcombine.low %v4709_v32, %v4713_v55 }
 0x48d   :  { %12644 = vmatprep.subr.bf16.mxu1 %v15195_v2  ;;  %v4857_v13 = vld [vmem:[%s23239_s3 + $0x16b0] sm:$0xff] }
 0x48e   :  { %12596 = vmatpush2.bf16.msra.mxu0 %v15050_v62  ;;  %v4957_v59 = vld [vmem:[%s23239_s3 + $0x19d0] sm:$0xff]  ;;  %v15179_v50 = vcombine.high %v4853_v12, %v4857_v13  ;;  %v15178_v8 = vcombine.low %v4853_v12, %v4857_v13 }
 0x48f   :  { %12597 = vmatprep.subr.bf16.mxu0 %v15043_v46  ;;  %v4961_v54 = vld [vmem:[%s23239_s3 + $0x19f0] sm:$0xff] }
 0x490   :  { %12645 = vmatpush2.bf16.msra.mxu1 %v15194_v34  ;;  %v4845_v5 = vld [vmem:[%s23239_s3 + $0x1650] sm:$0xff]  ;;  %v15283_v6 = vcombine.high %v4957_v59, %v4961_v54  ;;  %v15282_v46 = vcombine.low %v4957_v59, %v4961_v54 }
 0x491   :  { %12646 = vmatprep.subr.bf16.mxu1 %v15187_v57  ;;  %v4849_v0 = vld [vmem:[%s23239_s3 + $0x1670] sm:$0xff] }
 0x492   :  { %12598 = vmatpush2.bf16.msra.mxu0 %v15042_v14  ;;  %v4949_v45 = vld [vmem:[%s23239_s3 + $0x1990] sm:$0xff]  ;;  %v15171_v62 = vcombine.high %v4845_v5, %v4849_v0  ;;  %v15170_v32 = vcombine.low %v4845_v5, %v4849_v0 }
 0x493   :  { %12599 = vmatprep.subr.bf16.mxu0 %v15035_v3  ;;  %v4953_v2 = vld [vmem:[%s23239_s3 + $0x19b0] sm:$0xff] }
 0x494   :  { %12647 = vmatpush2.bf16.msra.mxu1 %v15186_v61  ;;  %v4837_v10 = vld [vmem:[%s23239_s3 + $0x1610] sm:$0xff]  ;;  %v15275_v34 = vcombine.high %v4949_v45, %v4953_v2  ;;  %v15274_v3 = vcombine.low %v4949_v45, %v4953_v2 }
 0x495   :  { %12648 = vmatprep.subr.bf16.mxu1 %v15179_v50  ;;  %v4841_v29 = vld [vmem:[%s23239_s3 + $0x1630] sm:$0xff] }
 0x496   :  { %12600 = vmatpush2.bf16.msra.mxu0 %v15034_v21  ;;  %v4941_v55 = vld [vmem:[%s23239_s3 + $0x1950] sm:$0xff]  ;;  %v15163_v12 = vcombine.high %v4837_v10, %v4841_v29  ;;  %v15162_v21 = vcombine.low %v4837_v10, %v4841_v29 }
 0x497   :  { %12675 = vmatprep.subr.bf16.mxu0 %v15283_v6  ;;  %v4945_v57 = vld [vmem:[%s23239_s3 + $0x1970] sm:$0xff] }
 0x498   :  { %12649 = vmatpush2.bf16.msra.mxu1 %v15178_v8  ;;  %v5085_v61 = vld [vmem:[%s23239_s3 + $0x1dd0] sm:$0xff]  ;;  %v15267_v50 = vcombine.high %v4941_v55, %v4945_v57  ;;  %v15266_v2 = vcombine.low %v4941_v55, %v4945_v57 }
 0x499   :  { %12650 = vmatprep.subr.bf16.mxu1 %v15171_v62  ;;  %v12285_v14 = vpop.f32.mrf.mxu0  ;;  %12602 = vmatmul.mubr.bf16.vlgmr.msra.gmra.mxu0 %v18612_v26  ;;  %v5089_v59 = vld [vmem:[%s23239_s3 + $0x1df0] sm:$0xff] }
 0x49a   :  { %v12286_v13 = vadd.f32 %v12285_v14, %v21091_v7  ;;  %12611 = vmatprep.mubr.bf16.mxu0 %v19055_v43  ;;  %12676 = vmatpush1.bf16.msra.mxu0 %v15282_v46  ;;  %v4933_v7 = vld [vmem:[%s23239_s3 + $0x1910] sm:$0xff]  ;;  %v15411_v8 = vcombine.high %v5085_v61, %v5089_v59  ;;  %v15410_v46 = vcombine.low %v5085_v61, %v5089_v59 }
 0x49b   :  { %v12287_v54 = vpop.f32.mrf.mxu0  ;;  %12677 = vmatprep.subr.bf16.mxu0 %v15275_v34  ;;  %v4937_v0 = vld [vmem:[%s23239_s3 + $0x1930] sm:$0xff]  ;;  %v11507_v61 = vadd.f32 %v19732_v24, %v19689_v58  ;;  %v23806_v24 = vld [vmem:[#allocation54_spill] sm:$0xff] }
 0x49c   :  { %12651 = vmatpush2.bf16.msra.mxu1 %v15170_v32  ;;  %v12288_v5 = vadd.f32 %v12287_v54, %v21101_v48  ;;  %v5077_v62 = vld [vmem:[%s23239_s3 + $0x1d90] sm:$0xff]  ;;  %v15259_v29 = vcombine.high %v4933_v7, %v4937_v0 }
 0x49d   :  { %12652 = vmatprep.subr.bf16.mxu1 %v15163_v12  ;;  %v12289_v6 = vpop.f32.mrf.mxu0  ;;  %v5081_v48 = vld [vmem:[%s23239_s3 + $0x1db0] sm:$0xff]  ;;  %v15258_v12 = vcombine.low %v4933_v7, %v4937_v0 }
 0x49e   :  { %v12290_v45 = vadd.f32 %v12289_v6, %v21110_v30  ;;  %12678 = vmatpush1.bf16.msra.mxu0 %v15274_v3  ;;  %v4925_v30 = vld [vmem:[%s23239_s3 + $0x18d0] sm:$0xff]  ;;  %v15403_v57 = vcombine.high %v5077_v62, %v5081_v48  ;;  %v11560_v6 = vadd.f32 %v23806_v24, %v11507_v61 }
 0x49f   :  { %v12291_v10 = vpop.f32.mrf.mxu0  ;;  %12679 = vmatprep.subr.bf16.mxu0 %v15267_v50  ;;  %v4929_v32 = vld [vmem:[%s23239_s3 + $0x18f0] sm:$0xff] }
 0x4a0   :  { %12653 = vmatpush2.bf16.msra.mxu1 %v15162_v21  ;;  %v12292_v34 = vadd.f32 %v12291_v10, %v21119_v23  ;;  %v5069_v23 = vld [vmem:[%s23239_s3 + $0x1d50] sm:$0xff]  ;;  %v15402_v21 = vcombine.low %v5077_v62, %v5081_v48 }
 0x4a1   :  { %12728 = vmatprep.subr.bf16.mxu1 %v15411_v8  ;;  %v12295_v55 = vpop.f32.mrf.mxu0  ;;  %12612 = vmatmul.mubr.bf16.gmra.mxu0 %v19111_v18  ;;  %v5073_v3 = vld [vmem:[%s23239_s3 + $0x1d70] sm:$0xff] }
 0x4a2   :  { %v12296_v14 = vadd.f32 %v12295_v55, %v21128_v37  ;;  %12680 = vmatpush1.bf16.msra.mxu0 %v15266_v2  ;;  %12707 = vmatprep.mubr.bf16.mxu0 %v19126_v33  ;;  %v15251_v37 = vcombine.high %v4925_v30, %v4929_v32  ;;  %v4917_v0 = vld [vmem:[%s23239_s3 + $0x1890] sm:$0xff]  ;;  %v15395_v62 = vcombine.high %v5069_v23, %v5073_v3 }
 0x4a3   :  { %v12338_v59 = vpop.f32.mrf.mxu1  ;;  %12655 = vmatmul.mubr.bf16.vlgmr.msra.gmra.mxu1 %v18779_v20  ;;  %v12297_v54 = vpop.f32.mrf.mxu0  ;;  %12681 = vmatprep.subr.bf16.mxu0 %v15259_v29  ;;  %v4921_v58 = vld [vmem:[%s23239_s3 + $0x18b0] sm:$0xff]  ;;  %v15250_v29 = vcombine.low %v4925_v30, %v4929_v32  ;;  %v15394_v30 = vcombine.low %v5069_v23, %v5073_v3 }
 0x4a4   :  { %v21317_v50 = vadd.f32 %v12338_v59, %v12286_v13  ;;  %12664 = vmatprep.mubr.bf16.mxu1 %v19135_v9  ;;  %12729 = vmatpush1.bf16.msra.mxu1 %v15410_v46  ;;  %v12298_v7 = vadd.f32 %v12297_v54, %v21137_v31  ;;  %v21330_v13 = vadd.f32 %v20390_v11, %v20206_v47  ;;  %v5061_v46 = vld [vmem:[%s23239_s3 + $0x1d10] sm:$0xff] }
 0x4a5   :  { %v12340_v8 = vpop.f32.mrf.mxu1  ;;  %12730 = vmatprep.subr.bf16.mxu1 %v15403_v57  ;;  %v12299_v2 = vpop.f32.mrf.mxu0  ;;  %v5065_v47 = vld [vmem:[%s23239_s3 + $0x1d30] sm:$0xff]  ;;  %v15243_v59 = vcombine.high %v4917_v0, %v4921_v58 }
 0x4a6   :  { %23805 = vst [vmem:[#allocation66_spill] sm:$0xff] %v21317_v50  ;;  %23807 = vst [vmem:[#allocation85_spill] sm:$0xff] %v21330_v13  ;;  %v21334_v48 = vadd.f32 %v12340_v8, %v12288_v5  ;;  %v12300_v10 = vadd.f32 %v12299_v2, %v21145_v16  ;;  %12682 = vmatpush1.bf16.msra.mxu0 %v15258_v12  ;;  %v23809_v11 = vld [vmem:[#allocation53_spill] sm:$0xff]  ;;  %v23850_v50 = vld [vmem:[#allocation16_spill] sm:$0xff] }
 0x4a7   :  { %v11613_v55 = vadd.f32 %v23809_v11, %v11560_v6  ;;  %v12342_v57 = vpop.f32.mrf.mxu1  ;;  %v12301_v61 = vpop.f32.mrf.mxu0  ;;  %12683 = vmatprep.subr.bf16.mxu0 %v15251_v37  ;;  %v4909_v12 = vld [vmem:[%s23239_s3 + $0x1850] sm:$0xff]  ;;  %v15387_v37 = vcombine.high %v5061_v46, %v5065_v47  ;;  %v23811_v6 = vld [vmem:[#allocation19_spill] sm:$0xff] }
 0x4a8   :  { %23808 = vst [vmem:[#allocation23_spill] sm:$0xff] %v21334_v48  ;;  %v21346_v16 = vadd.f32 %v12342_v57, %v12290_v45  ;;  %12731 = vmatpush1.bf16.msra.mxu1 %v15402_v21  ;;  %v12302_v32 = vadd.f32 %v12301_v61, %v21153_v19  ;;  %v4913_v54 = vld [vmem:[%s23239_s3 + $0x1870] sm:$0xff]  ;;  %v15242_v19 = vcombine.low %v4917_v0, %v4921_v58  ;;  %v23813_v11 = vld [vmem:[#allocation55_spill] sm:$0xff] }
 0x4a9   :  { %v12344_v24 = vpop.f32.mrf.mxu1  ;;  %12732 = vmatprep.subr.bf16.mxu1 %v15395_v62  ;;  %v11666_v8 = vadd.f32 %v23811_v6, %v11613_v55  ;;  %v5053_v23 = vld [vmem:[%s23239_s3 + $0x1cd0] sm:$0xff]  ;;  %v15235_v62 = vcombine.high %v4909_v12, %v4913_v54  ;;  %v23826_v6 = vld [vmem:[#allocation48_spill] sm:$0xff] }
 0x4aa   :  { %23810 = vst [vmem:[#allocation26_spill] sm:$0xff] %v21346_v16  ;;  %v21358_v21 = vadd.f32 %v12344_v24, %v12292_v34  ;;  %12684 = vmatpush1.bf16.msra.mxu0 %v15250_v29  ;;  %v5057_v3 = vld [vmem:[%s23239_s3 + $0x1cf0] sm:$0xff]  ;;  %v15386_v34 = vcombine.low %v5061_v46, %v5065_v47  ;;  %v15234_v46 = vcombine.low %v4909_v12, %v4913_v54 }
 0x4ab   :  { %v12348_v2 = vpop.f32.mrf.mxu1  ;;  %12665 = vmatmul.mubr.bf16.gmra.mxu1 %v19176_v42  ;;  %12685 = vmatprep.subr.bf16.mxu0 %v15243_v59  ;;  %v11719_v55 = vadd.f32 %v23813_v11, %v11666_v8  ;;  %v4901_v0 = vld [vmem:[%s23239_s3 + $0x1810] sm:$0xff]  ;;  %v15379_v61 = vcombine.high %v5053_v23, %v5057_v3  ;;  %v15378_v12 = vcombine.low %v5053_v23, %v5057_v3 }
 0x4ac   :  { %23812 = vst [vmem:[#allocation24_spill] sm:$0xff] %v21358_v21  ;;  %v21368_v57 = vadd.f32 %v12348_v2, %v12296_v14  ;;  %12733 = vmatpush1.bf16.msra.mxu1 %v15394_v30  ;;  %12760 = vmatprep.mubr.bf16.mxu1 %v19180_v1  ;;  %v4905_v58 = vld [vmem:[%s23239_s3 + $0x1830] sm:$0xff] }
 0x4ad   :  { %v12350_v29 = vpop.f32.mrf.mxu1  ;;  %12734 = vmatprep.subr.bf16.mxu1 %v15387_v37  ;;  %v23815_v59 = vld [vmem:[#allocation57_spill] sm:$0xff]  ;;  %v15227_v37 = vcombine.high %v4901_v0, %v4905_v58  ;;  %v15226_v23 = vcombine.low %v4901_v0, %v4905_v58 }
 0x4ae   :  { %23814 = vst [vmem:[#allocation73_spill] sm:$0xff] %v21368_v57  ;;  %v11772_v24 = vadd.f32 %v23815_v59, %v11719_v55  ;;  %v21380_v30 = vadd.f32 %v12350_v29, %v12298_v7  ;;  %12686 = vmatpush1.bf16.msra.mxu0 %v15242_v19  ;;  %v5045_v47 = vld [vmem:[%s23239_s3 + $0x1c90] sm:$0xff] }
 0x4af   :  { %v5049_v8 = vld [vmem:[%s23239_s3 + $0x1cb0] sm:$0xff]  ;;  %v12352_v2 = vpop.f32.mrf.mxu1  ;;  %12687 = vmatprep.subr.bf16.mxu0 %v15235_v62 }
 0x4b0   :  { %23817 = vst [vmem:[#allocation81_spill] sm:$0xff] %v21380_v30  ;;  %v23818_v11 = vld [vmem:[#allocation25_spill] sm:$0xff]  ;;  %v21391_v7 = vadd.f32 %v12352_v2, %v12300_v10  ;;  %12735 = vmatpush1.bf16.msra.mxu1 %v15386_v34  ;;  %v15371_v62 = vcombine.high %v5045_v47, %v5049_v8 }
 0x4b1   :  { %v11825_v55 = vadd.f32 %v23818_v11, %v11772_v24  ;;  %v5021_v54 = vld [vmem:[%s23239_s3 + $0x1bd0] sm:$0xff]  ;;  %v12354_v29 = vpop.f32.mrf.mxu1  ;;  %12736 = vmatprep.subr.bf16.mxu1 %v15379_v61  ;;  %v23830_v11 = vld [vmem:[#allocation52_spill] sm:$0xff] }
 0x4b2   :  { %23820 = vst [vmem:[#allocation27_spill] sm:$0xff] %v21391_v7  ;;  %v5025_v19 = vld [vmem:[%s23239_s3 + $0x1bf0] sm:$0xff]  ;;  %v21404_v2 = vadd.f32 %v12354_v29, %v12302_v32  ;;  %12688 = vmatpush1.bf16.msra.mxu0 %v15234_v46 }
 0x4b3   :  { %v23821_v45 = vld [vmem:[#allocation65_spill] sm:$0xff]  ;;  %12689 = vmatprep.subr.bf16.mxu0 %v15227_v37  ;;  %v15347_v61 = vcombine.high %v5021_v54, %v5025_v19  ;;  %v15346_v46 = vcombine.low %v5021_v54, %v5025_v19 }
 0x4b4   :  { %v21400_v24 = vadd.f32 %v23821_v45, %v11825_v55  ;;  %23824 = vst [vmem:[#allocation62_spill] sm:$0xff] %v21404_v2  ;;  %v5037_v3 = vld [vmem:[%s23239_s3 + $0x1c50] sm:$0xff]  ;;  %12737 = vmatpush1.bf16.msra.mxu1 %v15378_v12  ;;  %v15370_v55 = vcombine.low %v5045_v47, %v5049_v8  ;;  %v23825_v45 = vld [vmem:[#allocation42_spill] sm:$0xff] }
 0x4b5   :  { %v5041_v34 = vld [vmem:[%s23239_s3 + $0x1c70] sm:$0xff]  ;;  %12738 = vmatprep.subr.bf16.mxu1 %v15371_v62  ;;  %v23828_v2 = vld [vmem:[#allocation46_spill] sm:$0xff] }
 0x4b6   :  { %23822 = vst [vmem:[#allocation29_spill] sm:$0xff] %v21400_v24  ;;  %v5013_v32 = vld [vmem:[%s23239_s3 + $0x1b90] sm:$0xff]  ;;  %v15363_v58 = vcombine.high %v5037_v3, %v5041_v34  ;;  %12690 = vmatpush1.bf16.msra.mxu0 %v15226_v23  ;;  %v15362_v12 = vcombine.low %v5037_v3, %v5041_v34  ;;  %v23829_v24 = vld [vmem:[#allocation47_spill] sm:$0xff] }
 0x4b7   :  { %v5017_v0 = vld [vmem:[%s23239_s3 + $0x1bb0] sm:$0xff]  ;;  %12691 = vmatprep.subr.bf16.mxu0 %v15347_v61 }
 0x4b8   :  { %v5029_v37 = vld [vmem:[%s23239_s3 + $0x1c10] sm:$0xff]  ;;  %v15339_v8 = vcombine.high %v5013_v32, %v5017_v0  ;;  %12739 = vmatpush1.bf16.msra.mxu1 %v15370_v55  ;;  %v15338_v62 = vcombine.low %v5013_v32, %v5017_v0 }
 0x4b9   :  { %v5033_v47 = vld [vmem:[%s23239_s3 + $0x1c30] sm:$0xff]  ;;  %12740 = vmatprep.subr.bf16.mxu1 %v15363_v58 }
 0x4ba   :  { %v5005_v29 = vld [vmem:[%s23239_s3 + $0x1b50] sm:$0xff]  ;;  %v15355_v19 = vcombine.high %v5029_v37, %v5033_v47  ;;  %12692 = vmatpush2.bf16.msra.mxu0 %v15346_v46  ;;  %v15354_v61 = vcombine.low %v5029_v37, %v5033_v47 }
 0x4bb   :  { %v5009_v54 = vld [vmem:[%s23239_s3 + $0x1b70] sm:$0xff]  ;;  %12693 = vmatprep.subr.bf16.mxu0 %v15339_v8 }
 0x4bc   :  { %v5149_v23 = vld [vmem:[%s23239_s3 + $0x1fd0] sm:$0xff]  ;;  %v15331_v34 = vcombine.high %v5005_v29, %v5009_v54  ;;  %12741 = vmatpush1.bf16.msra.mxu1 %v15362_v12  ;;  %v15330_v58 = vcombine.low %v5005_v29, %v5009_v54 }
 0x4bd   :  { %v5153_v3 = vld [vmem:[%s23239_s3 + $0x1ff0] sm:$0xff]  ;;  %12742 = vmatprep.subr.bf16.mxu1 %v15355_v19 }
 0x4be   :  { %v4997_v55 = vld [vmem:[%s23239_s3 + $0x1b10] sm:$0xff]  ;;  %v15475_v0 = vcombine.high %v5149_v23, %v5153_v3  ;;  %12694 = vmatpush2.bf16.msra.mxu0 %v15338_v62  ;;  %v15474_v8 = vcombine.low %v5149_v23, %v5153_v3 }
 0x4bf   :  { %v5001_v32 = vld [vmem:[%s23239_s3 + $0x1b30] sm:$0xff]  ;;  %12695 = vmatprep.subr.bf16.mxu0 %v15331_v34 }
 0x4c0   :  { %v5141_v46 = vld [vmem:[%s23239_s3 + $0x1f90] sm:$0xff]  ;;  %v15323_v47 = vcombine.high %v4997_v55, %v5001_v32  ;;  %12743 = vmatpush1.bf16.msra.mxu1 %v15354_v61  ;;  %v15322_v19 = vcombine.low %v4997_v55, %v5001_v32 }
 0x4c1   :  { %v5145_v37 = vld [vmem:[%s23239_s3 + $0x1fb0] sm:$0xff]  ;;  %12744 = vmatprep.subr.bf16.mxu1 %v15475_v0 }
 0x4c2   :  { %v4989_v12 = vld [vmem:[%s23239_s3 + $0x1ad0] sm:$0xff]  ;;  %v15467_v54 = vcombine.high %v5141_v46, %v5145_v37  ;;  %12696 = vmatpush2.bf16.msra.mxu0 %v15330_v58  ;;  %v15466_v34 = vcombine.low %v5141_v46, %v5145_v37 }
 0x4c3   :  { %v4993_v29 = vld [vmem:[%s23239_s3 + $0x1af0] sm:$0xff]  ;;  %12697 = vmatprep.subr.bf16.mxu0 %v15323_v47 }
 0x4c4   :  { %v5133_v62 = vld [vmem:[%s23239_s3 + $0x1f50] sm:$0xff]  ;;  %v15315_v3 = vcombine.high %v4989_v12, %v4993_v29  ;;  %12745 = vmatpush2.bf16.msra.mxu1 %v15474_v8  ;;  %v15314_v0 = vcombine.low %v4989_v12, %v4993_v29 }
 0x4c5   :  { %v5137_v23 = vld [vmem:[%s23239_s3 + $0x1f70] sm:$0xff]  ;;  %12746 = vmatprep.subr.bf16.mxu1 %v15467_v54 }
 0x4c6   :  { %v4981_v61 = vld [vmem:[%s23239_s3 + $0x1a90] sm:$0xff]  ;;  %v15459_v32 = vcombine.high %v5133_v62, %v5137_v23  ;;  %12698 = vmatpush2.bf16.msra.mxu0 %v15322_v19  ;;  %v15458_v47 = vcombine.low %v5133_v62, %v5137_v23 }
 0x4c7   :  { %v4985_v55 = vld [vmem:[%s23239_s3 + $0x1ab0] sm:$0xff]  ;;  %12699 = vmatprep.subr.bf16.mxu0 %v15315_v3 }
 0x4c8   :  { %v5125_v58 = vld [vmem:[%s23239_s3 + $0x1f10] sm:$0xff]  ;;  %v15307_v37 = vcombine.high %v4981_v61, %v4985_v55  ;;  %12747 = vmatpush2.bf16.msra.mxu1 %v15466_v34  ;;  %v15306_v54 = vcombine.low %v4981_v61, %v4985_v55 }
 0x4c9   :  { %v5129_v46 = vld [vmem:[%s23239_s3 + $0x1f30] sm:$0xff]  ;;  %12748 = vmatprep.subr.bf16.mxu1 %v15459_v32 }
 0x4ca   :  { %v4973_v8 = vld [vmem:[%s23239_s3 + $0x1a50] sm:$0xff]  ;;  %v15451_v29 = vcombine.high %v5125_v58, %v5129_v46  ;;  %12700 = vmatpush2.bf16.msra.mxu0 %v15314_v0  ;;  %v15450_v3 = vcombine.low %v5125_v58, %v5129_v46 }
 0x4cb   :  { %v4977_v12 = vld [vmem:[%s23239_s3 + $0x1a70] sm:$0xff]  ;;  %12701 = vmatprep.subr.bf16.mxu0 %v15307_v37 }
 0x4cc   :  { %v5117_v19 = vld [vmem:[%s23239_s3 + $0x1ed0] sm:$0xff]  ;;  %v15299_v23 = vcombine.high %v4973_v8, %v4977_v12  ;;  %12749 = vmatpush2.bf16.msra.mxu1 %v15458_v47  ;;  %v15298_v32 = vcombine.low %v4973_v8, %v4977_v12 }
 0x4cd   :  { %v5121_v62 = vld [vmem:[%s23239_s3 + $0x1ef0] sm:$0xff]  ;;  %12750 = vmatprep.subr.bf16.mxu1 %v15451_v29 }
 0x4ce   :  { %v4965_v34 = vld [vmem:[%s23239_s3 + $0x1a10] sm:$0xff]  ;;  %v15443_v55 = vcombine.high %v5117_v19, %v5121_v62  ;;  %12702 = vmatpush2.bf16.msra.mxu0 %v15306_v54  ;;  %v15442_v37 = vcombine.low %v5117_v19, %v5121_v62 }
 0x4cf   :  { %v4969_v61 = vld [vmem:[%s23239_s3 + $0x1a30] sm:$0xff]  ;;  %12703 = vmatprep.subr.bf16.mxu0 %v15299_v23 }
 0x4d0   :  { %v5109_v0 = vld [vmem:[%s23239_s3 + $0x1e90] sm:$0xff]  ;;  %v15291_v46 = vcombine.high %v4965_v34, %v4969_v61  ;;  %12751 = vmatpush2.bf16.msra.mxu1 %v15450_v3  ;;  %v15290_v29 = vcombine.low %v4965_v34, %v4969_v61 }
 0x4d1   :  { %v5113_v58 = vld [vmem:[%s23239_s3 + $0x1eb0] sm:$0xff]  ;;  %12752 = vmatprep.subr.bf16.mxu1 %v15443_v55 }
 0x4d2   :  { %v5213_v47 = vld [vmem:[%s23239_s3 + $0x21d0] sm:$0xff]  ;;  %v15435_v12 = vcombine.high %v5109_v0, %v5113_v58  ;;  %12704 = vmatpush2.bf16.msra.mxu0 %v15298_v32  ;;  %v15434_v23 = vcombine.low %v5109_v0, %v5113_v58 }
 0x4d3   :  { %v5217_v8 = vld [vmem:[%s23239_s3 + $0x21f0] sm:$0xff]  ;;  %12705 = vmatprep.subr.bf16.mxu0 %v15291_v46 }
 0x4d4   :  { %v5101_v54 = vld [vmem:[%s23239_s3 + $0x1e50] sm:$0xff]  ;;  %v15539_v62 = vcombine.high %v5213_v47, %v5217_v8  ;;  %12753 = vmatpush2.bf16.msra.mxu1 %v15442_v37  ;;  %v15538_v0 = vcombine.low %v5213_v47, %v5217_v8  ;;  %v4190_v8 = vld [vmem:[%s23239_s3 + $0x1d8] sm:$0xff] }
 0x4d5   :  { %v5105_v19 = vld [vmem:[%s23239_s3 + $0x1e70] sm:$0xff]  ;;  %12754 = vmatprep.subr.bf16.mxu1 %v15435_v12 }
 0x4d6   :  { %v5205_v3 = vld [vmem:[%s23239_s3 + $0x2190] sm:$0xff]  ;;  %v15427_v61 = vcombine.high %v5101_v54, %v5105_v19  ;;  %12706 = vmatpush2.bf16.msra.mxu0 %v15290_v29  ;;  %v15426_v46 = vcombine.low %v5101_v54, %v5105_v19  ;;  %v4194_v54 = vld [vmem:[%s23239_s3 + $0x1f8] sm:$0xff] }
 0x4d7   :  { %v5209_v34 = vld [vmem:[%s23239_s3 + $0x21b0] sm:$0xff]  ;;  %12781 = vmatprep.subr.bf16.mxu0 %v15539_v62 }
 0x4d8   :  { %v5093_v55 = vld [vmem:[%s23239_s3 + $0x1e10] sm:$0xff]  ;;  %v15531_v58 = vcombine.high %v5205_v3, %v5209_v34  ;;  %12755 = vmatpush2.bf16.msra.mxu1 %v15434_v23  ;;  %v15530_v47 = vcombine.low %v5205_v3, %v5209_v34 }
 0x4d9   :  { %v5097_v32 = vld [vmem:[%s23239_s3 + $0x1e30] sm:$0xff]  ;;  %12756 = vmatprep.subr.bf16.mxu1 %v15427_v61  ;;  %v12391_v29 = vpop.f32.mrf.mxu0  ;;  %12708 = vmatmul.mubr.bf16.vlgmr.msra.gmra.mxu0 %v23825_v45 }
 0x4da   :  { %v5197_v37 = vld [vmem:[%s23239_s3 + $0x2150] sm:$0xff]  ;;  %v15419_v10 = vcombine.high %v5093_v55, %v5097_v32  ;;  %12717 = vmatprep.mubr.bf16.mxu0 %v23826_v6  ;;  %12782 = vmatpush1.bf16.msra.mxu0 %v15538_v0  ;;  %v15418_v23 = vcombine.low %v5093_v55, %v5097_v32  ;;  %v14517_v0 = vcombine.high %v4190_v8, %v4194_v54  ;;  %v4186_v55 = vld [vmem:[%s23239_s3 + $0x1b8] sm:$0xff] }
 0x4db   :  { %v5201_v12 = vld [vmem:[%s23239_s3 + $0x2170] sm:$0xff]  ;;  %v12393_v19 = vpop.f32.mrf.mxu0  ;;  %12783 = vmatprep.subr.bf16.mxu0 %v15531_v58  ;;  %v4182_v58 = vld [vmem:[%s23239_s3 + $0x198] sm:$0xff] }
 0x4dc   :  { %v15523_v62 = vcombine.high %v5197_v37, %v5201_v12  ;;  %12757 = vmatpush2.bf16.msra.mxu1 %v15426_v46  ;;  %v5189_v61 = vld [vmem:[%s23239_s3 + $0x2110] sm:$0xff]  ;;  %v15522_v5 = vcombine.low %v5197_v37, %v5201_v12  ;;  %v14516_v46 = vcombine.low %v4190_v8, %v4194_v54  ;;  %v14509_v31 = vcombine.high %v4182_v58, %v4186_v55  ;;  %v4174_v8 = vld [vmem:[%s23239_s3 + $0x158] sm:$0xff] }
 0x4dd   :  { %v5193_v3 = vld [vmem:[%s23239_s3 + $0x2130] sm:$0xff]  ;;  %12758 = vmatprep.subr.bf16.mxu1 %v15419_v10  ;;  %v12395_v34 = vpop.f32.mrf.mxu0  ;;  %v4178_v54 = vld [vmem:[%s23239_s3 + $0x178] sm:$0xff] }
 0x4de   :  { %12784 = vmatpush1.bf16.msra.mxu0 %v15530_v47  ;;  %v15515_v32 = vcombine.high %v5189_v61, %v5193_v3  ;;  %v5181_v10 = vld [vmem:[%s23239_s3 + $0x20d0] sm:$0xff]  ;;  %v23827_v47 = vld [vmem:[#allocation12_spill] sm:$0xff]  ;;  %v14501_v57 = vcombine.high %v4174_v8, %v4178_v54 }
 0x4df   :  { %12785 = vmatprep.subr.bf16.mxu0 %v15523_v62  ;;  %v5185_v37 = vld [vmem:[%s23239_s3 + $0x20f0] sm:$0xff]  ;;  %v12397_v12 = vpop.f32.mrf.mxu0  ;;  %v15514_v62 = vcombine.low %v5189_v61, %v5193_v3 }
 0x4e0   :  { %12759 = vmatpush2.bf16.msra.mxu1 %v15418_v23  ;;  %v5173_v61 = vld [vmem:[%s23239_s3 + $0x2090] sm:$0xff] }
 0x4e1   :  { %12834 = vmatprep.subr.bf16.mxu1 %v14517_v0  ;;  %12718 = vmatmul.mubr.bf16.gmra.mxu0 %v23827_v47  ;;  %v15507_v0 = vcombine.high %v5181_v10, %v5185_v37  ;;  %v5177_v3 = vld [vmem:[%s23239_s3 + $0x20b0] sm:$0xff]  ;;  %v12401_v59 = vpop.f32.mrf.mxu0 }
 0x4e2   :  { %12786 = vmatpush1.bf16.msra.mxu0 %v15522_v5  ;;  %12813 = vmatprep.mubr.bf16.mxu0 %v23828_v2  ;;  %v14508_v5 = vcombine.low %v4182_v58, %v4186_v55  ;;  %v4166_v58 = vld [vmem:[%s23239_s3 + $0x118] sm:$0xff] }
 0x4e3   :  { %v12444_v23 = vpop.f32.mrf.mxu1  ;;  %12761 = vmatmul.mubr.bf16.vlgmr.msra.gmra.mxu1 %v23829_v24  ;;  %12787 = vmatprep.subr.bf16.mxu0 %v15515_v32  ;;  %v4170_v55 = vld [vmem:[%s23239_s3 + $0x138] sm:$0xff] }
 0x4e4   :  { %v21563_v7 = vadd.f32 %v12444_v23, %v12391_v29  ;;  %12770 = vmatprep.mubr.bf16.mxu1 %v23830_v11  ;;  %12835 = vmatpush1.bf16.msra.mxu1 %v14516_v46  ;;  %v15506_v29 = vcombine.low %v5181_v10, %v5185_v37  ;;  %v15499_v23 = vcombine.high %v5173_v61, %v5177_v3  ;;  %v12403_v10 = vpop.f32.mrf.mxu0 }
 0x4e5   :  { %v12446_v30 = vpop.f32.mrf.mxu1  ;;  %12836 = vmatprep.subr.bf16.mxu1 %v14509_v31  ;;  %v14500_v31 = vcombine.low %v4174_v8, %v4178_v54  ;;  %v4162_v8 = vld [vmem:[%s23239_s3 + $0xf8] sm:$0xff] }
 0x4e6   :  { %v21572_v32 = vadd.f32 %v12446_v30, %v12393_v19  ;;  %12788 = vmatpush1.bf16.msra.mxu0 %v15514_v62  ;;  %v5165_v30 = vld [vmem:[%s23239_s3 + $0x2050] sm:$0xff]  ;;  %v14493_v62 = vcombine.high %v4166_v58, %v4170_v55 }
 0x4e7   :  { %v12448_v46 = vpop.f32.mrf.mxu1  ;;  %12789 = vmatprep.subr.bf16.mxu0 %v15507_v0  ;;  %v5169_v19 = vld [vmem:[%s23239_s3 + $0x2070] sm:$0xff]  ;;  %v15498_v0 = vcombine.low %v5173_v61, %v5177_v3  ;;  %v12405_v3 = vpop.f32.mrf.mxu0 }
 0x4e8   :  { %v21580_v14 = vadd.f32 %v12448_v46, %v12395_v34  ;;  %12837 = vmatpush1.bf16.msra.mxu1 %v14508_v5  ;;  %v4158_v34 = vld [vmem:[%s23239_s3 + $0xd8] sm:$0xff]  ;;  %v23831_v5 = vld [vmem:[#allocation11_spill] sm:$0xff]  ;;  %v15491_v46 = vcombine.high %v5165_v30, %v5169_v19  ;;  %v5161_v61 = vld [vmem:[%s23239_s3 + $0x2030] sm:$0xff] }
 0x4e9   :  { %v12450_v37 = vpop.f32.mrf.mxu1  ;;  %12838 = vmatprep.subr.bf16.mxu1 %v14501_v57  ;;  %v14492_v57 = vcombine.low %v4166_v58, %v4170_v55  ;;  %v4154_v58 = vld [vmem:[%s23239_s3 + $0xb8] sm:$0xff] }
 0x4ea   :  { %v21588_v16 = vadd.f32 %v12450_v37, %v12397_v12  ;;  %12790 = vmatpush1.bf16.msra.mxu0 %v15506_v29  ;;  %v5157_v12 = vld [vmem:[%s23239_s3 + $0x2010] sm:$0xff]  ;;  %v14485_v37 = vcombine.high %v4158_v34, %v4162_v8 }
 0x4eb   :  { %v12454_v54 = vpop.f32.mrf.mxu1  ;;  %12771 = vmatmul.mubr.bf16.gmra.mxu1 %v23831_v5  ;;  %12791 = vmatprep.subr.bf16.mxu0 %v15499_v23 }
 0x4ec   :  { %v21597_v39 = vadd.f32 %v12454_v54, %v12401_v59  ;;  %12839 = vmatpush1.bf16.msra.mxu1 %v14500_v31  ;;  %12866 = vmatprep.mubr.bf16.mxu1 %v17800_v22  ;;  %v15490_v59 = vcombine.low %v5165_v30, %v5169_v19  ;;  %v4150_v22 = vld [vmem:[%s23239_s3 + $0x98] sm:$0xff]  ;;  %v15483_v31 = vcombine.high %v5157_v12, %v5161_v61  ;;  %v5281_v30 = vld [vmem:[%s23239_s3 + $0x23f0] sm:$0xff]  ;;  %v12407_v19 = vpop.f32.mrf.mxu0 }
 0x4ed   :  { %v12456_v29 = vpop.f32.mrf.mxu1  ;;  %12840 = vmatprep.subr.bf16.mxu1 %v14493_v62  ;;  %v14484_v62 = vcombine.low %v4158_v34, %v4162_v8  ;;  %v4142_v34 = vld [vmem:[%s23239_s3 + $0x58] sm:$0xff] }
 0x4ee   :  { %v21606_v23 = vadd.f32 %v12456_v29, %v12403_v10  ;;  %12792 = vmatpush1.bf16.msra.mxu0 %v15498_v0  ;;  %v5277_v10 = vld [vmem:[%s23239_s3 + $0x23d0] sm:$0xff]  ;;  %v14477_v29 = vcombine.high %v4150_v22, %v4154_v58  ;;  %v4146_v8 = vld [vmem:[%s23239_s3 + $0x78] sm:$0xff] }
 0x4ef   :  { %v12458_v55 = vpop.f32.mrf.mxu1  ;;  %12793 = vmatprep.subr.bf16.mxu0 %v15491_v46  ;;  %v15482_v46 = vcombine.low %v5157_v12, %v5161_v61  ;;  %v5273_v12 = vld [vmem:[%s23239_s3 + $0x23b0] sm:$0xff]  ;;  %v14469_v61 = vcombine.high %v4142_v34, %v4146_v8 }
 0x4f0   :  { %v21614_v54 = vadd.f32 %v12458_v55, %v12405_v3  ;;  %12841 = vmatpush1.bf16.msra.mxu1 %v14492_v57  ;;  %v15603_v57 = vcombine.high %v5277_v10, %v5281_v30  ;;  %v14476_v3 = vcombine.low %v4150_v22, %v4154_v58  ;;  %v4134_v55 = vld [vmem:[%s23239_s3 + $0x18] sm:$0xff] }
 0x4f1   :  { %v12460_v0 = vpop.f32.mrf.mxu1  ;;  %12842 = vmatprep.subr.bf16.mxu1 %v14485_v37  ;;  %v5269_v37 = vld [vmem:[%s23239_s3 + $0x2390] sm:$0xff]  ;;  %v4138_v22 = vld [vmem:[%s23239_s3 + $0x38] sm:$0xff] }
 0x4f2   :  { %v21622_v21 = vadd.f32 %v12460_v0, %v12407_v19  ;;  %12794 = vmatpush1.bf16.msra.mxu0 %v15490_v59  ;;  %v15602_v59 = vcombine.low %v5277_v10, %v5281_v30  ;;  %v15595_v58 = vcombine.high %v5269_v37, %v5273_v12  ;;  %v5265_v10 = vld [vmem:[%s23239_s3 + $0x2370] sm:$0xff]  ;;  %v14461_v30 = vcombine.high %v4134_v55, %v4138_v22  ;;  %v4254_v0 = vld [vmem:[%s23239_s3 + $0x3d8] sm:$0xff] }
 0x4f3   :  { %12795 = vmatprep.subr.bf16.mxu0 %v15483_v31  ;;  %v14468_v31 = vcombine.low %v4142_v34, %v4146_v8  ;;  %v15594_v19 = vcombine.low %v5269_v37, %v5273_v12  ;;  %v14460_v34 = vcombine.low %v4134_v55, %v4138_v22  ;;  %v5253_v8 = vld [vmem:[%s23239_s3 + $0x2310] sm:$0xff]  ;;  %v4246_v12 = vld [vmem:[%s23239_s3 + $0x398] sm:$0xff] }
 0x4f4   :  { %12843 = vmatpush1.bf16.msra.mxu1 %v14484_v62  ;;  %v5261_v62 = vld [vmem:[%s23239_s3 + $0x2350] sm:$0xff] }
 0x4f5   :  { %12844 = vmatprep.subr.bf16.mxu1 %v14477_v29  ;;  %v4258_v29 = vld [vmem:[%s23239_s3 + $0x3f8] sm:$0xff]  ;;  %v15586_v37 = vcombine.low %v5261_v62, %v5265_v10  ;;  %v5245_v22 = vld [vmem:[%s23239_s3 + $0x22d0] sm:$0xff] }
 0x4f6   :  { %12796 = vmatpush1.bf16.msra.mxu0 %v15482_v46  ;;  %v15587_v46 = vcombine.high %v5261_v62, %v5265_v10  ;;  %v14580_v55 = vcombine.low %v4254_v0, %v4258_v29  ;;  %v4238_v10 = vld [vmem:[%s23239_s3 + $0x358] sm:$0xff] }
 0x4f7   :  { %12797 = vmatprep.subr.bf16.mxu0 %v15603_v57  ;;  %v5257_v57 = vld [vmem:[%s23239_s3 + $0x2330] sm:$0xff] }
 0x4f8   :  { %12845 = vmatpush1.bf16.msra.mxu1 %v14476_v3  ;;  %v14581_v3 = vcombine.high %v4254_v0, %v4258_v29  ;;  %v15578_v62 = vcombine.low %v5253_v8, %v5257_v57  ;;  %v5237_v29 = vld [vmem:[%s23239_s3 + $0x2290] sm:$0xff] }
 0x4f9   :  { %12846 = vmatprep.subr.bf16.mxu1 %v14469_v61  ;;  %v4250_v61 = vld [vmem:[%s23239_s3 + $0x3b8] sm:$0xff] }
 0x4fa   :  { %12798 = vmatpush2.bf16.msra.mxu0 %v15602_v59  ;;  %v15579_v59 = vcombine.high %v5253_v8, %v5257_v57  ;;  %v14572_v0 = vcombine.low %v4246_v12, %v4250_v61  ;;  %v4230_v57 = vld [vmem:[%s23239_s3 + $0x318] sm:$0xff] }
 0x4fb   :  { %12799 = vmatprep.subr.bf16.mxu0 %v15595_v58  ;;  %v5249_v58 = vld [vmem:[%s23239_s3 + $0x22f0] sm:$0xff] }
 0x4fc   :  { %12847 = vmatpush1.bf16.msra.mxu1 %v14468_v31  ;;  %v14573_v31 = vcombine.high %v4246_v12, %v4250_v61  ;;  %v15570_v8 = vcombine.low %v5245_v22, %v5249_v58  ;;  %v5229_v61 = vld [vmem:[%s23239_s3 + $0x2250] sm:$0xff] }
 0x4fd   :  { %12848 = vmatprep.subr.bf16.mxu1 %v14461_v30  ;;  %v4242_v30 = vld [vmem:[%s23239_s3 + $0x378] sm:$0xff] }
 0x4fe   :  { %12800 = vmatpush2.bf16.msra.mxu0 %v15594_v19  ;;  %v15571_v19 = vcombine.high %v5245_v22, %v5249_v58  ;;  %v14564_v12 = vcombine.low %v4238_v10, %v4242_v30  ;;  %v4222_v58 = vld [vmem:[%s23239_s3 + $0x2d8] sm:$0xff] }
 0x4ff   :  { %12801 = vmatprep.subr.bf16.mxu0 %v15587_v46  ;;  %v5241_v46 = vld [vmem:[%s23239_s3 + $0x22b0] sm:$0xff] }
 0x500   :  { %12849 = vmatpush1.bf16.msra.mxu1 %v14460_v34  ;;  %v14565_v34 = vcombine.high %v4238_v10, %v4242_v30  ;;  %v15562_v22 = vcombine.low %v5237_v29, %v5241_v46  ;;  %v5221_v30 = vld [vmem:[%s23239_s3 + $0x2210] sm:$0xff] }
 0x501   :  { %12850 = vmatprep.subr.bf16.mxu1 %v14581_v3  ;;  %v4234_v3 = vld [vmem:[%s23239_s3 + $0x338] sm:$0xff] }
 0x502   :  { %12802 = vmatpush2.bf16.msra.mxu0 %v15586_v37  ;;  %v15563_v37 = vcombine.high %v5237_v29, %v5241_v46  ;;  %v14556_v10 = vcombine.low %v4230_v57, %v4234_v3  ;;  %v4214_v46 = vld [vmem:[%s23239_s3 + $0x298] sm:$0xff] }
 0x503   :  { %12803 = vmatprep.subr.bf16.mxu0 %v15579_v59  ;;  %v5233_v59 = vld [vmem:[%s23239_s3 + $0x2270] sm:$0xff] }
 0x504   :  { %12851 = vmatpush2.bf16.msra.mxu1 %v14580_v55  ;;  %v14557_v55 = vcombine.high %v4230_v57, %v4234_v3  ;;  %v15554_v29 = vcombine.low %v5229_v61, %v5233_v59  ;;  %v4318_v3 = vld [vmem:[%s23239_s3 + $0x5d8] sm:$0xff] }
 0x505   :  { %12852 = vmatprep.subr.bf16.mxu1 %v14573_v31  ;;  %v4226_v31 = vld [vmem:[%s23239_s3 + $0x2f8] sm:$0xff] }
 0x506   :  { %12804 = vmatpush2.bf16.msra.mxu0 %v15578_v62  ;;  %v15555_v62 = vcombine.high %v5229_v61, %v5233_v59  ;;  %v14548_v57 = vcombine.low %v4222_v58, %v4226_v31  ;;  %v4206_v59 = vld [vmem:[%s23239_s3 + $0x258] sm:$0xff] }
 0x507   :  { %12805 = vmatprep.subr.bf16.mxu0 %v15571_v19  ;;  %v5225_v19 = vld [vmem:[%s23239_s3 + $0x2230] sm:$0xff] }
 0x508   :  { %12853 = vmatpush2.bf16.msra.mxu1 %v14572_v0  ;;  %v14549_v0 = vcombine.high %v4222_v58, %v4226_v31  ;;  %v15546_v61 = vcombine.low %v5221_v30, %v5225_v19  ;;  %v4310_v31 = vld [vmem:[%s23239_s3 + $0x598] sm:$0xff] }
 0x509   :  { %12854 = vmatprep.subr.bf16.mxu1 %v14565_v34  ;;  %v4218_v34 = vld [vmem:[%s23239_s3 + $0x2b8] sm:$0xff] }
 0x50a   :  { %12806 = vmatpush2.bf16.msra.mxu0 %v15570_v8  ;;  %v15547_v8 = vcombine.high %v5221_v30, %v5225_v19  ;;  %v14540_v58 = vcombine.low %v4214_v46, %v4218_v34  ;;  %v4198_v30 = vld [vmem:[%s23239_s3 + $0x218] sm:$0xff] }
 0x50b   :  { %12807 = vmatprep.subr.bf16.mxu0 %v15563_v37  ;;  %v4322_v37 = vld [vmem:[%s23239_s3 + $0x5f8] sm:$0xff] }
 0x50c   :  { %12855 = vmatpush2.bf16.msra.mxu1 %v14564_v12  ;;  %v14541_v12 = vcombine.high %v4214_v46, %v4218_v34  ;;  %v4202_v19 = vld [vmem:[%s23239_s3 + $0x238] sm:$0xff] }
 0x50d   :  { %12856 = vmatprep.subr.bf16.mxu1 %v14557_v55  ;;  %v4210_v55 = vld [vmem:[%s23239_s3 + $0x278] sm:$0xff] }
 0x50e   :  { %12808 = vmatpush2.bf16.msra.mxu0 %v15562_v22  ;;  %v14645_v22 = vcombine.high %v4318_v3, %v4322_v37  ;;  %v14532_v46 = vcombine.low %v4206_v59, %v4210_v55  ;;  %v4302_v34 = vld [vmem:[%s23239_s3 + $0x558] sm:$0xff] }
 0x50f   :  { %12809 = vmatprep.subr.bf16.mxu0 %v15555_v62  ;;  %v4314_v62 = vld [vmem:[%s23239_s3 + $0x5b8] sm:$0xff] }
 0x510   :  { %12857 = vmatpush2.bf16.msra.mxu1 %v14556_v10  ;;  %v14533_v10 = vcombine.high %v4206_v59, %v4210_v55  ;;  %v4446_v59 = vld [vmem:[%s23239_s3 + $0x9d8] sm:$0xff] }
 0x511   :  { %12858 = vmatprep.subr.bf16.mxu1 %v14549_v0  ;;  %v14644_v0 = vcombine.low %v4318_v3, %v4322_v37  ;;  %v23833_v3 = vld [vmem:[#allocation14_spill] sm:$0xff]  ;;  %v14636_v37 = vcombine.low %v4310_v31, %v4314_v62 }
 0x512   :  { %12810 = vmatpush2.bf16.msra.mxu0 %v15554_v29  ;;  %v14637_v29 = vcombine.high %v4310_v31, %v4314_v62  ;;  %v4450_v55 = vld [vmem:[%s23239_s3 + $0x9f8] sm:$0xff] }
 0x513   :  { %12811 = vmatprep.subr.bf16.mxu0 %v15547_v8  ;;  %v4306_v8 = vld [vmem:[%s23239_s3 + $0x578] sm:$0xff] }
 0x514   :  { %12859 = vmatpush2.bf16.msra.mxu1 %v14548_v57  ;;  %v4298_v31 = vld [vmem:[%s23239_s3 + $0x538] sm:$0xff] }
 0x515   :  { %12860 = vmatprep.subr.bf16.mxu1 %v14541_v12  ;;  %v23832_v12 = vld [vmem:[#allocation15_spill] sm:$0xff] }
 0x516   :  { %12812 = vmatpush2.bf16.msra.mxu0 %v15546_v61  ;;  %v14525_v61 = vcombine.high %v4198_v30, %v4202_v19 }
 0x517   :  { %12887 = vmatprep.subr.bf16.mxu0 %v14645_v22 }
 0x518   :  { %12861 = vmatpush2.bf16.msra.mxu1 %v14540_v58  ;;  %v14629_v58 = vcombine.high %v4302_v34, %v4306_v8 }
 0x519   :  { %12862 = vmatprep.subr.bf16.mxu1 %v14533_v10  ;;  %v12497_v57 = vpop.f32.mrf.mxu0  ;;  %12814 = vmatmul.mubr.bf16.vlgmr.msra.gmra.mxu0 %v23832_v12  ;;  %v14524_v10 = vcombine.low %v4198_v30, %v4202_v19  ;;  %v4438_v30 = vld [vmem:[%s23239_s3 + $0x998] sm:$0xff] }
 0x51a   :  { %v12498_v48 = vadd.f32 %v12497_v57, %v21563_v7  ;;  %12823 = vmatprep.mubr.bf16.mxu0 %v23833_v3  ;;  %12888 = vmatpush1.bf16.msra.mxu0 %v14644_v0  ;;  %v4294_v7 = vld [vmem:[%s23239_s3 + $0x518] sm:$0xff]  ;;  %v14773_v0 = vcombine.high %v4446_v59, %v4450_v55 }
 0x51b   :  { %v12499_v22 = vpop.f32.mrf.mxu0  ;;  %12889 = vmatprep.subr.bf16.mxu0 %v14637_v29  ;;  %v14628_v29 = vcombine.low %v4302_v34, %v4306_v8  ;;  %v4290_v34 = vld [vmem:[%s23239_s3 + $0x4f8] sm:$0xff] }
 0x51c   :  { %12863 = vmatpush2.bf16.msra.mxu1 %v14532_v46  ;;  %v12500_v13 = vadd.f32 %v12499_v22, %v21572_v32  ;;  %v4442_v32 = vld [vmem:[%s23239_s3 + $0x9b8] sm:$0xff]  ;;  %v14621_v46 = vcombine.high %v4294_v7, %v4298_v31  ;;  %v14772_v22 = vcombine.low %v4446_v59, %v4450_v55  ;;  %v14620_v59 = vcombine.low %v4294_v7, %v4298_v31 }
 0x51d   :  { %12864 = vmatprep.subr.bf16.mxu1 %v14525_v61  ;;  %v12501_v62 = vpop.f32.mrf.mxu0  ;;  %v4434_v55 = vld [vmem:[%s23239_s3 + $0x978] sm:$0xff] }
 0x51e   :  { %v12502_v57 = vadd.f32 %v12501_v62, %v21580_v14  ;;  %12890 = vmatpush1.bf16.msra.mxu0 %v14636_v37  ;;  %v4286_v14 = vld [vmem:[%s23239_s3 + $0x4d8] sm:$0xff]  ;;  %v14765_v37 = vcombine.high %v4438_v30, %v4442_v32 }
 0x51f   :  { %v12503_v19 = vpop.f32.mrf.mxu0  ;;  %12891 = vmatprep.subr.bf16.mxu0 %v14629_v58  ;;  %v4278_v7 = vld [vmem:[%s23239_s3 + $0x498] sm:$0xff] }
 0x520   :  { %12865 = vmatpush2.bf16.msra.mxu1 %v14524_v10  ;;  %v12504_v61 = vadd.f32 %v12503_v19, %v21588_v16  ;;  %v4430_v16 = vld [vmem:[%s23239_s3 + $0x958] sm:$0xff] }
 0x521   :  { %12940 = vmatprep.subr.bf16.mxu1 %v14773_v0  ;;  %v12507_v8 = vpop.f32.mrf.mxu0  ;;  %12824 = vmatmul.mubr.bf16.gmra.mxu0 %v19724_v53  ;;  %v14613_v0 = vcombine.high %v4286_v14, %v4290_v34  ;;  %v4282_v31 = vld [vmem:[%s23239_s3 + $0x4b8] sm:$0xff] }
 0x522   :  { %v12508_v58 = vadd.f32 %v12507_v8, %v21597_v39  ;;  %12892 = vmatpush1.bf16.msra.mxu0 %v14628_v29  ;;  %12919 = vmatprep.mubr.bf16.mxu0 %v17849_v17  ;;  %v14764_v17 = vcombine.low %v4438_v30, %v4442_v32  ;;  %v14612_v30 = vcombine.low %v4286_v14, %v4290_v34  ;;  %v4426_v32 = vld [vmem:[%s23239_s3 + $0x938] sm:$0xff] }
 0x523   :  { %v12550_v10 = vpop.f32.mrf.mxu1  ;;  %12867 = vmatmul.mubr.bf16.vlgmr.msra.gmra.mxu1 %v23772_v35  ;;  %v12509_v62 = vpop.f32.mrf.mxu0  ;;  %12893 = vmatprep.subr.bf16.mxu0 %v14621_v46  ;;  %v14757_v46 = vcombine.high %v4430_v16, %v4434_v55  ;;  %v4270_v14 = vld [vmem:[%s23239_s3 + $0x458] sm:$0xff] }
 0x524   :  { %v21784_v19 = vadd.f32 %v12550_v10, %v12498_v48  ;;  %12876 = vmatprep.mubr.bf16.mxu1 %v23773_v36  ;;  %12941 = vmatpush1.bf16.msra.mxu1 %v14772_v22  ;;  %v12510_v39 = vadd.f32 %v12509_v62, %v21606_v23  ;;  %v4422_v23 = vld [vmem:[%s23239_s3 + $0x918] sm:$0xff] }
 0x525   :  { %v12552_v35 = vpop.f32.mrf.mxu1  ;;  %12942 = vmatprep.subr.bf16.mxu1 %v14765_v37  ;;  %v12511_v29 = vpop.f32.mrf.mxu0  ;;  %v14605_v37 = vcombine.high %v4278_v7, %v4282_v31  ;;  %v4274_v34 = vld [vmem:[%s23239_s3 + $0x478] sm:$0xff]  ;;  %v14749_v62 = vcombine.high %v4422_v23, %v4426_v32 }
 0x526   :  { %v21794_v48 = vadd.f32 %v12552_v35, %v12500_v13  ;;  %v12512_v36 = vadd.f32 %v12511_v29, %v21614_v54  ;;  %12894 = vmatpush1.bf16.msra.mxu0 %v14620_v59  ;;  %v14756_v13 = vcombine.low %v4430_v16, %v4434_v55  ;;  %v4414_v16 = vld [vmem:[%s23239_s3 + $0x8d8] sm:$0xff] }
 0x527   :  { %v12554_v22 = vpop.f32.mrf.mxu1  ;;  %v12513_v8 = vpop.f32.mrf.mxu0  ;;  %12895 = vmatprep.subr.bf16.mxu0 %v14613_v0  ;;  %v14597_v0 = vcombine.high %v4270_v14, %v4274_v34 }
 0x528   :  { %v21803_v10 = vadd.f32 %v12554_v22, %v12502_v57  ;;  %12943 = vmatpush1.bf16.msra.mxu1 %v14764_v17  ;;  %v12514_v54 = vadd.f32 %v12513_v8, %v21622_v21  ;;  %v14604_v57 = vcombine.low %v4278_v7, %v4282_v31  ;;  %v4418_v21 = vld [vmem:[%s23239_s3 + $0x8f8] sm:$0xff] }
 0x529   :  { %v12556_v59 = vpop.f32.mrf.mxu1  ;;  %12944 = vmatprep.subr.bf16.mxu1 %v14757_v46  ;;  %v4262_v7 = vld [vmem:[%s23239_s3 + $0x418] sm:$0xff]  ;;  %v14741_v46 = vcombine.high %v4414_v16, %v4418_v21  ;;  %v14740_v8 = vcombine.low %v4414_v16, %v4418_v21 }
 0x52a   :  { %v21812_v35 = vadd.f32 %v12556_v59, %v12504_v61  ;;  %12896 = vmatpush1.bf16.msra.mxu0 %v14612_v30  ;;  %v14748_v61 = vcombine.low %v4422_v23, %v4426_v32  ;;  %v4266_v31 = vld [vmem:[%s23239_s3 + $0x438] sm:$0xff] }
 0x52b   :  { %v12560_v55 = vpop.f32.mrf.mxu1  ;;  %12877 = vmatmul.mubr.bf16.gmra.mxu1 %v23775_v63  ;;  %12897 = vmatprep.subr.bf16.mxu0 %v14605_v37  ;;  %v4410_v30 = vld [vmem:[%s23239_s3 + $0x8b8] sm:$0xff]  ;;  %v14589_v32 = vcombine.high %v4262_v7, %v4266_v31  ;;  %v14588_v59 = vcombine.low %v4262_v7, %v4266_v31 }
 0x52c   :  { %v21821_v17 = vadd.f32 %v12560_v55, %v12508_v58  ;;  %12945 = vmatpush1.bf16.msra.mxu1 %v14756_v13  ;;  %12972 = vmatprep.mubr.bf16.mxu1 %v23776_v27  ;;  %v14596_v58 = vcombine.low %v4270_v14, %v4274_v34  ;;  %v4406_v27 = vld [vmem:[%s23239_s3 + $0x898] sm:$0xff] }
 0x52d   :  { %v12562_v29 = vpop.f32.mrf.mxu1  ;;  %12946 = vmatprep.subr.bf16.mxu1 %v14749_v62  ;;  %v4386_v37 = vld [vmem:[%s23239_s3 + $0x7f8] sm:$0xff]  ;;  %v14733_v14 = vcombine.high %v4406_v27, %v4410_v30  ;;  %v14732_v16 = vcombine.low %v4406_v27, %v4410_v30 }
 0x52e   :  { %v21830_v63 = vadd.f32 %v12562_v29, %v12510_v39  ;;  %12898 = vmatpush1.bf16.msra.mxu0 %v14604_v57  ;;  %v4382_v39 = vld [vmem:[%s23239_s3 + $0x7d8] sm:$0xff] }
 0x52f   :  { %v12564_v23 = vpop.f32.mrf.mxu1  ;;  %12899 = vmatprep.subr.bf16.mxu0 %v14597_v0  ;;  %v4402_v62 = vld [vmem:[%s23239_s3 + $0x878] sm:$0xff]  ;;  %v14709_v57 = vcombine.high %v4382_v39, %v4386_v37  ;;  %v14708_v0 = vcombine.low %v4382_v39, %v4386_v37 }
 0x530   :  { %v21838_v22 = vadd.f32 %v12564_v23, %v12512_v36  ;;  %12947 = vmatpush1.bf16.msra.mxu1 %v14748_v61  ;;  %v4398_v36 = vld [vmem:[%s23239_s3 + $0x858] sm:$0xff] }
 0x531   :  { %v12566_v13 = vpop.f32.mrf.mxu1  ;;  %12948 = vmatprep.subr.bf16.mxu1 %v14741_v46  ;;  %v4374_v21 = vld [vmem:[%s23239_s3 + $0x798] sm:$0xff]  ;;  %v14725_v55 = vcombine.high %v4398_v36, %v4402_v62  ;;  %v14724_v29 = vcombine.low %v4398_v36, %v4402_v62 }
 0x532   :  { %v21846_v34 = vadd.f32 %v12566_v13, %v12514_v54  ;;  %12900 = vmatpush1.bf16.msra.mxu0 %v14596_v58  ;;  %v4378_v54 = vld [vmem:[%s23239_s3 + $0x7b8] sm:$0xff] }
 0x533   :  { %12901 = vmatprep.subr.bf16.mxu0 %v14589_v32  ;;  %v4390_v61 = vld [vmem:[%s23239_s3 + $0x818] sm:$0xff]  ;;  %v14701_v31 = vcombine.high %v4374_v21, %v4378_v54  ;;  %v14700_v30 = vcombine.low %v4374_v21, %v4378_v54 }
 0x534   :  { %12949 = vmatpush1.bf16.msra.mxu1 %v14740_v8  ;;  %v4394_v7 = vld [vmem:[%s23239_s3 + $0x838] sm:$0xff] }
 0x535   :  { %12950 = vmatprep.subr.bf16.mxu1 %v14733_v14  ;;  %v4366_v46 = vld [vmem:[%s23239_s3 + $0x758] sm:$0xff]  ;;  %v14717_v27 = vcombine.high %v4390_v61, %v4394_v7  ;;  %v14716_v39 = vcombine.low %v4390_v61, %v4394_v7 }
 0x536   :  { %12902 = vmatpush1.bf16.msra.mxu0 %v14588_v59  ;;  %v4370_v58 = vld [vmem:[%s23239_s3 + $0x778] sm:$0xff] }
 0x537   :  { %12903 = vmatprep.subr.bf16.mxu0 %v14709_v57  ;;  %v4510_v23 = vld [vmem:[%s23239_s3 + $0xbd8] sm:$0xff]  ;;  %v14693_v8 = vcombine.high %v4366_v46, %v4370_v58  ;;  %v14692_v59 = vcombine.low %v4366_v46, %v4370_v58 }
 0x538   :  { %12951 = vmatpush1.bf16.msra.mxu1 %v14732_v16  ;;  %v4514_v32 = vld [vmem:[%s23239_s3 + $0xbf8] sm:$0xff] }
 0x539   :  { %12952 = vmatprep.subr.bf16.mxu1 %v14725_v55  ;;  %v4358_v37 = vld [vmem:[%s23239_s3 + $0x718] sm:$0xff]  ;;  %v14837_v14 = vcombine.high %v4510_v23, %v4514_v32  ;;  %v14836_v16 = vcombine.low %v4510_v23, %v4514_v32 }
 0x53a   :  { %12904 = vmatpush2.bf16.msra.mxu0 %v14708_v0  ;;  %v4362_v13 = vld [vmem:[%s23239_s3 + $0x738] sm:$0xff] }
 0x53b   :  { %12905 = vmatprep.subr.bf16.mxu0 %v14701_v31  ;;  %v4502_v36 = vld [vmem:[%s23239_s3 + $0xb98] sm:$0xff]  ;;  %v14685_v57 = vcombine.high %v4358_v37, %v4362_v13  ;;  %v14684_v0 = vcombine.low %v4358_v37, %v4362_v13 }
 0x53c   :  { %12953 = vmatpush1.bf16.msra.mxu1 %v14724_v29  ;;  %v4506_v62 = vld [vmem:[%s23239_s3 + $0xbb8] sm:$0xff] }
 0x53d   :  { %12954 = vmatprep.subr.bf16.mxu1 %v14717_v27  ;;  %v4350_v21 = vld [vmem:[%s23239_s3 + $0x6d8] sm:$0xff]  ;;  %v14829_v55 = vcombine.high %v4502_v36, %v4506_v62  ;;  %v14828_v29 = vcombine.low %v4502_v36, %v4506_v62 }
 0x53e   :  { %12906 = vmatpush2.bf16.msra.mxu0 %v14700_v30  ;;  %v4354_v54 = vld [vmem:[%s23239_s3 + $0x6f8] sm:$0xff] }
 0x53f   :  { %12907 = vmatprep.subr.bf16.mxu0 %v14693_v8  ;;  %v4494_v61 = vld [vmem:[%s23239_s3 + $0xb58] sm:$0xff]  ;;  %v14677_v31 = vcombine.high %v4350_v21, %v4354_v54  ;;  %v14676_v30 = vcombine.low %v4350_v21, %v4354_v54 }
 0x540   :  { %12955 = vmatpush1.bf16.msra.mxu1 %v14716_v39  ;;  %v4498_v7 = vld [vmem:[%s23239_s3 + $0xb78] sm:$0xff] }
 0x541   :  { %12956 = vmatprep.subr.bf16.mxu1 %v14837_v14  ;;  %v4342_v46 = vld [vmem:[%s23239_s3 + $0x698] sm:$0xff]  ;;  %v14821_v27 = vcombine.high %v4494_v61, %v4498_v7  ;;  %v14820_v39 = vcombine.low %v4494_v61, %v4498_v7 }
 0x542   :  { %12908 = vmatpush2.bf16.msra.mxu0 %v14692_v59  ;;  %v4346_v58 = vld [vmem:[%s23239_s3 + $0x6b8] sm:$0xff] }
 0x543   :  { %12909 = vmatprep.subr.bf16.mxu0 %v14685_v57  ;;  %v4486_v23 = vld [vmem:[%s23239_s3 + $0xb18] sm:$0xff]  ;;  %v14669_v8 = vcombine.high %v4342_v46, %v4346_v58  ;;  %v14668_v59 = vcombine.low %v4342_v46, %v4346_v58 }
 0x544   :  { %12957 = vmatpush2.bf16.msra.mxu1 %v14836_v16  ;;  %v4490_v32 = vld [vmem:[%s23239_s3 + $0xb38] sm:$0xff] }
 0x545   :  { %12958 = vmatprep.subr.bf16.mxu1 %v14829_v55  ;;  %v4334_v37 = vld [vmem:[%s23239_s3 + $0x658] sm:$0xff]  ;;  %v14813_v14 = vcombine.high %v4486_v23, %v4490_v32  ;;  %v14812_v16 = vcombine.low %v4486_v23, %v4490_v32 }
 0x546   :  { %12910 = vmatpush2.bf16.msra.mxu0 %v14684_v0  ;;  %v4338_v13 = vld [vmem:[%s23239_s3 + $0x678] sm:$0xff] }
 0x547   :  { %12911 = vmatprep.subr.bf16.mxu0 %v14677_v31  ;;  %v4478_v36 = vld [vmem:[%s23239_s3 + $0xad8] sm:$0xff]  ;;  %v14661_v57 = vcombine.high %v4334_v37, %v4338_v13  ;;  %v14660_v0 = vcombine.low %v4334_v37, %v4338_v13 }
 0x548   :  { %12959 = vmatpush2.bf16.msra.mxu1 %v14828_v29  ;;  %v4482_v62 = vld [vmem:[%s23239_s3 + $0xaf8] sm:$0xff] }
 0x549   :  { %12960 = vmatprep.subr.bf16.mxu1 %v14821_v27  ;;  %v4326_v21 = vld [vmem:[%s23239_s3 + $0x618] sm:$0xff]  ;;  %v14805_v55 = vcombine.high %v4478_v36, %v4482_v62  ;;  %v14804_v29 = vcombine.low %v4478_v36, %v4482_v62 }
 0x54a   :  { %12912 = vmatpush2.bf16.msra.mxu0 %v14676_v30  ;;  %v4330_v54 = vld [vmem:[%s23239_s3 + $0x638] sm:$0xff] }
 0x54b   :  { %12913 = vmatprep.subr.bf16.mxu0 %v14669_v8  ;;  %v4470_v61 = vld [vmem:[%s23239_s3 + $0xa98] sm:$0xff]  ;;  %v14653_v31 = vcombine.high %v4326_v21, %v4330_v54  ;;  %v14652_v30 = vcombine.low %v4326_v21, %v4330_v54 }
 0x54c   :  { %12961 = vmatpush2.bf16.msra.mxu1 %v14820_v39  ;;  %v4474_v7 = vld [vmem:[%s23239_s3 + $0xab8] sm:$0xff] }
 0x54d   :  { %12962 = vmatprep.subr.bf16.mxu1 %v14813_v14  ;;  %v4574_v46 = vld [vmem:[%s23239_s3 + $0xdd8] sm:$0xff]  ;;  %v14797_v27 = vcombine.high %v4470_v61, %v4474_v7  ;;  %v14796_v39 = vcombine.low %v4470_v61, %v4474_v7 }
 0x54e   :  { %12914 = vmatpush2.bf16.msra.mxu0 %v14668_v59  ;;  %v4578_v58 = vld [vmem:[%s23239_s3 + $0xdf8] sm:$0xff] }
 0x54f   :  { %12915 = vmatprep.subr.bf16.mxu0 %v14661_v57  ;;  %v4462_v23 = vld [vmem:[%s23239_s3 + $0xa58] sm:$0xff]  ;;  %v14901_v8 = vcombine.high %v4574_v46, %v4578_v58  ;;  %v14900_v62 = vcombine.low %v4574_v46, %v4578_v58 }
 0x550   :  { %12963 = vmatpush2.bf16.msra.mxu1 %v14812_v16  ;;  %v4466_v32 = vld [vmem:[%s23239_s3 + $0xa78] sm:$0xff] }
 0x551   :  { %12964 = vmatprep.subr.bf16.mxu1 %v14805_v55  ;;  %v4566_v37 = vld [vmem:[%s23239_s3 + $0xd98] sm:$0xff]  ;;  %v14789_v14 = vcombine.high %v4462_v23, %v4466_v32  ;;  %v14788_v16 = vcombine.low %v4462_v23, %v4466_v32 }
 0x552   :  { %12916 = vmatpush2.bf16.msra.mxu0 %v14660_v0  ;;  %v4570_v13 = vld [vmem:[%s23239_s3 + $0xdb8] sm:$0xff] }
 0x553   :  { %12917 = vmatprep.subr.bf16.mxu0 %v14653_v31  ;;  %v4454_v59 = vld [vmem:[%s23239_s3 + $0xa18] sm:$0xff]  ;;  %v14893_v57 = vcombine.high %v4566_v37, %v4570_v13  ;;  %v14892_v7 = vcombine.low %v4566_v37, %v4570_v13 }
 0x554   :  { %12965 = vmatpush2.bf16.msra.mxu1 %v14804_v29  ;;  %v4458_v36 = vld [vmem:[%s23239_s3 + $0xa38] sm:$0xff] }
 0x555   :  { %12966 = vmatprep.subr.bf16.mxu1 %v14797_v27  ;;  %v4558_v21 = vld [vmem:[%s23239_s3 + $0xd58] sm:$0xff]  ;;  %v14781_v0 = vcombine.high %v4454_v59, %v4458_v36 }
 0x556   :  { %12918 = vmatpush2.bf16.msra.mxu0 %v14652_v30  ;;  %v4562_v54 = vld [vmem:[%s23239_s3 + $0xd78] sm:$0xff] }
 0x557   :  { %12993 = vmatprep.subr.bf16.mxu0 %v14901_v8  ;;  %v4702_v31 = vld [vmem:[%s23239_s3 + $0x11d8] sm:$0xff]  ;;  %v14885_v58 = vcombine.high %v4558_v21, %v4562_v54  ;;  %v14884_v8 = vcombine.low %v4558_v21, %v4562_v54 }
 0x558   :  { %12967 = vmatpush2.bf16.msra.mxu1 %v14796_v39  ;;  %v4706_v29 = vld [vmem:[%s23239_s3 + $0x11f8] sm:$0xff] }
 0x559   :  { %12968 = vmatprep.subr.bf16.mxu1 %v14789_v14  ;;  %v12603_v55 = vpop.f32.mrf.mxu0  ;;  %12920 = vmatmul.mubr.bf16.vlgmr.msra.gmra.mxu0 %v23778_v41  ;;  %v14780_v41 = vcombine.low %v4454_v59, %v4458_v36  ;;  %v15029_v23 = vcombine.high %v4702_v31, %v4706_v29  ;;  %v4694_v39 = vld [vmem:[%s23239_s3 + $0x1198] sm:$0xff]  ;;  %v15028_v14 = vcombine.low %v4702_v31, %v4706_v29 }
 0x55a   :  { %v12604_v61 = vadd.f32 %v12603_v55, %v21784_v19  ;;  %12929 = vmatprep.mubr.bf16.mxu0 %v23779_v15  ;;  %12994 = vmatpush1.bf16.msra.mxu0 %v14900_v62  ;;  %v4550_v15 = vld [vmem:[%s23239_s3 + $0xd18] sm:$0xff] }
 0x55b   :  { %v12605_v46 = vpop.f32.mrf.mxu0  ;;  %12995 = vmatprep.subr.bf16.mxu0 %v14893_v57  ;;  %v4554_v19 = vld [vmem:[%s23239_s3 + $0xd38] sm:$0xff] }
 0x55c   :  { %12969 = vmatpush2.bf16.msra.mxu1 %v14788_v16  ;;  %v12606_v27 = vadd.f32 %v12605_v46, %v21794_v48  ;;  %v4698_v48 = vld [vmem:[%s23239_s3 + $0x11b8] sm:$0xff]  ;;  %v14877_v13 = vcombine.high %v4550_v15, %v4554_v19  ;;  %v14876_v21 = vcombine.low %v4550_v15, %v4554_v19 }
 0x55d   :  { %12970 = vmatprep.subr.bf16.mxu1 %v14781_v0  ;;  %v12607_v30 = vpop.f32.mrf.mxu0  ;;  %v4546_v36 = vld [vmem:[%s23239_s3 + $0xcf8] sm:$0xff]  ;;  %v15021_v57 = vcombine.high %v4694_v39, %v4698_v48 }
 0x55e   :  { %v12608_v32 = vadd.f32 %v12607_v30, %v21803_v10  ;;  %12996 = vmatpush1.bf16.msra.mxu0 %v14892_v7  ;;  %v4542_v10 = vld [vmem:[%s23239_s3 + $0xcd8] sm:$0xff] }
 0x55f   :  { %v12609_v37 = vpop.f32.mrf.mxu0  ;;  %12997 = vmatprep.subr.bf16.mxu0 %v14885_v58  ;;  %v4690_v54 = vld [vmem:[%s23239_s3 + $0x1178] sm:$0xff] }
 0x560   :  { %12971 = vmatpush2.bf16.msra.mxu1 %v14780_v41  ;;  %v12610_v59 = vadd.f32 %v12609_v37, %v21812_v35  ;;  %v4686_v35 = vld [vmem:[%s23239_s3 + $0x1158] sm:$0xff]  ;;  %v14868_v41 = vcombine.low %v4542_v10, %v4546_v36 }
 0x561   :  { %13046 = vmatprep.subr.bf16.mxu1 %v15029_v23  ;;  %v12613_v62 = vpop.f32.mrf.mxu0  ;;  %12930 = vmatmul.mubr.bf16.gmra.mxu0 %v23782_v38  ;;  %v14869_v38 = vcombine.high %v4542_v10, %v4546_v36  ;;  %v4534_v31 = vld [vmem:[%s23239_s3 + $0xc98] sm:$0xff]  ;;  %v15013_v58 = vcombine.high %v4686_v35, %v4690_v54 }
 0x562   :  { %v12614_v16 = vadd.f32 %v12613_v62, %v21821_v17  ;;  %12998 = vmatpush1.bf16.msra.mxu0 %v14884_v8  ;;  %13025 = vmatprep.mubr.bf16.mxu0 %v23783_v44  ;;  %v15020_v44 = vcombine.low %v4694_v39, %v4698_v48  ;;  %v4538_v29 = vld [vmem:[%s23239_s3 + $0xcb8] sm:$0xff] }
 0x563   :  { %v12656_v55 = vpop.f32.mrf.mxu1  ;;  %12973 = vmatmul.mubr.bf16.vlgmr.msra.gmra.mxu1 %v23784_v40  ;;  %v12615_v0 = vpop.f32.mrf.mxu0  ;;  %12999 = vmatprep.subr.bf16.mxu0 %v14877_v13  ;;  %v4682_v15 = vld [vmem:[%s23239_s3 + $0x1138] sm:$0xff]  ;;  %v14861_v23 = vcombine.high %v4534_v31, %v4538_v29 }
 0x564   :  { %v22008_v7 = vadd.f32 %v12656_v55, %v12604_v61  ;;  %12982 = vmatprep.mubr.bf16.mxu1 %v23785_v25  ;;  %13047 = vmatpush1.bf16.msra.mxu1 %v15028_v14  ;;  %v12616_v17 = vadd.f32 %v12615_v0, %v21830_v63  ;;  %v4678_v63 = vld [vmem:[%s23239_s3 + $0x1118] sm:$0xff] }
 0x565   :  { %v12658_v40 = vpop.f32.mrf.mxu1  ;;  %13048 = vmatprep.subr.bf16.mxu1 %v15021_v57  ;;  %v12617_v46 = vpop.f32.mrf.mxu0  ;;  %v4526_v39 = vld [vmem:[%s23239_s3 + $0xc58] sm:$0xff]  ;;  %v15005_v13 = vcombine.high %v4678_v63, %v4682_v15 }
 0x566   :  { %v22018_v61 = vadd.f32 %v12658_v40, %v12606_v27  ;;  %v12618_v25 = vadd.f32 %v12617_v46, %v21838_v22  ;;  %13000 = vmatpush1.bf16.msra.mxu0 %v14876_v21  ;;  %v15012_v27 = vcombine.low %v4686_v35, %v4690_v54  ;;  %v4530_v48 = vld [vmem:[%s23239_s3 + $0xc78] sm:$0xff] }
 0x567   :  { %v12660_v19 = vpop.f32.mrf.mxu1  ;;  %v12619_v30 = vpop.f32.mrf.mxu0  ;;  %13001 = vmatprep.subr.bf16.mxu0 %v14869_v38  ;;  %v4670_v10 = vld [vmem:[%s23239_s3 + $0x10d8] sm:$0xff]  ;;  %v14853_v62 = vcombine.high %v4526_v39, %v4530_v48 }
 0x568   :  { %v22027_v8 = vadd.f32 %v12660_v19, %v12608_v32  ;;  %13049 = vmatpush1.bf16.msra.mxu1 %v15020_v44  ;;  %v12620_v22 = vadd.f32 %v12619_v30, %v21846_v34  ;;  %v14860_v32 = vcombine.low %v4534_v31, %v4538_v29  ;;  %v4674_v34 = vld [vmem:[%s23239_s3 + $0x10f8] sm:$0xff] }
 0x569   :  { %v12662_v37 = vpop.f32.mrf.mxu1  ;;  %13050 = vmatprep.subr.bf16.mxu1 %v15013_v58  ;;  %v4518_v21 = vld [vmem:[%s23239_s3 + $0xc18] sm:$0xff]  ;;  %v14997_v55 = vcombine.high %v4670_v10, %v4674_v34  ;;  %v14996_v29 = vcombine.low %v4670_v10, %v4674_v34 }
 0x56a   :  { %v22036_v14 = vadd.f32 %v12662_v37, %v12610_v59  ;;  %13002 = vmatpush1.bf16.msra.mxu0 %v14868_v41  ;;  %v15004_v59 = vcombine.low %v4678_v63, %v4682_v15  ;;  %v4522_v35 = vld [vmem:[%s23239_s3 + $0xc38] sm:$0xff] }
 0x56b   :  { %v12666_v36 = vpop.f32.mrf.mxu1  ;;  %12983 = vmatmul.mubr.bf16.gmra.mxu1 %v23787_v56  ;;  %13003 = vmatprep.subr.bf16.mxu0 %v14861_v23  ;;  %v4666_v0 = vld [vmem:[%s23239_s3 + $0x10b8] sm:$0xff]  ;;  %v14845_v44 = vcombine.high %v4518_v21, %v4522_v35  ;;  %v14844_v63 = vcombine.low %v4518_v21, %v4522_v35 }
 0x56c   :  { %v22045_v57 = vadd.f32 %v12666_v36, %v12614_v16  ;;  %13051 = vmatpush1.bf16.msra.mxu1 %v15012_v27  ;;  %13078 = vmatprep.mubr.bf16.mxu1 %v23788_v49  ;;  %v14852_v16 = vcombine.low %v4526_v39, %v4530_v48  ;;  %v4662_v49 = vld [vmem:[%s23239_s3 + $0x1098] sm:$0xff] }
 0x56d   :  { %v12668_v54 = vpop.f32.mrf.mxu1  ;;  %13052 = vmatprep.subr.bf16.mxu1 %v15005_v13  ;;  %v4642_v40 = vld [vmem:[%s23239_s3 + $0xff8] sm:$0xff]  ;;  %v14989_v58 = vcombine.high %v4662_v49, %v4666_v0  ;;  %v14988_v30 = vcombine.low %v4662_v49, %v4666_v0 }
 0x56e   :  { %v22054_v56 = vadd.f32 %v12668_v54, %v12616_v17  ;;  %13004 = vmatpush1.bf16.msra.mxu0 %v14860_v32  ;;  %v4638_v17 = vld [vmem:[%s23239_s3 + $0xfd8] sm:$0xff] }
 0x56f   :  { %v12670_v38 = vpop.f32.mrf.mxu1  ;;  %13005 = vmatprep.subr.bf16.mxu0 %v14853_v62  ;;  %v4658_v15 = vld [vmem:[%s23239_s3 + $0x1078] sm:$0xff]  ;;  %v14965_v19 = vcombine.high %v4638_v17, %v4642_v40  ;;  %v14964_v39 = vcombine.low %v4638_v17, %v4642_v40 }
 0x570   :  { %v22062_v31 = vadd.f32 %v12670_v38, %v12618_v25  ;;  %13053 = vmatpush1.bf16.msra.mxu1 %v15004_v59  ;;  %v4654_v25 = vld [vmem:[%s23239_s3 + $0x1058] sm:$0xff] }
 0x571   :  { %v12672_v46 = vpop.f32.mrf.mxu1  ;;  %13054 = vmatprep.subr.bf16.mxu1 %v14997_v55  ;;  %v4630_v23 = vld [vmem:[%s23239_s3 + $0xf98] sm:$0xff]  ;;  %v14980_v32 = vcombine.low %v4654_v25, %v4658_v15 }
 0x572   :  { %v22070_v41 = vadd.f32 %v12672_v46, %v12620_v22  ;;  %13006 = vmatpush1.bf16.msra.mxu0 %v14852_v16  ;;  %v4634_v27 = vld [vmem:[%s23239_s3 + $0xfb8] sm:$0xff]  ;;  %v14981_v22 = vcombine.high %v4654_v25, %v4658_v15 }
 0x573   :  { %13007 = vmatprep.subr.bf16.mxu0 %v14845_v44  ;;  %v4646_v48 = vld [vmem:[%s23239_s3 + $0x1018] sm:$0xff]  ;;  %v14957_v13 = vcombine.high %v4630_v23, %v4634_v27  ;;  %v14956_v62 = vcombine.low %v4630_v23, %v4634_v27 }
 0x574   :  { %13055 = vmatpush1.bf16.msra.mxu1 %v14996_v29  ;;  %v4650_v37 = vld [vmem:[%s23239_s3 + $0x1038] sm:$0xff] }
 0x575   :  { %13056 = vmatprep.subr.bf16.mxu1 %v14989_v58  ;;  %v4622_v10 = vld [vmem:[%s23239_s3 + $0xf58] sm:$0xff]  ;;  %v14973_v36 = vcombine.high %v4646_v48, %v4650_v37  ;;  %v14972_v54 = vcombine.low %v4646_v48, %v4650_v37 }
 0x576   :  { %13008 = vmatpush1.bf16.msra.mxu0 %v14844_v63  ;;  %v4626_v34 = vld [vmem:[%s23239_s3 + $0xf78] sm:$0xff] }
 0x577   :  { %13009 = vmatprep.subr.bf16.mxu0 %v14965_v19  ;;  %v4766_v59 = vld [vmem:[%s23239_s3 + $0x13d8] sm:$0xff]  ;;  %v14949_v35 = vcombine.high %v4622_v10, %v4626_v34  ;;  %v14948_v0 = vcombine.low %v4622_v10, %v4626_v34 }
 0x578   :  { %13057 = vmatpush1.bf16.msra.mxu1 %v14988_v30  ;;  %v4770_v21 = vld [vmem:[%s23239_s3 + $0x13f8] sm:$0xff] }
 0x579   :  { %13058 = vmatprep.subr.bf16.mxu1 %v14981_v22  ;;  %v4614_v55 = vld [vmem:[%s23239_s3 + $0xf18] sm:$0xff]  ;;  %v15093_v49 = vcombine.high %v4766_v59, %v4770_v21  ;;  %v15092_v17 = vcombine.low %v4766_v59, %v4770_v21 }
 0x57a   :  { %13010 = vmatpush2.bf16.msra.mxu0 %v14964_v39  ;;  %v4618_v16 = vld [vmem:[%s23239_s3 + $0xf38] sm:$0xff] }
 0x57b   :  { %13011 = vmatprep.subr.bf16.mxu0 %v14957_v13  ;;  %v4758_v38 = vld [vmem:[%s23239_s3 + $0x1398] sm:$0xff]  ;;  %v14941_v29 = vcombine.high %v4614_v55, %v4618_v16  ;;  %v14940_v63 = vcombine.low %v4614_v55, %v4618_v16 }
 0x57c   :  { %13059 = vmatpush1.bf16.msra.mxu1 %v14980_v32  ;;  %v4762_v44 = vld [vmem:[%s23239_s3 + $0x13b8] sm:$0xff] }
 0x57d   :  { %13060 = vmatprep.subr.bf16.mxu1 %v14973_v36  ;;  %v4606_v40 = vld [vmem:[%s23239_s3 + $0xed8] sm:$0xff]  ;;  %v15085_v58 = vcombine.high %v4758_v38, %v4762_v44  ;;  %v15084_v30 = vcombine.low %v4758_v38, %v4762_v44 }
 0x57e   :  { %13012 = vmatpush2.bf16.msra.mxu0 %v14956_v62  ;;  %v4610_v46 = vld [vmem:[%s23239_s3 + $0xef8] sm:$0xff] }
 0x57f   :  { %13013 = vmatprep.subr.bf16.mxu0 %v14949_v35  ;;  %v4750_v25 = vld [vmem:[%s23239_s3 + $0x1358] sm:$0xff]  ;;  %v14933_v19 = vcombine.high %v4606_v40, %v4610_v46  ;;  %v14932_v39 = vcombine.low %v4606_v40, %v4610_v46 }
 0x580   :  { %13061 = vmatpush1.bf16.msra.mxu1 %v14972_v54  ;;  %v4754_v15 = vld [vmem:[%s23239_s3 + $0x1378] sm:$0xff] }
 0x581   :  { %13062 = vmatprep.subr.bf16.mxu1 %v15093_v49  ;;  %v4598_v23 = vld [vmem:[%s23239_s3 + $0xe98] sm:$0xff]  ;;  %v15077_v22 = vcombine.high %v4750_v25, %v4754_v15  ;;  %v15076_v32 = vcombine.low %v4750_v25, %v4754_v15 }
 0x582   :  { %13014 = vmatpush2.bf16.msra.mxu0 %v14948_v0  ;;  %v4602_v27 = vld [vmem:[%s23239_s3 + $0xeb8] sm:$0xff] }
 0x583   :  { %13015 = vmatprep.subr.bf16.mxu0 %v14941_v29  ;;  %v4742_v48 = vld [vmem:[%s23239_s3 + $0x1318] sm:$0xff]  ;;  %v14925_v13 = vcombine.high %v4598_v23, %v4602_v27  ;;  %v14924_v62 = vcombine.low %v4598_v23, %v4602_v27 }
 0x584   :  { %13063 = vmatpush2.bf16.msra.mxu1 %v15092_v17  ;;  %v4746_v37 = vld [vmem:[%s23239_s3 + $0x1338] sm:$0xff] }
 0x585   :  { %13064 = vmatprep.subr.bf16.mxu1 %v15085_v58  ;;  %v4590_v10 = vld [vmem:[%s23239_s3 + $0xe58] sm:$0xff]  ;;  %v15069_v36 = vcombine.high %v4742_v48, %v4746_v37  ;;  %v15068_v54 = vcombine.low %v4742_v48, %v4746_v37 }
 0x586   :  { %13016 = vmatpush2.bf16.msra.mxu0 %v14940_v63  ;;  %v4594_v34 = vld [vmem:[%s23239_s3 + $0xe78] sm:$0xff] }
 0x587   :  { %13017 = vmatprep.subr.bf16.mxu0 %v14933_v19  ;;  %v4734_v59 = vld [vmem:[%s23239_s3 + $0x12d8] sm:$0xff]  ;;  %v14917_v35 = vcombine.high %v4590_v10, %v4594_v34  ;;  %v14916_v0 = vcombine.low %v4590_v10, %v4594_v34 }
 0x588   :  { %13065 = vmatpush2.bf16.msra.mxu1 %v15084_v30  ;;  %v4738_v21 = vld [vmem:[%s23239_s3 + $0x12f8] sm:$0xff] }
 0x589   :  { %13066 = vmatprep.subr.bf16.mxu1 %v15077_v22  ;;  %v4582_v55 = vld [vmem:[%s23239_s3 + $0xe18] sm:$0xff]  ;;  %v15061_v49 = vcombine.high %v4734_v59, %v4738_v21  ;;  %v15060_v17 = vcombine.low %v4734_v59, %v4738_v21 }
 0x58a   :  { %13018 = vmatpush2.bf16.msra.mxu0 %v14932_v39  ;;  %v4586_v16 = vld [vmem:[%s23239_s3 + $0xe38] sm:$0xff] }
 0x58b   :  { %13019 = vmatprep.subr.bf16.mxu0 %v14925_v13  ;;  %v4726_v38 = vld [vmem:[%s23239_s3 + $0x1298] sm:$0xff]  ;;  %v14909_v29 = vcombine.high %v4582_v55, %v4586_v16  ;;  %v14908_v63 = vcombine.low %v4582_v55, %v4586_v16 }
 0x58c   :  { %13067 = vmatpush2.bf16.msra.mxu1 %v15076_v32  ;;  %v4730_v44 = vld [vmem:[%s23239_s3 + $0x12b8] sm:$0xff] }
 0x58d   :  { %13068 = vmatprep.subr.bf16.mxu1 %v15069_v36  ;;  %v4830_v40 = vld [vmem:[%s23239_s3 + $0x15d8] sm:$0xff]  ;;  %v15053_v58 = vcombine.high %v4726_v38, %v4730_v44  ;;  %v15052_v30 = vcombine.low %v4726_v38, %v4730_v44 }
 0x58e   :  { %13020 = vmatpush2.bf16.msra.mxu0 %v14924_v62  ;;  %v4834_v46 = vld [vmem:[%s23239_s3 + $0x15f8] sm:$0xff] }
 0x58f   :  { %13021 = vmatprep.subr.bf16.mxu0 %v14917_v35  ;;  %v4718_v25 = vld [vmem:[%s23239_s3 + $0x1258] sm:$0xff]  ;;  %v15157_v19 = vcombine.high %v4830_v40, %v4834_v46  ;;  %v15156_v37 = vcombine.low %v4830_v40, %v4834_v46 }
 0x590   :  { %13069 = vmatpush2.bf16.msra.mxu1 %v15068_v54  ;;  %v4722_v15 = vld [vmem:[%s23239_s3 + $0x1278] sm:$0xff] }
 0x591   :  { %13070 = vmatprep.subr.bf16.mxu1 %v15061_v49  ;;  %v4822_v23 = vld [vmem:[%s23239_s3 + $0x1598] sm:$0xff]  ;;  %v15045_v22 = vcombine.high %v4718_v25, %v4722_v15  ;;  %v15044_v32 = vcombine.low %v4718_v25, %v4722_v15 }
 0x592   :  { %13022 = vmatpush2.bf16.msra.mxu0 %v14916_v0  ;;  %v4826_v27 = vld [vmem:[%s23239_s3 + $0x15b8] sm:$0xff] }
 0x593   :  { %13023 = vmatprep.subr.bf16.mxu0 %v14909_v29  ;;  %v4710_v39 = vld [vmem:[%s23239_s3 + $0x1218] sm:$0xff]  ;;  %v15149_v13 = vcombine.high %v4822_v23, %v4826_v27  ;;  %v15148_v21 = vcombine.low %v4822_v23, %v4826_v27 }
 0x594   :  { %13071 = vmatpush2.bf16.msra.mxu1 %v15060_v17  ;;  %v4714_v48 = vld [vmem:[%s23239_s3 + $0x1238] sm:$0xff] }
 0x595   :  { %13072 = vmatprep.subr.bf16.mxu1 %v15053_v58  ;;  %v4814_v10 = vld [vmem:[%s23239_s3 + $0x1558] sm:$0xff]  ;;  %v15037_v62 = vcombine.high %v4710_v39, %v4714_v48 }
 0x596   :  { %13024 = vmatpush2.bf16.msra.mxu0 %v14908_v63  ;;  %v4818_v34 = vld [vmem:[%s23239_s3 + $0x1578] sm:$0xff] }
 0x597   :  { %13099 = vmatprep.subr.bf16.mxu0 %v15157_v19  ;;  %v4958_v35 = vld [vmem:[%s23239_s3 + $0x19d8] sm:$0xff]  ;;  %v15141_v16 = vcombine.high %v4814_v10, %v4818_v34  ;;  %v15140_v29 = vcombine.low %v4814_v10, %v4818_v34 }
 0x598   :  { %13073 = vmatpush2.bf16.msra.mxu1 %v15052_v30  ;;  %v4962_v54 = vld [vmem:[%s23239_s3 + $0x19f8] sm:$0xff] }
 0x599   :  { %13074 = vmatprep.subr.bf16.mxu1 %v15045_v22  ;;  %v12709_v36 = vpop.f32.mrf.mxu0  ;;  %13026 = vmatmul.mubr.bf16.vlgmr.msra.gmra.mxu0 %v23790_v51  ;;  %v15036_v51 = vcombine.low %v4710_v39, %v4714_v48  ;;  %v15285_v38 = vcombine.high %v4958_v35, %v4962_v54  ;;  %v4950_v17 = vld [vmem:[%s23239_s3 + $0x1998] sm:$0xff]  ;;  %v15284_v58 = vcombine.low %v4958_v35, %v4962_v54 }
 0x59a   :  { %v12710_v59 = vadd.f32 %v12709_v36, %v22008_v7  ;;  %13035 = vmatprep.mubr.bf16.mxu0 %v23791_v60  ;;  %13100 = vmatpush1.bf16.msra.mxu0 %v15156_v37  ;;  %v4806_v60 = vld [vmem:[%s23239_s3 + $0x1518] sm:$0xff] }
 0x59b   :  { %v12711_v55 = vpop.f32.mrf.mxu0  ;;  %13101 = vmatprep.subr.bf16.mxu0 %v15149_v13  ;;  %v4810_v7 = vld [vmem:[%s23239_s3 + $0x1538] sm:$0xff] }
 0x59c   :  { %13075 = vmatpush2.bf16.msra.mxu1 %v15044_v32  ;;  %v12712_v49 = vadd.f32 %v12711_v55, %v22018_v61  ;;  %v4954_v61 = vld [vmem:[%s23239_s3 + $0x19b8] sm:$0xff]  ;;  %v15133_v46 = vcombine.high %v4806_v60, %v4810_v7  ;;  %v15132_v23 = vcombine.low %v4806_v60, %v4810_v7 }
 0x59d   :  { %13076 = vmatprep.subr.bf16.mxu1 %v15037_v62  ;;  %v12713_v0 = vpop.f32.mrf.mxu0  ;;  %v4802_v25 = vld [vmem:[%s23239_s3 + $0x14f8] sm:$0xff]  ;;  %v15277_v19 = vcombine.high %v4950_v17, %v4954_v61 }
 0x59e   :  { %v12714_v44 = vadd.f32 %v12713_v0, %v22027_v8  ;;  %13102 = vmatpush1.bf16.msra.mxu0 %v15148_v21  ;;  %v4798_v8 = vld [vmem:[%s23239_s3 + $0x14d8] sm:$0xff] }
 0x59f   :  { %v12715_v40 = vpop.f32.mrf.mxu0  ;;  %13103 = vmatprep.subr.bf16.mxu0 %v15141_v16  ;;  %v4946_v27 = vld [vmem:[%s23239_s3 + $0x1978] sm:$0xff]  ;;  %v15124_v36 = vcombine.low %v4798_v8, %v4802_v25 }
 0x5a0   :  { %13077 = vmatpush2.bf16.msra.mxu1 %v15036_v51  ;;  %v12716_v63 = vadd.f32 %v12715_v40, %v22036_v14  ;;  %v4942_v14 = vld [vmem:[%s23239_s3 + $0x1958] sm:$0xff] }
 0x5a1   :  { %13152 = vmatprep.subr.bf16.mxu1 %v15285_v38  ;;  %v12719_v15 = vpop.f32.mrf.mxu0  ;;  %13036 = vmatmul.mubr.bf16.gmra.mxu0 %v23794_v4  ;;  %v15125_v4 = vcombine.high %v4798_v8, %v4802_v25  ;;  %v4790_v37 = vld [vmem:[%s23239_s3 + $0x1498] sm:$0xff]  ;;  %v15269_v10 = vcombine.high %v4942_v14, %v4946_v27  ;;  %v15268_v55 = vcombine.low %v4942_v14, %v4946_v27 }
 0x5a2   :  { %v12720_v30 = vadd.f32 %v12719_v15, %v22045_v57  ;;  %13104 = vmatpush1.bf16.msra.mxu0 %v15140_v29  ;;  %13131 = vmatprep.mubr.bf16.mxu0 %v23795_v52  ;;  %v15276_v52 = vcombine.low %v4950_v17, %v4954_v61  ;;  %v4794_v13 = vld [vmem:[%s23239_s3 + $0x14b8] sm:$0xff] }
 0x5a3   :  { %v12762_v22 = vpop.f32.mrf.mxu1  ;;  %13079 = vmatmul.mubr.bf16.vlgmr.msra.gmra.mxu1 %v18612_v26  ;;  %v12721_v39 = vpop.f32.mrf.mxu0  ;;  %13105 = vmatprep.subr.bf16.mxu0 %v15133_v46  ;;  %v4938_v62 = vld [vmem:[%s23239_s3 + $0x1938] sm:$0xff]  ;;  %v15117_v35 = vcombine.high %v4790_v37, %v4794_v13  ;;  %v15116_v0 = vcombine.low %v4790_v37, %v4794_v13 }
 0x5a4   :  { %v22232_v48 = vadd.f32 %v12762_v22, %v12710_v59  ;;  %13088 = vmatprep.mubr.bf16.mxu1 %v19055_v43  ;;  %13153 = vmatpush1.bf16.msra.mxu1 %v15284_v58  ;;  %v12722_v57 = vadd.f32 %v12721_v39, %v22054_v56  ;;  %v4934_v56 = vld [vmem:[%s23239_s3 + $0x1918] sm:$0xff] }
 0x5a5   :  { %v12764_v26 = vpop.f32.mrf.mxu1  ;;  %13154 = vmatprep.subr.bf16.mxu1 %v15277_v19  ;;  %v12723_v32 = vpop.f32.mrf.mxu0  ;;  %v4782_v16 = vld [vmem:[%s23239_s3 + $0x1458] sm:$0xff]  ;;  %v15261_v60 = vcombine.high %v4934_v56, %v4938_v62  ;;  %v15260_v61 = vcombine.low %v4934_v56, %v4938_v62 }
 0x5a6   :  { %v22242_v34 = vadd.f32 %v12764_v26, %v12712_v49  ;;  %v12724_v43 = vadd.f32 %v12723_v32, %v22062_v31  ;;  %13106 = vmatpush1.bf16.msra.mxu0 %v15132_v23  ;;  %v4786_v51 = vld [vmem:[%s23239_s3 + $0x1478] sm:$0xff] }
 0x5a7   :  { %v12766_v59 = vpop.f32.mrf.mxu1  ;;  %v12725_v21 = vpop.f32.mrf.mxu0  ;;  %13107 = vmatprep.subr.bf16.mxu0 %v15125_v4  ;;  %v4926_v38 = vld [vmem:[%s23239_s3 + $0x18d8] sm:$0xff]  ;;  %v15109_v29 = vcombine.high %v4782_v16, %v4786_v51  ;;  %v15108_v8 = vcombine.low %v4782_v16, %v4786_v51 }
 0x5a8   :  { %v22251_v54 = vadd.f32 %v12766_v59, %v12714_v44  ;;  %13155 = vmatpush1.bf16.msra.mxu1 %v15276_v52  ;;  %v12726_v31 = vadd.f32 %v12725_v21, %v22070_v41  ;;  %v4930_v41 = vld [vmem:[%s23239_s3 + $0x18f8] sm:$0xff] }
 0x5a9   :  { %v12768_v49 = vpop.f32.mrf.mxu1  ;;  %13156 = vmatprep.subr.bf16.mxu1 %v15269_v10  ;;  %v4774_v40 = vld [vmem:[%s23239_s3 + $0x1418] sm:$0xff]  ;;  %v15252_v23 = vcombine.low %v4926_v38, %v4930_v41 }
 0x5aa   :  { %v22260_v7 = vadd.f32 %v12768_v49, %v12716_v63  ;;  %13108 = vmatpush1.bf16.msra.mxu0 %v15124_v36  ;;  %v4778_v46 = vld [vmem:[%s23239_s3 + $0x1438] sm:$0xff]  ;;  %v15253_v63 = vcombine.high %v4926_v38, %v4930_v41 }
 0x5ab   :  { %v12772_v44 = vpop.f32.mrf.mxu1  ;;  %13089 = vmatmul.mubr.bf16.gmra.mxu1 %v19111_v18  ;;  %13109 = vmatprep.subr.bf16.mxu0 %v15117_v35  ;;  %v4922_v25 = vld [vmem:[%s23239_s3 + $0x18b8] sm:$0xff]  ;;  %v15101_v19 = vcombine.high %v4774_v40, %v4778_v46  ;;  %v15100_v52 = vcombine.low %v4774_v40, %v4778_v46 }
 0x5ac   :  { %v22269_v17 = vadd.f32 %v12772_v44, %v12720_v30  ;;  %13157 = vmatpush1.bf16.msra.mxu1 %v15268_v55  ;;  %13184 = vmatprep.mubr.bf16.mxu1 %v19126_v33  ;;  %v4918_v33 = vld [vmem:[%s23239_s3 + $0x1898] sm:$0xff] }
 0x5ad   :  { %v12774_v58 = vpop.f32.mrf.mxu1  ;;  %13158 = vmatprep.subr.bf16.mxu1 %v15261_v60  ;;  %v4894_v14 = vld [vmem:[%s23239_s3 + $0x17d8] sm:$0xff]  ;;  %v15245_v39 = vcombine.high %v4918_v33, %v4922_v25  ;;  %v15244_v26 = vcombine.low %v4918_v33, %v4922_v25 }
 0x5ae   :  { %v22278_v18 = vadd.f32 %v12774_v58, %v12722_v57  ;;  %13110 = vmatpush1.bf16.msra.mxu0 %v15116_v0  ;;  %v4898_v27 = vld [vmem:[%s23239_s3 + $0x17f8] sm:$0xff] }
 0x5af   :  { %v12776_v15 = vpop.f32.mrf.mxu1  ;;  %13111 = vmatprep.subr.bf16.mxu0 %v15109_v29  ;;  %v4910_v57 = vld [vmem:[%s23239_s3 + $0x1858] sm:$0xff]  ;;  %v15221_v13 = vcombine.high %v4894_v14, %v4898_v27  ;;  %v15220_v36 = vcombine.low %v4894_v14, %v4898_v27 }
 0x5b0   :  { %v22286_v30 = vadd.f32 %v12776_v15, %v12724_v43  ;;  %13159 = vmatpush1.bf16.msra.mxu1 %v15260_v61  ;;  %v4914_v37 = vld [vmem:[%s23239_s3 + $0x1878] sm:$0xff] }
 0x5b1   :  { %v12778_v22 = vpop.f32.mrf.mxu1  ;;  %13160 = vmatprep.subr.bf16.mxu1 %v15253_v63  ;;  %v4886_v32 = vld [vmem:[%s23239_s3 + $0x1798] sm:$0xff]  ;;  %v15237_v43 = vcombine.high %v4910_v57, %v4914_v37  ;;  %v15236_v21 = vcombine.low %v4910_v57, %v4914_v37 }
 0x5b2   :  { %v22294_v4 = vadd.f32 %v12778_v22, %v12726_v31  ;;  %13112 = vmatpush1.bf16.msra.mxu0 %v15108_v8  ;;  %v4890_v10 = vld [vmem:[%s23239_s3 + $0x17b8] sm:$0xff] }
 0x5b3   :  { %13113 = vmatprep.subr.bf16.mxu0 %v15101_v19  ;;  %v4902_v56 = vld [vmem:[%s23239_s3 + $0x1818] sm:$0xff]  ;;  %v15213_v59 = vcombine.high %v4886_v32, %v4890_v10  ;;  %v15212_v16 = vcombine.low %v4886_v32, %v4890_v10 }
 0x5b4   :  { %13161 = vmatpush1.bf16.msra.mxu1 %v15252_v23  ;;  %v4906_v62 = vld [vmem:[%s23239_s3 + $0x1838] sm:$0xff] }
 0x5b5   :  { %13162 = vmatprep.subr.bf16.mxu1 %v15245_v39  ;;  %v4878_v35 = vld [vmem:[%s23239_s3 + $0x1758] sm:$0xff]  ;;  %v15229_v31 = vcombine.high %v4902_v56, %v4906_v62  ;;  %v15228_v0 = vcombine.low %v4902_v56, %v4906_v62 }
 0x5b6   :  { %13114 = vmatpush1.bf16.msra.mxu0 %v15100_v52  ;;  %v4882_v55 = vld [vmem:[%s23239_s3 + $0x1778] sm:$0xff] }
 0x5b7   :  { %13115 = vmatprep.subr.bf16.mxu0 %v15221_v13  ;;  %v5022_v51 = vld [vmem:[%s23239_s3 + $0x1bd8] sm:$0xff]  ;;  %v15205_v60 = vcombine.high %v4878_v35, %v4882_v55  ;;  %v15204_v29 = vcombine.low %v4878_v35, %v4882_v55 }
 0x5b8   :  { %13163 = vmatpush1.bf16.msra.mxu1 %v15244_v26  ;;  %v5026_v49 = vld [vmem:[%s23239_s3 + $0x1bf8] sm:$0xff] }
 0x5b9   :  { %13164 = vmatprep.subr.bf16.mxu1 %v15237_v43  ;;  %v4870_v38 = vld [vmem:[%s23239_s3 + $0x1718] sm:$0xff]  ;;  %v15349_v44 = vcombine.high %v5022_v51, %v5026_v49  ;;  %v15348_v58 = vcombine.low %v5022_v51, %v5026_v49 }
 0x5ba   :  { %13116 = vmatpush2.bf16.msra.mxu0 %v15220_v36  ;;  %v4874_v41 = vld [vmem:[%s23239_s3 + $0x1738] sm:$0xff] }
 0x5bb   :  { %13117 = vmatprep.subr.bf16.mxu0 %v15213_v59  ;;  %v5014_v61 = vld [vmem:[%s23239_s3 + $0x1b98] sm:$0xff]  ;;  %v15197_v46 = vcombine.high %v4870_v38, %v4874_v41  ;;  %v15196_v25 = vcombine.low %v4870_v38, %v4874_v41 }
 0x5bc   :  { %13165 = vmatpush1.bf16.msra.mxu1 %v15236_v21  ;;  %v5018_v40 = vld [vmem:[%s23239_s3 + $0x1bb8] sm:$0xff] }
 0x5bd   :  { %13166 = vmatprep.subr.bf16.mxu1 %v15229_v31  ;;  %v4862_v63 = vld [vmem:[%s23239_s3 + $0x16d8] sm:$0xff]  ;;  %v15341_v33 = vcombine.high %v5014_v61, %v5018_v40  ;;  %v15340_v14 = vcombine.low %v5014_v61, %v5018_v40 }
 0x5be   :  { %13118 = vmatpush2.bf16.msra.mxu0 %v15212_v16  ;;  %v4866_v8 = vld [vmem:[%s23239_s3 + $0x16f8] sm:$0xff] }
 0x5bf   :  { %13119 = vmatprep.subr.bf16.mxu0 %v15205_v60  ;;  %v5006_v15 = vld [vmem:[%s23239_s3 + $0x1b58] sm:$0xff]  ;;  %v15189_v23 = vcombine.high %v4862_v63, %v4866_v8  ;;  %v15188_v52 = vcombine.low %v4862_v63, %v4866_v8 }
 0x5c0   :  { %13167 = vmatpush1.bf16.msra.mxu1 %v15228_v0  ;;  %v5010_v19 = vld [vmem:[%s23239_s3 + $0x1b78] sm:$0xff] }
 0x5c1   :  { %13168 = vmatprep.subr.bf16.mxu1 %v15349_v44  ;;  %v4854_v27 = vld [vmem:[%s23239_s3 + $0x1698] sm:$0xff]  ;;  %v15333_v39 = vcombine.high %v5006_v15, %v5010_v19  ;;  %v15332_v26 = vcombine.low %v5006_v15, %v5010_v19 }
 0x5c2   :  { %13120 = vmatpush2.bf16.msra.mxu0 %v15204_v29  ;;  %v4858_v22 = vld [vmem:[%s23239_s3 + $0x16b8] sm:$0xff] }
 0x5c3   :  { %13121 = vmatprep.subr.bf16.mxu0 %v15197_v46  ;;  %v4998_v57 = vld [vmem:[%s23239_s3 + $0x1b18] sm:$0xff]  ;;  %v15181_v13 = vcombine.high %v4854_v27, %v4858_v22  ;;  %v15180_v36 = vcombine.low %v4854_v27, %v4858_v22 }
 0x5c4   :  { %13169 = vmatpush2.bf16.msra.mxu1 %v15348_v58  ;;  %v5002_v37 = vld [vmem:[%s23239_s3 + $0x1b38] sm:$0xff] }
 0x5c5   :  { %13170 = vmatprep.subr.bf16.mxu1 %v15341_v33  ;;  %v4846_v32 = vld [vmem:[%s23239_s3 + $0x1658] sm:$0xff]  ;;  %v15325_v43 = vcombine.high %v4998_v57, %v5002_v37  ;;  %v15324_v21 = vcombine.low %v4998_v57, %v5002_v37 }
 0x5c6   :  { %13122 = vmatpush2.bf16.msra.mxu0 %v15196_v25  ;;  %v4850_v10 = vld [vmem:[%s23239_s3 + $0x1678] sm:$0xff] }
 0x5c7   :  { %13123 = vmatprep.subr.bf16.mxu0 %v15189_v23  ;;  %v4990_v56 = vld [vmem:[%s23239_s3 + $0x1ad8] sm:$0xff]  ;;  %v15173_v59 = vcombine.high %v4846_v32, %v4850_v10  ;;  %v15172_v16 = vcombine.low %v4846_v32, %v4850_v10 }
 0x5c8   :  { %13171 = vmatpush2.bf16.msra.mxu1 %v15340_v14  ;;  %v4994_v62 = vld [vmem:[%s23239_s3 + $0x1af8] sm:$0xff] }
 0x5c9   :  { %13172 = vmatprep.subr.bf16.mxu1 %v15333_v39  ;;  %v4838_v35 = vld [vmem:[%s23239_s3 + $0x1618] sm:$0xff]  ;;  %v15317_v31 = vcombine.high %v4990_v56, %v4994_v62  ;;  %v15316_v0 = vcombine.low %v4990_v56, %v4994_v62 }
 0x5ca   :  { %13124 = vmatpush2.bf16.msra.mxu0 %v15188_v52  ;;  %v4842_v55 = vld [vmem:[%s23239_s3 + $0x1638] sm:$0xff] }
 0x5cb   :  { %13125 = vmatprep.subr.bf16.mxu0 %v15181_v13  ;;  %v4982_v51 = vld [vmem:[%s23239_s3 + $0x1a98] sm:$0xff]  ;;  %v15165_v60 = vcombine.high %v4838_v35, %v4842_v55  ;;  %v15164_v29 = vcombine.low %v4838_v35, %v4842_v55 }
 0x5cc   :  { %13173 = vmatpush2.bf16.msra.mxu1 %v15332_v26  ;;  %v4986_v49 = vld [vmem:[%s23239_s3 + $0x1ab8] sm:$0xff] }
 0x5cd   :  { %13174 = vmatprep.subr.bf16.mxu1 %v15325_v43  ;;  %v5086_v38 = vld [vmem:[%s23239_s3 + $0x1dd8] sm:$0xff]  ;;  %v15309_v44 = vcombine.high %v4982_v51, %v4986_v49  ;;  %v15308_v58 = vcombine.low %v4982_v51, %v4986_v49 }
 0x5ce   :  { %13126 = vmatpush2.bf16.msra.mxu0 %v15180_v36  ;;  %v5090_v41 = vld [vmem:[%s23239_s3 + $0x1df8] sm:$0xff] }
 0x5cf   :  { %13127 = vmatprep.subr.bf16.mxu0 %v15173_v59  ;;  %v4974_v61 = vld [vmem:[%s23239_s3 + $0x1a58] sm:$0xff]  ;;  %v15413_v46 = vcombine.high %v5086_v38, %v5090_v41  ;;  %v15412_v19 = vcombine.low %v5086_v38, %v5090_v41 }
 0x5d0   :  { %13175 = vmatpush2.bf16.msra.mxu1 %v15324_v21  ;;  %v4978_v40 = vld [vmem:[%s23239_s3 + $0x1a78] sm:$0xff] }
 0x5d1   :  { %13176 = vmatprep.subr.bf16.mxu1 %v15317_v31  ;;  %v5078_v63 = vld [vmem:[%s23239_s3 + $0x1d98] sm:$0xff]  ;;  %v15301_v33 = vcombine.high %v4974_v61, %v4978_v40  ;;  %v15300_v14 = vcombine.low %v4974_v61, %v4978_v40 }
 0x5d2   :  { %13128 = vmatpush2.bf16.msra.mxu0 %v15172_v16  ;;  %v5082_v8 = vld [vmem:[%s23239_s3 + $0x1db8] sm:$0xff] }
 0x5d3   :  { %13129 = vmatprep.subr.bf16.mxu0 %v15165_v60  ;;  %v4966_v25 = vld [vmem:[%s23239_s3 + $0x1a18] sm:$0xff]  ;;  %v15405_v23 = vcombine.high %v5078_v63, %v5082_v8  ;;  %v15404_v37 = vcombine.low %v5078_v63, %v5082_v8 }
 0x5d4   :  { %13177 = vmatpush2.bf16.msra.mxu1 %v15316_v0  ;;  %v4970_v15 = vld [vmem:[%s23239_s3 + $0x1a38] sm:$0xff] }
 0x5d5   :  { %13178 = vmatprep.subr.bf16.mxu1 %v15309_v44  ;;  %v5070_v27 = vld [vmem:[%s23239_s3 + $0x1d58] sm:$0xff]  ;;  %v15293_v52 = vcombine.high %v4966_v25, %v4970_v15 }
 0x5d6   :  { %13130 = vmatpush2.bf16.msra.mxu0 %v15164_v29  ;;  %v5074_v22 = vld [vmem:[%s23239_s3 + $0x1d78] sm:$0xff] }
 0x5d7   :  { %13205 = vmatprep.subr.bf16.mxu0 %v15413_v46  ;;  %v5214_v13 = vld [vmem:[%s23239_s3 + $0x21d8] sm:$0xff]  ;;  %v15397_v10 = vcombine.high %v5070_v27, %v5074_v22  ;;  %v15396_v59 = vcombine.low %v5070_v27, %v5074_v22 }
 0x5d8   :  { %13179 = vmatpush2.bf16.msra.mxu1 %v15308_v58  ;;  %v5218_v26 = vld [vmem:[%s23239_s3 + $0x21f8] sm:$0xff] }
 0x5d9   :  { %13180 = vmatprep.subr.bf16.mxu1 %v15301_v33  ;;  %v12815_v39 = vpop.f32.mrf.mxu0  ;;  %13132 = vmatmul.mubr.bf16.vlgmr.msra.gmra.mxu0 %v18779_v20  ;;  %v15292_v20 = vcombine.low %v4966_v25, %v4970_v15  ;;  %v5066_v43 = vld [vmem:[%s23239_s3 + $0x1d38] sm:$0xff]  ;;  %v15541_v56 = vcombine.high %v5214_v13, %v5218_v26  ;;  %v15540_v31 = vcombine.low %v5214_v13, %v5218_v26 }
 0x5da   :  { %v22418_v57 = vadd.f32 %v12815_v39, %v22232_v48  ;;  %13141 = vmatprep.mubr.bf16.mxu0 %v19135_v9  ;;  %13206 = vmatpush1.bf16.msra.mxu0 %v15412_v19  ;;  %v5062_v9 = vld [vmem:[%s23239_s3 + $0x1d18] sm:$0xff] }
 0x5db   :  { %v12817_v32 = vpop.f32.mrf.mxu0  ;;  %13207 = vmatprep.subr.bf16.mxu0 %v15405_v23  ;;  %v5210_v21 = vld [vmem:[%s23239_s3 + $0x21b8] sm:$0xff]  ;;  %v15389_v55 = vcombine.high %v5062_v9, %v5066_v43 }
 0x5dc   :  { %13181 = vmatpush2.bf16.msra.mxu1 %v15300_v14  ;;  %v22428_v48 = vadd.f32 %v12817_v32, %v22242_v34  ;;  %v5206_v34 = vld [vmem:[%s23239_s3 + $0x2198] sm:$0xff] }
 0x5dd   :  { %13182 = vmatprep.subr.bf16.mxu1 %v15293_v52  ;;  %v12819_v36 = vpop.f32.mrf.mxu0  ;;  %v5058_v51 = vld [vmem:[%s23239_s3 + $0x1cf8] sm:$0xff]  ;;  %v15533_v60 = vcombine.high %v5206_v34, %v5210_v21 }
 0x5de   :  { %23834 = vst [vmem:[#allocation35_spill] sm:$0xff] %v22428_v48  ;;  %v22437_v62 = vadd.f32 %v12819_v36, %v22251_v54  ;;  %13208 = vmatpush1.bf16.msra.mxu0 %v15404_v37  ;;  %v5054_v54 = vld [vmem:[%s23239_s3 + $0x1cd8] sm:$0xff] }
 0x5df   :  { %v12821_v35 = vpop.f32.mrf.mxu0  ;;  %13209 = vmatprep.subr.bf16.mxu0 %v15397_v10  ;;  %v5198_v38 = vld [vmem:[%s23239_s3 + $0x2158] sm:$0xff] }
 0x5e0   :  { %23835 = vst [vmem:[#allocation37_spill] sm:$0xff] %v22437_v62  ;;  %13183 = vmatpush2.bf16.msra.mxu1 %v15292_v20  ;;  %v22446_v16 = vadd.f32 %v12821_v35, %v22260_v7  ;;  %v15388_v7 = vcombine.low %v5062_v9, %v5066_v43  ;;  %v5202_v41 = vld [vmem:[%s23239_s3 + $0x2178] sm:$0xff] }
 0x5e1   :  { %13258 = vmatprep.subr.bf16.mxu1 %v15541_v56  ;;  %v12825_v49 = vpop.f32.mrf.mxu0  ;;  %13142 = vmatmul.mubr.bf16.gmra.mxu0 %v19176_v42  ;;  %v15381_v42 = vcombine.high %v5054_v54, %v5058_v51  ;;  %v5046_v29 = vld [vmem:[%s23239_s3 + $0x1c98] sm:$0xff]  ;;  %v15525_v40 = vcombine.high %v5198_v38, %v5202_v41  ;;  %v15524_v33 = vcombine.low %v5198_v38, %v5202_v41 }
 0x5e2   :  { %23836 = vst [vmem:[#allocation63_spill] sm:$0xff] %v22446_v16  ;;  %v22456_v0 = vadd.f32 %v12825_v49, %v22269_v17  ;;  %13210 = vmatpush1.bf16.msra.mxu0 %v15396_v59  ;;  %13237 = vmatprep.mubr.bf16.mxu0 %v19180_v1  ;;  %v15532_v17 = vcombine.low %v5206_v34, %v5210_v21  ;;  %v5050_v61 = vld [vmem:[%s23239_s3 + $0x1cb8] sm:$0xff] }
 0x5e3   :  { %13185 = vmatmul.mubr.bf16.vlgmr.msra.gmra.mxu1 %v23825_v45  ;;  %v12827_v44 = vpop.f32.mrf.mxu0  ;;  %13211 = vmatprep.subr.bf16.mxu0 %v15389_v55  ;;  %v5194_v58 = vld [vmem:[%s23239_s3 + $0x2138] sm:$0xff]  ;;  %v15373_v8 = vcombine.high %v5046_v29, %v5050_v61  ;;  %v15372_v23 = vcombine.low %v5046_v29, %v5050_v61 }
 0x5e4   :  { %23837 = vst [vmem:[#allocation64_spill] sm:$0xff] %v22456_v0  ;;  %13194 = vmatprep.mubr.bf16.mxu1 %v23826_v6  ;;  %13259 = vmatpush1.bf16.msra.mxu1 %v15540_v31  ;;  %v22468_v1 = vadd.f32 %v12827_v44, %v22278_v18  ;;  %v15380_v6 = vcombine.low %v5054_v54, %v5058_v51  ;;  %v5190_v18 = vld [vmem:[%s23239_s3 + $0x2118] sm:$0xff] }
 0x5e5   :  { %13260 = vmatprep.subr.bf16.mxu1 %v15533_v60  ;;  %v12829_v45 = vpop.f32.mrf.mxu0  ;;  %v5042_v15 = vld [vmem:[%s23239_s3 + $0x1c78] sm:$0xff]  ;;  %v15517_v19 = vcombine.high %v5190_v18, %v5194_v58  ;;  %v15516_v22 = vcombine.low %v5190_v18, %v5194_v58 }
 0x5e6   :  { %23838 = vst [vmem:[#allocation67_spill] sm:$0xff] %v22468_v1  ;;  %v22477_v46 = vadd.f32 %v12829_v45, %v22286_v30  ;;  %13212 = vmatpush1.bf16.msra.mxu0 %v15388_v7  ;;  %v5038_v30 = vld [vmem:[%s23239_s3 + $0x1c58] sm:$0xff]  ;;  %v23847_v1 = vld [vmem:[#allocation56_spill] sm:$0xff] }
 0x5e7   :  { %v12831_v63 = vpop.f32.mrf.mxu0  ;;  %13213 = vmatprep.subr.bf16.mxu0 %v15381_v42  ;;  %v5182_v14 = vld [vmem:[%s23239_s3 + $0x20d8] sm:$0xff]  ;;  %v15365_v27 = vcombine.high %v5038_v30, %v5042_v15  ;;  %v15364_v13 = vcombine.low %v5038_v30, %v5042_v15 }
 0x5e8   :  { %23839 = vst [vmem:[#allocation68_spill] sm:$0xff] %v22477_v46  ;;  %13261 = vmatpush1.bf16.msra.mxu1 %v15532_v17  ;;  %v22486_v25 = vadd.f32 %v12831_v63, %v22294_v4  ;;  %v5186_v4 = vld [vmem:[%s23239_s3 + $0x20f8] sm:$0xff] }
 0x5e9   :  { %13262 = vmatprep.subr.bf16.mxu1 %v15525_v40  ;;  %v5030_v39 = vld [vmem:[%s23239_s3 + $0x1c18] sm:$0xff]  ;;  %v15509_v37 = vcombine.high %v5182_v14, %v5186_v4  ;;  %v15508_v32 = vcombine.low %v5182_v14, %v5186_v4 }
 0x5ea   :  { %23840 = vst [vmem:[#allocation71_spill] sm:$0xff] %v22486_v25  ;;  %13214 = vmatpush1.bf16.msra.mxu0 %v15380_v6  ;;  %v5034_v52 = vld [vmem:[%s23239_s3 + $0x1c38] sm:$0xff] }
 0x5eb   :  { %13195 = vmatmul.mubr.bf16.gmra.mxu1 %v23827_v47  ;;  %13215 = vmatprep.subr.bf16.mxu0 %v15373_v8  ;;  %v5174_v47 = vld [vmem:[%s23239_s3 + $0x2098] sm:$0xff]  ;;  %v15357_v26 = vcombine.high %v5030_v39, %v5034_v52  ;;  %v15356_v43 = vcombine.low %v5030_v39, %v5034_v52 }
 0x5ec   :  { %13263 = vmatpush1.bf16.msra.mxu1 %v15524_v33  ;;  %13290 = vmatprep.mubr.bf16.mxu1 %v23828_v2  ;;  %v5178_v2 = vld [vmem:[%s23239_s3 + $0x20b8] sm:$0xff] }
 0x5ed   :  { %13264 = vmatprep.subr.bf16.mxu1 %v15517_v19  ;;  %v5150_v10 = vld [vmem:[%s23239_s3 + $0x1fd8] sm:$0xff]  ;;  %v15501_v9 = vcombine.high %v5174_v47, %v5178_v2  ;;  %v15500_v34 = vcombine.low %v5174_v47, %v5178_v2 }
 0x5ee   :  { %13216 = vmatpush1.bf16.msra.mxu0 %v15372_v23  ;;  %v5154_v20 = vld [vmem:[%s23239_s3 + $0x1ff8] sm:$0xff] }
 0x5ef   :  { %13217 = vmatprep.subr.bf16.mxu0 %v15365_v27  ;;  %v5166_v36 = vld [vmem:[%s23239_s3 + $0x2058] sm:$0xff]  ;;  %v15477_v59 = vcombine.high %v5150_v10, %v5154_v20  ;;  %v15476_v31 = vcombine.low %v5150_v10, %v5154_v20 }
 0x5f0   :  { %13265 = vmatpush1.bf16.msra.mxu1 %v15516_v22  ;;  %v5170_v56 = vld [vmem:[%s23239_s3 + $0x2078] sm:$0xff] }
 0x5f1   :  { %13266 = vmatprep.subr.bf16.mxu1 %v15509_v37  ;;  %v5142_v21 = vld [vmem:[%s23239_s3 + $0x1f98] sm:$0xff]  ;;  %v15493_v55 = vcombine.high %v5166_v36, %v5170_v56  ;;  %v15492_v60 = vcombine.low %v5166_v36, %v5170_v56 }
 0x5f2   :  { %13218 = vmatpush1.bf16.msra.mxu0 %v15364_v13  ;;  %v5146_v35 = vld [vmem:[%s23239_s3 + $0x1fb8] sm:$0xff] }
 0x5f3   :  { %13219 = vmatprep.subr.bf16.mxu0 %v15357_v26  ;;  %v5158_v54 = vld [vmem:[%s23239_s3 + $0x2018] sm:$0xff]  ;;  %v15469_v49 = vcombine.high %v5142_v21, %v5146_v35  ;;  %v15468_v44 = vcombine.low %v5142_v21, %v5146_v35 }
 0x5f4   :  { %13267 = vmatpush1.bf16.msra.mxu1 %v15508_v32  ;;  %v5162_v51 = vld [vmem:[%s23239_s3 + $0x2038] sm:$0xff] }
 0x5f5   :  { %13268 = vmatprep.subr.bf16.mxu1 %v15501_v9  ;;  %v5134_v7 = vld [vmem:[%s23239_s3 + $0x1f58] sm:$0xff]  ;;  %v15485_v41 = vcombine.high %v5158_v54, %v5162_v51  ;;  %v15484_v61 = vcombine.low %v5158_v54, %v5162_v51 }
 0x5f6   :  { %13220 = vmatpush1.bf16.msra.mxu0 %v15356_v43  ;;  %v5138_v38 = vld [vmem:[%s23239_s3 + $0x1f78] sm:$0xff] }
 0x5f7   :  { %13221 = vmatprep.subr.bf16.mxu0 %v15477_v59  ;;  %v5278_v42 = vld [vmem:[%s23239_s3 + $0x23d8] sm:$0xff]  ;;  %v15461_v29 = vcombine.high %v5134_v7, %v5138_v38  ;;  %v15460_v18 = vcombine.low %v5134_v7, %v5138_v38 }
 0x5f8   :  { %13269 = vmatpush1.bf16.msra.mxu1 %v15500_v34  ;;  %v5282_v17 = vld [vmem:[%s23239_s3 + $0x23f8] sm:$0xff] }
 0x5f9   :  { %13270 = vmatprep.subr.bf16.mxu1 %v15493_v55  ;;  %v5126_v45 = vld [vmem:[%s23239_s3 + $0x1f18] sm:$0xff]  ;;  %v15605_v6 = vcombine.high %v5278_v42, %v5282_v17  ;;  %v15604_v33 = vcombine.low %v5278_v42, %v5282_v17 }
 0x5fa   :  { %13222 = vmatpush2.bf16.msra.mxu0 %v15476_v31  ;;  %v5130_v40 = vld [vmem:[%s23239_s3 + $0x1f38] sm:$0xff] }
 0x5fb   :  { %13223 = vmatprep.subr.bf16.mxu0 %v15469_v49  ;;  %v5270_v58 = vld [vmem:[%s23239_s3 + $0x2398] sm:$0xff]  ;;  %v15453_v8 = vcombine.high %v5126_v45, %v5130_v40  ;;  %v15452_v23 = vcombine.low %v5126_v45, %v5130_v40 }
 0x5fc   :  { %13271 = vmatpush1.bf16.msra.mxu1 %v15492_v60  ;;  %v5274_v63 = vld [vmem:[%s23239_s3 + $0x23b8] sm:$0xff] }
 0x5fd   :  { %13272 = vmatprep.subr.bf16.mxu1 %v15485_v41  ;;  %v5118_v30 = vld [vmem:[%s23239_s3 + $0x1ed8] sm:$0xff]  ;;  %v15597_v19 = vcombine.high %v5270_v58, %v5274_v63  ;;  %v15596_v22 = vcombine.low %v5270_v58, %v5274_v63 }
 0x5fe   :  { %13224 = vmatpush2.bf16.msra.mxu0 %v15468_v44  ;;  %v5122_v15 = vld [vmem:[%s23239_s3 + $0x1ef8] sm:$0xff] }
 0x5ff   :  { %13225 = vmatprep.subr.bf16.mxu0 %v15461_v29  ;;  %v5262_v14 = vld [vmem:[%s23239_s3 + $0x2358] sm:$0xff]  ;;  %v15445_v27 = vcombine.high %v5118_v30, %v5122_v15  ;;  %v15444_v13 = vcombine.low %v5118_v30, %v5122_v15  ;;  %v13457_v30 = vld [vmem:[%s23241_s5 + $0x70] sm:$0xff] }
 0x600   :  { %13273 = vmatpush1.bf16.msra.mxu1 %v15484_v61  ;;  %v5266_v4 = vld [vmem:[%s23239_s3 + $0x2378] sm:$0xff]  ;;  %v13489_v15 = vld [vmem:[%s23241_s5 + $0x170] sm:$0xff] }
 0x601   :  { %13274 = vmatprep.subr.bf16.mxu1 %v15605_v6  ;;  %v5110_v39 = vld [vmem:[%s23239_s3 + $0x1e98] sm:$0xff]  ;;  %v15589_v37 = vcombine.high %v5262_v14, %v5266_v4  ;;  %v15588_v32 = vcombine.low %v5262_v14, %v5266_v4  ;;  %v13456_v14 = vld [vmem:[%s23241_s5 + $0x68] sm:$0xff] }
 0x602   :  { %13226 = vmatpush2.bf16.msra.mxu0 %v15460_v18  ;;  %v5114_v52 = vld [vmem:[%s23239_s3 + $0x1eb8] sm:$0xff]  ;;  %v22628_v18 = vpop.f32.mrf.mxu1  ;;  %v13488_v4 = vld [vmem:[%s23241_s5 + $0x168] sm:$0xff] }
 0x603   :  { %13227 = vmatprep.subr.bf16.mxu0 %v15453_v8  ;;  %v5254_v47 = vld [vmem:[%s23239_s3 + $0x2318] sm:$0xff]  ;;  %v15437_v26 = vcombine.high %v5110_v39, %v5114_v52  ;;  %v15436_v43 = vcombine.low %v5110_v39, %v5114_v52  ;;  %v13505_v8 = vld [vmem:[%s23241_s5 + $0x1f0] sm:$0xff]  ;;  %v13455_v39 = vld [vmem:[%s23241_s5 + $0x60] sm:$0xff] }
 0x604   :  { %13275 = vmatpush2.bf16.msra.mxu1 %v15604_v33  ;;  %v5258_v2 = vld [vmem:[%s23239_s3 + $0x2338] sm:$0xff]  ;;  %v22630_v58 = vpop.f32.mrf.mxu1  ;;  %v13487_v52 = vld [vmem:[%s23241_s5 + $0x160] sm:$0xff] }
 0x605   :  { %13276 = vmatprep.subr.bf16.mxu1 %v15597_v19  ;;  %v5102_v10 = vld [vmem:[%s23239_s3 + $0x1e58] sm:$0xff]  ;;  %v15581_v9 = vcombine.high %v5254_v47, %v5258_v2  ;;  %v15580_v34 = vcombine.low %v5254_v47, %v5258_v2  ;;  %v13472_v19 = vld [vmem:[%s23241_s5 + $0xe8] sm:$0xff] }
 0x606   :  { %13228 = vmatpush2.bf16.msra.mxu0 %v15452_v23  ;;  %v5106_v20 = vld [vmem:[%s23239_s3 + $0x1e78] sm:$0xff]  ;;  %v13504_v23 = vld [vmem:[%s23241_s5 + $0x1e8] sm:$0xff] }
 0x607   :  { %13229 = vmatprep.subr.bf16.mxu0 %v15445_v27  ;;  %v5246_v36 = vld [vmem:[%s23239_s3 + $0x22d8] sm:$0xff]  ;;  %v15429_v59 = vcombine.high %v5102_v10, %v5106_v20  ;;  %v15428_v31 = vcombine.low %v5102_v10, %v5106_v20  ;;  %v13471_v27 = vld [vmem:[%s23241_s5 + $0xe0] sm:$0xff]  ;;  %v13469_v10 = vld [vmem:[%s23241_s5 + $0xd0] sm:$0xff] }
 0x608   :  { %13277 = vmatpush2.bf16.msra.mxu1 %v15596_v22  ;;  %v5250_v56 = vld [vmem:[%s23239_s3 + $0x22f8] sm:$0xff]  ;;  %v13503_v22 = vld [vmem:[%s23241_s5 + $0x1e0] sm:$0xff]  ;;  %v13501_v20 = vld [vmem:[%s23241_s5 + $0x1d0] sm:$0xff] }
 0x609   :  { %13278 = vmatprep.subr.bf16.mxu1 %v15589_v37  ;;  %v5094_v21 = vld [vmem:[%s23239_s3 + $0x1e18] sm:$0xff]  ;;  %v15573_v55 = vcombine.high %v5246_v36, %v5250_v56  ;;  %v15572_v60 = vcombine.low %v5246_v36, %v5250_v56  ;;  %v13468_v36 = vld [vmem:[%s23241_s5 + $0xc8] sm:$0xff] }
 0x60a   :  { %13230 = vmatpush2.bf16.msra.mxu0 %v15444_v13  ;;  %v5098_v35 = vld [vmem:[%s23239_s3 + $0x1e38] sm:$0xff]  ;;  %v13500_v56 = vld [vmem:[%s23241_s5 + $0x1c8] sm:$0xff] }
 0x60b   :  { %13231 = vmatprep.subr.bf16.mxu0 %v15437_v26  ;;  %v5238_v54 = vld [vmem:[%s23239_s3 + $0x2298] sm:$0xff]  ;;  %v15421_v49 = vcombine.high %v5094_v21, %v5098_v35  ;;  %v15420_v38 = vcombine.low %v5094_v21, %v5098_v35  ;;  %v13452_v21 = vld [vmem:[%s23241_s5 + $0x48] sm:$0xff] }
 0x60c   :  { %13279 = vmatpush2.bf16.msra.mxu1 %v15588_v32  ;;  %v5242_v51 = vld [vmem:[%s23239_s3 + $0x22b8] sm:$0xff]  ;;  %v13484_v35 = vld [vmem:[%s23241_s5 + $0x148] sm:$0xff] }
 0x60d   :  { %13280 = vmatprep.subr.bf16.mxu1 %v15581_v9  ;;  %v15565_v7 = vcombine.high %v5238_v54, %v5242_v51  ;;  %v5230_v41 = vld [vmem:[%s23239_s3 + $0x2258] sm:$0xff]  ;;  %v15564_v42 = vcombine.low %v5238_v54, %v5242_v51  ;;  %v13453_v9 = vld [vmem:[%s23241_s5 + $0x50] sm:$0xff]  ;;  %v13451_v54 = vld [vmem:[%s23241_s5 + $0x40] sm:$0xff] }
 0x60e   :  { %13232 = vmatpush2.bf16.msra.mxu0 %v15436_v43  ;;  %v5234_v44 = vld [vmem:[%s23239_s3 + $0x2278] sm:$0xff]  ;;  %v13485_v43 = vld [vmem:[%s23241_s5 + $0x150] sm:$0xff]  ;;  %v13483_v51 = vld [vmem:[%s23241_s5 + $0x140] sm:$0xff] }
 0x60f   :  { %13233 = vmatprep.subr.bf16.mxu0 %v15429_v59  ;;  %v15557_v17 = vcombine.high %v5230_v41, %v5234_v44  ;;  %v5222_v29 = vld [vmem:[%s23239_s3 + $0x2218] sm:$0xff]  ;;  %v15556_v45 = vcombine.low %v5230_v41, %v5234_v44 }
 0x610   :  { %13281 = vmatpush2.bf16.msra.mxu1 %v15580_v34  ;;  %v5226_v61 = vld [vmem:[%s23239_s3 + $0x2238] sm:$0xff] }
 0x611   :  { %13282 = vmatprep.subr.bf16.mxu1 %v15573_v55  ;;  %v15549_v40 = vcombine.high %v5222_v29, %v5226_v61  ;;  %v15548_v6 = vcombine.low %v5222_v29, %v5226_v61  ;;  %v13470_v37 = vld [vmem:[%s23241_s5 + $0xd8] sm:$0xff]  ;;  %v13467_v55 = vld [vmem:[%s23241_s5 + $0xc0] sm:$0xff]  ;;  %v13449_v61 = vld [vmem:[%s23241_s5 + $0x30] sm:$0xff] }
 0x612   :  { %13234 = vmatpush2.bf16.msra.mxu0 %v15428_v31  ;;  %v13502_v2 = vld [vmem:[%s23241_s5 + $0x1d8] sm:$0xff]  ;;  %v13499_v31 = vld [vmem:[%s23241_s5 + $0x1c0] sm:$0xff] }
 0x613   :  { %13235 = vmatprep.subr.bf16.mxu0 %v15421_v49  ;;  %v13454_v26 = vld [vmem:[%s23241_s5 + $0x58] sm:$0xff] }
 0x614   :  { %13283 = vmatpush2.bf16.msra.mxu1 %v15572_v60  ;;  %v13486_v32 = vld [vmem:[%s23241_s5 + $0x158] sm:$0xff] }
 0x615   :  { %13284 = vmatprep.subr.bf16.mxu1 %v15565_v7  ;;  %v13466_v49 = vld [vmem:[%s23241_s5 + $0xb8] sm:$0xff] }
 0x616   :  { %13236 = vmatpush2.bf16.msra.mxu0 %v15420_v38  ;;  %v13498_v60 = vld [vmem:[%s23241_s5 + $0x1b8] sm:$0xff] }
 0x617   :  { %v13450_v41 = vld [vmem:[%s23241_s5 + $0x38] sm:$0xff] }
 0x618   :  { %13285 = vmatpush2.bf16.msra.mxu1 %v15564_v42  ;;  %v13482_v44 = vld [vmem:[%s23241_s5 + $0x138] sm:$0xff]  ;;  %v13465_v42 = vld [vmem:[%s23241_s5 + $0xb0] sm:$0xff] }
 0x619   :  { %13286 = vmatprep.subr.bf16.mxu1 %v15557_v17  ;;  %13238 = vmatmul.mubr.bf16.vlgmr.msra.gmra.mxu0 %v23829_v24  ;;  %v22632_v24 = vpop.f32.mrf.mxu1  ;;  %v22691_v47 = vpop.f32.mrf.mxu0  ;;  %v13497_v17 = vld [vmem:[%s23241_s5 + $0x1b0] sm:$0xff] }
 0x61a   :  { %13247 = vmatprep.mubr.bf16.mxu0 %v23830_v11  ;;  %v13474_v11 = vld [vmem:[%s23241_s5 + $0xf8] sm:$0xff]  ;;  %v12922_v62 = vadd.f32 %v22691_v47, %v22628_v18  ;;  %v23852_v47 = vld [vmem:[#allocation17_spill] sm:$0xff] }
 0x61b   :  { %v22634_v63 = vpop.f32.mrf.mxu1  ;;  %15615 = vmatprep.subr.mxu0 %v13474_v11  ;;  %v22722_v34 = vpop.f32.mrf.mxu0 }
 0x61c   :  { %13287 = vmatpush2.bf16.msra.mxu1 %v15556_v45  ;;  %v13481_v45 = vld [vmem:[%s23241_s5 + $0x130] sm:$0xff] }
 0x61d   :  { %13288 = vmatprep.subr.bf16.mxu1 %v15549_v40  ;;  %v22654_v33 = vpop.f32.mrf.mxu1  ;;  %v22750_v38 = vpop.f32.mrf.mxu0  ;;  %v13464_v40 = vld [vmem:[%s23241_s5 + $0xa8] sm:$0xff] }
 0x61f   :  { %v22689_v13 = vpop.f32.mrf.mxu1  ;;  %v22778_v11 = vpop.f32.mrf.mxu0 }
 0x620   :  { %13289 = vmatpush2.bf16.msra.mxu1 %v15548_v6  ;;  %v13496_v6 = vld [vmem:[%s23241_s5 + $0x1a8] sm:$0xff] }
 0x621   :  { %13248 = vmatmul.mubr.bf16.gmra.mxu0 %v23831_v5  ;;  %v13506_v5 = vld [vmem:[%s23241_s5 + $0x1f8] sm:$0xff]  ;;  %v22720_v59 = vpop.f32.mrf.mxu1 }
 0x622   :  { %15650 = vmatprep.subr.mxu1 %v13506_v5  ;;  %v13448_v5 = vld [vmem:[%s23241_s5 + $0x28] sm:$0xff] }
 0x623   :  { %13291 = vmatmul.mubr.bf16.vlgmr.msra.gmra.mxu1 %v23832_v12  ;;  %v13490_v12 = vld [vmem:[%s23241_s5 + $0x178] sm:$0xff]  ;;  %v22748_v7 = vpop.f32.mrf.mxu1 }
 0x624   :  { %13300 = vmatprep.mubr.bf16.mxu1 %v23833_v3  ;;  %v13473_v3 = vld [vmem:[%s23241_s5 + $0xf0] sm:$0xff]  ;;  %15651 = vmatpush3.msra.mxu1 %v13490_v12  ;;  %v13463_v12 = vld [vmem:[%s23241_s5 + $0xa0] sm:$0xff] }
 0x625   :  { %15652 = vmatprep.subr.mxu1 %v13505_v8  ;;  %v22764_v29 = vpop.f32.mrf.mxu1 }
 0x626   :  { %15653 = vmatpush3.msra.mxu1 %v13489_v15  ;;  %v13479_v15 = vld [vmem:[%s23241_s5 + $0x120] sm:$0xff] }
 0x627   :  { %15654 = vmatprep.subr.mxu1 %v13504_v23  ;;  %v22792_v8 = vpop.f32.mrf.mxu1  ;;  %v13494_v23 = vld [vmem:[%s23241_s5 + $0x198] sm:$0xff] }
 0x628   :  { %15655 = vmatpush3.msra.mxu1 %v13488_v4  ;;  %v13446_v4 = vld [vmem:[%s23241_s5 + $0x18] sm:$0xff] }
 0x629   :  { %15656 = vmatprep.subr.mxu1 %v13503_v22  ;;  %v13461_v22 = vld [vmem:[%s23241_s5 + $0x90] sm:$0xff] }
 0x62a   :  { %15657 = vmatpush3.msra.mxu1 %v13487_v52  ;;  %v22820_v52 = vpop.f32.mrf.mxu1 }
 0x62b   :  { %13301 = vmatmul.mubr.bf16.gmra.mxu1 %v19724_v53  ;;  %v13458_v53 = vld [vmem:[%s23241_s5 + $0x78] sm:$0xff]  ;;  %15658 = vmatprep.subr.mxu1 %v13502_v2  ;;  %v13477_v2 = vld [vmem:[%s23241_s5 + $0x110] sm:$0xff] }
 0x62c   :  { %15616 = vmatpush3.msra.mxu0 %v13458_v53  ;;  %15659 = vmatpush3.msra.mxu1 %v13486_v32  ;;  %v13480_v53 = vld [vmem:[%s23241_s5 + $0x128] sm:$0xff] }
 0x62d   :  { %15617 = vmatprep.subr.mxu0 %v13473_v3  ;;  %15660 = vmatprep.subr.mxu1 %v13501_v20  ;;  %v13495_v3 = vld [vmem:[%s23241_s5 + $0x1a0] sm:$0xff]  ;;  %v13492_v32 = vld [vmem:[%s23241_s5 + $0x188] sm:$0xff] }
 0x62e   :  { %15618 = vmatpush3.msra.mxu0 %v13457_v30  ;;  %15661 = vmatpush3.msra.mxu1 %v13485_v43  ;;  %v13447_v30 = vld [vmem:[%s23241_s5 + $0x20] sm:$0xff]  ;;  %v13444_v20 = vld [vmem:[%s23241_s5 + $0x8] sm:$0xff] }
 0x62f   :  { %15619 = vmatprep.subr.mxu0 %v13472_v19  ;;  %15662 = vmatprep.subr.mxu1 %v13500_v56  ;;  %v13462_v19 = vld [vmem:[%s23241_s5 + $0x98] sm:$0xff]  ;;  %v13459_v43 = vld [vmem:[%s23241_s5 + $0x80] sm:$0xff]  ;;  %v22848_v56 = vpop.f32.mrf.mxu1 }
 0x630   :  { %15620 = vmatpush3.msra.mxu0 %v13456_v14  ;;  %15663 = vmatpush3.msra.mxu1 %v13484_v35  ;;  %v22806_v14 = vpop.f32.mrf.mxu0  ;;  %v13475_v35 = vld [vmem:[%s23241_s5 + $0x100] sm:$0xff] }
 0x631   :  { %15621 = vmatprep.subr.mxu0 %v13471_v27  ;;  %15664 = vmatprep.subr.mxu1 %v13499_v31  ;;  %v13478_v27 = vld [vmem:[%s23241_s5 + $0x118] sm:$0xff] }
 0x632   :  { %15622 = vmatpush3.msra.mxu0 %v13455_v39  ;;  %15665 = vmatpush3.msra.mxu1 %v13483_v51  ;;  %v13493_v39 = vld [vmem:[%s23241_s5 + $0x190] sm:$0xff]  ;;  %v13570_v31 = vld [vmem:[%s23241_s5 + $0x3f8] sm:$0xff]  ;;  %v22864_v51 = vpop.f32.mrf.mxu1 }
 0x633   :  { %15623 = vmatprep.subr.mxu0 %v13470_v37  ;;  %15666 = vmatprep.subr.mxu1 %v13498_v60  ;;  %v13445_v37 = vld [vmem:[%s23241_s5 + $0x10] sm:$0xff] }
 0x634   :  { %15624 = vmatpush3.msra.mxu0 %v13454_v26  ;;  %15667 = vmatpush3.msra.mxu1 %v13482_v44  ;;  %v13460_v26 = vld [vmem:[%s23241_s5 + $0x88] sm:$0xff]  ;;  %v22868_v60 = vpop.f32.mrf.mxu1 }
 0x635   :  { %15625 = vmatprep.subr.mxu0 %v13469_v10  ;;  %15668 = vmatprep.subr.mxu1 %v13497_v17  ;;  %v22834_v10 = vpop.f32.mrf.mxu0 }
 0x636   :  { %15626 = vmatpush3.msra.mxu0 %v13453_v9  ;;  %15669 = vmatpush3.msra.mxu1 %v13481_v45  ;;  %v13476_v9 = vld [vmem:[%s23241_s5 + $0x108] sm:$0xff]  ;;  %v22870_v44 = vpop.f32.mrf.mxu1 }
 0x637   :  { %15627 = vmatprep.subr.mxu0 %v13468_v36  ;;  %15670 = vmatprep.subr.mxu1 %v13496_v6  ;;  %v13491_v36 = vld [vmem:[%s23241_s5 + $0x180] sm:$0xff] }
 0x638   :  { %15628 = vmatpush3.msra.mxu0 %v13452_v21  ;;  %15671 = vmatpush3.msra.mxu1 %v13480_v53  ;;  %v13443_v21 = vld [vmem:[%s23241_s5] sm:$0xff]  ;;  %v22872_v17 = vpop.f32.mrf.mxu1 }
 0x639   :  { %15629 = vmatprep.subr.mxu0 %v13467_v55  ;;  %15672 = vmatprep.subr.mxu1 %v13495_v3  ;;  %v13538_v55 = vld [vmem:[%s23241_s5 + $0x2f8] sm:$0xff] }
 0x63a   :  { %15630 = vmatpush3.msra.mxu0 %v13451_v54  ;;  %15673 = vmatpush3.msra.mxu1 %v13479_v15  ;;  %v22862_v54 = vpop.f32.mrf.mxu0 }
 0x63b   :  { %15631 = vmatprep.subr.mxu0 %v13466_v49  ;;  %15674 = vmatprep.subr.mxu1 %v13494_v23 }
 0x63c   :  { %15632 = vmatpush3.msra.mxu0 %v13450_v41  ;;  %15675 = vmatpush3.msra.mxu1 %v13478_v27  ;;  %v22866_v49 = vpop.f32.mrf.mxu0 }
 0x63d   :  { %15633 = vmatprep.subr.mxu0 %v13465_v42  ;;  %15676 = vmatprep.subr.mxu1 %v13493_v39 }
 0x63e   :  { %15634 = vmatpush3.msra.mxu0 %v13449_v61  ;;  %15677 = vmatpush3.msra.mxu1 %v13477_v2 }
 0x63f   :  { %15635 = vmatprep.subr.mxu0 %v13464_v40  ;;  %15678 = vmatprep.subr.mxu1 %v13492_v32 }
 0x640   :  { %15636 = vmatpush3.msra.mxu0 %v13448_v5  ;;  %15679 = vmatpush3.msra.mxu1 %v13476_v9 }
 0x641   :  { %15637 = vmatprep.subr.mxu0 %v13463_v12  ;;  %15680 = vmatprep.subr.mxu1 %v13491_v36  ;;  %v23843_v36 = vld [vmem:[#allocation13_spill] sm:$0xff] }
 0x642   :  { %15638 = vmatpush3.msra.mxu0 %v13447_v30  ;;  %15681 = vmatpush3.msra.mxu1 %v13475_v35 }
 0x643   :  { %15639 = vmatprep.subr.mxu0 %v13462_v19  ;;  %15720 = vmatprep.subr.mxu1 %v13570_v31  ;;  %v23845_v31 = vld [vmem:[#allocation51_spill] sm:$0xff] }
 0x644   :  { %15640 = vmatpush3.msra.mxu0 %v13446_v4 }
 0x645   :  { %15641 = vmatprep.subr.mxu0 %v13461_v22 }
 0x646   :  { %15642 = vmatpush3.msra.mxu0 %v13445_v37 }
 0x647   :  { %15643 = vmatprep.subr.mxu0 %v13460_v26 }
 0x648   :  { %15644 = vmatpush3.msra.mxu0 %v13444_v20 }
 0x649   :  { %15645 = vmatprep.subr.mxu0 %v13459_v43 }
 0x64a   :  { %15646 = vmatpush3.msra.mxu0 %v13443_v21  ;;  %v23844_v21 = vld [vmem:[#allocation49_spill] sm:$0xff] }
 0x64b   :  { %15685 = vmatprep.subr.mxu0 %v13538_v55  ;;  %v11497_v35 = vadd.f32 %v23844_v21, %v23843_v36  ;;  %v12924_v36 = vadd.f32 %v22722_v34, %v22630_v58  ;;  %v12975_v21 = vadd.f32 %v22764_v29, %v12922_v62 }
 0x64d   :  { %v11550_v25 = vadd.f32 %v23845_v31, %v11497_v35 }
 0x64f   :  { %v11603_v0 = vadd.f32 %v23847_v1, %v11550_v25  ;;  %v12926_v1 = vadd.f32 %v22750_v38, %v22632_v24  ;;  %v12977_v25 = vadd.f32 %v22792_v8, %v12924_v36  ;;  %v23854_v36 = vld [vmem:[#allocation20_spill] sm:$0xff] }
 0x651   :  { %v12979_v58 = vadd.f32 %v22820_v52, %v12926_v1 }
 0x659   :  { %v13027_v41 = vpop.f32.mrf.mxu0 }
 0x65a   :  { %v13028_v18 = vadd.f32 %v13027_v41, %v12975_v21 }
 0x65b   :  { %v13029_v42 = vpop.f32.mrf.mxu0 }
 0x65c   :  { %v13030_v62 = vadd.f32 %v13029_v42, %v12977_v25 }
 0x65d   :  { %v13031_v61 = vpop.f32.mrf.mxu0 }
 0x65e   :  { %v13032_v38 = vadd.f32 %v13031_v61, %v12979_v58  ;;  %v12938_v61 = vadd.f32 %v22866_v49, %v22748_v7 }
 0x65f   :  { %v13033_v40 = vpop.f32.mrf.mxu0 }
 0x661   :  { %v22874_v5 = vpop.f32.mrf.mxu0 }
 0x663   :  { %v13080_v45 = vpop.f32.mrf.mxu1  ;;  %v22876_v12 = vpop.f32.mrf.mxu0 }
 0x664   :  { %v13081_v34 = vadd.f32 %v13080_v45, %v13028_v18 }
 0x665   :  { %v13082_v6 = vpop.f32.mrf.mxu1  ;;  %v22878_v30 = vpop.f32.mrf.mxu0 }
 0x666   :  { %v13083_v8 = vadd.f32 %v13082_v6, %v13030_v62  ;;  %v23858_v62 = vld [vmem:[#allocation66_spill] sm:$0xff] }
 0x667   :  { %v13084_v53 = vpop.f32.mrf.mxu1  ;;  %v22882_v19 = vpop.f32.mrf.mxu0 }
 0x668   :  { %v13085_v45 = vadd.f32 %v13084_v53, %v13032_v38 }
 0x669   :  { %v13086_v3 = vpop.f32.mrf.mxu1 }
 0x66b   :  { %v22880_v15 = vpop.f32.mrf.mxu1 }
 0x66d   :  { %v22884_v23 = vpop.f32.mrf.mxu1 }
 0x66f   :  { %v22886_v27 = vpop.f32.mrf.mxu1 }
 0x670   :  { %23841 = vst [vmem:[#allocation72_spill] sm:$0xff] %v22886_v27 }
 0x671   :  { %v22888_v39 = vpop.f32.mrf.mxu1 }
 0x672   :  { %23842 = vst [vmem:[#allocation43_spill] sm:$0xff] %v22888_v39  ;;  %v23848_v39 = vld [vmem:[#allocation18_spill] sm:$0xff] }
 0x673   :  { %v11656_v27 = vadd.f32 %v23848_v39, %v11603_v0 }
 0x675   :  { %v11709_v35 = vadd.f32 %v23850_v50, %v11656_v27  ;;  %v23853_v50 = vld [vmem:[#allocation59_spill] sm:$0xff] }
 0x677   :  { %v11762_v0 = vadd.f32 %v23852_v47, %v11709_v35 }
 0x679   :  { %v11815_v29 = vadd.f32 %v23853_v50, %v11762_v0 }
 0x67b   :  { %v22927_v21 = vadd.f32 %v23854_v36, %v11815_v29 }
 0x699   :  { %v13133_v4 = vpop.f32.mrf.mxu0 }
 0x69a   :  { %v13134_v41 = vadd.f32 %v13133_v4, %v13081_v34  ;;  %v23859_v34 = vmax.f32 %v20381_v28, %v23858_v62 }
 0x69b   :  { %v13135_v22 = vpop.f32.mrf.mxu0 }
 0x69c   :  { %v13136_v35 = vadd.f32 %v13135_v22, %v13083_v8 }
 0x69d   :  { %v13137_v37 = vpop.f32.mrf.mxu0 }
 0x69e   :  { %v13138_v25 = vadd.f32 %v13137_v37, %v13085_v45  ;;  %v23865_v45 = vld [vmem:[#allocation23_spill] sm:$0xff] }
 0x69f   :  { %v13139_v26 = vpop.f32.mrf.mxu0 }
 0x6a1   :  { %v22890_v20 = vpop.f32.mrf.mxu0 }
 0x6a3   :  { %v13186_v2 = vpop.f32.mrf.mxu1  ;;  %v22892_v43 = vpop.f32.mrf.mxu0 }
 0x6a4   :  { %v13187_v1 = vadd.f32 %v13186_v2, %v13134_v41 }
 0x6a5   :  { %v13188_v32 = vpop.f32.mrf.mxu1  ;;  %v22899_v46 = vpop.f32.mrf.mxu0 }
 0x6a6   :  { %23846 = vst [vmem:[#allocation44_spill] sm:$0xff] %v22899_v46 }
 0x6a7   :  { %v13190_v9 = vpop.f32.mrf.mxu1  ;;  %v22907_v48 = vpop.f32.mrf.mxu0 }
 0x6a8   :  { %23849 = vst [vmem:[#allocation69_spill] sm:$0xff] %v22907_v48  ;;  %v12928_v48 = vadd.f32 %v22778_v11, %v22634_v63  ;;  %v12932_v63 = vadd.f32 %v22806_v14, %v22654_v33  ;;  %v12934_v11 = vadd.f32 %v22834_v10, %v22689_v13  ;;  %v13189_v13 = vadd.f32 %v13188_v32, %v13136_v35  ;;  %v23855_v32 = vld [vmem:[#allocation50_spill] sm:$0xff] }
 0x6a9   :  { %v22896_v55 = vpop.f32.mrf.mxu1  ;;  %v23856_v18 = vsub.s32 0, %v23855_v32 }
 0x6aa   :  { %v12981_v24 = vadd.f32 %v22848_v56, %v12928_v48  ;;  %v12936_v48 = vadd.f32 %v22862_v54, %v22720_v59  ;;  %v12985_v56 = vadd.f32 %v22864_v51, %v12932_v63  ;;  %v12987_v6 = vadd.f32 %v22868_v60, %v12934_v11 }
 0x6ab   :  { %v22902_v16 = vpop.f32.mrf.mxu1  ;;  %v12991_v59 = vadd.f32 %v22872_v17, %v12938_v61  ;;  %v13191_v60 = vadd.f32 %v13190_v9, %v13138_v25 }
 0x6ac   :  { %v13034_v42 = vadd.f32 %v13033_v40, %v12981_v24  ;;  %v13335_v40 = vld [vmem:[%s23242_s4] sm:$0x3]  ;;  %v12989_v53 = vadd.f32 %v22870_v44, %v12936_v48  ;;  %v13038_v54 = vadd.f32 %v22874_v5, %v12985_v56  ;;  %v13040_v7 = vadd.f32 %v22876_v12, %v12987_v6  ;;  %v23861_v24 = vld [vmem:[#allocation72_spill] sm:$0xff] }
 0x6ad   :  { %v22913_v31 = vpop.f32.mrf.mxu1  ;;  %v22951_v44 = vrot.slane %v13335_v40, %v23856_v18  ;;  %v13044_v0 = vadd.f32 %v22882_v19, %v12991_v59  ;;  %v23862_v19 = vld [vmem:[#allocation43_spill] sm:$0xff]  ;;  %v23868_v56 = vld [vmem:[#allocation24_spill] sm:$0xff]  ;;  %v23872_v59 = vld [vmem:[#allocation26_spill] sm:$0xff] }
 0x6ae   :  { %23851 = vst [vmem:[#allocation70_spill] sm:$0xff] %v22913_v31  ;;  %v13087_v14 = vadd.f32 %v13086_v3, %v13034_v42  ;;  %v13042_v37 = vadd.f32 %v22878_v30, %v12989_v53  ;;  %v13093_v2 = vadd.f32 %v22884_v23, %v13040_v7  ;;  %v23857_v23 = vsub.s32 1, %v23855_v32  ;;  %v23864_v42 = vld [vmem:[#allocation85_spill] sm:$0xff]  ;;  %v23869_v6 = vld [vmem:[#allocation44_spill] sm:$0xff]  ;;  %v23871_v53 = vld [vmem:[#allocation74_spill] sm:$0xff] }
 0x6af   :  { %v22923_v27 = vpop.f32.mrf.mxu1  ;;  %v13097_v8 = vadd.f32 %v23862_v19, %v13044_v0  ;;  %v23866_v28 = vmax.f32 %v23864_v42, %v23865_v45  ;;  %v13314_v61 = vmax.f32 %v22927_v21, %v23868_v56  ;;  %v23870_v25 = vld [vmem:[#allocation69_spill] sm:$0xff]  ;;  %v23887_v56 = vld [vmem:[#allocation27_spill] sm:$0xff] }
 0x6b0   :  { %v13140_v49 = vadd.f32 %v13139_v26, %v13087_v14  ;;  %v13095_v38 = vadd.f32 %v23861_v24, %v13042_v37 }
 0x6b1   :  { %v13202_v4 = vpop.f32.mrf.mxu1 }
 0x6b2   :  { %v13193_v5 = vadd.f32 %v22896_v55, %v13140_v49  ;;  %v13148_v14 = vadd.f32 %v23869_v6, %v13095_v38  ;;  %v23874_v49 = vld [vmem:[#allocation63_spill] sm:$0xff] }
 0x6d9   :  { %v13239_v46 = vpop.f32.mrf.mxu0 }
 0x6da   :  { %v13240_v10 = vadd.f32 %v13239_v46, %v13187_v1  ;;  %v13091_v46 = vadd.f32 %v22880_v15, %v13038_v54  ;;  %v13146_v15 = vadd.f32 %v22892_v43, %v13093_v2  ;;  %v23863_v43 = vld [vmem:[#allocation70_spill] sm:$0xff]  ;;  %v23873_v54 = vmax.f32 %v23871_v53, %v23872_v59 }
 0x6db   :  { %v13241_v39 = vpop.f32.mrf.mxu0 }
 0x6dc   :  { %v13242_v22 = vadd.f32 %v13241_v39, %v13189_v13  ;;  %v13144_v30 = vadd.f32 %v22890_v20, %v13091_v46  ;;  %v22960_v39 = vrot.slane %v13335_v40, %v23857_v23  ;;  %v13199_v41 = vadd.f32 %v23863_v43, %v13146_v15  ;;  %v23877_v23 = vld [vmem:[#allocation73_spill] sm:$0xff] }
 0x6dd   :  { %v13243_v31 = vpop.f32.mrf.mxu0  ;;  %v23882_v43 = vld [vmem:[#allocation81_spill] sm:$0xff] }
 0x6de   :  { %v13244_v12 = vadd.f32 %v13243_v31, %v13191_v60  ;;  %v23860_v31 = vld [vmem:[#allocation35_spill] sm:$0xff]  ;;  %v13197_v20 = vadd.f32 %v22902_v16, %v13144_v30  ;;  %v13150_v16 = vadd.f32 %v23870_v25, %v13097_v8 }
 0x6df   :  { %v13245_v52 = vpop.f32.mrf.mxu0 }
 0x6e0   :  { %v13246_v55 = vadd.f32 %v13245_v52, %v13193_v5  ;;  %v23867_v52 = vld [vmem:[#allocation37_spill] sm:$0xff] }
 0x6e1   :  { %v13249_v33 = vpop.f32.mrf.mxu0 }
 0x6e2   :  { %v13250_v13 = vadd.f32 %v13249_v33, %v13197_v20  ;;  %v23881_v20 = vld [vmem:[#allocation21_spill] sm:$0xff] }
 0x6e3   :  { %v13292_v51 = vpop.f32.mrf.mxu1  ;;  %v13251_v47 = vpop.f32.mrf.mxu0 }
 0x6e4   :  { %v13293_v3 = vadd.f32 %v13292_v51, %v13240_v10  ;;  %v13252_v51 = vadd.f32 %v13251_v47, %v13199_v41  ;;  %v23883_v41 = vmax.f32 %v23881_v20, %v23882_v43 }
 0x6e5   :  { %v13294_v17 = vpop.f32.mrf.mxu1  ;;  %v13253_v63 = vpop.f32.mrf.mxu0 }
 0x6e6   :  { %v13319_v26 = vmax.f32 %v22418_v57, %v13293_v3  ;;  %v13295_v9 = vadd.f32 %v13294_v17, %v13242_v22  ;;  %v13201_v22 = vadd.f32 %v22923_v27, %v13148_v14  ;;  %v13203_v3 = vadd.f32 %v13202_v4, %v13150_v16  ;;  %v23876_v4 = vld [vmem:[#allocation22_spill] sm:$0xff] }
 0x6e7   :  { %v13296_v58 = vpop.f32.mrf.mxu1  ;;  %v13255_v46 = vpop.f32.mrf.mxu0 }
 0x6e8   :  { %v13327_v50 = vmax.f32 %v23859_v34, %v13319_v26  ;;  %v13320_v29 = vmax.f32 %v23860_v31, %v13295_v9  ;;  %v13297_v57 = vadd.f32 %v13296_v58, %v13244_v12  ;;  %v13254_v5 = vadd.f32 %v13253_v63, %v13201_v22  ;;  %v23875_v12 = vld [vmem:[#allocation64_spill] sm:$0xff]  ;;  %v23879_v34 = vld [vmem:[#allocation67_spill] sm:$0xff] }
 0x6e9   :  { %v13298_v36 = vpop.f32.mrf.mxu1  ;;  %v13256_v15 = vadd.f32 %v13255_v46, %v13203_v3  ;;  %v23878_v58 = vmax.f32 %v23876_v4, %v23877_v23  ;;  %v23884_v63 = vld [vmem:[#allocation68_spill] sm:$0xff] }
 0x6ea   :  { %v13347_v11 = vadd.f32 %v22951_v44, %v13327_v50  ;;  %v13328_v35 = vmax.f32 %v23866_v28, %v13320_v29  ;;  %v13321_v1 = vmax.f32 %v23867_v52, %v13297_v57  ;;  %v13299_v48 = vadd.f32 %v13298_v36, %v13246_v55  ;;  %v23880_v29 = vld [vmem:[#allocation61_spill] sm:$0xff]  ;;  %v23885_v28 = vld [vmem:[#allocation71_spill] sm:$0xff] }
 0x6eb   :  { %v13302_v10 = vpop.f32.mrf.mxu1 }
 0x6ec   :  { %v13348_v40 = vadd.f32 %v22960_v39, %v13328_v35  ;;  %v13329_v7 = vmax.f32 %v23873_v54, %v13321_v1  ;;  %v13322_v60 = vmax.f32 %v23874_v49, %v13299_v48  ;;  %v13355_v37 = vmax.f32 %v13347_v11, 0.0  ;;  %v23886_v48 = vld [vmem:[#allocation58_spill] sm:$0xff] }
 0x6ed   :  { %v13303_v21 = vadd.f32 %v13302_v10, %v13250_v13  ;;  %v13304_v2 = vpop.f32.mrf.mxu1  ;;  %v23889_v13 = vld [vmem:[#allocation29_spill] sm:$0xff]  ;;  %v23890_v10 = vld [vmem:[#allocation62_spill] sm:$0xff] }
 0x6ee   :  { %v13356_v32 = vmax.f32 %v13348_v40, 0.0  ;;  %v13349_v33 = vadd.f32 %v22951_v44, %v13329_v7  ;;  %v13330_v18 = vmax.f32 %v13314_v61, %v13322_v60  ;;  %v13305_v17 = vadd.f32 %v13304_v2, %v13252_v51 }
 0x6ef   :  { %v13323_v26 = vmax.f32 %v23875_v12, %v13303_v21  ;;  %v13306_v9 = vpop.f32.mrf.mxu1  ;;  %v23888_v61 = vmax.f32 %v23886_v48, %v23887_v56  ;;  %v23891_v40 = vmax.f32 %v23889_v13, %v23890_v10  ;;  %v13568_v13 = vld [vmem:[%s23241_s5 + $0x3e8] sm:$0xff] }
 0x6f0   :  { %v13371_v0 = vcombine.low %v13355_v37, %v13356_v32  ;;  %v13372_v47 = vcombine.high %v13355_v37, %v13356_v32  ;;  %v13350_v30 = vadd.f32 %v22960_v39, %v13330_v18  ;;  %v13357_v27 = vmax.f32 %v13349_v33, 0.0  ;;  %v23892_v37 = vld [vmem:[#allocation60_spill] sm:$0xff] }
 0x6f1   :  { %v13331_v62 = vmax.f32 %v23878_v58, %v13323_v26  ;;  %v13324_v50 = vmax.f32 %v23879_v34, %v13305_v17  ;;  %v13307_v55 = vadd.f32 %v13306_v9, %v13254_v5  ;;  %v13308_v31 = vpop.f32.mrf.mxu1  ;;  %v13520_v10 = vld [vmem:[%s23241_s5 + $0x268] sm:$0xff] }
 0x6f2   :  { %v13393_v57 = vrot.slane %v13371_v0, %v23880_v29  ;;  %v13400_v24 = vrot.slane %v13372_v47, %v23880_v29  ;;  %v13358_v38 = vmax.f32 %v13350_v30, 0.0  ;;  %v13309_v19 = vadd.f32 %v13308_v31, %v13256_v15 }
 0x6f3   :  { %v13351_v8 = vadd.f32 %v22951_v44, %v13331_v62  ;;  %v13332_v36 = vmax.f32 %v23883_v41, %v13324_v50  ;;  %v13325_v11 = vmax.f32 %v23884_v63, %v13307_v55 }
 0x6f4   :  { %v13373_v42 = vcombine.low %v13357_v27, %v13358_v38  ;;  %v13374_v45 = vcombine.high %v13357_v27, %v13358_v38  ;;  %v13326_v35 = vmax.f32 %v23885_v28, %v13309_v19  ;;  %v13586_v52 = vcombine.low %v13393_v57, %v13400_v24  ;;  %v13522_v28 = vld [vmem:[%s23241_s5 + $0x278] sm:$0xff] }
 0x6f5   :  { %v13352_v1 = vadd.f32 %v22960_v39, %v13332_v36  ;;  %v13333_v6 = vmax.f32 %v23888_v61, %v13325_v11  ;;  %v13587_v14 = vcombine.high %v13393_v57, %v13400_v24  ;;  %v13359_v59 = vmax.f32 %v13351_v8, 0.0  ;;  %v13537_v61 = vld [vmem:[%s23241_s5 + $0x2f0] sm:$0xff] }
 0x6f6   :  { %v13407_v25 = vrot.slane %v13373_v42, %v23880_v29  ;;  %v13414_v16 = vrot.slane %v13374_v45, %v23880_v29  ;;  %v13334_v53 = vmax.f32 %v23891_v40, %v13326_v35  ;;  %v13600_v21 = vrot.slane %v13586_v52, %v23892_v37  ;;  %v13554_v35 = vld [vmem:[%s23241_s5 + $0x378] sm:$0xff]  ;;  %v13552_v40 = vld [vmem:[%s23241_s5 + $0x368] sm:$0xff] }
 0x6f7   :  { %v13360_v54 = vmax.f32 %v13352_v1, 0.0  ;;  %v13353_v7 = vadd.f32 %v22951_v44, %v13333_v6  ;;  %v13607_v44 = vrot.slane %v13587_v14, %v23892_v37  ;;  %v13569_v6 = vld [vmem:[%s23241_s5 + $0x3f0] sm:$0xff] }
 0x6f8   :  { %v13354_v51 = vadd.f32 %v22960_v39, %v13334_v53  ;;  %v13588_v49 = vcombine.low %v13407_v25, %v13414_v16  ;;  %v13589_v60 = vcombine.high %v13407_v25, %v13414_v16  ;;  %v13521_v14 = vld [vmem:[%s23241_s5 + $0x270] sm:$0xff]  ;;  %v13536_v16 = vld [vmem:[%s23241_s5 + $0x2e8] sm:$0xff]  ;;  %v13535_v53 = vld [vmem:[%s23241_s5 + $0x2e0] sm:$0xff] }
 0x6f9   :  { %v13375_v22 = vcombine.low %v13359_v59, %v13360_v54  ;;  %v13376_v3 = vcombine.high %v13359_v59, %v13360_v54  ;;  %v13361_v46 = vmax.f32 %v13353_v7, 0.0  ;;  %v13553_v25 = vld [vmem:[%s23241_s5 + $0x370] sm:$0xff]  ;;  %v13567_v59 = vld [vmem:[%s23241_s5 + $0x3e0] sm:$0xff] }
 0x6fa   :  { %v13362_v2 = vmax.f32 %v13354_v51, 0.0  ;;  %v13614_v32 = vrot.slane %v13588_v49, %v23892_v37  ;;  %v13621_v33 = vrot.slane %v13589_v60, %v23892_v37  ;;  %v13519_v54 = vld [vmem:[%s23241_s5 + $0x260] sm:$0xff]  ;;  %v13534_v51 = vld [vmem:[%s23241_s5 + $0x2d8] sm:$0xff] }
 0x6fb   :  { %v13421_v18 = vrot.slane %v13375_v22, %v23880_v29  ;;  %v13428_v17 = vrot.slane %v13376_v3, %v23880_v29  ;;  %v13551_v7 = vld [vmem:[%s23241_s5 + $0x360] sm:$0xff]  ;;  %v13566_v49 = vld [vmem:[%s23241_s5 + $0x3d8] sm:$0xff]  ;;  %v13533_v3 = vld [vmem:[%s23241_s5 + $0x2d0] sm:$0xff] }
 0x6fc   :  { %v13377_v5 = vcombine.low %v13361_v46, %v13362_v2  ;;  %v13378_v39 = vcombine.high %v13361_v46, %v13362_v2  ;;  %v13650_v12 = vcombine.low %v13600_v21, %v13614_v32  ;;  %v13651_v26 = vcombine.high %v13600_v21, %v13614_v32  ;;  %v13518_v60 = vld [vmem:[%s23241_s5 + $0x258] sm:$0xff]  ;;  %v13517_v21 = vld [vmem:[%s23241_s5 + $0x250] sm:$0xff]  ;;  %v13532_v2 = vld [vmem:[%s23241_s5 + $0x2c8] sm:$0xff] }
 0x6fd   :  { %v13590_v9 = vcombine.low %v13421_v18, %v13428_v17  ;;  %v13591_v0 = vcombine.high %v13421_v18, %v13428_v17  ;;  %v13652_v47 = vcombine.low %v13607_v44, %v13621_v33  ;;  %v13653_v30 = vcombine.high %v13607_v44, %v13621_v33  ;;  %v13550_v22 = vld [vmem:[%s23241_s5 + $0x358] sm:$0xff]  ;;  %v13549_v46 = vld [vmem:[%s23241_s5 + $0x350] sm:$0xff]  ;;  %v13564_v32 = vld [vmem:[%s23241_s5 + $0x3c8] sm:$0xff] }
 0x6fe   :  { %v13435_v15 = vrot.slane %v13377_v5, %v23880_v29  ;;  %v13442_v27 = vrot.slane %v13378_v39, %v23880_v29  ;;  %v13664_v38 = vrot.slane %v13650_v12, %v23892_v37  ;;  %v13678_v19 = vrot.slane %v13651_v26, %v23892_v37  ;;  %v13516_v33 = vld [vmem:[%s23241_s5 + $0x248] sm:$0xff]  ;;  %v13531_v17 = vld [vmem:[%s23241_s5 + $0x2c0] sm:$0xff]  ;;  %v13530_v12 = vld [vmem:[%s23241_s5 + $0x2b8] sm:$0xff] }
 0x6ff   :  { %v13628_v58 = vrot.slane %v13590_v9, %v23892_v37  ;;  %v13635_v34 = vrot.slane %v13591_v0, %v23892_v37  ;;  %v13685_v41 = vrot.slane %v13653_v30, %v23892_v37  ;;  %v23033_v36 = vrot.slane %v13652_v47, %v23892_v37  ;;  %v13548_v18 = vld [vmem:[%s23241_s5 + $0x348] sm:$0xff]  ;;  %v13563_v44 = vld [vmem:[%s23241_s5 + $0x3c0] sm:$0xff]  ;;  %v13562_v26 = vld [vmem:[%s23241_s5 + $0x3b8] sm:$0xff] }
 0x700   :  { %v13592_v4 = vcombine.low %v13435_v15, %v13442_v27  ;;  %v13593_v23 = vcombine.high %v13435_v15, %v13442_v27  ;;  %v13515_v5 = vld [vmem:[%s23241_s5 + $0x240] sm:$0xff]  ;;  %v13514_v9 = vld [vmem:[%s23241_s5 + $0x238] sm:$0xff]  ;;  %v13529_v47 = vld [vmem:[%s23241_s5 + $0x2b0] sm:$0xff] }
 0x701   :  { %v13547_v39 = vld [vmem:[%s23241_s5 + $0x340] sm:$0xff]  ;;  %v13546_v0 = vld [vmem:[%s23241_s5 + $0x338] sm:$0xff]  ;;  %v13561_v30 = vld [vmem:[%s23241_s5 + $0x3b0] sm:$0xff] }
 0x702   :  { %v13642_v62 = vrot.slane %v13592_v4, %v23892_v37  ;;  %v13649_v50 = vrot.slane %v13593_v23, %v23892_v37  ;;  %v13513_v15 = vld [vmem:[%s23241_s5 + $0x230] sm:$0xff]  ;;  %v13528_v4 = vld [vmem:[%s23241_s5 + $0x2a8] sm:$0xff] }
 0x703   :  { %v13545_v27 = vld [vmem:[%s23241_s5 + $0x330] sm:$0xff]  ;;  %v13560_v23 = vld [vmem:[%s23241_s5 + $0x3a8] sm:$0xff] }
 0x704   :  { %v13654_v55 = vcombine.low %v13628_v58, %v13642_v62  ;;  %v13655_v31 = vcombine.high %v13628_v58, %v13642_v62  ;;  %v13656_v57 = vcombine.low %v13635_v34, %v13649_v50  ;;  %v13657_v24 = vcombine.high %v13635_v34, %v13649_v50  ;;  %v13512_v58 = vld [vmem:[%s23241_s5 + $0x228] sm:$0xff]  ;;  %v13527_v34 = vld [vmem:[%s23241_s5 + $0x2a0] sm:$0xff] }
 0x705   :  { %v13544_v62 = vld [vmem:[%s23241_s5 + $0x328] sm:$0xff]  ;;  %v13559_v50 = vld [vmem:[%s23241_s5 + $0x3a0] sm:$0xff] }
 0x706   :  { %v13692_v29 = vrot.slane %v13654_v55, %v23892_v37  ;;  %v13706_v8 = vrot.slane %v13655_v31, %v23892_v37  ;;  %v13713_v20 = vrot.slane %v13657_v24, %v23892_v37  ;;  %v23029_v43 = vrot.slane %v13656_v57, %v23892_v37  ;;  %v13565_v37 = vld [vmem:[%s23241_s5 + $0x3d0] sm:$0xff]  ;;  %v13511_v55 = vld [vmem:[%s23241_s5 + $0x220] sm:$0xff]  ;;  %v13526_v57 = vld [vmem:[%s23241_s5 + $0x298] sm:$0xff] }
 0x707   :  { %v13543_v31 = vld [vmem:[%s23241_s5 + $0x320] sm:$0xff]  ;;  %v13558_v24 = vld [vmem:[%s23241_s5 + $0x398] sm:$0xff] }
 0x708   :  { %v13714_v63 = vcombine.low %v13664_v38, %v13692_v29  ;;  %v13715_v11 = vcombine.high %v13664_v38, %v13692_v29  ;;  %v13718_v42 = vcombine.low %v13678_v19, %v13706_v8  ;;  %v13719_v45 = vcombine.high %v13678_v19, %v13706_v8  ;;  %v13510_v38 = vld [vmem:[%s23241_s5 + $0x218] sm:$0xff]  ;;  %v13525_v29 = vld [vmem:[%s23241_s5 + $0x290] sm:$0xff] }
 0x709   :  { %v13720_v52 = vcombine.low %v13685_v41, %v13713_v20  ;;  %v13721_v1 = vcombine.high %v13685_v41, %v13713_v20  ;;  %v13716_v48 = vcombine.low %v23033_v36, %v23029_v43  ;;  %v13717_v56 = vcombine.high %v23033_v36, %v23029_v43  ;;  %v13542_v19 = vld [vmem:[%s23241_s5 + $0x318] sm:$0xff]  ;;  %v13557_v8 = vld [vmem:[%s23241_s5 + $0x390] sm:$0xff] }
 0x70a   :  { %13794 = vmatprep.mubr.f32.mxu0 %v13718_v42  ;;  %13864 = vmatprep.mubr.f32.mxu1 %v13719_v45  ;;  %v13509_v20 = vld [vmem:[%s23241_s5 + $0x210] sm:$0xff]  ;;  %v13508_v42 = vld [vmem:[%s23241_s5 + $0x208] sm:$0xff] }
 0x70b   :  { %13795 = vmatmul.mubr.f32.vlgmr.msra.gmra.mxu0 %v13714_v63  ;;  %13865 = vmatmul.mubr.f32.vlgmr.msra.gmra.mxu1 %v13715_v11  ;;  %v13541_v41 = vld [vmem:[%s23241_s5 + $0x310] sm:$0xff]  ;;  %v13524_v63 = vld [vmem:[%s23241_s5 + $0x288] sm:$0xff] }
 0x70c   :  { %15686 = vmatpush3.msra.mxu0 %v13522_v28  ;;  %15721 = vmatpush3.msra.mxu1 %v13554_v35  ;;  %v13556_v11 = vld [vmem:[%s23241_s5 + $0x388] sm:$0xff]  ;;  %v13523_v28 = vld [vmem:[%s23241_s5 + $0x280] sm:$0xff] }
 0x70d   :  { %15687 = vmatprep.subr.mxu0 %v13537_v61  ;;  %13934 = vmatprep.mubr.f32.mxu0 %v13720_v52  ;;  %v13540_v45 = vld [vmem:[%s23241_s5 + $0x308] sm:$0xff]  ;;  %v13555_v35 = vld [vmem:[%s23241_s5 + $0x380] sm:$0xff] }
 0x70e   :  { %15722 = vmatprep.subr.mxu1 %v13569_v6  ;;  %14004 = vmatprep.mubr.f32.mxu1 %v13721_v1  ;;  %v13507_v52 = vld [vmem:[%s23241_s5 + $0x200] sm:$0xff] }
 0x70f   :  { %15688 = vmatpush3.msra.mxu0 %v13521_v14  ;;  %15723 = vmatpush3.msra.mxu1 %v13553_v25  ;;  %v13539_v1 = vld [vmem:[%s23241_s5 + $0x300] sm:$0xff] }
 0x710   :  { %15689 = vmatprep.subr.mxu0 %v13536_v16  ;;  %15724 = vmatprep.subr.mxu1 %v13568_v13  ;;  %v15606_v16 = vld [vmem:[%s23243_s6] ss:$0 sm:$0xff] }
 0x711   :  { %15690 = vmatpush3.msra.mxu0 %v13520_v10  ;;  %15725 = vmatpush3.msra.mxu1 %v13552_v40 }
 0x712   :  { %15691 = vmatprep.subr.mxu0 %v13535_v53  ;;  %15726 = vmatprep.subr.mxu1 %v13567_v59 }
 0x713   :  { %15692 = vmatpush3.msra.mxu0 %v13519_v54  ;;  %15727 = vmatpush3.msra.mxu1 %v13551_v7 }
 0x714   :  { %15693 = vmatprep.subr.mxu0 %v13534_v51  ;;  %15728 = vmatprep.subr.mxu1 %v13566_v49 }
 0x715   :  { %15694 = vmatpush3.msra.mxu0 %v13518_v60  ;;  %15729 = vmatpush3.msra.mxu1 %v13550_v22 }
 0x716   :  { %15695 = vmatprep.subr.mxu0 %v13533_v3  ;;  %15730 = vmatprep.subr.mxu1 %v13565_v37 }
 0x717   :  { %15696 = vmatpush3.msra.mxu0 %v13517_v21  ;;  %15731 = vmatpush3.msra.mxu1 %v13549_v46 }
 0x718   :  { %15697 = vmatprep.subr.mxu0 %v13532_v2  ;;  %15732 = vmatprep.subr.mxu1 %v13564_v32 }
 0x719   :  { %15698 = vmatpush3.msra.mxu0 %v13516_v33  ;;  %15733 = vmatpush3.msra.mxu1 %v13548_v18 }
 0x71a   :  { %15699 = vmatprep.subr.mxu0 %v13531_v17  ;;  %15734 = vmatprep.subr.mxu1 %v13563_v44 }
 0x71b   :  { %15700 = vmatpush3.msra.mxu0 %v13515_v5  ;;  %15735 = vmatpush3.msra.mxu1 %v13547_v39 }
 0x71c   :  { %15701 = vmatprep.subr.mxu0 %v13530_v12  ;;  %15736 = vmatprep.subr.mxu1 %v13562_v26 }
 0x71d   :  { %15702 = vmatpush3.msra.mxu0 %v13514_v9  ;;  %15737 = vmatpush3.msra.mxu1 %v13546_v0 }
 0x71e   :  { %15703 = vmatprep.subr.mxu0 %v13529_v47  ;;  %15738 = vmatprep.subr.mxu1 %v13561_v30 }
 0x71f   :  { %15704 = vmatpush3.msra.mxu0 %v13513_v15  ;;  %15739 = vmatpush3.msra.mxu1 %v13545_v27 }
 0x720   :  { %15705 = vmatprep.subr.mxu0 %v13528_v4  ;;  %15740 = vmatprep.subr.mxu1 %v13560_v23 }
 0x721   :  { %15706 = vmatpush3.msra.mxu0 %v13512_v58  ;;  %15741 = vmatpush3.msra.mxu1 %v13544_v62 }
 0x722   :  { %15707 = vmatprep.subr.mxu0 %v13527_v34  ;;  %15742 = vmatprep.subr.mxu1 %v13559_v50 }
 0x723   :  { %15708 = vmatpush3.msra.mxu0 %v13511_v55  ;;  %15743 = vmatpush3.msra.mxu1 %v13543_v31 }
 0x724   :  { %15709 = vmatprep.subr.mxu0 %v13526_v57  ;;  %15744 = vmatprep.subr.mxu1 %v13558_v24 }
 0x725   :  { %15710 = vmatpush3.msra.mxu0 %v13510_v38  ;;  %15745 = vmatpush3.msra.mxu1 %v13542_v19 }
 0x726   :  { %15711 = vmatprep.subr.mxu0 %v13525_v29  ;;  %15746 = vmatprep.subr.mxu1 %v13557_v8 }
 0x727   :  { %15712 = vmatpush3.msra.mxu0 %v13509_v20  ;;  %15747 = vmatpush3.msra.mxu1 %v13541_v41 }
 0x728   :  { %15713 = vmatprep.subr.mxu0 %v13524_v63  ;;  %15748 = vmatprep.subr.mxu1 %v13556_v11 }
 0x729   :  { %15714 = vmatpush3.msra.mxu0 %v13508_v42  ;;  %15749 = vmatpush3.msra.mxu1 %v13540_v45 }
 0x72a   :  { %15715 = vmatprep.subr.mxu0 %v13523_v28  ;;  %15750 = vmatprep.subr.mxu1 %v13555_v35 }
 0x72b   :  { %15716 = vmatpush3.msra.mxu0 %v13507_v52  ;;  %15751 = vmatpush3.msra.mxu1 %v13539_v1 }
 0x72c   :  { %13935 = vmatmul.mubr.f32.vlgmr.msra.gmra.mxu0 %v13716_v48  ;;  %14005 = vmatmul.mubr.f32.vlgmr.msra.gmra.mxu1 %v13717_v56 }
 0x7cb   :  { %v15647_v61 = vpop.f32.mrf.mxu0  ;;  %v15682_v14 = vpop.f32.mrf.mxu1 }
 0x7cd   :  { %v15648_v6 = vpop.f32.mrf.mxu0  ;;  %v15683_v13 = vpop.f32.mrf.mxu1 }
 0x7ce   :  { %v15649_v25 = vadd.f32 %v15648_v6, %v15647_v61  ;;  %v15684_v59 = vadd.f32 %v15683_v13, %v15682_v14 }
 0x7d0   :  { %v13797_v10 = vadd.f32 %v15649_v25, %v15606_v16 }
 0x7d2   :  { %v13867_v48 = vadd.f32 %v15684_v59, %v13797_v10 }
 0x7ec   :  { %v15717_v40 = vpop.f32.mrf.mxu0  ;;  %v15752_v53 = vpop.f32.mrf.mxu1 }
 0x7ee   :  { %v15718_v54 = vpop.f32.mrf.mxu0  ;;  %v15753_v7 = vpop.f32.mrf.mxu1 }
 0x7ef   :  { %v15719_v51 = vadd.f32 %v15718_v54, %v15717_v40  ;;  %v15754_v43 = vadd.f32 %v15753_v7, %v15752_v53 }
 0x7f1   :  { %v13937_v49 = vadd.f32 %v15719_v51, %v13867_v48 }
 0x7f3   :  { %v14007_v36 = vadd.f32 %v15754_v43, %v13937_v49 }
 0x7f5   :  { %14010 = vmax.xlane.f32.xlu0 %v14007_v36 }
 0x87e   :  { %v14011_v56 = vpop.xlane.xlu0 %14010 }
 0x87f   :  { %v14012_v60 = vsub.f32 %v14007_v36, %v14011_v56 }
 0x881   :  { %v14013_v22 = vmul.f32 1.442695, %v14012_v60 }
 0x883   :  { %16080 = vpow2.f32 %v14013_v22 }
 0x890   :  { %v16081_v3 = vpop.eup %16080 }
 0x891   :  { %14015 = vadd.xlane.f32.xlu0 %v16081_v3 }
 0x91a   :  { %v14016_v37 = vpop.xlane.xlu0 %14015 }
 0x91b   :  { %16082 = vlog2.f32 %v14016_v37 }
 0x928   :  { %v16083_v21 = vpop.eup %16082 }
 0x929   :  { %v14018_v46 = vmul.f32 0.6931472, %v16083_v21 }
 0x92b   :  { %v14019_v2 = vadd.f32 %v14018_v46, %v14011_v56 }
 0x92d   :  { %v14020_v32 = vsub.f32 %v14007_v36, %v14019_v2 }
 0x92f   :  { %14021 = vst [vmem:[%s23244_s7] sm:$0xff] %v14020_v32 }

</bundles_post_ra>
